<compile_context>
chip_gen: v7x
topology: tpu7x:2x2x1
jax: 0.10.0
libtpu: 0.0.40
codegen_flags: <defaults>
</compile_context>

<pallas_src>
import jax
import jax.numpy as jnp
import numpy as np
from jax.experimental import pallas as pl
from jax.experimental.pallas import tpu as pltpu

KSIZE = 4          # all deconvs use 4x4 kernels
_BN_EPS = 1e-5

# (stride, padding, use_bn) for deconv1..deconv5.
_LAYER_CFG = [(1, 0, True), (2, 1, True), (2, 1, True), (2, 1, True), (2, 1, False)]


# ------------------------------ fused whole-network kernel ---------------------
def _make_generator_kernel(meta):
    """refs = (x0, [per-layer consts...], out). Everything VMEM-resident, one step."""

    def kernel(*refs):
        out_ref = refs[-1]
        x = refs[0][...].astype(jnp.float32)                       # (B*1, 1*Cin0)
        idx = 1
        for m in meta:
            w_ref, s_ref = refs[idx], refs[idx + 1]
            L = m["L"]
            # Column placement: one lane-dense bf16 MXU matmul per layer (f32 acc).
            c = jnp.dot(x.astype(jnp.bfloat16), w_ref[...],
                        preferred_element_type=jnp.float32)        # (B*H, K*L)
            # Row placement: tiny 0/1 selection matmuls, one per ky tap.
            y = jnp.dot(s_ref[0], c[:, 0:L], preferred_element_type=jnp.float32)
            for ky in range(1, KSIZE):
                y = y + jnp.dot(s_ref[ky], c[:, ky * L:(ky + 1) * L],
                                preferred_element_type=jnp.float32)  # (B*OH, L)
            if m["use_bn"]:
                p_ref, g_ref, b_ref = refs[idx + 2], refs[idx + 3], refs[idx + 4]
                idx += 5
                pavg = p_ref[...]                                   # (L, L), 1/count folded in
                mean = jnp.dot(jnp.sum(y, axis=0, keepdims=True), pavg,
                               preferred_element_type=jnp.float32)  # per-channel mean, on lanes
                cen = y - mean
                var = jnp.dot(jnp.sum(cen * cen, axis=0, keepdims=True), pavg,
                              preferred_element_type=jnp.float32)   # biased var (centered form)
                scale = g_ref[...] * jax.lax.rsqrt(var + _BN_EPS)
                x = jnp.maximum(cen * scale + b_ref[...], 0.0)      # BN + ReLU, single pass
            else:
                bias_ref = refs[idx + 2]
                idx += 3
                x = jnp.tanh(y + bias_ref[...])                     # deconv5 bias + tanh
        out_ref[...] = x.astype(out_ref.dtype)

    return kernel


# ------------------------------ parameter construction -------------------------
def init_generator(key, nz, num_classes, num_channel, d=8, batch=2):
    """Build per-layer placement matrices + static metadata + raw torch-layout weights."""
    chans = [nz + num_classes, d * 8, d * 4, d * 2, d, num_channel]
    h = w = 1
    params, meta, raw = [], [], []
    for li, (stride, pad, use_bn) in enumerate(_LAYER_CFG):
        cin, co = chans[li], chans[li + 1]
        key, wk, bk = jax.random.split(key, 3)
        # torch ConvTranspose2d weight layout (Cin, Co, K, K); N(0, 0.02) per gaussian_weights_init.
        wt = 0.02 * jax.random.normal(wk, (cin, co, KSIZE, KSIZE), jnp.float32)
        wt_np = np.asarray(wt)

        oh = (h - 1) * stride + KSIZE - 2 * pad
        ow = (w - 1) * stride + KSIZE - 2 * pad
        cop = co
        while (ow * cop) % 128 != 0:       # lane-dense width (only pads deconv5: 3 -> 4)
            cop += 1
        assert (not use_bn) or cop == co
        L = ow * cop

        # Column placement: Wcat[jx*cin+ci, ky*L + ox*cop + c] = wt[ci, c, ky, kx],
        # ox = jx*stride + kx - pad  (kx taps pre-summed into their output lanes).
        wcat = np.zeros((w * cin, KSIZE * L), np.float32)
        for ky in range(KSIZE):
            for jx in range(w):
                for kx in range(KSIZE):
                    ox = jx * stride + kx - pad
                    if 0 <= ox < ow:
                        wcat[jx * cin:(jx + 1) * cin,
                             ky * L + ox * cop: ky * L + ox * cop + co] += wt_np[:, :, ky, kx]

        # Row placement: S[ky, b*OH + oy, b*H + iy] = 1 iff oy == iy*stride + ky - pad.
        smat = np.zeros((KSIZE, batch * oh, batch * h), np.float32)
        for ky in range(KSIZE):
            for iy in range(h):
                oy = iy * stride + ky - pad
                if 0 <= oy < oh:
                    for b in range(batch):
                        smat[ky, b * oh + oy, b * h + iy] = 1.0

        layer = {"wcat": jnp.asarray(wcat, jnp.bfloat16), "s": jnp.asarray(smat)}
        bias = None
        if use_bn:
            count = batch * oh * ow
            # Channel-averaging projector: lanes -> per-channel mean, broadcast back to lanes.
            pavg = np.kron(np.ones((ow, ow), np.float32),
                           np.eye(cop, dtype=np.float32)) / count
            layer["pavg"] = jnp.asarray(pavg)
            layer["gamma_t"] = jnp.asarray(np.tile(np.ones(cop, np.float32), ow)[None, :])
            layer["beta_t"] = jnp.asarray(np.tile(np.zeros(cop, np.float32), ow)[None, :])
        else:
            bound = 1.0 / float(cin * KSIZE * KSIZE) ** 0.5
            bias = jax.random.uniform(bk, (co,), jnp.float32, -bound, bound)
            bias_pad = np.zeros(cop, np.float32)
            bias_pad[:co] = np.asarray(bias)
            layer["bias_t"] = jnp.asarray(np.tile(bias_pad, ow)[None, :])

        params.append(layer)
        meta.append(dict(H=h, W=w, OH=oh, OW=ow, cin=cin, co=co, cop=cop, L=L, use_bn=use_bn))
        raw.append((wt, bias, stride, pad, use_bn))
        h, w = oh, ow
    return params, meta, raw


# ------------------------------ forward wrapper ---------------------------------
def make_forward(meta, num_channel, batch):
    kernel = _make_generator_kernel(meta)
    mlast = meta[-1]
    out_struct = jax.ShapeDtypeStruct((batch * mlast["OH"], mlast["L"]), jnp.float32)

    flops = 0
    for m in meta:
        flops += 2 * (batch * m["H"]) * (m["W"] * m["cin"]) * (KSIZE * m["L"])
        flops += KSIZE * 2 * (batch * m["OH"]) * (batch * m["H"]) * m["L"]
        flops += 10 * (batch * m["OH"]) * m["L"]
    transcendentals = batch * mlast["OH"] * mlast["L"]

    def full_spec(ndim, shape):
        return pl.BlockSpec(shape, lambda i, n=ndim: (0,) * n)

    @jax.jit
    def forward(params, z, label):
        # torch: x = cat([input.unsqueeze(2).unsqueeze(3), label], dim=1)
        x0 = jnp.concatenate([z, label.reshape(label.shape[0], -1)], axis=1).astype(jnp.float32)
        args = [x0]
        for lp, m in zip(params, meta):
            args += [lp["wcat"], lp["s"]]
            if m["use_bn"]:
                args += [lp["pavg"], lp["gamma_t"], lp["beta_t"]]
            else:
                args += [lp["bias_t"]]

        io_bytes = sum(int(np.prod(a.shape)) * a.dtype.itemsize for a in args)
        io_bytes += int(np.prod(out_struct.shape)) * 4
        vmem_limit = int(min(32 << 20, 3 * io_bytes + (12 << 20)))   # ~22 MiB, fits v7x easily

        out = pl.pallas_call(
            kernel,
            out_shape=out_struct,
            grid_spec=pltpu.PrefetchScalarGridSpec(
                num_scalar_prefetch=0,
                grid=(1,),
                in_specs=[full_spec(a.ndim, a.shape) for a in args],
                out_specs=full_spec(2, out_struct.shape),
            ),
            compiler_params=pltpu.CompilerParams(
                # TODO(synk): on v7x, split the batch across the two TensorCores
                # (core-parallel leading axis + cross-core BN-stat reduction).
                dimension_semantics=("arbitrary",),
                vmem_limit_bytes=vmem_limit,
            ),
            cost_estimate=pl.CostEstimate(
                flops=flops, transcendentals=transcendentals, bytes_accessed=io_bytes),
        )(*args)

        # Final NHWC -> NCHW + drop lane-padding channels (pure layout, XLA glue).
        y = out.reshape(batch, mlast["OH"], mlast["OW"], mlast["cop"])
        return jnp.transpose(y, (0, 3, 1, 2))[:, :num_channel].astype(jnp.float32)

    return forward


# ------------------------------ definition-level reference ----------------------
def reference_forward(raw, z, label, num_channel):
    """ConvTranspose2d by definition + training BN + ReLU / Tanh, plain JAX f32."""
    x = jnp.concatenate([z[:, :, None, None], label], axis=1).astype(jnp.float32)
    for (wt, bias, stride, pad, use_bn) in raw:
        b, cin, h, w = x.shape
        co = wt.shape[1]
        taps = jnp.einsum("bchw,cokl->bohkwl", x, wt)             # (B, Co, H, K, W, K)
        ohf = (h - 1) * stride + KSIZE
        owf = (w - 1) * stride + KSIZE
        out = jnp.zeros((b, co, ohf, owf), jnp.float32)
        for ky in range(KSIZE):
            for kx in range(KSIZE):
                out = out.at[:, :, ky:ky + (h - 1) * stride + 1:stride,
                             kx:kx + (w - 1) * stride + 1:stride].add(taps[:, :, :, ky, :, kx])
        out = out[:, :, pad:ohf - pad, pad:owf - pad]
        if use_bn:
            mu = jnp.mean(out, axis=(0, 2, 3), keepdims=True)
            var = jnp.mean((out - mu) ** 2, axis=(0, 2, 3), keepdims=True)
            x = jnp.maximum((out - mu) * jax.lax.rsqrt(var + _BN_EPS), 0.0)
        else:
            x = jnp.tanh(out + bias[None, :, None, None])
    return x


# ----------------------------------- main ---------------------------------------
if __name__ == "__main__":
    B, NZ, NUM_CLASSES, NUM_CHANNEL, D = 2, 8, 4, 3, 8

    key = jax.random.PRNGKey(0)
    kp, kz, kl = jax.random.split(key, 3)
    params, meta, raw = init_generator(kp, NZ, NUM_CLASSES, NUM_CHANNEL, d=D, batch=B)
    forward = make_forward(meta, NUM_CHANNEL, B)

    z = jax.random.normal(kz, (B, NZ), jnp.float32)
    label_idx = jax.random.randint(kl, (B,), 0, NUM_CLASSES)
    label = jax.nn.one_hot(label_idx, NUM_CLASSES, dtype=jnp.float32)[:, :, None, None]

    out = jax.block_until_ready(forward(params, z, label))

    expected = (B, NUM_CHANNEL, 64, 64)
    assert out.shape == expected, f"bad output shape {out.shape} != {expected}"
    assert bool(jnp.all(jnp.isfinite(out))), "non-finite values in output"
    assert bool(jnp.all(jnp.abs(out) <= 1.0 + 1e-5)), "tanh range violated"

    # Definition-level pure-JAX check (loose tolerance: kernel uses bf16 operands).
    ref = jax.block_until_ready(reference_forward(raw, z, label, NUM_CHANNEL))
    max_err = float(jnp.max(jnp.abs(out - ref)))
    assert max_err < 0.1, f"kernel/reference mismatch: max abs err {max_err}"

    print("KERNEL_OK")
</pallas_src>

<mosaic_0001>
module attributes {stable_mosaic.version = 11 : i64} {
  func.func @kernel(%arg0: i32, %arg1: memref<2x12xf32, #tpu.memory_space<vmem>>, %arg2: memref<12x1024xbf16, #tpu.memory_space<vmem>>, %arg3: memref<4x8x2xf32, #tpu.memory_space<vmem>>, %arg4: memref<256x256xf32, #tpu.memory_space<vmem>>, %arg5: memref<1x256xf32, #tpu.memory_space<vmem>>, %arg6: memref<1x256xf32, #tpu.memory_space<vmem>>, %arg7: memref<256x1024xbf16, #tpu.memory_space<vmem>>, %arg8: memref<4x16x8xf32, #tpu.memory_space<vmem>>, %arg9: memref<256x256xf32, #tpu.memory_space<vmem>>, %arg10: memref<1x256xf32, #tpu.memory_space<vmem>>, %arg11: memref<1x256xf32, #tpu.memory_space<vmem>>, %arg12: memref<256x1024xbf16, #tpu.memory_space<vmem>>, %arg13: memref<4x32x16xf32, #tpu.memory_space<vmem>>, %arg14: memref<256x256xf32, #tpu.memory_space<vmem>>, %arg15: memref<1x256xf32, #tpu.memory_space<vmem>>, %arg16: memref<1x256xf32, #tpu.memory_space<vmem>>, %arg17: memref<256x1024xbf16, #tpu.memory_space<vmem>>, %arg18: memref<4x64x32xf32, #tpu.memory_space<vmem>>, %arg19: memref<256x256xf32, #tpu.memory_space<vmem>>, %arg20: memref<1x256xf32, #tpu.memory_space<vmem>>, %arg21: memref<1x256xf32, #tpu.memory_space<vmem>>, %arg22: memref<256x1024xbf16, #tpu.memory_space<vmem>>, %arg23: memref<4x128x64xf32, #tpu.memory_space<vmem>>, %arg24: memref<1x256xf32, #tpu.memory_space<vmem>>, %arg25: memref<128x256xf32, #tpu.memory_space<vmem>>) attributes {dimension_semantics = [#tpu.dimension_semantics<arbitrary>], iteration_bounds = array<i64: 1>, scalar_prefetch = 0 : i64, scratch_operands = 0 : i64, tpu.core_type = #tpu.core_type<tc>, window_params = [{pipeline_mode = #tpu.pipeline_mode<synchronous>, transform_indices = @transform_0, window_bounds = array<i64: 2, 12>}, {pipeline_mode = #tpu.pipeline_mode<synchronous>, transform_indices = @transform_1, window_bounds = array<i64: 12, 1024>}, {pipeline_mode = #tpu.pipeline_mode<synchronous>, transform_indices = @transform_2, window_bounds = array<i64: 4, 8, 2>}, {pipeline_mode = #tpu.pipeline_mode<synchronous>, transform_indices = @transform_3, window_bounds = array<i64: 256, 256>}, {pipeline_mode = #tpu.pipeline_mode<synchronous>, transform_indices = @transform_4, window_bounds = array<i64: 1, 256>}, {pipeline_mode = #tpu.pipeline_mode<synchronous>, transform_indices = @transform_5, window_bounds = array<i64: 1, 256>}, {pipeline_mode = #tpu.pipeline_mode<synchronous>, transform_indices = @transform_6, window_bounds = array<i64: 256, 1024>}, {pipeline_mode = #tpu.pipeline_mode<synchronous>, transform_indices = @transform_7, window_bounds = array<i64: 4, 16, 8>}, {pipeline_mode = #tpu.pipeline_mode<synchronous>, transform_indices = @transform_8, window_bounds = array<i64: 256, 256>}, {pipeline_mode = #tpu.pipeline_mode<synchronous>, transform_indices = @transform_9, window_bounds = array<i64: 1, 256>}, {pipeline_mode = #tpu.pipeline_mode<synchronous>, transform_indices = @transform_10, window_bounds = array<i64: 1, 256>}, {pipeline_mode = #tpu.pipeline_mode<synchronous>, transform_indices = @transform_11, window_bounds = array<i64: 256, 1024>}, {pipeline_mode = #tpu.pipeline_mode<synchronous>, transform_indices = @transform_12, window_bounds = array<i64: 4, 32, 16>}, {pipeline_mode = #tpu.pipeline_mode<synchronous>, transform_indices = @transform_13, window_bounds = array<i64: 256, 256>}, {pipeline_mode = #tpu.pipeline_mode<synchronous>, transform_indices = @transform_14, window_bounds = array<i64: 1, 256>}, {pipeline_mode = #tpu.pipeline_mode<synchronous>, transform_indices = @transform_15, window_bounds = array<i64: 1, 256>}, {pipeline_mode = #tpu.pipeline_mode<synchronous>, transform_indices = @transform_16, window_bounds = array<i64: 256, 1024>}, {pipeline_mode = #tpu.pipeline_mode<synchronous>, transform_indices = @transform_17, window_bounds = array<i64: 4, 64, 32>}, {pipeline_mode = #tpu.pipeline_mode<synchronous>, transform_indices = @transform_18, window_bounds = array<i64: 256, 256>}, {pipeline_mode = #tpu.pipeline_mode<synchronous>, transform_indices = @transform_19, window_bounds = array<i64: 1, 256>}, {pipeline_mode = #tpu.pipeline_mode<synchronous>, transform_indices = @transform_20, window_bounds = array<i64: 1, 256>}, {pipeline_mode = #tpu.pipeline_mode<synchronous>, transform_indices = @transform_21, window_bounds = array<i64: 256, 1024>}, {pipeline_mode = #tpu.pipeline_mode<synchronous>, transform_indices = @transform_22, window_bounds = array<i64: 4, 128, 64>}, {pipeline_mode = #tpu.pipeline_mode<synchronous>, transform_indices = @transform_23, window_bounds = array<i64: 1, 256>}, {pipeline_mode = #tpu.pipeline_mode<synchronous>, transform_indices = @transform_24, window_bounds = array<i64: 128, 256>}]} {
    %c0 = arith.constant 0 : index
    %c0_0 = arith.constant 0 : index
    %0 = vector.load %arg1[%c0, %c0_0] : memref<2x12xf32, #tpu.memory_space<vmem>>, vector<2x12xf32>
    %1 = arith.truncf %0 : vector<2x12xf32> to vector<2x12xbf16>
    %c0_1 = arith.constant 0 : index
    %c0_2 = arith.constant 0 : index
    %2 = vector.load %arg2[%c0_1, %c0_2] : memref<12x1024xbf16, #tpu.memory_space<vmem>>, vector<12x1024xbf16>
    %cst = arith.constant dense<0.000000e+00> : vector<2x1024xf32>
    %3 = tpu.matmul %1, %2, %cst {dimension_numbers = #tpu.dot_dimension_numbers<[1], [0], [0], [1], [0, 0, 1, 1], [], []>} : vector<2x12xbf16>, vector<12x1024xbf16>, vector<2x1024xf32> -> vector<2x1024xf32>
    %c0_3 = arith.constant 0 : index
    %c0_4 = arith.constant 0 : index
    %c0_5 = arith.constant 0 : index
    %4 = vector.load %arg3[%c0_3, %c0_4, %c0_5] : memref<4x8x2xf32, #tpu.memory_space<vmem>>, vector<1x8x2xf32>
    %5 = vector.shape_cast %4 : vector<1x8x2xf32> to vector<8x2xf32>
    %6 = vector.extract_strided_slice %3 {offsets = [0, 0], sizes = [2, 256], strides = [1, 1]} : vector<2x1024xf32> to vector<2x256xf32>
    %cst_6 = arith.constant dense<0.000000e+00> : vector<8x256xf32>
    %7 = tpu.matmul %5, %6, %cst_6 {dimension_numbers = #tpu.dot_dimension_numbers<[1], [0], [0], [1], [0, 0, 1, 1], [], []>} : vector<8x2xf32>, vector<2x256xf32>, vector<8x256xf32> -> vector<8x256xf32>
    %c1 = arith.constant 1 : index
    %c0_7 = arith.constant 0 : index
    %c0_8 = arith.constant 0 : index
    %8 = vector.load %arg3[%c1, %c0_7, %c0_8] : memref<4x8x2xf32, #tpu.memory_space<vmem>>, vector<1x8x2xf32>
    %9 = vector.shape_cast %8 : vector<1x8x2xf32> to vector<8x2xf32>
    %10 = vector.extract_strided_slice %3 {offsets = [0, 256], sizes = [2, 256], strides = [1, 1]} : vector<2x1024xf32> to vector<2x256xf32>
    %cst_9 = arith.constant dense<0.000000e+00> : vector<8x256xf32>
    %11 = tpu.matmul %9, %10, %cst_9 {dimension_numbers = #tpu.dot_dimension_numbers<[1], [0], [0], [1], [0, 0, 1, 1], [], []>} : vector<8x2xf32>, vector<2x256xf32>, vector<8x256xf32> -> vector<8x256xf32>
    %12 = arith.addf %7, %11 : vector<8x256xf32>
    %c2 = arith.constant 2 : index
    %c0_10 = arith.constant 0 : index
    %c0_11 = arith.constant 0 : index
    %13 = vector.load %arg3[%c2, %c0_10, %c0_11] : memref<4x8x2xf32, #tpu.memory_space<vmem>>, vector<1x8x2xf32>
    %14 = vector.shape_cast %13 : vector<1x8x2xf32> to vector<8x2xf32>
    %15 = vector.extract_strided_slice %3 {offsets = [0, 512], sizes = [2, 256], strides = [1, 1]} : vector<2x1024xf32> to vector<2x256xf32>
    %cst_12 = arith.constant dense<0.000000e+00> : vector<8x256xf32>
    %16 = tpu.matmul %14, %15, %cst_12 {dimension_numbers = #tpu.dot_dimension_numbers<[1], [0], [0], [1], [0, 0, 1, 1], [], []>} : vector<8x2xf32>, vector<2x256xf32>, vector<8x256xf32> -> vector<8x256xf32>
    %17 = arith.addf %12, %16 : vector<8x256xf32>
    %c3 = arith.constant 3 : index
    %c0_13 = arith.constant 0 : index
    %c0_14 = arith.constant 0 : index
    %18 = vector.load %arg3[%c3, %c0_13, %c0_14] : memref<4x8x2xf32, #tpu.memory_space<vmem>>, vector<1x8x2xf32>
    %19 = vector.shape_cast %18 : vector<1x8x2xf32> to vector<8x2xf32>
    %20 = vector.extract_strided_slice %3 {offsets = [0, 768], sizes = [2, 256], strides = [1, 1]} : vector<2x1024xf32> to vector<2x256xf32>
    %cst_15 = arith.constant dense<0.000000e+00> : vector<8x256xf32>
    %21 = tpu.matmul %19, %20, %cst_15 {dimension_numbers = #tpu.dot_dimension_numbers<[1], [0], [0], [1], [0, 0, 1, 1], [], []>} : vector<8x2xf32>, vector<2x256xf32>, vector<8x256xf32> -> vector<8x256xf32>
    %22 = arith.addf %17, %21 : vector<8x256xf32>
    %c0_16 = arith.constant 0 : index
    %c0_17 = arith.constant 0 : index
    %23 = vector.load %arg4[%c0_16, %c0_17] : memref<256x256xf32, #tpu.memory_space<vmem>>, vector<256x256xf32>
    %cst_18 = arith.constant dense<0.000000e+00> : vector<256xf32>
    %24 = vector.multi_reduction <add>, %22, %cst_18 [0] : vector<8x256xf32> to vector<256xf32>
    %25 = vector.shape_cast %24 : vector<256xf32> to vector<1x256xf32>
    %cst_19 = arith.constant dense<0.000000e+00> : vector<1x256xf32>
    %26 = tpu.matmul %25, %23, %cst_19 {dimension_numbers = #tpu.dot_dimension_numbers<[1], [0], [0], [1], [0, 0, 1, 1], [], []>} : vector<1x256xf32>, vector<256x256xf32>, vector<1x256xf32> -> vector<1x256xf32>
    %27 = vector.broadcast %26 : vector<1x256xf32> to vector<8x256xf32>
    %28 = arith.subf %22, %27 : vector<8x256xf32>
    %29 = arith.mulf %28, %28 : vector<8x256xf32>
    %cst_20 = arith.constant dense<0.000000e+00> : vector<256xf32>
    %30 = vector.multi_reduction <add>, %29, %cst_20 [0] : vector<8x256xf32> to vector<256xf32>
    %31 = vector.shape_cast %30 : vector<256xf32> to vector<1x256xf32>
    %cst_21 = arith.constant dense<0.000000e+00> : vector<1x256xf32>
    %32 = tpu.matmul %31, %23, %cst_21 {dimension_numbers = #tpu.dot_dimension_numbers<[1], [0], [0], [1], [0, 0, 1, 1], [], []>} : vector<1x256xf32>, vector<256x256xf32>, vector<1x256xf32> -> vector<1x256xf32>
    %c0_22 = arith.constant 0 : index
    %c0_23 = arith.constant 0 : index
    %33 = vector.load %arg5[%c0_22, %c0_23] : memref<1x256xf32, #tpu.memory_space<vmem>>, vector<1x256xf32>
    %cst_24 = arith.constant 9.99999974E-6 : f32
    %34 = vector.broadcast %cst_24 : f32 to vector<1x256xf32>
    %35 = arith.addf %32, %34 : vector<1x256xf32>
    %36 = math.rsqrt %35 : vector<1x256xf32>
    %37 = arith.mulf %33, %36 : vector<1x256xf32>
    %38 = vector.broadcast %37 : vector<1x256xf32> to vector<8x256xf32>
    %39 = arith.mulf %28, %38 : vector<8x256xf32>
    %c0_25 = arith.constant 0 : index
    %c0_26 = arith.constant 0 : index
    %40 = vector.load %arg6[%c0_25, %c0_26] : memref<1x256xf32, #tpu.memory_space<vmem>>, vector<1x256xf32>
    %41 = vector.broadcast %40 : vector<1x256xf32> to vector<8x256xf32>
    %42 = arith.addf %39, %41 : vector<8x256xf32>
    %cst_27 = arith.constant 0.000000e+00 : f32
    %43 = vector.broadcast %cst_27 : f32 to vector<8x256xf32>
    %44 = arith.maximumf %42, %43 : vector<8x256xf32>
    %45 = arith.truncf %44 : vector<8x256xf32> to vector<8x256xbf16>
    %c0_28 = arith.constant 0 : index
    %c0_29 = arith.constant 0 : index
    %46 = vector.load %arg7[%c0_28, %c0_29] : memref<256x1024xbf16, #tpu.memory_space<vmem>>, vector<256x1024xbf16>
    %cst_30 = arith.constant dense<0.000000e+00> : vector<8x1024xf32>
    %47 = tpu.matmul %45, %46, %cst_30 {dimension_numbers = #tpu.dot_dimension_numbers<[1], [0], [0], [1], [0, 0, 1, 1], [], []>} : vector<8x256xbf16>, vector<256x1024xbf16>, vector<8x1024xf32> -> vector<8x1024xf32>
    %c0_31 = arith.constant 0 : index
    %c0_32 = arith.constant 0 : index
    %c0_33 = arith.constant 0 : index
    %48 = vector.load %arg8[%c0_31, %c0_32, %c0_33] : memref<4x16x8xf32, #tpu.memory_space<vmem>>, vector<1x16x8xf32>
    %49 = vector.shape_cast %48 : vector<1x16x8xf32> to vector<16x8xf32>
    %50 = vector.extract_strided_slice %47 {offsets = [0, 0], sizes = [8, 256], strides = [1, 1]} : vector<8x1024xf32> to vector<8x256xf32>
    %cst_34 = arith.constant dense<0.000000e+00> : vector<16x256xf32>
    %51 = tpu.matmul %49, %50, %cst_34 {dimension_numbers = #tpu.dot_dimension_numbers<[1], [0], [0], [1], [0, 0, 1, 1], [], []>} : vector<16x8xf32>, vector<8x256xf32>, vector<16x256xf32> -> vector<16x256xf32>
    %c1_35 = arith.constant 1 : index
    %c0_36 = arith.constant 0 : index
    %c0_37 = arith.constant 0 : index
    %52 = vector.load %arg8[%c1_35, %c0_36, %c0_37] : memref<4x16x8xf32, #tpu.memory_space<vmem>>, vector<1x16x8xf32>
    %53 = vector.shape_cast %52 : vector<1x16x8xf32> to vector<16x8xf32>
    %54 = vector.extract_strided_slice %47 {offsets = [0, 256], sizes = [8, 256], strides = [1, 1]} : vector<8x1024xf32> to vector<8x256xf32>
    %cst_38 = arith.constant dense<0.000000e+00> : vector<16x256xf32>
    %55 = tpu.matmul %53, %54, %cst_38 {dimension_numbers = #tpu.dot_dimension_numbers<[1], [0], [0], [1], [0, 0, 1, 1], [], []>} : vector<16x8xf32>, vector<8x256xf32>, vector<16x256xf32> -> vector<16x256xf32>
    %56 = arith.addf %51, %55 : vector<16x256xf32>
    %c2_39 = arith.constant 2 : index
    %c0_40 = arith.constant 0 : index
    %c0_41 = arith.constant 0 : index
    %57 = vector.load %arg8[%c2_39, %c0_40, %c0_41] : memref<4x16x8xf32, #tpu.memory_space<vmem>>, vector<1x16x8xf32>
    %58 = vector.shape_cast %57 : vector<1x16x8xf32> to vector<16x8xf32>
    %59 = vector.extract_strided_slice %47 {offsets = [0, 512], sizes = [8, 256], strides = [1, 1]} : vector<8x1024xf32> to vector<8x256xf32>
    %cst_42 = arith.constant dense<0.000000e+00> : vector<16x256xf32>
    %60 = tpu.matmul %58, %59, %cst_42 {dimension_numbers = #tpu.dot_dimension_numbers<[1], [0], [0], [1], [0, 0, 1, 1], [], []>} : vector<16x8xf32>, vector<8x256xf32>, vector<16x256xf32> -> vector<16x256xf32>
    %61 = arith.addf %56, %60 : vector<16x256xf32>
    %c3_43 = arith.constant 3 : index
    %c0_44 = arith.constant 0 : index
    %c0_45 = arith.constant 0 : index
    %62 = vector.load %arg8[%c3_43, %c0_44, %c0_45] : memref<4x16x8xf32, #tpu.memory_space<vmem>>, vector<1x16x8xf32>
    %63 = vector.shape_cast %62 : vector<1x16x8xf32> to vector<16x8xf32>
    %64 = vector.extract_strided_slice %47 {offsets = [0, 768], sizes = [8, 256], strides = [1, 1]} : vector<8x1024xf32> to vector<8x256xf32>
    %cst_46 = arith.constant dense<0.000000e+00> : vector<16x256xf32>
    %65 = tpu.matmul %63, %64, %cst_46 {dimension_numbers = #tpu.dot_dimension_numbers<[1], [0], [0], [1], [0, 0, 1, 1], [], []>} : vector<16x8xf32>, vector<8x256xf32>, vector<16x256xf32> -> vector<16x256xf32>
    %66 = arith.addf %61, %65 : vector<16x256xf32>
    %c0_47 = arith.constant 0 : index
    %c0_48 = arith.constant 0 : index
    %67 = vector.load %arg9[%c0_47, %c0_48] : memref<256x256xf32, #tpu.memory_space<vmem>>, vector<256x256xf32>
    %cst_49 = arith.constant dense<0.000000e+00> : vector<256xf32>
    %68 = vector.multi_reduction <add>, %66, %cst_49 [0] : vector<16x256xf32> to vector<256xf32>
    %69 = vector.shape_cast %68 : vector<256xf32> to vector<1x256xf32>
    %cst_50 = arith.constant dense<0.000000e+00> : vector<1x256xf32>
    %70 = tpu.matmul %69, %67, %cst_50 {dimension_numbers = #tpu.dot_dimension_numbers<[1], [0], [0], [1], [0, 0, 1, 1], [], []>} : vector<1x256xf32>, vector<256x256xf32>, vector<1x256xf32> -> vector<1x256xf32>
    %71 = vector.broadcast %70 : vector<1x256xf32> to vector<16x256xf32>
    %72 = arith.subf %66, %71 : vector<16x256xf32>
    %73 = arith.mulf %72, %72 : vector<16x256xf32>
    %cst_51 = arith.constant dense<0.000000e+00> : vector<256xf32>
    %74 = vector.multi_reduction <add>, %73, %cst_51 [0] : vector<16x256xf32> to vector<256xf32>
    %75 = vector.shape_cast %74 : vector<256xf32> to vector<1x256xf32>
    %cst_52 = arith.constant dense<0.000000e+00> : vector<1x256xf32>
    %76 = tpu.matmul %75, %67, %cst_52 {dimension_numbers = #tpu.dot_dimension_numbers<[1], [0], [0], [1], [0, 0, 1, 1], [], []>} : vector<1x256xf32>, vector<256x256xf32>, vector<1x256xf32> -> vector<1x256xf32>
    %c0_53 = arith.constant 0 : index
    %c0_54 = arith.constant 0 : index
    %77 = vector.load %arg10[%c0_53, %c0_54] : memref<1x256xf32, #tpu.memory_space<vmem>>, vector<1x256xf32>
    %cst_55 = arith.constant 9.99999974E-6 : f32
    %78 = vector.broadcast %cst_55 : f32 to vector<1x256xf32>
    %79 = arith.addf %76, %78 : vector<1x256xf32>
    %80 = math.rsqrt %79 : vector<1x256xf32>
    %81 = arith.mulf %77, %80 : vector<1x256xf32>
    %82 = vector.broadcast %81 : vector<1x256xf32> to vector<16x256xf32>
    %83 = arith.mulf %72, %82 : vector<16x256xf32>
    %c0_56 = arith.constant 0 : index
    %c0_57 = arith.constant 0 : index
    %84 = vector.load %arg11[%c0_56, %c0_57] : memref<1x256xf32, #tpu.memory_space<vmem>>, vector<1x256xf32>
    %85 = vector.broadcast %84 : vector<1x256xf32> to vector<16x256xf32>
    %86 = arith.addf %83, %85 : vector<16x256xf32>
    %cst_58 = arith.constant 0.000000e+00 : f32
    %87 = vector.broadcast %cst_58 : f32 to vector<16x256xf32>
    %88 = arith.maximumf %86, %87 : vector<16x256xf32>
    %89 = arith.truncf %88 : vector<16x256xf32> to vector<16x256xbf16>
    %c0_59 = arith.constant 0 : index
    %c0_60 = arith.constant 0 : index
    %90 = vector.load %arg12[%c0_59, %c0_60] : memref<256x1024xbf16, #tpu.memory_space<vmem>>, vector<256x1024xbf16>
    %cst_61 = arith.constant dense<0.000000e+00> : vector<16x1024xf32>
    %91 = tpu.matmul %89, %90, %cst_61 {dimension_numbers = #tpu.dot_dimension_numbers<[1], [0], [0], [1], [0, 0, 1, 1], [], []>} : vector<16x256xbf16>, vector<256x1024xbf16>, vector<16x1024xf32> -> vector<16x1024xf32>
    %c0_62 = arith.constant 0 : index
    %c0_63 = arith.constant 0 : index
    %c0_64 = arith.constant 0 : index
    %92 = vector.load %arg13[%c0_62, %c0_63, %c0_64] : memref<4x32x16xf32, #tpu.memory_space<vmem>>, vector<1x32x16xf32>
    %93 = vector.shape_cast %92 : vector<1x32x16xf32> to vector<32x16xf32>
    %94 = vector.extract_strided_slice %91 {offsets = [0, 0], sizes = [16, 256], strides = [1, 1]} : vector<16x1024xf32> to vector<16x256xf32>
    %cst_65 = arith.constant dense<0.000000e+00> : vector<32x256xf32>
    %95 = tpu.matmul %93, %94, %cst_65 {dimension_numbers = #tpu.dot_dimension_numbers<[1], [0], [0], [1], [0, 0, 1, 1], [], []>} : vector<32x16xf32>, vector<16x256xf32>, vector<32x256xf32> -> vector<32x256xf32>
    %c1_66 = arith.constant 1 : index
    %c0_67 = arith.constant 0 : index
    %c0_68 = arith.constant 0 : index
    %96 = vector.load %arg13[%c1_66, %c0_67, %c0_68] : memref<4x32x16xf32, #tpu.memory_space<vmem>>, vector<1x32x16xf32>
    %97 = vector.shape_cast %96 : vector<1x32x16xf32> to vector<32x16xf32>
    %98 = vector.extract_strided_slice %91 {offsets = [0, 256], sizes = [16, 256], strides = [1, 1]} : vector<16x1024xf32> to vector<16x256xf32>
    %cst_69 = arith.constant dense<0.000000e+00> : vector<32x256xf32>
    %99 = tpu.matmul %97, %98, %cst_69 {dimension_numbers = #tpu.dot_dimension_numbers<[1], [0], [0], [1], [0, 0, 1, 1], [], []>} : vector<32x16xf32>, vector<16x256xf32>, vector<32x256xf32> -> vector<32x256xf32>
    %100 = arith.addf %95, %99 : vector<32x256xf32>
    %c2_70 = arith.constant 2 : index
    %c0_71 = arith.constant 0 : index
    %c0_72 = arith.constant 0 : index
    %101 = vector.load %arg13[%c2_70, %c0_71, %c0_72] : memref<4x32x16xf32, #tpu.memory_space<vmem>>, vector<1x32x16xf32>
    %102 = vector.shape_cast %101 : vector<1x32x16xf32> to vector<32x16xf32>
    %103 = vector.extract_strided_slice %91 {offsets = [0, 512], sizes = [16, 256], strides = [1, 1]} : vector<16x1024xf32> to vector<16x256xf32>
    %cst_73 = arith.constant dense<0.000000e+00> : vector<32x256xf32>
    %104 = tpu.matmul %102, %103, %cst_73 {dimension_numbers = #tpu.dot_dimension_numbers<[1], [0], [0], [1], [0, 0, 1, 1], [], []>} : vector<32x16xf32>, vector<16x256xf32>, vector<32x256xf32> -> vector<32x256xf32>
    %105 = arith.addf %100, %104 : vector<32x256xf32>
    %c3_74 = arith.constant 3 : index
    %c0_75 = arith.constant 0 : index
    %c0_76 = arith.constant 0 : index
    %106 = vector.load %arg13[%c3_74, %c0_75, %c0_76] : memref<4x32x16xf32, #tpu.memory_space<vmem>>, vector<1x32x16xf32>
    %107 = vector.shape_cast %106 : vector<1x32x16xf32> to vector<32x16xf32>
    %108 = vector.extract_strided_slice %91 {offsets = [0, 768], sizes = [16, 256], strides = [1, 1]} : vector<16x1024xf32> to vector<16x256xf32>
    %cst_77 = arith.constant dense<0.000000e+00> : vector<32x256xf32>
    %109 = tpu.matmul %107, %108, %cst_77 {dimension_numbers = #tpu.dot_dimension_numbers<[1], [0], [0], [1], [0, 0, 1, 1], [], []>} : vector<32x16xf32>, vector<16x256xf32>, vector<32x256xf32> -> vector<32x256xf32>
    %110 = arith.addf %105, %109 : vector<32x256xf32>
    %c0_78 = arith.constant 0 : index
    %c0_79 = arith.constant 0 : index
    %111 = vector.load %arg14[%c0_78, %c0_79] : memref<256x256xf32, #tpu.memory_space<vmem>>, vector<256x256xf32>
    %cst_80 = arith.constant dense<0.000000e+00> : vector<256xf32>
    %112 = vector.multi_reduction <add>, %110, %cst_80 [0] : vector<32x256xf32> to vector<256xf32>
    %113 = vector.shape_cast %112 : vector<256xf32> to vector<1x256xf32>
    %cst_81 = arith.constant dense<0.000000e+00> : vector<1x256xf32>
    %114 = tpu.matmul %113, %111, %cst_81 {dimension_numbers = #tpu.dot_dimension_numbers<[1], [0], [0], [1], [0, 0, 1, 1], [], []>} : vector<1x256xf32>, vector<256x256xf32>, vector<1x256xf32> -> vector<1x256xf32>
    %115 = vector.broadcast %114 : vector<1x256xf32> to vector<32x256xf32>
    %116 = arith.subf %110, %115 : vector<32x256xf32>
    %117 = arith.mulf %116, %116 : vector<32x256xf32>
    %cst_82 = arith.constant dense<0.000000e+00> : vector<256xf32>
    %118 = vector.multi_reduction <add>, %117, %cst_82 [0] : vector<32x256xf32> to vector<256xf32>
    %119 = vector.shape_cast %118 : vector<256xf32> to vector<1x256xf32>
    %cst_83 = arith.constant dense<0.000000e+00> : vector<1x256xf32>
    %120 = tpu.matmul %119, %111, %cst_83 {dimension_numbers = #tpu.dot_dimension_numbers<[1], [0], [0], [1], [0, 0, 1, 1], [], []>} : vector<1x256xf32>, vector<256x256xf32>, vector<1x256xf32> -> vector<1x256xf32>
    %c0_84 = arith.constant 0 : index
    %c0_85 = arith.constant 0 : index
    %121 = vector.load %arg15[%c0_84, %c0_85] : memref<1x256xf32, #tpu.memory_space<vmem>>, vector<1x256xf32>
    %cst_86 = arith.constant 9.99999974E-6 : f32
    %122 = vector.broadcast %cst_86 : f32 to vector<1x256xf32>
    %123 = arith.addf %120, %122 : vector<1x256xf32>
    %124 = math.rsqrt %123 : vector<1x256xf32>
    %125 = arith.mulf %121, %124 : vector<1x256xf32>
    %126 = vector.broadcast %125 : vector<1x256xf32> to vector<32x256xf32>
    %127 = arith.mulf %116, %126 : vector<32x256xf32>
    %c0_87 = arith.constant 0 : index
    %c0_88 = arith.constant 0 : index
    %128 = vector.load %arg16[%c0_87, %c0_88] : memref<1x256xf32, #tpu.memory_space<vmem>>, vector<1x256xf32>
    %129 = vector.broadcast %128 : vector<1x256xf32> to vector<32x256xf32>
    %130 = arith.addf %127, %129 : vector<32x256xf32>
    %cst_89 = arith.constant 0.000000e+00 : f32
    %131 = vector.broadcast %cst_89 : f32 to vector<32x256xf32>
    %132 = arith.maximumf %130, %131 : vector<32x256xf32>
    %133 = arith.truncf %132 : vector<32x256xf32> to vector<32x256xbf16>
    %c0_90 = arith.constant 0 : index
    %c0_91 = arith.constant 0 : index
    %134 = vector.load %arg17[%c0_90, %c0_91] : memref<256x1024xbf16, #tpu.memory_space<vmem>>, vector<256x1024xbf16>
    %cst_92 = arith.constant dense<0.000000e+00> : vector<32x1024xf32>
    %135 = tpu.matmul %133, %134, %cst_92 {dimension_numbers = #tpu.dot_dimension_numbers<[1], [0], [0], [1], [0, 0, 1, 1], [], []>} : vector<32x256xbf16>, vector<256x1024xbf16>, vector<32x1024xf32> -> vector<32x1024xf32>
    %c0_93 = arith.constant 0 : index
    %c0_94 = arith.constant 0 : index
    %c0_95 = arith.constant 0 : index
    %136 = vector.load %arg18[%c0_93, %c0_94, %c0_95] : memref<4x64x32xf32, #tpu.memory_space<vmem>>, vector<1x64x32xf32>
    %137 = vector.shape_cast %136 : vector<1x64x32xf32> to vector<64x32xf32>
    %138 = vector.extract_strided_slice %135 {offsets = [0, 0], sizes = [32, 256], strides = [1, 1]} : vector<32x1024xf32> to vector<32x256xf32>
    %cst_96 = arith.constant dense<0.000000e+00> : vector<64x256xf32>
    %139 = tpu.matmul %137, %138, %cst_96 {dimension_numbers = #tpu.dot_dimension_numbers<[1], [0], [0], [1], [0, 0, 1, 1], [], []>} : vector<64x32xf32>, vector<32x256xf32>, vector<64x256xf32> -> vector<64x256xf32>
    %c1_97 = arith.constant 1 : index
    %c0_98 = arith.constant 0 : index
    %c0_99 = arith.constant 0 : index
    %140 = vector.load %arg18[%c1_97, %c0_98, %c0_99] : memref<4x64x32xf32, #tpu.memory_space<vmem>>, vector<1x64x32xf32>
    %141 = vector.shape_cast %140 : vector<1x64x32xf32> to vector<64x32xf32>
    %142 = vector.extract_strided_slice %135 {offsets = [0, 256], sizes = [32, 256], strides = [1, 1]} : vector<32x1024xf32> to vector<32x256xf32>
    %cst_100 = arith.constant dense<0.000000e+00> : vector<64x256xf32>
    %143 = tpu.matmul %141, %142, %cst_100 {dimension_numbers = #tpu.dot_dimension_numbers<[1], [0], [0], [1], [0, 0, 1, 1], [], []>} : vector<64x32xf32>, vector<32x256xf32>, vector<64x256xf32> -> vector<64x256xf32>
    %144 = arith.addf %139, %143 : vector<64x256xf32>
    %c2_101 = arith.constant 2 : index
    %c0_102 = arith.constant 0 : index
    %c0_103 = arith.constant 0 : index
    %145 = vector.load %arg18[%c2_101, %c0_102, %c0_103] : memref<4x64x32xf32, #tpu.memory_space<vmem>>, vector<1x64x32xf32>
    %146 = vector.shape_cast %145 : vector<1x64x32xf32> to vector<64x32xf32>
    %147 = vector.extract_strided_slice %135 {offsets = [0, 512], sizes = [32, 256], strides = [1, 1]} : vector<32x1024xf32> to vector<32x256xf32>
    %cst_104 = arith.constant dense<0.000000e+00> : vector<64x256xf32>
    %148 = tpu.matmul %146, %147, %cst_104 {dimension_numbers = #tpu.dot_dimension_numbers<[1], [0], [0], [1], [0, 0, 1, 1], [], []>} : vector<64x32xf32>, vector<32x256xf32>, vector<64x256xf32> -> vector<64x256xf32>
    %149 = arith.addf %144, %148 : vector<64x256xf32>
    %c3_105 = arith.constant 3 : index
    %c0_106 = arith.constant 0 : index
    %c0_107 = arith.constant 0 : index
    %150 = vector.load %arg18[%c3_105, %c0_106, %c0_107] : memref<4x64x32xf32, #tpu.memory_space<vmem>>, vector<1x64x32xf32>
    %151 = vector.shape_cast %150 : vector<1x64x32xf32> to vector<64x32xf32>
    %152 = vector.extract_strided_slice %135 {offsets = [0, 768], sizes = [32, 256], strides = [1, 1]} : vector<32x1024xf32> to vector<32x256xf32>
    %cst_108 = arith.constant dense<0.000000e+00> : vector<64x256xf32>
    %153 = tpu.matmul %151, %152, %cst_108 {dimension_numbers = #tpu.dot_dimension_numbers<[1], [0], [0], [1], [0, 0, 1, 1], [], []>} : vector<64x32xf32>, vector<32x256xf32>, vector<64x256xf32> -> vector<64x256xf32>
    %154 = arith.addf %149, %153 : vector<64x256xf32>
    %c0_109 = arith.constant 0 : index
    %c0_110 = arith.constant 0 : index
    %155 = vector.load %arg19[%c0_109, %c0_110] : memref<256x256xf32, #tpu.memory_space<vmem>>, vector<256x256xf32>
    %cst_111 = arith.constant dense<0.000000e+00> : vector<256xf32>
    %156 = vector.multi_reduction <add>, %154, %cst_111 [0] : vector<64x256xf32> to vector<256xf32>
    %157 = vector.shape_cast %156 : vector<256xf32> to vector<1x256xf32>
    %cst_112 = arith.constant dense<0.000000e+00> : vector<1x256xf32>
    %158 = tpu.matmul %157, %155, %cst_112 {dimension_numbers = #tpu.dot_dimension_numbers<[1], [0], [0], [1], [0, 0, 1, 1], [], []>} : vector<1x256xf32>, vector<256x256xf32>, vector<1x256xf32> -> vector<1x256xf32>
    %159 = vector.broadcast %158 : vector<1x256xf32> to vector<64x256xf32>
    %160 = arith.subf %154, %159 : vector<64x256xf32>
    %161 = arith.mulf %160, %160 : vector<64x256xf32>
    %cst_113 = arith.constant dense<0.000000e+00> : vector<256xf32>
    %162 = vector.multi_reduction <add>, %161, %cst_113 [0] : vector<64x256xf32> to vector<256xf32>
    %163 = vector.shape_cast %162 : vector<256xf32> to vector<1x256xf32>
    %cst_114 = arith.constant dense<0.000000e+00> : vector<1x256xf32>
    %164 = tpu.matmul %163, %155, %cst_114 {dimension_numbers = #tpu.dot_dimension_numbers<[1], [0], [0], [1], [0, 0, 1, 1], [], []>} : vector<1x256xf32>, vector<256x256xf32>, vector<1x256xf32> -> vector<1x256xf32>
    %c0_115 = arith.constant 0 : index
    %c0_116 = arith.constant 0 : index
    %165 = vector.load %arg20[%c0_115, %c0_116] : memref<1x256xf32, #tpu.memory_space<vmem>>, vector<1x256xf32>
    %cst_117 = arith.constant 9.99999974E-6 : f32
    %166 = vector.broadcast %cst_117 : f32 to vector<1x256xf32>
    %167 = arith.addf %164, %166 : vector<1x256xf32>
    %168 = math.rsqrt %167 : vector<1x256xf32>
    %169 = arith.mulf %165, %168 : vector<1x256xf32>
    %170 = vector.broadcast %169 : vector<1x256xf32> to vector<64x256xf32>
    %171 = arith.mulf %160, %170 : vector<64x256xf32>
    %c0_118 = arith.constant 0 : index
    %c0_119 = arith.constant 0 : index
    %172 = vector.load %arg21[%c0_118, %c0_119] : memref<1x256xf32, #tpu.memory_space<vmem>>, vector<1x256xf32>
    %173 = vector.broadcast %172 : vector<1x256xf32> to vector<64x256xf32>
    %174 = arith.addf %171, %173 : vector<64x256xf32>
    %cst_120 = arith.constant 0.000000e+00 : f32
    %175 = vector.broadcast %cst_120 : f32 to vector<64x256xf32>
    %176 = arith.maximumf %174, %175 : vector<64x256xf32>
    %177 = arith.truncf %176 : vector<64x256xf32> to vector<64x256xbf16>
    %c0_121 = arith.constant 0 : index
    %c0_122 = arith.constant 0 : index
    %178 = vector.load %arg22[%c0_121, %c0_122] : memref<256x1024xbf16, #tpu.memory_space<vmem>>, vector<256x1024xbf16>
    %cst_123 = arith.constant dense<0.000000e+00> : vector<64x1024xf32>
    %179 = tpu.matmul %177, %178, %cst_123 {dimension_numbers = #tpu.dot_dimension_numbers<[1], [0], [0], [1], [0, 0, 1, 1], [], []>} : vector<64x256xbf16>, vector<256x1024xbf16>, vector<64x1024xf32> -> vector<64x1024xf32>
    %c0_124 = arith.constant 0 : index
    %c0_125 = arith.constant 0 : index
    %c0_126 = arith.constant 0 : index
    %180 = vector.load %arg23[%c0_124, %c0_125, %c0_126] : memref<4x128x64xf32, #tpu.memory_space<vmem>>, vector<1x128x64xf32>
    %181 = vector.shape_cast %180 : vector<1x128x64xf32> to vector<128x64xf32>
    %182 = vector.extract_strided_slice %179 {offsets = [0, 0], sizes = [64, 256], strides = [1, 1]} : vector<64x1024xf32> to vector<64x256xf32>
    %cst_127 = arith.constant dense<0.000000e+00> : vector<128x256xf32>
    %183 = tpu.matmul %181, %182, %cst_127 {dimension_numbers = #tpu.dot_dimension_numbers<[1], [0], [0], [1], [0, 0, 1, 1], [], []>} : vector<128x64xf32>, vector<64x256xf32>, vector<128x256xf32> -> vector<128x256xf32>
    %c1_128 = arith.constant 1 : index
    %c0_129 = arith.constant 0 : index
    %c0_130 = arith.constant 0 : index
    %184 = vector.load %arg23[%c1_128, %c0_129, %c0_130] : memref<4x128x64xf32, #tpu.memory_space<vmem>>, vector<1x128x64xf32>
    %185 = vector.shape_cast %184 : vector<1x128x64xf32> to vector<128x64xf32>
    %186 = vector.extract_strided_slice %179 {offsets = [0, 256], sizes = [64, 256], strides = [1, 1]} : vector<64x1024xf32> to vector<64x256xf32>
    %cst_131 = arith.constant dense<0.000000e+00> : vector<128x256xf32>
    %187 = tpu.matmul %185, %186, %cst_131 {dimension_numbers = #tpu.dot_dimension_numbers<[1], [0], [0], [1], [0, 0, 1, 1], [], []>} : vector<128x64xf32>, vector<64x256xf32>, vector<128x256xf32> -> vector<128x256xf32>
    %188 = arith.addf %183, %187 : vector<128x256xf32>
    %c2_132 = arith.constant 2 : index
    %c0_133 = arith.constant 0 : index
    %c0_134 = arith.constant 0 : index
    %189 = vector.load %arg23[%c2_132, %c0_133, %c0_134] : memref<4x128x64xf32, #tpu.memory_space<vmem>>, vector<1x128x64xf32>
    %190 = vector.shape_cast %189 : vector<1x128x64xf32> to vector<128x64xf32>
    %191 = vector.extract_strided_slice %179 {offsets = [0, 512], sizes = [64, 256], strides = [1, 1]} : vector<64x1024xf32> to vector<64x256xf32>
    %cst_135 = arith.constant dense<0.000000e+00> : vector<128x256xf32>
    %192 = tpu.matmul %190, %191, %cst_135 {dimension_numbers = #tpu.dot_dimension_numbers<[1], [0], [0], [1], [0, 0, 1, 1], [], []>} : vector<128x64xf32>, vector<64x256xf32>, vector<128x256xf32> -> vector<128x256xf32>
    %193 = arith.addf %188, %192 : vector<128x256xf32>
    %c3_136 = arith.constant 3 : index
    %c0_137 = arith.constant 0 : index
    %c0_138 = arith.constant 0 : index
    %194 = vector.load %arg23[%c3_136, %c0_137, %c0_138] : memref<4x128x64xf32, #tpu.memory_space<vmem>>, vector<1x128x64xf32>
    %195 = vector.shape_cast %194 : vector<1x128x64xf32> to vector<128x64xf32>
    %196 = vector.extract_strided_slice %179 {offsets = [0, 768], sizes = [64, 256], strides = [1, 1]} : vector<64x1024xf32> to vector<64x256xf32>
    %cst_139 = arith.constant dense<0.000000e+00> : vector<128x256xf32>
    %197 = tpu.matmul %195, %196, %cst_139 {dimension_numbers = #tpu.dot_dimension_numbers<[1], [0], [0], [1], [0, 0, 1, 1], [], []>} : vector<128x64xf32>, vector<64x256xf32>, vector<128x256xf32> -> vector<128x256xf32>
    %198 = arith.addf %193, %197 : vector<128x256xf32>
    %c0_140 = arith.constant 0 : index
    %c0_141 = arith.constant 0 : index
    %199 = vector.load %arg24[%c0_140, %c0_141] : memref<1x256xf32, #tpu.memory_space<vmem>>, vector<1x256xf32>
    %200 = vector.broadcast %199 : vector<1x256xf32> to vector<128x256xf32>
    %201 = arith.addf %198, %200 : vector<128x256xf32>
    %202 = math.tanh %201 : vector<128x256xf32>
    %c0_142 = arith.constant 0 : index
    %c0_143 = arith.constant 0 : index
    %203 = vector.load %arg25[%c0_142, %c0_143] : memref<128x256xf32, #tpu.memory_space<vmem>>, vector<128x256xf32>
    tpu.vector_store %arg25[%c0_142, %c0_143], %202 {strides = array<i32>} : memref<128x256xf32, #tpu.memory_space<vmem>>, vector<128x256xf32>,
    return
  }
  func.func @transform_0(%arg0: i32) -> (i32, i32) {
    %c0_i32 = arith.constant 0 : i32
    %c0_i32_0 = arith.constant 0 : i32
    %c0_i32_1 = arith.constant 0 : i32
    return %c0_i32, %c0_i32_0 : i32, i32
  }
  func.func @transform_1(%arg0: i32) -> (i32, i32) {
    %c0_i32 = arith.constant 0 : i32
    %c0_i32_0 = arith.constant 0 : i32
    %c0_i32_1 = arith.constant 0 : i32
    return %c0_i32, %c0_i32_0 : i32, i32
  }
  func.func @transform_2(%arg0: i32) -> (i32, i32, i32) {
    %c0_i32 = arith.constant 0 : i32
    %c0_i32_0 = arith.constant 0 : i32
    %c0_i32_1 = arith.constant 0 : i32
    %c0_i32_2 = arith.constant 0 : i32
    return %c0_i32, %c0_i32_0, %c0_i32_1 : i32, i32, i32
  }
  func.func @transform_3(%arg0: i32) -> (i32, i32) {
    %c0_i32 = arith.constant 0 : i32
    %c0_i32_0 = arith.constant 0 : i32
    %c0_i32_1 = arith.constant 0 : i32
    return %c0_i32, %c0_i32_0 : i32, i32
  }
  func.func @transform_4(%arg0: i32) -> (i32, i32) {
    %c0_i32 = arith.constant 0 : i32
    %c0_i32_0 = arith.constant 0 : i32
    %c0_i32_1 = arith.constant 0 : i32
    return %c0_i32, %c0_i32_0 : i32, i32
  }
  func.func @transform_5(%arg0: i32) -> (i32, i32) {
    %c0_i32 = arith.constant 0 : i32
    %c0_i32_0 = arith.constant 0 : i32
    %c0_i32_1 = arith.constant 0 : i32
    return %c0_i32, %c0_i32_0 : i32, i32
  }
  func.func @transform_6(%arg0: i32) -> (i32, i32) {
    %c0_i32 = arith.constant 0 : i32
    %c0_i32_0 = arith.constant 0 : i32
    %c0_i32_1 = arith.constant 0 : i32
    return %c0_i32, %c0_i32_0 : i32, i32
  }
  func.func @transform_7(%arg0: i32) -> (i32, i32, i32) {
    %c0_i32 = arith.constant 0 : i32
    %c0_i32_0 = arith.constant 0 : i32
    %c0_i32_1 = arith.constant 0 : i32
    %c0_i32_2 = arith.constant 0 : i32
    return %c0_i32, %c0_i32_0, %c0_i32_1 : i32, i32, i32
  }
  func.func @transform_8(%arg0: i32) -> (i32, i32) {
    %c0_i32 = arith.constant 0 : i32
    %c0_i32_0 = arith.constant 0 : i32
    %c0_i32_1 = arith.constant 0 : i32
    return %c0_i32, %c0_i32_0 : i32, i32
  }
  func.func @transform_9(%arg0: i32) -> (i32, i32) {
    %c0_i32 = arith.constant 0 : i32
    %c0_i32_0 = arith.constant 0 : i32
    %c0_i32_1 = arith.constant 0 : i32
    return %c0_i32, %c0_i32_0 : i32, i32
  }
  func.func @transform_10(%arg0: i32) -> (i32, i32) {
    %c0_i32 = arith.constant 0 : i32
    %c0_i32_0 = arith.constant 0 : i32
    %c0_i32_1 = arith.constant 0 : i32
    return %c0_i32, %c0_i32_0 : i32, i32
  }
  func.func @transform_11(%arg0: i32) -> (i32, i32) {
    %c0_i32 = arith.constant 0 : i32
    %c0_i32_0 = arith.constant 0 : i32
    %c0_i32_1 = arith.constant 0 : i32
    return %c0_i32, %c0_i32_0 : i32, i32
  }
  func.func @transform_12(%arg0: i32) -> (i32, i32, i32) {
    %c0_i32 = arith.constant 0 : i32
    %c0_i32_0 = arith.constant 0 : i32
    %c0_i32_1 = arith.constant 0 : i32
    %c0_i32_2 = arith.constant 0 : i32
    return %c0_i32, %c0_i32_0, %c0_i32_1 : i32, i32, i32
  }
  func.func @transform_13(%arg0: i32) -> (i32, i32) {
    %c0_i32 = arith.constant 0 : i32
    %c0_i32_0 = arith.constant 0 : i32
    %c0_i32_1 = arith.constant 0 : i32
    return %c0_i32, %c0_i32_0 : i32, i32
  }
  func.func @transform_14(%arg0: i32) -> (i32, i32) {
    %c0_i32 = arith.constant 0 : i32
    %c0_i32_0 = arith.constant 0 : i32
    %c0_i32_1 = arith.constant 0 : i32
    return %c0_i32, %c0_i32_0 : i32, i32
  }
  func.func @transform_15(%arg0: i32) -> (i32, i32) {
    %c0_i32 = arith.constant 0 : i32
    %c0_i32_0 = arith.constant 0 : i32
    %c0_i32_1 = arith.constant 0 : i32
    return %c0_i32, %c0_i32_0 : i32, i32
  }
  func.func @transform_16(%arg0: i32) -> (i32, i32) {
    %c0_i32 = arith.constant 0 : i32
    %c0_i32_0 = arith.constant 0 : i32
    %c0_i32_1 = arith.constant 0 : i32
    return %c0_i32, %c0_i32_0 : i32, i32
  }
  func.func @transform_17(%arg0: i32) -> (i32, i32, i32) {
    %c0_i32 = arith.constant 0 : i32
    %c0_i32_0 = arith.constant 0 : i32
    %c0_i32_1 = arith.constant 0 : i32
    %c0_i32_2 = arith.constant 0 : i32
    return %c0_i32, %c0_i32_0, %c0_i32_1 : i32, i32, i32
  }
  func.func @transform_18(%arg0: i32) -> (i32, i32) {
    %c0_i32 = arith.constant 0 : i32
    %c0_i32_0 = arith.constant 0 : i32
    %c0_i32_1 = arith.constant 0 : i32
    return %c0_i32, %c0_i32_0 : i32, i32
  }
  func.func @transform_19(%arg0: i32) -> (i32, i32) {
    %c0_i32 = arith.constant 0 : i32
    %c0_i32_0 = arith.constant 0 : i32
    %c0_i32_1 = arith.constant 0 : i32
    return %c0_i32, %c0_i32_0 : i32, i32
  }
  func.func @transform_20(%arg0: i32) -> (i32, i32) {
    %c0_i32 = arith.constant 0 : i32
    %c0_i32_0 = arith.constant 0 : i32
    %c0_i32_1 = arith.constant 0 : i32
    return %c0_i32, %c0_i32_0 : i32, i32
  }
  func.func @transform_21(%arg0: i32) -> (i32, i32) {
    %c0_i32 = arith.constant 0 : i32
    %c0_i32_0 = arith.constant 0 : i32
    %c0_i32_1 = arith.constant 0 : i32
    return %c0_i32, %c0_i32_0 : i32, i32
  }
  func.func @transform_22(%arg0: i32) -> (i32, i32, i32) {
    %c0_i32 = arith.constant 0 : i32
    %c0_i32_0 = arith.constant 0 : i32
    %c0_i32_1 = arith.constant 0 : i32
    %c0_i32_2 = arith.constant 0 : i32
    return %c0_i32, %c0_i32_0, %c0_i32_1 : i32, i32, i32
  }
  func.func @transform_23(%arg0: i32) -> (i32, i32) {
    %c0_i32 = arith.constant 0 : i32
    %c0_i32_0 = arith.constant 0 : i32
    %c0_i32_1 = arith.constant 0 : i32
    return %c0_i32, %c0_i32_0 : i32, i32
  }
  func.func @transform_24(%arg0: i32) -> (i32, i32) {
    %c0_i32 = arith.constant 0 : i32
    %c0_i32_0 = arith.constant 0 : i32
    %c0_i32_1 = arith.constant 0 : i32
    return %c0_i32, %c0_i32_0 : i32, i32
  }
}

</mosaic_0001>

<bundles_post_ra>
// kernel: forward.1
= control target key start
LH: loop header
LB: loop body
LE: loop exit
PB: predicated region body
PF: predicated region fallthrough
CT: control target
= control target key end

     0   :  { %s12922_s0 = inlined_call_operand.vmem [shape: f32[2,12], index: 0, kind: input, shape index: {}]   ;;  %s12923_s1 = inlined_call_operand.hbm [shape: bf16[12,1024], index: 1, kind: input, shape index: {}]   ;;  %s12924_s2 = inlined_call_operand.vmem [shape: f32[4,8,2], index: 2, kind: input, shape index: {}]   ;;  %s12925_s3 = inlined_call_operand.hbm [shape: f32[256,256], index: 3, kind: input, shape index: {}]   ;;  %s12926_s4 = inlined_call_operand.vmem [shape: f32[1,256], index: 4, kind: input, shape index: {}]   ;;  %s12927_s5 = inlined_call_operand.vmem [shape: f32[1,256], index: 5, kind: input, shape index: {}]   ;;  %s12928_s6 = inlined_call_operand.vmem [shape: bf16[256,1024], index: 6, kind: input, shape index: {}]   ;;  %s12929_s7 = inlined_call_operand.vmem [shape: f32[4,16,8], index: 7, kind: input, shape index: {}]   ;;  %s12930_s8 = inlined_call_operand.hbm [shape: f32[256,256], index: 8, kind: input, shape index: {}]   ;;  %s12931_s9 = inlined_call_operand.vmem [shape: f32[1,256], index: 9, kind: input, shape index: {}]   ;;  %s12932_s10 = inlined_call_operand.vmem [shape: f32[1,256], index: 10, kind: input, shape index: {}]   ;;  %s12933_s11 = inlined_call_operand.hbm [shape: bf16[256,1024], index: 11, kind: input, shape index: {}]   ;;  %s12934_s12 = inlined_call_operand.vmem [shape: f32[4,32,16], index: 12, kind: input, shape index: {}]   ;;  %s12935_s13 = inlined_call_operand.hbm [shape: f32[256,256], index: 13, kind: input, shape index: {}]   ;;  %s12936_s14 = inlined_call_operand.vmem [shape: f32[1,256], index: 14, kind: input, shape index: {}]   ;;  %s12937_s15 = inlined_call_operand.vmem [shape: f32[1,256], index: 15, kind: input, shape index: {}]   ;;  %s12938_s16 = inlined_call_operand.hbm [shape: bf16[256,1024], index: 16, kind: input, shape index: {}]   ;;  %s12939_s17 = inlined_call_operand.vmem [shape: f32[4,64,32], index: 17, kind: input, shape index: {}]   ;;  %s12940_s18 = inlined_call_operand.vmem [shape: f32[256,256], index: 18, kind: input, shape index: {}]   ;;  %s12941_s19 = inlined_call_operand.vmem [shape: f32[1,256], index: 19, kind: input, shape index: {}]   ;;  %s12942_s20 = inlined_call_operand.vmem [shape: f32[1,256], index: 20, kind: input, shape index: {}]   ;;  %s12943_s21 = inlined_call_operand.hbm [shape: bf16[256,1024], index: 21, kind: input, shape index: {}]   ;;  %s12944_s22 = inlined_call_operand.vmem [shape: f32[4,128,64], index: 22, kind: input, shape index: {}]   ;;  %s12945_s23 = inlined_call_operand.vmem [shape: f32[1,256], index: 23, kind: input, shape index: {}]   ;;  %s12946_s24 = inlined_call_operand.vmem [shape: f32[128,256], index: 24, kind: output, shape index: {}]  }
   0x1   :  { %12965 = sst [smem:[#allocation22_spill]] %s12922_s0 }
   0x2   :  { %12966 = sst [smem:[#allocation23_spill]] %s12923_s1 }
   0x3   :  { %12967 = sst [smem:[#allocation24_spill]] %s12924_s2 }
   0x4   :  { %12968 = sst [smem:[#allocation25_spill]] %s12925_s3 }
   0x5   :  { %12969 = sst [smem:[#allocation26_spill]] %s12926_s4 }
   0x6   :  { %12970 = sst [smem:[#allocation27_spill]] %s12927_s5 }
   0x7   :  { %12971 = sst [smem:[#allocation28_spill]] %s12928_s6 }
   0x8   :  { %12972 = sst [smem:[#allocation29_spill]] %s12929_s7 }
   0x9   :  { %12973 = sst [smem:[#allocation30_spill]] %s12930_s8 }
   0xa   :  { %12974 = sst [smem:[#allocation31_spill]] %s12945_s23 }
   0xb   :  { %12975 = sst [smem:[#allocation32_spill]] %s12946_s24 }
   0xc   :  { %29 = vsyncpa [#allocation3], 0 }
   0xd   :  { %30 = vsyncpa [#allocation5], 0 }
   0xe   :  { %31 = vsyncpa [#allocation8], 0 }
   0xf   :  { %32 = vsyncpa [#allocation11], 0  ;;  %s10306_s5 = smov [#allocation4]   ;;  %s12976_s6 = sld [smem:[#allocation25_spill]] }
  0x10   :  { %s54_s26 = sshll.u32 %s10306_s5, 4  ;;  %s55_s26 = int_to_ptr.vmem [resolvable:$true] %s54_s26 }
  0x15   :  { %s10144_s2 = scalar_lea.hbm %s12976_s6, 8192 }
  0x16   :  { %p10145_p0 = scmp.ne.s32.totalorder %s12976_s6, %s10144_s2  ;;  %p10148_p1 = scmp.lt.u32.totalorder %s10144_s2, %s12976_s6 }
  0x18   :  { %p10150_p2 = pnand %p10148_p1, %p10145_p0 }
  0x1a   :  { %10153 = shalt.err (!%p10150_p2)
}
  0x1b   :  { %s10154_s3 = scalar_lea.vmem %s55_s26, 8192  ;;  %p10159_p4 = scmp.lt.s32.totalorder %s55_s26, %s55_s26 }
  0x1c   :  { %p10155_p3 = scmp.ne.s32.totalorder %s55_s26, %s10154_s3  ;;  %p10160_p5 = scmp.lt.s32.totalorder %s10154_s3, %s10154_s3 }
  0x1e   :  { %p10161_p6 = por %p10160_p5, %p10159_p4 }
  0x20   :  { %p10162_p7 = pnand %p10161_p6, %p10155_p3 }
  0x22   :  { %10165 = shalt.err (!%p10162_p7)
}
  0x23   :  { %s12954_s25 = smov 256   ;;  %s10308_s8 = smov 16  }
  0x24   :  { %60 = dma.hbm_to_vmem [thread:$0]  %s12976_s6, 8192, %s55_s26, [#allocation5], %s12954_s25, %s12954_s25, %s10308_s8  }
  0x25   :  { %s10309_s5 = smov [#allocation7]   ;;  %s10310_s28 = smov [#allocation10]  }
  0x26   :  { %s90_s27 = sshll.u32 %s10309_s5, 4  ;;  %s120_s2 = sshll.u32 %s10310_s28, 4  ;;  %s91_s27 = int_to_ptr.vmem [resolvable:$true] %s90_s27  ;;  %s121_s2 = int_to_ptr.vmem [resolvable:$true] %s120_s2 }
  0x27   :  { %s10166_s7 = scalar_lea.hbm %s12933_s11, 16384 }
  0x28   :  { %p10167_p8 = scmp.ne.s32.totalorder %s12933_s11, %s10166_s7  ;;  %p10170_p9 = scmp.lt.u32.totalorder %s10166_s7, %s12933_s11 }
  0x2a   :  { %p10172_p10 = pnand %p10170_p9, %p10167_p8 }
  0x2c   :  { %10175 = shalt.err (!%p10172_p10)
}
  0x2d   :  { %s10176_s26 = scalar_lea.vmem %s91_s27, 16384  ;;  %p10181_p12 = scmp.lt.s32.totalorder %s91_s27, %s91_s27 }
  0x2e   :  { %p10177_p11 = scmp.ne.s32.totalorder %s91_s27, %s10176_s26  ;;  %p10182_p13 = scmp.lt.s32.totalorder %s10176_s26, %s10176_s26 }
  0x30   :  { %p10183_p0 = por %p10182_p13, %p10181_p12 }
  0x32   :  { %p10184_p1 = pnand %p10183_p0, %p10177_p11 }
  0x34   :  { %10187 = shalt.err (!%p10184_p1)
}
  0x35   :  { %s10311_s6 = smov 512   ;;  %s10312_s4 = smov 32  }
  0x36   :  { %96 = dma.hbm_to_vmem [thread:$0]  %s12933_s11, 16384, %s91_s27, [#allocation8], %s10311_s6, %s10311_s6, %s10312_s4  }
  0x37   :  { %s10188_s28 = scalar_lea.hbm %s12938_s16, 16384 }
  0x38   :  { %p10189_p2 = scmp.ne.s32.totalorder %s12938_s16, %s10188_s28  ;;  %p10192_p3 = scmp.lt.u32.totalorder %s10188_s28, %s12938_s16 }
  0x3a   :  { %p10194_p4 = pnand %p10192_p3, %p10189_p2 }
  0x3c   :  { %10197 = shalt.err (!%p10194_p4)
}
  0x3d   :  { %s10198_s3 = scalar_lea.vmem %s121_s2, 16384  ;;  %p10203_p6 = scmp.lt.s32.totalorder %s121_s2, %s121_s2 }
  0x3e   :  { %p10199_p5 = scmp.ne.s32.totalorder %s121_s2, %s10198_s3  ;;  %p10204_p7 = scmp.lt.s32.totalorder %s10198_s3, %s10198_s3 }
  0x40   :  { %p10205_p8 = por %p10204_p7, %p10203_p6 }
  0x42   :  { %p10206_p9 = pnand %p10205_p8, %p10199_p5 }
  0x44   :  { %10209 = shalt.err (!%p10206_p9)
}
  0x45   :  { %126 = dma.hbm_to_vmem [thread:$0]  %s12938_s16, 16384, %s121_s2, [#allocation11], %s10311_s6, %s10311_s6, %s10312_s4  }
  0x46   :  { %s10313_s26 = smov [#allocation2]   ;;  %s10314_s5 = smov [#allocation6]  }
  0x47   :  { %s40_s1 = sshll.u32 %s10313_s26, 4  ;;  %s74_s23 = sshll.u32 %s10314_s5, 4  ;;  %s41_s1 = int_to_ptr.vmem [resolvable:$true] %s40_s1  ;;  %s75_s23 = int_to_ptr.vmem [resolvable:$true] %s74_s23 }
  0x48   :  { %s12977_s29 = sld [smem:[#allocation23_spill]] }
  0x4e   :  { %s10210_s0 = scalar_lea.hbm %s12977_s29, 1024 }
  0x4f   :  { %p10211_p10 = scmp.ne.s32.totalorder %s12977_s29, %s10210_s0  ;;  %p10214_p11 = scmp.lt.u32.totalorder %s10210_s0, %s12977_s29 }
  0x51   :  { %p10216_p12 = pnand %p10214_p11, %p10211_p10 }
  0x53   :  { %10219 = shalt.err (!%p10216_p12)
}
  0x54   :  { %s10220_s16 = scalar_lea.vmem %s41_s1, 1024  ;;  %p10225_p0 = scmp.lt.s32.totalorder %s41_s1, %s41_s1 }
  0x55   :  { %p10221_p13 = scmp.ne.s32.totalorder %s41_s1, %s10220_s16  ;;  %p10226_p1 = scmp.lt.s32.totalorder %s10220_s16, %s10220_s16 }
  0x57   :  { %p10227_p2 = por %p10226_p1, %p10225_p0 }
  0x59   :  { %p10228_p3 = pnand %p10227_p2, %p10221_p13 }
  0x5b   :  { %10231 = shalt.err (!%p10228_p3)
}
  0x5c   :  { %46 = dma.hbm_to_vmem [thread:$0]  %s12977_s29, 1024, %s41_s1, [#allocation3], %s10311_s6, %s10311_s6, %s10312_s4  }
  0x5d   :  { %s12978_s26 = sld [smem:[#allocation30_spill]] }
  0x63   :  { %s10232_s5 = scalar_lea.hbm %s12978_s26, 8192 }
  0x64   :  { %p10233_p4 = scmp.ne.s32.totalorder %s12978_s26, %s10232_s5  ;;  %p10236_p5 = scmp.lt.u32.totalorder %s10232_s5, %s12978_s26 }
  0x66   :  { %p10238_p6 = pnand %p10236_p5, %p10233_p4 }
  0x68   :  { %10241 = shalt.err (!%p10238_p6)
}
  0x69   :  { %s10242_s30 = scalar_lea.vmem %s75_s23, 8192  ;;  %p10247_p8 = scmp.lt.s32.totalorder %s75_s23, %s75_s23 }
  0x6a   :  { %p10243_p7 = scmp.ne.s32.totalorder %s75_s23, %s10242_s30  ;;  %p10248_p9 = scmp.lt.s32.totalorder %s10242_s30, %s10242_s30 }
  0x6c   :  { %p10249_p10 = por %p10248_p9, %p10247_p8 }
  0x6e   :  { %p10250_p11 = pnand %p10249_p10, %p10243_p7 }
  0x70   :  { %10253 = shalt.err (!%p10250_p11)
}
  0x71   :  { %s12979_s1 = smov 256   ;;  %s10315_s16 = smov [#allocation9]  }
  0x72   :  { %80 = dma.hbm_to_vmem [thread:$0]  %s12978_s26, 8192, %s75_s23, [#allocation5], %s12979_s1, %s12979_s1, %s10308_s8  }
  0x73   :  { %s104_s2 = sshll.u32 %s10315_s16, 4  ;;  %s10316_s11 = smov [#allocation12]   ;;  %s105_s2 = int_to_ptr.vmem [resolvable:$true] %s104_s2 }
  0x74   :  { %s140_s27 = sshll.u32 %s10316_s11, 4  ;;  %s10254_s24 = scalar_lea.hbm %s12935_s13, 8192  ;;  %s141_s27 = int_to_ptr.vmem [resolvable:$true] %s140_s27 }
  0x75   :  { %p10255_p12 = scmp.ne.s32.totalorder %s12935_s13, %s10254_s24  ;;  %p10258_p13 = scmp.lt.u32.totalorder %s10254_s24, %s12935_s13 }
  0x77   :  { %p10260_p0 = pnand %p10258_p13, %p10255_p12 }
  0x79   :  { %10263 = shalt.err (!%p10260_p0)
}
  0x7a   :  { %s10264_s23 = scalar_lea.vmem %s105_s2, 8192  ;;  %p10269_p2 = scmp.lt.s32.totalorder %s105_s2, %s105_s2 }
  0x7b   :  { %p10265_p1 = scmp.ne.s32.totalorder %s105_s2, %s10264_s23  ;;  %p10270_p3 = scmp.lt.s32.totalorder %s10264_s23, %s10264_s23 }
  0x7d   :  { %p10271_p4 = por %p10270_p3, %p10269_p2 }
  0x7f   :  { %p10272_p5 = pnand %p10271_p4, %p10265_p1 }
  0x81   :  { %10275 = shalt.err (!%p10272_p5)
}
  0x82   :  { %110 = dma.hbm_to_vmem [thread:$0]  %s12935_s13, 8192, %s105_s2, [#allocation8], %s12979_s1, %s12979_s1, %s10308_s8  }
  0x83   :  { %s10276_s11 = scalar_lea.hbm %s12943_s21, 16384 }
  0x84   :  { %p10277_p6 = scmp.ne.s32.totalorder %s12943_s21, %s10276_s11  ;;  %p10280_p7 = scmp.lt.u32.totalorder %s10276_s11, %s12943_s21 }
  0x86   :  { %p10282_p8 = pnand %p10280_p7, %p10277_p6 }
  0x88   :  { %10285 = shalt.err (!%p10282_p8)
}
  0x89   :  { %s10286_s0 = scalar_lea.vmem %s141_s27, 16384  ;;  %p10291_p10 = scmp.lt.s32.totalorder %s141_s27, %s141_s27 }
  0x8a   :  { %p10287_p9 = scmp.ne.s32.totalorder %s141_s27, %s10286_s0  ;;  %p10292_p11 = scmp.lt.s32.totalorder %s10286_s0, %s10286_s0 }
  0x8c   :  { %p10293_p12 = por %p10292_p11, %p10291_p10 }
  0x8e   :  { %p10294_p13 = pnand %p10293_p12, %p10287_p9 }
  0x90   :  { %10297 = shalt.err (!%p10294_p13)
}
  0x91   :  { %146 = dma.hbm_to_vmem [thread:$0]  %s12943_s21, 16384, %s141_s27, [#allocation11], %s10311_s6, %s10311_s6, %s10312_s4  }
  0x92   :  { %10298 = dma.done.wait [#allocation3], 1024  }
  0x93   :  { %10299 = vsyncadd [#allocation3], 4294966272 }
  0x94   :  { %10300 = dma.done.wait [#allocation5], 16384  }
  0x95   :  { %10301 = vsyncadd [#allocation5], 4294950912 }
  0x96   :  { %10302 = dma.done.wait [#allocation8], 24576  }
  0x97   :  { %10303 = vsyncadd [#allocation8], 4294942720 }
  0x98   :  { %10304 = dma.done.wait [#allocation11], 32768  }
  0x99   :  { %10305 = vsyncadd [#allocation11], 4294934528  ;;  %v10317_v0 = vmov 0   ;;  %v175_v1 = vld [vmem:[#allocation2] sm:$0xff]  ;;  %vm219_vm0 = vcmask 1045504   ;;  %s12980_s7 = sld [smem:[#allocation22_spill]] }
  0x9a   :  { %276 = vmatprep.mubr.bf16.mxu0 %v10317_v0  ;;  %399 = vmatprep.mubr.bf16.mxu1 %v10317_v0  ;;  %v179_v2 = vld [vmem:[#allocation2 + $0x20] sm:$0x33]  ;;  %v176_v6 = vld [vmem:[#allocation2 + $0x8] sm:$0xff]  ;;  %v177_v8 = vld [vmem:[#allocation2 + $0x10] sm:$0xff]  ;;  %vm215_vm1 = vcmask 97280   ;;  %v12956_v23 = vmov 0.0  }
  0x9b   :  { %v8488_v4 = vcombine.high %v175_v1, %v179_v2  ;;  %v8487_v5 = vcombine.low %v175_v1, %v179_v2  ;;  %v180_v7 = vld [vmem:[#allocation2 + $0x28] sm:$0x33]  ;;  %v181_v11 = vld [vmem:[#allocation2 + $0x30] sm:$0x33]  ;;  %v178_v12 = vld [vmem:[#allocation2 + $0x18] sm:$0xff]  ;;  %vm415_vm2 = vcmask 1041408  }
  0x9c   :  { %v8490_v9 = vcombine.high %v176_v6, %v180_v7  ;;  %v8489_v10 = vcombine.low %v176_v6, %v180_v7  ;;  %v182_v13 = vld [vmem:[#allocation2 + $0x38] sm:$0x33]  ;;  %v8492_v19 = vcombine.high %v177_v8, %v181_v11  ;;  %v8491_v21 = vcombine.low %v177_v8, %v181_v11  ;;  %s12981_s4 = sld [smem:[#allocation24_spill]]  ;;  %v742_v42 = vld [vmem:[#allocation4 + $0x8] sm:$0xff]  ;;  %v741_v46 = vld [vmem:[#allocation4] sm:$0xff]  ;;  %s12982_s25 = sld [smem:[#allocation28_spill]] }
  0x9d   :  { %8495 = vmatprep.subr.msk.bf16.mxu0 %vm219_vm0, %v8488_v4  ;;  %v221_v14 = vsel %vm219_vm0, %v8487_v5, 0  ;;  %v8494_v16 = vcombine.high %v178_v12, %v182_v13  ;;  %v8493_v17 = vcombine.low %v178_v12, %v182_v13  ;;  %vm411_vm3 = vcmask 15360   ;;  %v744_v43 = vld [vmem:[#allocation4 + $0x18] sm:$0xff]  ;;  %v743_v47 = vld [vmem:[#allocation4 + $0x10] sm:$0xff]  ;;  %v746_v48 = vld [vmem:[#allocation4 + $0x28] sm:$0xff]  ;;  %s12984_s29 = sld [smem:[#allocation26_spill]] }
  0x9e   :  { %245 = vmatpush1.bf16.msra.mxu0 %v221_v14  ;;  %v227_v18 = vsel %vm219_vm0, %v8489_v10, 0  ;;  %v233_v22 = vsel %vm219_vm0, %v8491_v21, 0  ;;  %v10586_v45 = vpack.c.bf16 %v744_v43, %v742_v42  ;;  %v748_v49 = vld [vmem:[#allocation4 + $0x38] sm:$0xff]  ;;  %v10595_v51 = vpack.c.bf16 %v743_v47, %v741_v46  ;;  %v745_v53 = vld [vmem:[#allocation4 + $0x20] sm:$0xff]  ;;  %v747_v54 = vld [vmem:[#allocation4 + $0x30] sm:$0xff]  ;;  %s12986_s11 = sld [smem:[#allocation27_spill]] }
  0x9f   :  { %v173_v3 = vld [vmem:[%s12980_s7] sm:$0x3]  ;;  %8497 = vmatprep.subr.msk.bf16.mxu0 %vm219_vm0, %v8490_v9  ;;  %8501 = vmatprep.subr.msk.bf16.mxu1 %vm219_vm0, %v8494_v16  ;;  %v239_v20 = vsel %vm219_vm0, %v8493_v17, 0  ;;  %v10597_v52 = vpack.c.bf16 %v748_v49, %v746_v48  ;;  %v750_v55 = vld [vmem:[#allocation4 + $0x48] sm:$0xff]  ;;  %v752_v56 = vld [vmem:[#allocation4 + $0x58] sm:$0xff]  ;;  %v10601_v57 = vpack.c.bf16 %v747_v54, %v745_v53  ;;  %s12987_s24 = sld [smem:[#allocation29_spill]] }
  0xa0   :  { %v174_v15 = vpack.c.bf16 %v173_v3, %v173_v3  ;;  %368 = vmatpush1.bf16.msra.mxu1 %v239_v20  ;;  %v10604_v58 = vpack.c.bf16 %v752_v56, %v750_v55  ;;  %v749_v59 = vld [vmem:[#allocation4 + $0x40] sm:$0xff]  ;;  %v751_v60 = vld [vmem:[#allocation4 + $0x50] sm:$0xff]  ;;  %v754_v61 = vld [vmem:[#allocation4 + $0x68] sm:$0xff]  ;;  %vm1973_vm4 = vcmask 64512   ;;  %vm3578_vm5 = vcmask 130048   ;;  %s12998_s0 = sld [smem:[#allocation32_spill]] }
  0xa1   :  { %v756_v62 = vld [vmem:[#allocation4 + $0x78] sm:$0xff]  ;;  %v10607_v63 = vpack.c.bf16 %v751_v60, %v749_v59  ;;  %v753_v1 = vld [vmem:[#allocation4 + $0x60] sm:$0xff]  ;;  %v755_v2 = vld [vmem:[#allocation4 + $0x70] sm:$0xff]  ;;  %vm5345_vm6 = vcmask 261120   ;;  %vm7436_vm7 = vcmask 523264  }
  0xa2   :  { %8496 = vmatmul.mubr.msk.bf16.vlgmr.msra.gmra.mrb[0].mxu0 %vm215_vm1, %v174_v15  ;;  %v8503_v34 = vld [vmem:[%s12981_s4 + $0x8] sm:$0xff]  ;;  %v408_v38 = vld [vmem:[%s12981_s4] sm:$0xff]  ;;  %v8510_v44 = vld [vmem:[%s12981_s4 + $0x10] sm:$0xff]  ;;  %v10613_v5 = vpack.c.bf16 %v755_v2, %v753_v1 }
  0xa3   :  { %286 = vmatpush1.bf16.msra.mxu0 %v227_v18  ;;  %317 = vmatprep.mubr.bf16.mxu0 %v10317_v0  ;;  %v8514_v50 = vld [vmem:[%s12981_s4 + $0x18] sm:$0xff]  ;;  %v758_v3 = vld [vmem:[#allocation4 + $0x88] sm:$0xff]  ;;  %v757_v7 = vld [vmem:[#allocation4 + $0x80] sm:$0xff] }
  0xa4   :  { %8499 = vmatprep.subr.msk.bf16.mxu0 %vm219_vm0, %v8492_v19  ;;  %8502 = vmatmul.mubr.msk.bf16.vlgmr.msra.gmra.mrb[0].mxu1 %vm215_vm1, %v174_v15  ;;  %v760_v4 = vld [vmem:[#allocation4 + $0x98] sm:$0xff]  ;;  %v759_v8 = vld [vmem:[#allocation4 + $0x90] sm:$0xff]  ;;  %v762_v9 = vld [vmem:[#allocation4 + $0xa8] sm:$0xff] }
  0xa5   :  { %v10616_v6 = vpack.c.bf16 %v760_v4, %v758_v3  ;;  %v764_v10 = vld [vmem:[#allocation4 + $0xb8] sm:$0xff]  ;;  %v10619_v11 = vpack.c.bf16 %v759_v8, %v757_v7  ;;  %v761_v13 = vld [vmem:[#allocation4 + $0xa0] sm:$0xff]  ;;  %v763_v14 = vld [vmem:[#allocation4 + $0xb0] sm:$0xff] }
  0xa6   :  { %v10622_v12 = vpack.c.bf16 %v764_v10, %v762_v9  ;;  %v768_v16 = vld [vmem:[#allocation4 + $0xd8] sm:$0xff]  ;;  %v10625_v17 = vpack.c.bf16 %v763_v14, %v761_v13  ;;  %v765_v19 = vld [vmem:[#allocation4 + $0xc0] sm:$0xff]  ;;  %v767_v20 = vld [vmem:[#allocation4 + $0xd0] sm:$0xff] }
  0xa7   :  { %v770_v21 = vld [vmem:[#allocation4 + $0xe8] sm:$0xff]  ;;  %v783_v46 = vld [vmem:[#allocation4 + $0x150] sm:$0xff]  ;;  %v788_v48 = vld [vmem:[#allocation4 + $0x178] sm:$0xff] }
  0xa8   :  { %v786_v47 = vld [vmem:[#allocation4 + $0x168] sm:$0xff]  ;;  %v785_v53 = vld [vmem:[#allocation4 + $0x160] sm:$0xff]  ;;  %v787_v54 = vld [vmem:[#allocation4 + $0x170] sm:$0xff] }
  0xa9   :  { %v790_v55 = vld [vmem:[#allocation4 + $0x188] sm:$0xff]  ;;  %v792_v56 = vld [vmem:[#allocation4 + $0x198] sm:$0xff]  ;;  %v10661_v59 = vpack.c.bf16 %v787_v54, %v785_v53  ;;  %v793_v7 = vld [vmem:[#allocation4 + $0x1a0] sm:$0xff] }
  0xaa   :  { %8498 = vmatmul.mubr.msk.bf16.vlgmr.msra.gmra.mrb[4].mxu0 %vm215_vm1, %v174_v15  ;;  %v10664_v60 = vpack.c.bf16 %v792_v56, %v790_v55  ;;  %v794_v2 = vld [vmem:[#allocation4 + $0x1a8] sm:$0xff]  ;;  %v796_v3 = vld [vmem:[#allocation4 + $0x1b8] sm:$0xff]  ;;  %v795_v8 = vld [vmem:[#allocation4 + $0x1b0] sm:$0xff] }
  0xab   :  { %327 = vmatpush1.bf16.msra.mxu0 %v233_v22  ;;  %358 = vmatprep.mubr.bf16.mxu0 %v10317_v0  ;;  %v10610_v0 = vpack.c.bf16 %v756_v62, %v754_v61  ;;  %v772_v22 = vld [vmem:[#allocation4 + $0xf8] sm:$0xff]  ;;  %v789_v61 = vld [vmem:[#allocation4 + $0x180] sm:$0xff]  ;;  %v791_v62 = vld [vmem:[#allocation4 + $0x190] sm:$0xff]  ;;  %v10671_v4 = vpack.c.bf16 %v796_v3, %v794_v2  ;;  %v9294_v9 = vpack.c.bf16 %v795_v8, %v793_v7 }
  0xac   :  { %v10668_v1 = vpack.c.bf16 %v791_v62, %v789_v61  ;;  %v798_v10 = vld [vmem:[#allocation4 + $0x1c8] sm:$0xff]  ;;  %v800_v13 = vld [vmem:[#allocation4 + $0x1d8] sm:$0xff]  ;;  %v1076_v55 = vld [vmem:[%s12982_s25 + $0x140] sm:$0xff] }
  0xad   :  { %v9296_v14 = vpack.c.bf16 %v800_v13, %v798_v10  ;;  %v1080_v56 = vld [vmem:[%s12982_s25 + $0x160] sm:$0xff] }
  0xae   :  { %v1084_v61 = vld [vmem:[%s12982_s25 + $0x180] sm:$0xff] }
  0xaf   :  { %v1088_v62 = vld [vmem:[%s12982_s25 + $0x1a0] sm:$0xff] }
  0xb0   :  { %v8566_v2 = vcombine.low %v1084_v61, %v1088_v62  ;;  %v1092_v3 = vld [vmem:[%s12982_s25 + $0x1c0] sm:$0xff] }
  0xb2   :  { %8500 = vmatmul.mubr.msk.bf16.vlgmr.msra.gmra.mrb[8].mxu0 %vm215_vm1, %v174_v15  ;;  %v766_v15 = vld [vmem:[#allocation4 + $0xc8] sm:$0xff] }
  0xb3   :  { %486 = vmatprep.mubr.f32.mxu0 %v12956_v23  ;;  %v10628_v18 = vpack.c.bf16 %v768_v16, %v766_v15  ;;  %v797_v15 = vld [vmem:[#allocation4 + $0x1c0] sm:$0xff]  ;;  %v799_v16 = vld [vmem:[#allocation4 + $0x1d0] sm:$0xff] }
 0x175   :  { %v278_v24 = vpop.f32.mrb[0].mxu0 }
 0x176   :  { %v280_v25 = vpop.f32.mrb[1].mxu0 }
 0x177   :  { %v282_v26 = vpop.f32.mrb[2].mxu0  ;;  %v401_v28 = vpop.f32.mrb[0].mxu1 }
 0x178   :  { %v283_v27 = vpop.f32.mrb[3].mxu0  ;;  %v403_v29 = vpop.f32.mrb[1].mxu1  ;;  %v769_v26 = vld [vmem:[#allocation4 + $0xe0] sm:$0xff] }
 0x179   :  { %v405_v30 = vpop.f32.mrb[2].mxu1  ;;  %v771_v27 = vld [vmem:[#allocation4 + $0xf0] sm:$0xff] }
 0x17a   :  { %v406_v31 = vpop.f32.mrb[3].mxu1  ;;  %v10637_v30 = vpack.c.bf16 %v771_v27, %v769_v26  ;;  %v801_v26 = vld [vmem:[#allocation4 + $0x1e0] sm:$0xff]  ;;  %v803_v27 = vld [vmem:[#allocation4 + $0x1f0] sm:$0xff] }
 0x17d   :  { %v319_v32 = vpop.f32.mrb[4].mxu0 }
 0x17e   :  { %v321_v33 = vpop.f32.mrb[5].mxu0 }
 0x17f   :  { %v323_v35 = vpop.f32.mrb[6].mxu0  ;;  %8504 = vmatprep.subr.msk.mxu0 %vm415_vm2, %v321_v33  ;;  %v775_v33 = vld [vmem:[#allocation4 + $0x110] sm:$0xff] }
 0x180   :  { %v324_v36 = vpop.f32.mrb[7].mxu0  ;;  %8505 = vmatpush1.msk.msra.mxu0 %vm415_vm2, %v319_v32  ;;  %v773_v32 = vld [vmem:[#allocation4 + $0x100] sm:$0xff]  ;;  %v780_v35 = vld [vmem:[#allocation4 + $0x138] sm:$0xff] }
 0x181   :  { %8506 = vmatmul.mubr.msk.f32.vlgmr.msra.gmra.mrb[12].mxu0 %vm411_vm3, %v8503_v34  ;;  %8507 = vmatprep.subr.msk.mxu0 %vm415_vm2, %v280_v25  ;;  %v10634_v25 = vpack.c.bf16 %v772_v22, %v770_v21  ;;  %v778_v34 = vld [vmem:[#allocation4 + $0x128] sm:$0xff]  ;;  %v10643_v36 = vpack.c.bf16 %v775_v33, %v773_v32  ;;  %v804_v21 = vld [vmem:[#allocation4 + $0x1f8] sm:$0xff] }
 0x182   :  { %8508 = vmatpush1.msk.msra.mxu0 %vm415_vm2, %v278_v24  ;;  %566 = vmatprep.mubr.f32.mxu0 %v12956_v23  ;;  %v10631_v24 = vpack.c.bf16 %v767_v20, %v765_v19  ;;  %v9298_v19 = vpack.c.bf16 %v799_v16, %v797_v15  ;;  %v802_v20 = vld [vmem:[#allocation4 + $0x1e8] sm:$0xff] }
 0x183   :  { %v9300_v22 = vpack.c.bf16 %v804_v21, %v802_v20 }
 0x185   :  { %v360_v37 = vpop.f32.mrb[8].mxu0 }
 0x186   :  { %v362_v39 = vpop.f32.mrb[9].mxu0 }
 0x187   :  { %v364_v40 = vpop.f32.mrb[10].mxu0  ;;  %8511 = vmatprep.subr.msk.mxu0 %vm415_vm2, %v362_v39  ;;  %v779_v39 = vld [vmem:[#allocation4 + $0x130] sm:$0xff] }
 0x188   :  { %v365_v41 = vpop.f32.mrb[11].mxu0  ;;  %v782_v40 = vld [vmem:[#allocation4 + $0x148] sm:$0xff] }
 0x189   :  { %8509 = vmatmul.mubr.msk.f32.vlgmr.msra.gmra.mrb[12].mxu0 %vm411_vm3, %v408_v38  ;;  %v777_v38 = vld [vmem:[#allocation4 + $0x120] sm:$0xff]  ;;  %v784_v41 = vld [vmem:[#allocation4 + $0x158] sm:$0xff] }
 0x18a   :  { %8512 = vmatpush1.msk.msra.mxu0 %vm415_vm2, %v360_v37  ;;  %648 = vmatprep.mubr.f32.mxu0 %v12956_v23  ;;  %v10646_v37 = vpack.c.bf16 %v780_v35, %v778_v34  ;;  %v10649_v42 = vpack.c.bf16 %v779_v39, %v777_v38  ;;  %v10652_v43 = vpack.c.bf16 %v784_v41, %v782_v40 }
 0x18b   :  { %8515 = vmatprep.subr.msk.mxu0 %vm415_vm2, %v403_v29  ;;  %v776_v29 = vld [vmem:[#allocation4 + $0x118] sm:$0xff] }
 0x191   :  { %8513 = vmatmul.mubr.msk.f32.vlgmr.msra.gmra.mrb[12].mxu0 %vm411_vm3, %v8510_v44  ;;  %v781_v44 = vld [vmem:[#allocation4 + $0x140] sm:$0xff] }
 0x192   :  { %8516 = vmatpush1.msk.msra.mxu0 %vm415_vm2, %v401_v28  ;;  %732 = vmatprep.mubr.f32.mxu0 %v12956_v23  ;;  %v774_v28 = vld [vmem:[#allocation4 + $0x108] sm:$0xff]  ;;  %v10655_v49 = vpack.c.bf16 %v783_v46, %v781_v44 }
 0x193   :  { %9241 = vmatprep.subr.bf16.mxu0 %v10586_v45  ;;  %v10640_v31 = vpack.c.bf16 %v776_v29, %v774_v28  ;;  %v9302_v28 = vpack.c.bf16 %v803_v27, %v801_v26 }
 0x199   :  { %8517 = vmatmul.mubr.msk.f32.vlgmr.msra.gmra.mrb[12].mxu0 %vm411_vm3, %v8514_v50  ;;  %v10658_v50 = vpack.c.bf16 %v788_v48, %v786_v47 }
 0x19a   :  { %9243 = vmatpush1.bf16.msra.mxu0 %v10595_v51 }
 0x19b   :  { %9245 = vmatprep.subr.bf16.mxu0 %v10597_v52 }
 0x19e   :  { %9247 = vmatpush1.bf16.msra.mxu0 %v10601_v57 }
 0x19f   :  { %9249 = vmatprep.subr.bf16.mxu0 %v10604_v58 }
 0x1a2   :  { %9251 = vmatpush1.bf16.msra.mxu0 %v10607_v63 }
 0x1a3   :  { %9253 = vmatprep.subr.bf16.mxu0 %v10610_v0 }
 0x1a6   :  { %9255 = vmatpush1.bf16.msra.mxu0 %v10613_v5 }
 0x1a7   :  { %9257 = vmatprep.subr.bf16.mxu0 %v10616_v6 }
 0x1aa   :  { %9259 = vmatpush1.bf16.msra.mxu0 %v10619_v11 }
 0x1ab   :  { %9261 = vmatprep.subr.bf16.mxu0 %v10622_v12 }
 0x1ae   :  { %9263 = vmatpush1.bf16.msra.mxu0 %v10625_v17 }
 0x1af   :  { %9265 = vmatprep.subr.bf16.mxu0 %v10628_v18 }
 0x1b2   :  { %9267 = vmatpush1.bf16.msra.mxu0 %v10631_v24 }
 0x1b3   :  { %9269 = vmatprep.subr.bf16.mxu0 %v10634_v25 }
 0x1b6   :  { %9271 = vmatpush1.bf16.msra.mxu0 %v10637_v30 }
 0x1b7   :  { %9273 = vmatprep.subr.bf16.mxu0 %v10640_v31 }
 0x1ba   :  { %9275 = vmatpush1.bf16.msra.mxu0 %v10643_v36 }
 0x1bb   :  { %9277 = vmatprep.subr.bf16.mxu0 %v10646_v37 }
 0x1be   :  { %9279 = vmatpush1.bf16.msra.mxu0 %v10649_v42 }
 0x1bf   :  { %9281 = vmatprep.subr.bf16.mxu0 %v10652_v43 }
 0x1c2   :  { %9283 = vmatpush1.bf16.msra.mxu0 %v10655_v49 }
 0x1c3   :  { %9285 = vmatprep.subr.bf16.mxu0 %v10658_v50 }
 0x1c6   :  { %9287 = vmatpush1.bf16.msra.mxu0 %v10661_v59 }
 0x1c7   :  { %9289 = vmatprep.subr.bf16.mxu0 %v10664_v60 }
 0x1ca   :  { %9291 = vmatpush1.bf16.msra.mxu0 %v10668_v1 }
 0x1cb   :  { %9293 = vmatprep.subr.bf16.mxu0 %v10671_v4 }
 0x1ce   :  { %9295 = vmatpush1.bf16.msra.mxu0 %v9294_v9 }
 0x1cf   :  { %9297 = vmatprep.subr.bf16.mxu0 %v9296_v14 }
 0x1d2   :  { %9299 = vmatpush1.bf16.msra.mxu0 %v9298_v19 }
 0x1d3   :  { %9301 = vmatprep.subr.bf16.mxu0 %v9300_v22 }
 0x1d6   :  { %9303 = vmatpush1.bf16.msra.mxu0 %v9302_v28 }
 0x1d7   :  { %9305 = vmatprep.subr.bf16.mxu0 %v10586_v45 }
 0x26c   :  { %v10675_v29 = vpop.f32.mrb[12].mxu0 }
 0x26d   :  { %v805_v32 = vrot.slane %v10675_v29, 4  ;;  %v10678_v33 = vpop.f32.mrb[13].mxu0 }
 0x26e   :  { %v811_v34 = vrot.slane %v10678_v33, 4 }
 0x26f   :  { %v806_v35 = vadd.f32 %v805_v32, %v10675_v29 }
 0x270   :  { %v812_v38 = vadd.f32 %v811_v34, %v10678_v33 }
 0x271   :  { %v807_v39 = vrot.slane %v806_v35, 2 }
 0x272   :  { %v813_v40 = vrot.slane %v812_v38, 2 }
 0x273   :  { %v808_v41 = vadd.f32 %v807_v39, %v806_v35 }
 0x274   :  { %v814_v44 = vadd.f32 %v813_v40, %v812_v38 }
 0x275   :  { %v809_v46 = vrot.slane %v808_v41, 1 }
 0x276   :  { %v815_v47 = vrot.slane %v814_v44, 1 }
 0x277   :  { %v810_v45 = vadd.f32 %v809_v46, %v808_v41 }
 0x278   :  { %v816_v48 = vadd.f32 %v815_v47, %v814_v44  ;;  %v1049_v44 = vld [vmem:[%s12982_s25 + $0x68] sm:$0xff] }
 0x27a   :  { %881 = vmatprep.mubr.f32.mxu0 %v816_v48 }
 0x27b   :  { %882 = vmatmul.mubr.f32.vlgmr.msra.gmra.mrb[14].mxu0 %v810_v45  ;;  %v1053_v45 = vld [vmem:[%s12982_s25 + $0x88] sm:$0xff] }
 0x27c   :  { %9307 = vmatpush1.bf16.msra.mxu0 %v10595_v51  ;;  %v1036_v51 = vld [vmem:[%s12982_s25] sm:$0xff] }
 0x27d   :  { %9309 = vmatprep.subr.bf16.mxu0 %v10597_v52  ;;  %v1040_v52 = vld [vmem:[%s12982_s25 + $0x20] sm:$0xff] }
 0x280   :  { %9311 = vmatpush1.bf16.msra.mxu0 %v10601_v57  ;;  %v10718_v57 = vld [vmem:[%s12982_s25 + $0x8] sm:$0xff] }
 0x281   :  { %9313 = vmatprep.subr.bf16.mxu0 %v10604_v58  ;;  %v8518_v58 = vcombine.low %v1036_v51, %v1040_v52 }
 0x284   :  { %9315 = vmatpush1.bf16.msra.mxu0 %v10607_v63  ;;  %v8519_v63 = vcombine.high %v1036_v51, %v1040_v52  ;;  %v1057_v51 = vld [vmem:[%s12982_s25 + $0xa8] sm:$0xff] }
 0x285   :  { %9317 = vmatprep.subr.bf16.mxu0 %v10610_v0  ;;  %v10723_v0 = vld [vmem:[%s12982_s25 + $0x28] sm:$0xff] }
 0x286   :  { %1804 = vmatprep.subr.bf16.mxu1 %v8519_v63  ;;  %v1061_v63 = vld [vmem:[%s12982_s25 + $0xc8] sm:$0xff] }
 0x287   :  { %1805 = vmatpush1.bf16.msra.mxu1 %v8518_v58  ;;  %v8537_v58 = vcombine.high %v1053_v45, %v1057_v51 }
 0x288   :  { %9319 = vmatpush1.bf16.msra.mxu0 %v10613_v5  ;;  %v1044_v5 = vld [vmem:[%s12982_s25 + $0x40] sm:$0xff] }
 0x289   :  { %9321 = vmatprep.subr.bf16.mxu0 %v10616_v6  ;;  %v1048_v6 = vld [vmem:[%s12982_s25 + $0x60] sm:$0xff] }
 0x28c   :  { %9323 = vmatpush1.bf16.msra.mxu0 %v10619_v11  ;;  %v8520_v11 = vcombine.low %v10718_v57, %v10723_v0 }
 0x28d   :  { %9325 = vmatprep.subr.bf16.mxu0 %v10622_v12  ;;  %v8521_v12 = vcombine.high %v10718_v57, %v10723_v0  ;;  %v1069_v57 = vld [vmem:[%s12982_s25 + $0x108] sm:$0xff] }
 0x28e   :  { %v1073_v0 = vld [vmem:[%s12982_s25 + $0x128] sm:$0xff] }
 0x290   :  { %9327 = vmatpush1.bf16.msra.mxu0 %v10625_v17  ;;  %v8527_v17 = vcombine.high %v1044_v5, %v1048_v6 }
 0x291   :  { %9329 = vmatprep.subr.bf16.mxu0 %v10628_v18  ;;  %v8526_v18 = vcombine.low %v1044_v5, %v1048_v6  ;;  %v1065_v5 = vld [vmem:[%s12982_s25 + $0xe8] sm:$0xff]  ;;  %v8536_v6 = vcombine.low %v1053_v45, %v1057_v51 }
 0x292   :  { %1806 = vmatprep.subr.bf16.mxu1 %v8527_v17  ;;  %v8553_v17 = vcombine.high %v1069_v57, %v1073_v0  ;;  %v1133_v45 = vld [vmem:[%s12982_s25 + $0x308] sm:$0xff] }
 0x293   :  { %1807 = vmatpush1.bf16.msra.mxu1 %v8526_v18  ;;  %v1077_v18 = vld [vmem:[%s12982_s25 + $0x148] sm:$0xff] }
 0x294   :  { %9331 = vmatpush1.bf16.msra.mxu0 %v10631_v24  ;;  %v1052_v24 = vld [vmem:[%s12982_s25 + $0x80] sm:$0xff] }
 0x295   :  { %9333 = vmatprep.subr.bf16.mxu0 %v10634_v25  ;;  %v1056_v25 = vld [vmem:[%s12982_s25 + $0xa0] sm:$0xff] }
 0x298   :  { %9335 = vmatpush1.bf16.msra.mxu0 %v10637_v30  ;;  %v8535_v30 = vcombine.high %v1052_v24, %v1056_v25 }
 0x299   :  { %9337 = vmatprep.subr.bf16.mxu0 %v10640_v31  ;;  %v8534_v31 = vcombine.low %v1052_v24, %v1056_v25  ;;  %v1081_v24 = vld [vmem:[%s12982_s25 + $0x168] sm:$0xff]  ;;  %v8552_v25 = vcombine.low %v1069_v57, %v1073_v0 }
 0x29a   :  { %1808 = vmatprep.subr.bf16.mxu1 %v8535_v30  ;;  %v8561_v30 = vcombine.high %v1077_v18, %v1081_v24  ;;  %v1141_v57 = vld [vmem:[%s12982_s25 + $0x348] sm:$0xff] }
 0x29b   :  { %1809 = vmatpush1.bf16.msra.mxu1 %v8534_v31  ;;  %v1085_v31 = vld [vmem:[%s12982_s25 + $0x188] sm:$0xff] }
 0x29c   :  { %9339 = vmatpush1.bf16.msra.mxu0 %v10643_v36  ;;  %v1060_v36 = vld [vmem:[%s12982_s25 + $0xc0] sm:$0xff] }
 0x29d   :  { %9341 = vmatprep.subr.bf16.mxu0 %v10646_v37  ;;  %v1064_v37 = vld [vmem:[%s12982_s25 + $0xe0] sm:$0xff] }
 0x2a0   :  { %9343 = vmatpush1.bf16.msra.mxu0 %v10649_v42  ;;  %v8543_v42 = vcombine.high %v1060_v36, %v1064_v37 }
 0x2a1   :  { %9345 = vmatprep.subr.bf16.mxu0 %v10652_v43  ;;  %v8542_v43 = vcombine.low %v1060_v36, %v1064_v37  ;;  %v1089_v36 = vld [vmem:[%s12982_s25 + $0x1a8] sm:$0xff]  ;;  %v8560_v37 = vcombine.low %v1077_v18, %v1081_v24  ;;  %v1148_v18 = vld [vmem:[%s12982_s25 + $0x380] sm:$0xff] }
 0x2a2   :  { %1810 = vmatprep.subr.bf16.mxu1 %v8543_v42  ;;  %v8569_v42 = vcombine.high %v1085_v31, %v1089_v36  ;;  %v1152_v24 = vld [vmem:[%s12982_s25 + $0x3a0] sm:$0xff] }
 0x2a3   :  { %1811 = vmatpush1.bf16.msra.mxu1 %v8542_v43  ;;  %v1093_v43 = vld [vmem:[%s12982_s25 + $0x1c8] sm:$0xff] }
 0x2a4   :  { %9347 = vmatpush1.bf16.msra.mxu0 %v10655_v49  ;;  %v1068_v49 = vld [vmem:[%s12982_s25 + $0x100] sm:$0xff] }
 0x2a5   :  { %9349 = vmatprep.subr.bf16.mxu0 %v10658_v50  ;;  %v1072_v50 = vld [vmem:[%s12982_s25 + $0x120] sm:$0xff] }
 0x2a6   :  { %v8551_v53 = vcombine.high %v1068_v49, %v1072_v50  ;;  %v8550_v54 = vcombine.low %v1068_v49, %v1072_v50  ;;  %v1097_v49 = vld [vmem:[%s12982_s25 + $0x1e8] sm:$0xff]  ;;  %v8568_v50 = vcombine.low %v1085_v31, %v1089_v36  ;;  %v8631_v31 = vcombine.high %v1148_v18, %v1152_v24 }
 0x2a7   :  { %v1149_v36 = vld [vmem:[%s12982_s25 + $0x388] sm:$0xff] }
 0x2a8   :  { %9351 = vmatpush1.bf16.msra.mxu0 %v10661_v59  ;;  %1812 = vmatprep.subr.bf16.mxu1 %v8551_v53  ;;  %v8559_v59 = vcombine.high %v1076_v55, %v1080_v56  ;;  %v8577_v53 = vcombine.high %v1093_v43, %v1097_v49 }
 0x2a9   :  { %9353 = vmatprep.subr.bf16.mxu0 %v10664_v60  ;;  %1813 = vmatpush1.bf16.msra.mxu1 %v8550_v54  ;;  %v8558_v60 = vcombine.low %v1076_v55, %v1080_v56  ;;  %v8576_v54 = vcombine.low %v1093_v43, %v1097_v49  ;;  %v1100_v55 = vld [vmem:[%s12982_s25 + $0x200] sm:$0xff] }
 0x2aa   :  { %1814 = vmatprep.subr.bf16.mxu1 %v8559_v59  ;;  %v1104_v56 = vld [vmem:[%s12982_s25 + $0x220] sm:$0xff]  ;;  %v1101_v59 = vld [vmem:[%s12982_s25 + $0x208] sm:$0xff] }
 0x2ab   :  { %v1160_v49 = vld [vmem:[%s12982_s25 + $0x3e0] sm:$0xff] }
 0x2ac   :  { %9355 = vmatpush1.bf16.msra.mxu0 %v10668_v1  ;;  %v8567_v1 = vcombine.high %v1084_v61, %v1088_v62  ;;  %v1105_v61 = vld [vmem:[%s12982_s25 + $0x228] sm:$0xff]  ;;  %v8582_v62 = vcombine.low %v1100_v55, %v1104_v56 }
 0x2ad   :  { %9357 = vmatprep.subr.bf16.mxu0 %v10671_v4  ;;  %1815 = vmatpush1.bf16.msra.mxu1 %v8558_v60  ;;  %v1096_v4 = vld [vmem:[%s12982_s25 + $0x1e0] sm:$0xff]  ;;  %v8583_v60 = vcombine.high %v1100_v55, %v1104_v56 }
 0x2ae   :  { %1816 = vmatprep.subr.bf16.mxu1 %v8567_v1  ;;  %v8575_v7 = vcombine.high %v1092_v3, %v1096_v4  ;;  %v8574_v8 = vcombine.low %v1092_v3, %v1096_v4  ;;  %v8584_v1 = vcombine.low %v1101_v59, %v1105_v61  ;;  %v1108_v3 = vld [vmem:[%s12982_s25 + $0x240] sm:$0xff] }
 0x2af   :  { %v1112_v4 = vld [vmem:[%s12982_s25 + $0x260] sm:$0xff] }
 0x2b0   :  { %9359 = vmatpush1.bf16.msra.mxu0 %v9294_v9  ;;  %v888_v9 = vlaneseq }
 0x2b1   :  { %9361 = vmatprep.subr.bf16.mxu0 %v9296_v14  ;;  %1817 = vmatpush1.bf16.msra.mxu1 %v8566_v2  ;;  %v8585_v2 = vcombine.high %v1101_v59, %v1105_v61 }
 0x2b2   :  { %1818 = vmatprep.subr.bf16.mxu1 %v8575_v7  ;;  %v10771_v10 = vshrl.u32 %v888_v9, 7  ;;  %v1109_v7 = vld [vmem:[%s12982_s25 + $0x248] sm:$0xff] }
 0x2b3   :  { %v1113_v9 = vld [vmem:[%s12982_s25 + $0x268] sm:$0xff] }
 0x2b4   :  { %9363 = vmatpush1.bf16.msra.mxu0 %v9298_v19  ;;  %v10774_v13 = vsub.s32 0, %v10771_v10 }
 0x2b5   :  { %9365 = vmatprep.subr.bf16.mxu0 %v9300_v22  ;;  %1819 = vmatpush1.bf16.msra.mxu1 %v8574_v8  ;;  %v8591_v8 = vcombine.high %v1108_v3, %v1112_v4 }
 0x2b6   :  { %1820 = vmatprep.subr.bf16.mxu1 %v8583_v60 }
 0x2b8   :  { %9367 = vmatpush1.bf16.msra.mxu0 %v9302_v28 }
 0x2b9   :  { %1845 = vmatprep.subr.bf16.mxu0 %v8521_v12  ;;  %v8545_v12 = vcombine.high %v1061_v63, %v1065_v5  ;;  %1821 = vmatpush1.bf16.msra.mxu1 %v8582_v62  ;;  %v1038_v62 = vld [vmem:[%s12982_s25 + $0x10] sm:$0xff] }
 0x2ba   :  { %1822 = vmatprep.subr.bf16.mxu1 %v8591_v8 }
 0x34e   :  { %v883_v14 = vpop.f32.mrb[14].mxu0 }
 0x34f   :  { %v891_v15 = vrot.slane %v883_v14, %v10774_v13  ;;  %v885_v16 = vpop.f32.mrb[15].mxu0  ;;  %v8590_v14 = vcombine.low %v1108_v3, %v1112_v4  ;;  %v1043_v4 = vld [vmem:[%s12982_s25 + $0x38] sm:$0xff] }
 0x350   :  { %v895_v19 = vrot.slane %v885_v16, %v10774_v13  ;;  %v8593_v16 = vcombine.high %v1109_v7, %v1113_v9 }
 0x351   :  { %v10779_v20 = vsub.f32 %v10675_v29, %v891_v15  ;;  %v8592_v15 = vcombine.low %v1109_v7, %v1113_v9  ;;  %1823 = vmatpush1.bf16.msra.mxu1 %v8590_v14 }
 0x352   :  { %v10782_v21 = vsub.f32 %v10678_v33, %v895_v19  ;;  %v1045_v33 = vld [vmem:[%s12982_s25 + $0x48] sm:$0xff]  ;;  %v1116_v19 = vld [vmem:[%s12982_s25 + $0x280] sm:$0xff] }
 0x353   :  { %v898_v22 = vmul.f32 %v10779_v20, %v10779_v20  ;;  %v8529_v48 = vcombine.high %v1045_v33, %v1049_v44  ;;  %v8528_v52 = vcombine.low %v1045_v33, %v1049_v44 }
 0x354   :  { %v899_v26 = vmul.f32 %v10782_v21, %v10782_v21 }
 0x355   :  { %v900_v27 = vrot.slane %v898_v22, 4 }
 0x356   :  { %v906_v28 = vrot.slane %v899_v26, 4 }
 0x357   :  { %v901_v32 = vadd.f32 %v900_v27, %v898_v22  ;;  %v1120_v22 = vld [vmem:[%s12982_s25 + $0x2a0] sm:$0xff] }
 0x358   :  { %v907_v34 = vadd.f32 %v906_v28, %v899_v26  ;;  %v1117_v26 = vld [vmem:[%s12982_s25 + $0x288] sm:$0xff]  ;;  %v8599_v27 = vcombine.high %v1116_v19, %v1120_v22 }
 0x359   :  { %v902_v35 = vrot.slane %v901_v32, 2  ;;  %v1121_v28 = vld [vmem:[%s12982_s25 + $0x2a8] sm:$0xff] }
 0x35a   :  { %v908_v38 = vrot.slane %v907_v34, 2  ;;  %1824 = vmatprep.subr.bf16.mxu1 %v8599_v27 }
 0x35b   :  { %v903_v39 = vadd.f32 %v902_v35, %v901_v32  ;;  %v8598_v32 = vcombine.low %v1116_v19, %v1120_v22  ;;  %v8601_v35 = vcombine.high %v1117_v26, %v1121_v28  ;;  %v10319_v22 = vmov 1966171168  }
 0x35c   :  { %v909_v40 = vadd.f32 %v908_v38, %v907_v34  ;;  %v8600_v34 = vcombine.low %v1117_v26, %v1121_v28  ;;  %v1124_v38 = vld [vmem:[%s12982_s25 + $0x2c0] sm:$0xff]  ;;  %v990_v26 = vunpack.c.l.s4 %v10319_v22 }
 0x35d   :  { %v904_v41 = vrot.slane %v903_v39, 1  ;;  %1825 = vmatpush1.bf16.msra.mxu1 %v8598_v32 }
 0x35e   :  { %v910_v29 = vrot.slane %v909_v40, 1  ;;  %v991_v27 = vunpack.c.0.s8 %v990_v26  ;;  %v1086_v26 = vld [vmem:[%s12982_s25 + $0x190] sm:$0xff] }
 0x35f   :  { %v905_v47 = vadd.f32 %v904_v41, %v903_v39  ;;  %v1128_v39 = vld [vmem:[%s12982_s25 + $0x2e0] sm:$0xff] }
 0x360   :  { %v911_v46 = vadd.f32 %v910_v29, %v909_v40  ;;  %v1125_v40 = vld [vmem:[%s12982_s25 + $0x2c8] sm:$0xff]  ;;  %v8607_v41 = vcombine.high %v1124_v38, %v1128_v39  ;;  %v8606_v33 = vcombine.low %v1124_v38, %v1128_v39  ;;  %v10942_v32 = vsub.s32 %v991_v27, %v10771_v10  ;;  %v912_v39 = vld [vmem:[%s12984_s29] sm:$0x3]  ;;  %v1090_v27 = vld [vmem:[%s12982_s25 + $0x1b0] sm:$0xff] }
 0x361   :  { %v1129_v29 = vld [vmem:[%s12982_s25 + $0x2e8] sm:$0xff] }
 0x362   :  { %977 = vmatprep.mubr.f32.mxu0 %v911_v46  ;;  %v8608_v44 = vcombine.low %v1125_v40, %v1129_v29  ;;  %v8609_v46 = vcombine.high %v1125_v40, %v1129_v29  ;;  %1826 = vmatprep.subr.bf16.mxu1 %v8607_v41  ;;  %12983 = vst [vmem:[#allocation17_spill] sm:$0xff] %v10942_v32  ;;  %v10950_v41 = vsub.s32 1, %v10771_v10  ;;  %v1018_v29 = vld [vmem:[%s12986_s11] sm:$0x3] }
 0x363   :  { %978 = vmatmul.mubr.f32.vlgmr.msra.gmra.mrb[16].mxu0 %v905_v47  ;;  %1827 = vmatpush1.bf16.msra.mxu1 %v8606_v33  ;;  %v1132_v47 = vld [vmem:[%s12982_s25 + $0x300] sm:$0xff] }
 0x364   :  { %1846 = vmatpush1.bf16.msra.mxu0 %v8520_v11  ;;  %v8544_v11 = vcombine.low %v1061_v63, %v1065_v5  ;;  %12985 = vst [vmem:[#allocation18_spill] sm:$0xff] %v10950_v41 }
 0x365   :  { %1847 = vmatprep.subr.bf16.mxu0 %v8529_v48  ;;  %v1136_v48 = vld [vmem:[%s12982_s25 + $0x320] sm:$0xff] }
 0x366   :  { %v8615_v51 = vcombine.high %v1132_v47, %v1136_v48 }
 0x368   :  { %1848 = vmatpush1.bf16.msra.mxu0 %v8528_v52  ;;  %v1137_v52 = vld [vmem:[%s12982_s25 + $0x328] sm:$0xff]  ;;  %1828 = vmatprep.subr.bf16.mxu1 %v8615_v51 }
 0x369   :  { %1849 = vmatprep.subr.bf16.mxu0 %v8537_v58  ;;  %v8614_v58 = vcombine.low %v1132_v47, %v1136_v48  ;;  %v8616_v63 = vcombine.low %v1133_v45, %v1137_v52  ;;  %v8617_v5 = vcombine.high %v1133_v45, %v1137_v52  ;;  %v1023_v48 = vrot.slane %v1018_v29, %v10774_v13 }
 0x36b   :  { %1829 = vmatpush1.bf16.msra.mxu1 %v8614_v58 }
 0x36c   :  { %1850 = vmatpush1.bf16.msra.mxu0 %v8536_v6  ;;  %v1140_v6 = vld [vmem:[%s12982_s25 + $0x340] sm:$0xff] }
 0x36d   :  { %1851 = vmatprep.subr.bf16.mxu0 %v8545_v12  ;;  %v1144_v12 = vld [vmem:[%s12982_s25 + $0x360] sm:$0xff] }
 0x36e   :  { %v8622_v0 = vcombine.low %v1140_v6, %v1144_v12 }
 0x370   :  { %1852 = vmatpush1.bf16.msra.mxu0 %v8544_v11  ;;  %v8623_v11 = vcombine.high %v1140_v6, %v1144_v12  ;;  %v1050_v6 = vld [vmem:[%s12982_s25 + $0x70] sm:$0xff]  ;;  %v1047_v12 = vld [vmem:[%s12982_s25 + $0x58] sm:$0xff] }
 0x371   :  { %1853 = vmatprep.subr.bf16.mxu0 %v8553_v17  ;;  %v1145_v17 = vld [vmem:[%s12982_s25 + $0x368] sm:$0xff] }
 0x372   :  { %1830 = vmatprep.subr.bf16.mxu1 %v8623_v11 }
 0x373   :  { %1831 = vmatpush1.bf16.msra.mxu1 %v8622_v0  ;;  %v1054_v0 = vld [vmem:[%s12982_s25 + $0x90] sm:$0xff] }
 0x374   :  { %1854 = vmatpush1.bf16.msra.mxu0 %v8552_v25  ;;  %v8624_v25 = vcombine.low %v1141_v57, %v1145_v17  ;;  %1832 = vmatprep.subr.bf16.mxu1 %v8631_v31 }
 0x375   :  { %1855 = vmatprep.subr.bf16.mxu0 %v8561_v30  ;;  %v8625_v30 = vcombine.high %v1141_v57, %v1145_v17 }
 0x378   :  { %1856 = vmatpush1.bf16.msra.mxu0 %v8560_v37  ;;  %v1153_v37 = vld [vmem:[%s12982_s25 + $0x3a8] sm:$0xff] }
 0x379   :  { %1857 = vmatprep.subr.bf16.mxu0 %v8569_v42  ;;  %v1156_v42 = vld [vmem:[%s12982_s25 + $0x3c0] sm:$0xff]  ;;  %v8633_v43 = vcombine.high %v1149_v36, %v1153_v37  ;;  %v8632_v55 = vcombine.low %v1149_v36, %v1153_v37 }
 0x37a   :  { %v8639_v56 = vcombine.high %v1156_v42, %v1160_v49  ;;  %v8638_v60 = vcombine.low %v1156_v42, %v1160_v49  ;;  %v1062_v42 = vld [vmem:[%s12982_s25 + $0xd0] sm:$0xff]  ;;  %v1063_v49 = vld [vmem:[%s12982_s25 + $0xd8] sm:$0xff] }
 0x37c   :  { %1858 = vmatpush1.bf16.msra.mxu0 %v8568_v50  ;;  %v1157_v50 = vld [vmem:[%s12982_s25 + $0x3c8] sm:$0xff] }
 0x37d   :  { %1859 = vmatprep.subr.bf16.mxu0 %v8577_v53  ;;  %v1161_v53 = vld [vmem:[%s12982_s25 + $0x3e8] sm:$0xff] }
 0x37e   :  { %v8641_v59 = vcombine.high %v1157_v50, %v1161_v53  ;;  %v8640_v61 = vcombine.low %v1157_v50, %v1161_v53  ;;  %v1067_v50 = vld [vmem:[%s12982_s25 + $0xf8] sm:$0xff] }
 0x380   :  { %1860 = vmatpush1.bf16.msra.mxu0 %v8576_v54  ;;  %v8630_v54 = vcombine.low %v1148_v18, %v1152_v24  ;;  %v1058_v18 = vld [vmem:[%s12982_s25 + $0xb0] sm:$0xff]  ;;  %v1055_v24 = vld [vmem:[%s12982_s25 + $0x98] sm:$0xff] }
 0x381   :  { %1861 = vmatprep.subr.bf16.mxu0 %v8585_v2  ;;  %v1039_v2 = vld [vmem:[%s12982_s25 + $0x18] sm:$0xff]  ;;  %v8539_v36 = vcombine.high %v1054_v0, %v1058_v18  ;;  %v8538_v53 = vcombine.low %v1054_v0, %v1058_v18  ;;  %v1114_v0 = vld [vmem:[%s12982_s25 + $0x270] sm:$0xff] }
 0x382   :  { %1833 = vmatpush1.bf16.msra.mxu1 %v8630_v54  ;;  %v8524_v8 = vcombine.low %v1039_v2, %v1043_v4  ;;  %v8525_v9 = vcombine.high %v1039_v2, %v1043_v4  ;;  %v8548_v2 = vcombine.low %v1063_v49, %v1067_v50 }
 0x383   :  { %1834 = vmatprep.subr.bf16.mxu1 %v8639_v56  ;;  %v8549_v56 = vcombine.high %v1063_v49, %v1067_v50 }
 0x384   :  { %1862 = vmatpush1.bf16.msra.mxu0 %v8584_v1  ;;  %v1042_v1 = vld [vmem:[%s12982_s25 + $0x30] sm:$0xff] }
 0x385   :  { %1863 = vmatprep.subr.bf16.mxu0 %v8593_v16  ;;  %v8523_v3 = vcombine.high %v1038_v62, %v1042_v1  ;;  %v8522_v7 = vcombine.low %v1038_v62, %v1042_v1  ;;  %v1075_v62 = vld [vmem:[%s12982_s25 + $0x138] sm:$0xff] }
 0x386   :  { %1835 = vmatpush1.bf16.msra.mxu1 %v8638_v60  ;;  %v1074_v60 = vld [vmem:[%s12982_s25 + $0x130] sm:$0xff] }
 0x387   :  { %1886 = vmatprep.subr.bf16.mxu1 %v8523_v3 }
 0x388   :  { %1864 = vmatpush1.bf16.msra.mxu0 %v8592_v15 }
 0x389   :  { %1865 = vmatprep.subr.bf16.mxu0 %v8601_v35 }
 0x38c   :  { %1866 = vmatpush1.bf16.msra.mxu0 %v8600_v34 }
 0x38d   :  { %1867 = vmatprep.subr.bf16.mxu0 %v8609_v46  ;;  %v1027_v46 = vrot.slane %v1018_v29, %v10950_v41  ;;  %v1094_v29 = vld [vmem:[%s12982_s25 + $0x1d0] sm:$0xff] }
 0x390   :  { %1868 = vmatpush1.bf16.msra.mxu0 %v8608_v44 }
 0x391   :  { %1869 = vmatprep.subr.bf16.mxu0 %v8617_v5  ;;  %v1046_v5 = vld [vmem:[%s12982_s25 + $0x50] sm:$0xff] }
 0x392   :  { %v8531_v11 = vcombine.high %v1046_v5, %v1050_v6 }
 0x394   :  { %1870 = vmatpush1.bf16.msra.mxu0 %v8616_v63 }
 0x395   :  { %1871 = vmatprep.subr.bf16.mxu0 %v8625_v30  ;;  %v8530_v30 = vcombine.low %v1046_v5, %v1050_v6 }
 0x398   :  { %1872 = vmatpush1.bf16.msra.mxu0 %v8624_v25  ;;  %v1059_v25 = vld [vmem:[%s12982_s25 + $0xb8] sm:$0xff] }
 0x399   :  { %1873 = vmatprep.subr.bf16.mxu0 %v8633_v43  ;;  %v8541_v37 = vcombine.high %v1055_v24, %v1059_v25  ;;  %v1066_v43 = vld [vmem:[%s12982_s25 + $0xf0] sm:$0xff]  ;;  %v8540_v54 = vcombine.low %v1055_v24, %v1059_v25 }
 0x39a   :  { %v8546_v1 = vcombine.low %v1062_v42, %v1066_v43 }
 0x39c   :  { %1874 = vmatpush1.bf16.msra.mxu0 %v8632_v55  ;;  %v8547_v55 = vcombine.high %v1062_v42, %v1066_v43  ;;  %v1123_v42 = vld [vmem:[%s12982_s25 + $0x2b8] sm:$0xff] }
 0x39d   :  { %1875 = vmatprep.subr.bf16.mxu0 %v8641_v59  ;;  %v1070_v59 = vld [vmem:[%s12982_s25 + $0x110] sm:$0xff] }
 0x39e   :  { %v8555_v3 = vcombine.high %v1070_v59, %v1074_v60 }
 0x3a0   :  { %1876 = vmatpush1.bf16.msra.mxu0 %v8640_v61  ;;  %v1071_v61 = vld [vmem:[%s12982_s25 + $0x118] sm:$0xff] }
 0x3a1   :  { %1927 = vmatprep.subr.bf16.mxu0 %v8525_v9  ;;  %v8557_v4 = vcombine.high %v1071_v61, %v1075_v62  ;;  %v1079_v9 = vld [vmem:[%s12982_s25 + $0x158] sm:$0xff] }
 0x436   :  { %v979_v14 = vpop.f32.mrb[16].mxu0 }
 0x437   :  { %v980_v15 = vadd.f32 1e-05, %v979_v14  ;;  %v981_v16 = vpop.f32.mrb[17].mxu0  ;;  %v1083_v14 = vld [vmem:[%s12982_s25 + $0x178] sm:$0xff] }
 0x438   :  { %v982_v19 = vadd.f32 1e-05, %v981_v16  ;;  %v8556_v16 = vcombine.low %v1071_v61, %v1075_v62  ;;  %v8565_v22 = vcombine.high %v1079_v9, %v1083_v14 }
 0x439   :  { %10064 = vrsqrt.f32 %v980_v15  ;;  %v8554_v15 = vcombine.low %v1070_v59, %v1074_v60  ;;  %v1131_v59 = vld [vmem:[%s12982_s25 + $0x2f8] sm:$0xff] }
 0x43a   :  { %10066 = vrsqrt.f32 %v982_v19 }
 0x443   :  { %v10065_v28 = vpop.eup %10064 }
 0x444   :  { %v10067_v34 = vpop.eup %10066 }
 0x445   :  { %v988_v35 = vcombine.low %v10065_v28, %v10067_v34  ;;  %v1087_v28 = vld [vmem:[%s12982_s25 + $0x198] sm:$0xff] }
 0x446   :  { %v1091_v34 = vld [vmem:[%s12982_s25 + $0x1b8] sm:$0xff] }
 0x447   :  { %v995_v38 = vrot.slane %v988_v35, %v10942_v32 }
 0x449   :  { %v1002_v40 = vrot.slane %v995_v38, %v10942_v32  ;;  %v8564_v38 = vcombine.low %v1079_v9, %v1083_v14 }
 0x44b   :  { %v1004_v33 = vmul.f32 %v1002_v40, %v912_v39  ;;  %v8571_v39 = vcombine.high %v1086_v26, %v1090_v27  ;;  %v8573_v40 = vcombine.high %v1087_v28, %v1091_v34 }
 0x44d   :  { %v1013_v44 = vrot.slane %v1004_v33, %v10950_v41  ;;  %v1009_v47 = vrot.slane %v1004_v33, %v10774_v13  ;;  %v1098_v33 = vld [vmem:[%s12982_s25 + $0x1f0] sm:$0xff] }
 0x44e   :  { %v8578_v5 = vcombine.low %v1094_v29, %v1098_v33 }
 0x44f   :  { %v1017_v45 = vmul.f32 %v1013_v44, %v10782_v21  ;;  %v1016_v51 = vmul.f32 %v1009_v47, %v10779_v20  ;;  %v1051_v20 = vld [vmem:[%s12982_s25 + $0x78] sm:$0xff]  ;;  %v8570_v47 = vcombine.low %v1086_v26, %v1090_v27 }
 0x450   :  { %v8533_v17 = vcombine.high %v1047_v12, %v1051_v20  ;;  %v8532_v31 = vcombine.low %v1047_v12, %v1051_v20  ;;  %v1095_v44 = vld [vmem:[%s12982_s25 + $0x1d8] sm:$0xff] }
 0x451   :  { %v1031_v52 = vadd.f32 %v1027_v46, %v1017_v45  ;;  %v1030_v10 = vadd.f32 %v1023_v48, %v1016_v51  ;;  %v1099_v46 = vld [vmem:[%s12982_s25 + $0x1f8] sm:$0xff]  ;;  %v8572_v48 = vcombine.low %v1087_v28, %v1091_v34  ;;  %v8579_v45 = vcombine.high %v1094_v29, %v1098_v33 }
 0x452   :  { %v8581_v51 = vcombine.high %v1095_v44, %v1099_v46  ;;  %v8580_v6 = vcombine.low %v1095_v44, %v1099_v46  ;;  %v1147_v26 = vld [vmem:[%s12982_s25 + $0x378] sm:$0xff] }
 0x453   :  { %v1033_v58 = vmax.f32 %v1031_v52, 0.0  ;;  %v1032_v63 = vmax.f32 %v1030_v10, 0.0  ;;  %v1102_v52 = vld [vmem:[%s12982_s25 + $0x210] sm:$0xff]  ;;  %v1155_v29 = vld [vmem:[%s12982_s25 + $0x3b8] sm:$0xff] }
 0x454   :  { %v1106_v10 = vld [vmem:[%s12982_s25 + $0x230] sm:$0xff] }
 0x455   :  { %v1035_v21 = vpack.c.bf16 %v1033_v58, %v1033_v58  ;;  %v10973_v57 = vpack.c.bf16 %v1032_v63, %v1032_v63  ;;  %v1103_v58 = vld [vmem:[%s12982_s25 + $0x218] sm:$0xff]  ;;  %v8587_v12 = vcombine.high %v1102_v52, %v1106_v10  ;;  %v8586_v18 = vcombine.low %v1102_v52, %v1106_v10 }
 0x456   :  { %v1107_v63 = vld [vmem:[%s12982_s25 + $0x238] sm:$0xff] }
 0x457   :  { %1836 = vmatprep.mubr.bf16.mxu1 %v1035_v21  ;;  %1877 = vmatprep.mubr.bf16.mxu0 %v1035_v21  ;;  %v8589_v20 = vcombine.high %v1103_v58, %v1107_v63  ;;  %v8588_v24 = vcombine.low %v1103_v58, %v1107_v63  ;;  %v1163_v52 = vld [vmem:[%s12982_s25 + $0x3f8] sm:$0xff] }
 0x458   :  { %1837 = vmatmul.mubr.bf16.vlgmr.msra.gmra.mrb[4].mxu1 %v10973_v57  ;;  %1878 = vmatmul.mubr.bf16.vlgmr.msra.gmra.mrb[20].mxu0 %v10973_v57 }
 0x459   :  { %1887 = vmatpush1.bf16.msra.mxu1 %v8522_v7  ;;  %1928 = vmatpush1.bf16.msra.mxu0 %v8524_v8  ;;  %v1078_v7 = vld [vmem:[%s12982_s25 + $0x150] sm:$0xff] }
 0x45a   :  { %1918 = vmatprep.mubr.bf16.mxu1 %v1035_v21  ;;  %1959 = vmatprep.mubr.bf16.mxu0 %v1035_v21  ;;  %v1082_v8 = vld [vmem:[%s12982_s25 + $0x170] sm:$0xff] }
 0x45b   :  { %1888 = vmatprep.subr.bf16.mxu1 %v8531_v11  ;;  %1929 = vmatprep.subr.bf16.mxu0 %v8533_v17  ;;  %v8563_v19 = vcombine.high %v1078_v7, %v1082_v8  ;;  %v8562_v35 = vcombine.low %v1078_v7, %v1082_v8  ;;  %v1110_v21 = vld [vmem:[%s12982_s25 + $0x250] sm:$0xff]  ;;  %v1111_v11 = vld [vmem:[%s12982_s25 + $0x258] sm:$0xff] }
 0x45c   :  { %v1115_v17 = vld [vmem:[%s12982_s25 + $0x278] sm:$0xff]  ;;  %v8595_v25 = vcombine.high %v1110_v21, %v1114_v0  ;;  %v8594_v43 = vcombine.low %v1110_v21, %v1114_v0  ;;  %v2320_v0 = vld [vmem:[#allocation6] sm:$0xff] }
 0x45d   :  { %1889 = vmatpush1.bf16.msra.mxu1 %v8530_v30  ;;  %1930 = vmatpush1.bf16.msra.mxu0 %v8532_v31  ;;  %v8597_v30 = vcombine.high %v1111_v11, %v1115_v17  ;;  %v1118_v31 = vld [vmem:[%s12982_s25 + $0x290] sm:$0xff]  ;;  %v8596_v49 = vcombine.low %v1111_v11, %v1115_v17  ;;  %v1139_v7 = vld [vmem:[%s12982_s25 + $0x338] sm:$0xff] }
 0x45e   :  { %1890 = vmatprep.subr.bf16.mxu1 %v8539_v36  ;;  %1931 = vmatprep.subr.bf16.mxu0 %v8541_v37  ;;  %v1122_v36 = vld [vmem:[%s12982_s25 + $0x2b0] sm:$0xff]  ;;  %v1119_v37 = vld [vmem:[%s12982_s25 + $0x298] sm:$0xff] }
 0x45f   :  { %v8603_v50 = vcombine.high %v1118_v31, %v1122_v36  ;;  %v8602_v60 = vcombine.low %v1118_v31, %v1122_v36  ;;  %v8604_v61 = vcombine.low %v1119_v37, %v1123_v42  ;;  %v2323_v21 = vld [vmem:[#allocation6 + $0x18] sm:$0xff]  ;;  %v2322_v17 = vld [vmem:[#allocation6 + $0x10] sm:$0xff]  ;;  %v2324_v31 = vld [vmem:[#allocation6 + $0x20] sm:$0xff] }
 0x460   :  { %v2326_v36 = vld [vmem:[#allocation6 + $0x30] sm:$0xff] }
 0x461   :  { %1891 = vmatpush1.bf16.msra.mxu1 %v8538_v53  ;;  %1932 = vmatpush1.bf16.msra.mxu0 %v8540_v54  ;;  %v8605_v53 = vcombine.high %v1119_v37, %v1123_v42  ;;  %v1126_v54 = vld [vmem:[%s12982_s25 + $0x2d0] sm:$0xff]  ;;  %v2329_v37 = vld [vmem:[#allocation6 + $0x48] sm:$0xff]  ;;  %v11156_v42 = vpack.c.bf16 %v2326_v36, %v2324_v31 }
 0x462   :  { %1892 = vmatprep.subr.bf16.mxu1 %v8547_v55  ;;  %1933 = vmatprep.subr.bf16.mxu0 %v8549_v56  ;;  %v1130_v55 = vld [vmem:[%s12982_s25 + $0x2f0] sm:$0xff]  ;;  %v1127_v56 = vld [vmem:[%s12982_s25 + $0x2d8] sm:$0xff] }
 0x463   :  { %v8611_v62 = vcombine.high %v1126_v54, %v1130_v55  ;;  %v8610_v8 = vcombine.low %v1126_v54, %v1130_v55  ;;  %v8612_v9 = vcombine.low %v1127_v56, %v1131_v59  ;;  %v2335_v54 = vld [vmem:[#allocation6 + $0x78] sm:$0xff] }
 0x465   :  { %1893 = vmatpush1.bf16.msra.mxu1 %v8546_v1  ;;  %1934 = vmatpush1.bf16.msra.mxu0 %v8548_v2  ;;  %v8613_v1 = vcombine.high %v1127_v56, %v1131_v59  ;;  %v1134_v2 = vld [vmem:[%s12982_s25 + $0x310] sm:$0xff]  ;;  %v2332_v59 = vld [vmem:[#allocation6 + $0x60] sm:$0xff] }
 0x466   :  { %1894 = vmatprep.subr.bf16.mxu1 %v8555_v3  ;;  %1935 = vmatprep.subr.bf16.mxu0 %v8557_v4  ;;  %v1138_v3 = vld [vmem:[%s12982_s25 + $0x330] sm:$0xff]  ;;  %v1135_v4 = vld [vmem:[%s12982_s25 + $0x318] sm:$0xff] }
 0x467   :  { %v8619_v14 = vcombine.high %v1134_v2, %v1138_v3  ;;  %v8618_v27 = vcombine.low %v1134_v2, %v1138_v3  ;;  %v8620_v28 = vcombine.low %v1135_v4, %v1139_v7  ;;  %v2336_v3 = vld [vmem:[#allocation6 + $0x80] sm:$0xff] }
 0x469   :  { %1895 = vmatpush1.bf16.msra.mxu1 %v8554_v15  ;;  %1936 = vmatpush1.bf16.msra.mxu0 %v8556_v16  ;;  %v8621_v15 = vcombine.high %v1135_v4, %v1139_v7  ;;  %v1142_v16 = vld [vmem:[%s12982_s25 + $0x350] sm:$0xff]  ;;  %v2341_v7 = vld [vmem:[#allocation6 + $0xa8] sm:$0xff] }
 0x46a   :  { %1896 = vmatprep.subr.bf16.mxu1 %v8563_v19  ;;  %1937 = vmatprep.subr.bf16.mxu0 %v8565_v22  ;;  %v1146_v19 = vld [vmem:[%s12982_s25 + $0x370] sm:$0xff]  ;;  %v1143_v22 = vld [vmem:[%s12982_s25 + $0x358] sm:$0xff] }
 0x46b   :  { %v8627_v34 = vcombine.high %v1142_v16, %v1146_v19  ;;  %v8626_v33 = vcombine.low %v1142_v16, %v1146_v19  ;;  %v8628_v44 = vcombine.low %v1143_v22, %v1147_v26  ;;  %v2338_v4 = vld [vmem:[#allocation6 + $0x90] sm:$0xff]  ;;  %v2345_v19 = vld [vmem:[#allocation6 + $0xc8] sm:$0xff] }
 0x46c   :  { %v2342_v16 = vld [vmem:[#allocation6 + $0xb0] sm:$0xff] }
 0x46d   :  { %1897 = vmatpush1.bf16.msra.mxu1 %v8562_v35  ;;  %1938 = vmatpush1.bf16.msra.mxu0 %v8564_v38  ;;  %v8629_v35 = vcombine.high %v1143_v22, %v1147_v26  ;;  %v1150_v38 = vld [vmem:[%s12982_s25 + $0x390] sm:$0xff]  ;;  %v2347_v22 = vld [vmem:[#allocation6 + $0xd8] sm:$0xff] }
 0x46e   :  { %1898 = vmatprep.subr.bf16.mxu1 %v8571_v39  ;;  %1939 = vmatprep.subr.bf16.mxu0 %v8573_v40  ;;  %v1154_v39 = vld [vmem:[%s12982_s25 + $0x3b0] sm:$0xff]  ;;  %v1151_v40 = vld [vmem:[%s12982_s25 + $0x398] sm:$0xff] }
 0x46f   :  { %v8635_v46 = vcombine.high %v1150_v38, %v1154_v39  ;;  %v8634_v10 = vcombine.low %v1150_v38, %v1154_v39  ;;  %v8636_v58 = vcombine.low %v1151_v40, %v1155_v29  ;;  %v2351_v38 = vld [vmem:[#allocation6 + $0xf8] sm:$0xff] }
 0x471   :  { %1899 = vmatpush1.bf16.msra.mxu1 %v8570_v47  ;;  %1940 = vmatpush1.bf16.msra.mxu0 %v8572_v48  ;;  %v8637_v47 = vcombine.high %v1151_v40, %v1155_v29  ;;  %v1158_v48 = vld [vmem:[%s12982_s25 + $0x3d0] sm:$0xff]  ;;  %v2348_v29 = vld [vmem:[#allocation6 + $0xe0] sm:$0xff] }
 0x472   :  { %1900 = vmatprep.subr.bf16.mxu1 %v8579_v45  ;;  %1941 = vmatprep.subr.bf16.mxu0 %v8581_v51  ;;  %v1162_v45 = vld [vmem:[%s12982_s25 + $0x3f0] sm:$0xff]  ;;  %v1159_v51 = vld [vmem:[%s12982_s25 + $0x3d8] sm:$0xff] }
 0x473   :  { %v8643_v63 = vcombine.high %v1158_v48, %v1162_v45 }
 0x475   :  { %1901 = vmatpush1.bf16.msra.mxu1 %v8578_v5  ;;  %1942 = vmatpush1.bf16.msra.mxu0 %v8580_v6  ;;  %v8645_v5 = vcombine.high %v1159_v51, %v1163_v52  ;;  %v8642_v6 = vcombine.low %v1158_v48, %v1162_v45  ;;  %v2352_v45 = vld [vmem:[#allocation6 + $0x100] sm:$0xff] }
 0x476   :  { %1902 = vmatprep.subr.bf16.mxu1 %v8587_v12  ;;  %1943 = vmatprep.subr.bf16.mxu0 %v8589_v20  ;;  %v8644_v12 = vcombine.low %v1159_v51, %v1163_v52  ;;  %v2321_v20 = vld [vmem:[#allocation6 + $0x8] sm:$0xff]  ;;  %v2354_v51 = vld [vmem:[#allocation6 + $0x110] sm:$0xff] }
 0x477   :  { %v11148_v11 = vpack.c.bf16 %v2323_v21, %v2321_v20  ;;  %v2357_v52 = vld [vmem:[#allocation6 + $0x128] sm:$0xff]  ;;  %v2363_v20 = vld [vmem:[#allocation6 + $0x158] sm:$0xff] }
 0x479   :  { %1903 = vmatpush1.bf16.msra.mxu1 %v8586_v18  ;;  %1944 = vmatpush1.bf16.msra.mxu0 %v8588_v24  ;;  %v2325_v18 = vld [vmem:[#allocation6 + $0x28] sm:$0xff]  ;;  %v2327_v24 = vld [vmem:[#allocation6 + $0x38] sm:$0xff] }
 0x47a   :  { %1904 = vmatprep.subr.bf16.mxu1 %v8595_v25  ;;  %1945 = vmatprep.subr.bf16.mxu0 %v8597_v30  ;;  %v11150_v25 = vpack.c.bf16 %v2322_v17, %v2320_v0  ;;  %v11152_v30 = vpack.c.bf16 %v2327_v24, %v2325_v18  ;;  %v2360_v17 = vld [vmem:[#allocation6 + $0x140] sm:$0xff]  ;;  %v2362_v18 = vld [vmem:[#allocation6 + $0x150] sm:$0xff] }
 0x47b   :  { %v11210_v24 = vpack.c.bf16 %v2362_v18, %v2360_v17 }
 0x47d   :  { %1905 = vmatpush1.bf16.msra.mxu1 %v8594_v43  ;;  %1946 = vmatpush1.bf16.msra.mxu0 %v8596_v49  ;;  %v2328_v49 = vld [vmem:[#allocation6 + $0x40] sm:$0xff] }
 0x47e   :  { %1906 = vmatprep.subr.bf16.mxu1 %v8603_v50  ;;  %1947 = vmatprep.subr.bf16.mxu0 %v8605_v53  ;;  %v2330_v50 = vld [vmem:[#allocation6 + $0x50] sm:$0xff]  ;;  %v2333_v53 = vld [vmem:[#allocation6 + $0x68] sm:$0xff] }
 0x47f   :  { %v11162_v55 = vpack.c.bf16 %v2330_v50, %v2328_v49  ;;  %v11165_v56 = vpack.c.bf16 %v2335_v54, %v2333_v53  ;;  %v8646_v49 = vld [vmem:[%s12987_s24 + $0x10] sm:$0xff] }
 0x481   :  { %1907 = vmatpush1.bf16.msra.mxu1 %v8602_v60  ;;  %1948 = vmatpush1.bf16.msra.mxu0 %v8604_v61  ;;  %v2334_v60 = vld [vmem:[#allocation6 + $0x70] sm:$0xff]  ;;  %v2337_v61 = vld [vmem:[#allocation6 + $0x88] sm:$0xff] }
 0x482   :  { %1908 = vmatprep.subr.bf16.mxu1 %v8611_v62  ;;  %1949 = vmatprep.subr.bf16.mxu0 %v8613_v1  ;;  %v2339_v62 = vld [vmem:[#allocation6 + $0x98] sm:$0xff]  ;;  %v11168_v1 = vpack.c.bf16 %v2334_v60, %v2332_v59 }
 0x483   :  { %v11171_v2 = vpack.c.bf16 %v2339_v62, %v2337_v61  ;;  %v8647_v60 = vld [vmem:[%s12987_s24 + $0x18] sm:$0xff]  ;;  %v1968_v61 = vld [vmem:[%s12987_s24] sm:$0xff]  ;;  %v1969_v62 = vld [vmem:[%s12987_s24 + $0x8] sm:$0xff] }
 0x485   :  { %1909 = vmatpush1.bf16.msra.mxu1 %v8610_v8  ;;  %1950 = vmatpush1.bf16.msra.mxu0 %v8612_v9  ;;  %v2343_v8 = vld [vmem:[#allocation6 + $0xb8] sm:$0xff]  ;;  %v11174_v9 = vpack.c.bf16 %v2338_v4, %v2336_v3 }
 0x486   :  { %1910 = vmatprep.subr.bf16.mxu1 %v8619_v14  ;;  %1951 = vmatprep.subr.bf16.mxu0 %v8621_v15  ;;  %v11177_v14 = vpack.c.bf16 %v2343_v8, %v2341_v7  ;;  %v2340_v15 = vld [vmem:[#allocation6 + $0xa0] sm:$0xff] }
 0x487   :  { %v11180_v26 = vpack.c.bf16 %v2342_v16, %v2340_v15  ;;  %v8652_v15 = vld [vmem:[%s12987_s24 + $0x20] sm:$0xff] }
 0x489   :  { %1911 = vmatpush1.bf16.msra.mxu1 %v8618_v27  ;;  %1952 = vmatpush1.bf16.msra.mxu0 %v8620_v28  ;;  %v11183_v27 = vpack.c.bf16 %v2347_v22, %v2345_v19  ;;  %v2344_v28 = vld [vmem:[#allocation6 + $0xc0] sm:$0xff] }
 0x48a   :  { %1912 = vmatprep.subr.bf16.mxu1 %v8627_v34  ;;  %1953 = vmatprep.subr.bf16.mxu0 %v8629_v35  ;;  %v2346_v34 = vld [vmem:[#allocation6 + $0xd0] sm:$0xff]  ;;  %v2349_v35 = vld [vmem:[#allocation6 + $0xe8] sm:$0xff] }
 0x48b   :  { %v11186_v39 = vpack.c.bf16 %v2346_v34, %v2344_v28  ;;  %v11189_v40 = vpack.c.bf16 %v2351_v38, %v2349_v35  ;;  %v8653_v34 = vld [vmem:[%s12987_s24 + $0x28] sm:$0xff]  ;;  %v8656_v35 = vld [vmem:[%s12987_s24 + $0x30] sm:$0xff]  ;;  %v8657_v38 = vld [vmem:[%s12987_s24 + $0x38] sm:$0xff]  ;;  %s12997_s24 = sld [smem:[#allocation31_spill]] }
 0x48d   :  { %1913 = vmatpush1.bf16.msra.mxu1 %v8626_v33  ;;  %1954 = vmatpush1.bf16.msra.mxu0 %v8628_v44  ;;  %v2350_v33 = vld [vmem:[#allocation6 + $0xf0] sm:$0xff]  ;;  %v2353_v44 = vld [vmem:[#allocation6 + $0x108] sm:$0xff] }
 0x48e   :  { %1914 = vmatprep.subr.bf16.mxu1 %v8635_v46  ;;  %1955 = vmatprep.subr.bf16.mxu0 %v8637_v47  ;;  %v2355_v46 = vld [vmem:[#allocation6 + $0x118] sm:$0xff]  ;;  %v11192_v47 = vpack.c.bf16 %v2350_v33, %v2348_v29  ;;  %v2372_v29 = vld [vmem:[#allocation6 + $0x1a0] sm:$0xff]  ;;  %v2374_v33 = vld [vmem:[#allocation6 + $0x1b0] sm:$0xff] }
 0x48f   :  { %v11195_v48 = vpack.c.bf16 %v2355_v46, %v2353_v44  ;;  %v9422_v44 = vpack.c.bf16 %v2374_v33, %v2372_v29  ;;  %v2377_v46 = vld [vmem:[#allocation6 + $0x1c8] sm:$0xff]  ;;  %v2677_v33 = vld [vmem:[#allocation7 + $0x180] sm:$0xff] }
 0x491   :  { %1915 = vmatpush1.bf16.msra.mxu1 %v8634_v10  ;;  %1956 = vmatpush1.bf16.msra.mxu0 %v8636_v58  ;;  %v2359_v10 = vld [vmem:[#allocation6 + $0x138] sm:$0xff]  ;;  %v11198_v58 = vpack.c.bf16 %v2354_v51, %v2352_v45  ;;  %v2376_v45 = vld [vmem:[#allocation6 + $0x1c0] sm:$0xff]  ;;  %v2378_v51 = vld [vmem:[#allocation6 + $0x1d0] sm:$0xff] }
 0x492   :  { %1916 = vmatprep.subr.bf16.mxu1 %v8643_v63  ;;  %1957 = vmatprep.subr.bf16.mxu0 %v8645_v5  ;;  %v11201_v63 = vpack.c.bf16 %v2359_v10, %v2357_v52  ;;  %v2356_v5 = vld [vmem:[#allocation6 + $0x120] sm:$0xff]  ;;  %v9426_v52 = vpack.c.bf16 %v2378_v51, %v2376_v45  ;;  %v2381_v10 = vld [vmem:[#allocation6 + $0x1e8] sm:$0xff] }
 0x493   :  { %v2689_v45 = vld [vmem:[#allocation7 + $0x1e0] sm:$0xff] }
 0x495   :  { %1917 = vmatpush1.bf16.msra.mxu1 %v8642_v6  ;;  %1958 = vmatpush1.bf16.msra.mxu0 %v8644_v12  ;;  %v2358_v6 = vld [vmem:[#allocation6 + $0x130] sm:$0xff]  ;;  %v2361_v12 = vld [vmem:[#allocation6 + $0x148] sm:$0xff] }
 0x496   :  { %9369 = vmatprep.subr.bf16.mxu0 %v11148_v11  ;;  %v11204_v21 = vpack.c.bf16 %v2358_v6, %v2356_v5  ;;  %v11207_v0 = vpack.c.bf16 %v2363_v20, %v2361_v12  ;;  %v2380_v5 = vld [vmem:[#allocation6 + $0x1e0] sm:$0xff]  ;;  %v2382_v6 = vld [vmem:[#allocation6 + $0x1f0] sm:$0xff] }
 0x497   :  { %v9430_v12 = vpack.c.bf16 %v2382_v6, %v2380_v5 }
 0x498   :  { %1919 = vmatmul.mubr.bf16.vlgmr.msra.gmra.mrb[8].mxu1 %v10973_v57  ;;  %1960 = vmatmul.mubr.bf16.vlgmr.msra.gmra.mrb[24].mxu0 %v10973_v57  ;;  %v2331_v57 = vld [vmem:[#allocation6 + $0x58] sm:$0xff] }
 0x499   :  { %2044 = vmatprep.mubr.f32.mxu1 %v12956_v23  ;;  %9371 = vmatpush1.bf16.msra.mxu0 %v11150_v25  ;;  %v11159_v43 = vpack.c.bf16 %v2331_v57, %v2329_v37 }
 0x49a   :  { %9373 = vmatprep.subr.bf16.mxu0 %v11152_v30 }
 0x49d   :  { %9375 = vmatpush1.bf16.msra.mxu0 %v11156_v42 }
 0x49e   :  { %9377 = vmatprep.subr.bf16.mxu0 %v11159_v43 }
 0x4a1   :  { %9379 = vmatpush1.bf16.msra.mxu0 %v11162_v55 }
 0x4a2   :  { %9381 = vmatprep.subr.bf16.mxu0 %v11165_v56 }
 0x4a5   :  { %9383 = vmatpush1.bf16.msra.mxu0 %v11168_v1 }
 0x4a6   :  { %9385 = vmatprep.subr.bf16.mxu0 %v11171_v2 }
 0x4a9   :  { %9387 = vmatpush1.bf16.msra.mxu0 %v11174_v9 }
 0x4aa   :  { %9389 = vmatprep.subr.bf16.mxu0 %v11177_v14 }
 0x4ad   :  { %9391 = vmatpush1.bf16.msra.mxu0 %v11180_v26 }
 0x4ae   :  { %9393 = vmatprep.subr.bf16.mxu0 %v11183_v27 }
 0x4b1   :  { %9395 = vmatpush1.bf16.msra.mxu0 %v11186_v39 }
 0x4b2   :  { %9397 = vmatprep.subr.bf16.mxu0 %v11189_v40 }
 0x4b5   :  { %9399 = vmatpush1.bf16.msra.mxu0 %v11192_v47 }
 0x4b6   :  { %9401 = vmatprep.subr.bf16.mxu0 %v11195_v48 }
 0x4b9   :  { %9403 = vmatpush1.bf16.msra.mxu0 %v11198_v58 }
 0x4ba   :  { %9405 = vmatprep.subr.bf16.mxu0 %v11201_v63 }
 0x4bd   :  { %9407 = vmatpush1.bf16.msra.mxu0 %v11204_v21 }
 0x4be   :  { %9409 = vmatprep.subr.bf16.mxu0 %v11207_v0 }
 0x4c1   :  { %9411 = vmatpush1.bf16.msra.mxu0 %v11210_v24 }
 0x52b   :  { %v1838_v31 = vpop.f32.mrb[4].mxu1  ;;  %v1879_v36 = vpop.f32.mrb[20].mxu0 }
 0x52c   :  { %v1840_v37 = vpop.f32.mrb[5].mxu1  ;;  %v1881_v57 = vpop.f32.mrb[21].mxu0 }
 0x52d   :  { %v1842_v50 = vpop.f32.mrb[6].mxu1  ;;  %v1883_v53 = vpop.f32.mrb[22].mxu0  ;;  %1980 = vmatprep.subr.mxu1 %v1881_v57 }
 0x52e   :  { %v1843_v54 = vpop.f32.mrb[7].mxu1  ;;  %v1884_v59 = vpop.f32.mrb[23].mxu0  ;;  %1981 = vmatpush1.msra.mxu1 %v1879_v36 }
 0x52f   :  { %2063 = vmatprep.subr.mxu1 %v1840_v37  ;;  %8648 = vmatmul.mubr.msk.f32.vlgmr.msra.gmra.mrb[12].mxu1 %vm1973_vm4, %v8646_v49 }
 0x530   :  { %2064 = vmatpush1.msra.mxu1 %v1838_v31  ;;  %2050 = vmatprep.mubr.f32.mxu1 %v12956_v23 }
 0x533   :  { %8649 = vmatmul.mubr.msk.f32.gmra.mrb[14].mxu1 %vm1973_vm4, %v8647_v60 }
 0x534   :  { %2127 = vmatprep.mubr.f32.mxu1 %v12956_v23 }
 0x537   :  { %8650 = vmatmul.mubr.msk.f32.vlgmr.msra.gmra.mrb[12].mxu1 %vm1973_vm4, %v1968_v61 }
 0x538   :  { %2133 = vmatprep.mubr.f32.mxu1 %v12956_v23 }
 0x53b   :  { %8651 = vmatmul.mubr.msk.f32.gmra.mrb[14].mxu1 %vm1973_vm4, %v1969_v62 }
 0x53c   :  { %2213 = vmatprep.mubr.f32.mxu1 %v12956_v23 }
 0x56b   :  { %v1920_v3 = vpop.f32.mrb[8].mxu1  ;;  %v1961_v4 = vpop.f32.mrb[24].mxu0 }
 0x56c   :  { %v1922_v7 = vpop.f32.mrb[9].mxu1  ;;  %v1963_v8 = vpop.f32.mrb[25].mxu0 }
 0x56d   :  { %v1924_v16 = vpop.f32.mrb[10].mxu1  ;;  %v1965_v19 = vpop.f32.mrb[26].mxu0  ;;  %2149 = vmatprep.subr.mxu1 %v1922_v7  ;;  %v11287_v7 = vld [vmem:[#allocation7 + $0x8] sm:$0xff] }
 0x56e   :  { %v1925_v22 = vpop.f32.mrb[11].mxu1  ;;  %v1966_v28 = vpop.f32.mrb[27].mxu0  ;;  %2150 = vmatpush1.msra.mxu1 %v1920_v3  ;;  %v2629_v3 = vld [vmem:[#allocation7] sm:$0xff]  ;;  %v11289_v16 = vld [vmem:[#allocation7 + $0x28] sm:$0xff] }
 0x56f   :  { %8654 = vmatmul.mubr.msk.f32.vlgmr.msra.gmra.mrb[12].mxu1 %vm1973_vm4, %v8652_v15  ;;  %2239 = vmatprep.subr.mxu1 %v1963_v8  ;;  %v2637_v19 = vld [vmem:[#allocation7 + $0x40] sm:$0xff]  ;;  %v8662_v28 = vcombine.low %v11287_v7, %v11289_v16 }
 0x570   :  { %2240 = vmatpush1.msra.mxu1 %v1961_v4  ;;  %2219 = vmatprep.mubr.f32.mxu1 %v12956_v23  ;;  %v2633_v4 = vld [vmem:[#allocation7 + $0x20] sm:$0xff] }
 0x571   :  { %9433 = vmatprep.subr.bf16.mxu1 %v11148_v11  ;;  %v2365_v11 = vld [vmem:[#allocation6 + $0x168] sm:$0xff]  ;;  %v8660_v8 = vcombine.low %v2629_v3, %v2633_v4  ;;  %v8661_v15 = vcombine.high %v2629_v3, %v2633_v4  ;;  %v2641_v22 = vld [vmem:[#allocation7 + $0x60] sm:$0xff] }
 0x572   :  { %v2638_v3 = vld [vmem:[#allocation7 + $0x48] sm:$0xff] }
 0x573   :  { %8655 = vmatmul.mubr.msk.f32.gmra.mrb[14].mxu1 %vm1973_vm4, %v8653_v34  ;;  %v8663_v34 = vcombine.high %v11287_v7, %v11289_v16  ;;  %v2642_v4 = vld [vmem:[#allocation7 + $0x68] sm:$0xff] }
 0x574   :  { %2303 = vmatprep.mubr.f32.mxu1 %v12956_v23 }
 0x577   :  { %8658 = vmatmul.mubr.msk.f32.vlgmr.msra.gmra.mrb[12].mxu1 %vm1973_vm4, %v8656_v35  ;;  %v8669_v35 = vcombine.high %v2637_v19, %v2641_v22 }
 0x578   :  { %2309 = vmatprep.mubr.f32.mxu1 %v12956_v23  ;;  %9435 = vmatpush1.bf16.msra.mxu1 %v11150_v25  ;;  %v2367_v25 = vld [vmem:[#allocation6 + $0x178] sm:$0xff] }
 0x579   :  { %9437 = vmatprep.subr.bf16.mxu1 %v11152_v30  ;;  %v9412_v30 = vpack.c.bf16 %v2367_v25, %v2365_v11  ;;  %v2645_v11 = vld [vmem:[#allocation7 + $0x80] sm:$0xff] }
 0x57a   :  { %v2649_v25 = vld [vmem:[#allocation7 + $0xa0] sm:$0xff] }
 0x57b   :  { %8659 = vmatmul.mubr.msk.f32.gmra.mrb[14].mxu1 %vm1973_vm4, %v8657_v38  ;;  %9413 = vmatprep.subr.bf16.mxu0 %v9412_v30  ;;  %v8668_v38 = vcombine.low %v2637_v19, %v2641_v22  ;;  %v8671_v19 = vcombine.high %v2638_v3, %v2642_v4  ;;  %v2646_v22 = vld [vmem:[#allocation7 + $0x88] sm:$0xff] }
 0x57c   :  { %9439 = vmatpush1.bf16.msra.mxu1 %v11156_v42  ;;  %v2364_v42 = vld [vmem:[#allocation6 + $0x160] sm:$0xff] }
 0x57d   :  { %9441 = vmatprep.subr.bf16.mxu1 %v11159_v43  ;;  %v2366_v43 = vld [vmem:[#allocation6 + $0x170] sm:$0xff] }
 0x580   :  { %9443 = vmatpush1.bf16.msra.mxu1 %v11162_v55  ;;  %v9414_v55 = vpack.c.bf16 %v2366_v43, %v2364_v42  ;;  %v8676_v42 = vcombine.low %v2645_v11, %v2649_v25  ;;  %v2653_v43 = vld [vmem:[#allocation7 + $0xc0] sm:$0xff] }
 0x581   :  { %9445 = vmatprep.subr.bf16.mxu1 %v11165_v56  ;;  %v2369_v56 = vld [vmem:[#allocation6 + $0x188] sm:$0xff] }
 0x582   :  { %9415 = vmatpush1.bf16.msra.mxu0 %v9414_v55 }
 0x584   :  { %9447 = vmatpush1.bf16.msra.mxu1 %v11168_v1  ;;  %v2371_v1 = vld [vmem:[#allocation6 + $0x198] sm:$0xff] }
 0x585   :  { %9449 = vmatprep.subr.bf16.mxu1 %v11171_v2  ;;  %v9416_v2 = vpack.c.bf16 %v2371_v1, %v2369_v56 }
 0x587   :  { %9417 = vmatprep.subr.bf16.mxu0 %v9416_v2 }
 0x588   :  { %9451 = vmatpush1.bf16.msra.mxu1 %v11174_v9  ;;  %v2368_v9 = vld [vmem:[#allocation6 + $0x180] sm:$0xff] }
 0x589   :  { %9453 = vmatprep.subr.bf16.mxu1 %v11177_v14  ;;  %v2370_v14 = vld [vmem:[#allocation6 + $0x190] sm:$0xff] }
 0x58c   :  { %9455 = vmatpush1.bf16.msra.mxu1 %v11180_v26  ;;  %v9418_v26 = vpack.c.bf16 %v2370_v14, %v2368_v9  ;;  %v2665_v9 = vld [vmem:[#allocation7 + $0x120] sm:$0xff] }
 0x58d   :  { %9457 = vmatprep.subr.bf16.mxu1 %v11183_v27  ;;  %v2373_v27 = vld [vmem:[#allocation6 + $0x1a8] sm:$0xff] }
 0x58e   :  { %9419 = vmatpush1.bf16.msra.mxu0 %v9418_v26 }
 0x590   :  { %9459 = vmatpush1.bf16.msra.mxu1 %v11186_v39  ;;  %v2375_v39 = vld [vmem:[#allocation6 + $0x1b8] sm:$0xff] }
 0x591   :  { %9461 = vmatprep.subr.bf16.mxu1 %v11189_v40  ;;  %v9420_v40 = vpack.c.bf16 %v2375_v39, %v2373_v27  ;;  %v2669_v27 = vld [vmem:[#allocation7 + $0x140] sm:$0xff] }
 0x592   :  { %v2673_v39 = vld [vmem:[#allocation7 + $0x160] sm:$0xff] }
 0x593   :  { %9421 = vmatprep.subr.bf16.mxu0 %v9420_v40  ;;  %v8700_v29 = vcombine.low %v2669_v27, %v2673_v39 }
 0x594   :  { %9463 = vmatpush1.bf16.msra.mxu1 %v11192_v47  ;;  %9423 = vmatpush1.bf16.msra.mxu0 %v9422_v44  ;;  %v2379_v47 = vld [vmem:[#allocation6 + $0x1d8] sm:$0xff] }
 0x595   :  { %9465 = vmatprep.subr.bf16.mxu1 %v11195_v48  ;;  %v9424_v48 = vpack.c.bf16 %v2379_v47, %v2377_v46 }
 0x597   :  { %9425 = vmatprep.subr.bf16.mxu0 %v9424_v48 }
 0x598   :  { %9467 = vmatpush1.bf16.msra.mxu1 %v11198_v58  ;;  %9427 = vmatpush1.bf16.msra.mxu0 %v9426_v52  ;;  %v2383_v58 = vld [vmem:[#allocation6 + $0x1f8] sm:$0xff] }
 0x599   :  { %9469 = vmatprep.subr.bf16.mxu1 %v11201_v63  ;;  %v9428_v63 = vpack.c.bf16 %v2383_v58, %v2381_v10 }
 0x59b   :  { %9429 = vmatprep.subr.bf16.mxu0 %v9428_v63 }
 0x59c   :  { %9471 = vmatpush1.bf16.msra.mxu1 %v11204_v21  ;;  %9431 = vmatpush1.bf16.msra.mxu0 %v9430_v12 }
 0x59d   :  { %9473 = vmatprep.subr.bf16.mxu1 %v11207_v0  ;;  %3397 = vmatprep.subr.bf16.mxu0 %v8661_v15 }
 0x5a0   :  { %9475 = vmatpush1.bf16.msra.mxu1 %v11210_v24 }
 0x5a1   :  { %9477 = vmatprep.subr.bf16.mxu1 %v9412_v30  ;;  %v8677_v30 = vcombine.high %v2645_v11, %v2649_v25  ;;  %v2654_v11 = vld [vmem:[#allocation7 + $0xc8] sm:$0xff] }
 0x5a2   :  { %v2658_v25 = vld [vmem:[#allocation7 + $0xe8] sm:$0xff] }
 0x5a4   :  { %9479 = vmatpush1.bf16.msra.mxu1 %v9414_v55  ;;  %v2657_v55 = vld [vmem:[#allocation7 + $0xe0] sm:$0xff] }
 0x5a5   :  { %9481 = vmatprep.subr.bf16.mxu1 %v9416_v2  ;;  %v8685_v56 = vcombine.high %v2653_v43, %v2657_v55  ;;  %v8684_v1 = vcombine.low %v2653_v43, %v2657_v55  ;;  %v2661_v2 = vld [vmem:[#allocation7 + $0x100] sm:$0xff]  ;;  %v2662_v43 = vld [vmem:[#allocation7 + $0x108] sm:$0xff] }
 0x5a6   :  { %v8693_v14 = vcombine.high %v2661_v2, %v2665_v9  ;;  %v2666_v55 = vld [vmem:[#allocation7 + $0x128] sm:$0xff] }
 0x5a7   :  { %v8694_v7 = vcombine.low %v2662_v43, %v2666_v55 }
 0x5a8   :  { %9483 = vmatpush1.bf16.msra.mxu1 %v9418_v26  ;;  %v8692_v26 = vcombine.low %v2661_v2, %v2665_v9  ;;  %v2670_v2 = vld [vmem:[#allocation7 + $0x148] sm:$0xff] }
 0x5a9   :  { %9485 = vmatprep.subr.bf16.mxu1 %v9420_v40  ;;  %v8701_v40 = vcombine.high %v2669_v27, %v2673_v39  ;;  %v2674_v9 = vld [vmem:[#allocation7 + $0x168] sm:$0xff] }
 0x5aa   :  { %v8703_v16 = vcombine.high %v2670_v2, %v2674_v9  ;;  %v2686_v39 = vld [vmem:[#allocation7 + $0x1c8] sm:$0xff] }
 0x5ac   :  { %9487 = vmatpush1.bf16.msra.mxu1 %v9422_v44  ;;  %v2681_v44 = vld [vmem:[#allocation7 + $0x1a0] sm:$0xff] }
 0x5ad   :  { %9489 = vmatprep.subr.bf16.mxu1 %v9424_v48  ;;  %v8709_v46 = vcombine.high %v2677_v33, %v2681_v44  ;;  %v8708_v47 = vcombine.low %v2677_v33, %v2681_v44  ;;  %v2685_v48 = vld [vmem:[#allocation7 + $0x1c0] sm:$0xff] }
 0x5ae   :  { %v8717_v51 = vcombine.high %v2685_v48, %v2689_v45 }
 0x5b0   :  { %9491 = vmatpush1.bf16.msra.mxu1 %v9426_v52  ;;  %v8716_v52 = vcombine.low %v2685_v48, %v2689_v45  ;;  %v2694_v48 = vld [vmem:[#allocation7 + $0x208] sm:$0xff] }
 0x5b1   :  { %9493 = vmatprep.subr.bf16.mxu1 %v9428_v63 }
 0x5b4   :  { %9495 = vmatpush1.bf16.msra.mxu1 %v9430_v12 }
 0x5b5   :  { %3440 = vmatprep.subr.bf16.mxu1 %v8663_v34  ;;  %v2650_v34 = vld [vmem:[#allocation7 + $0xa8] sm:$0xff] }
 0x64a   :  { %v11275_v20 = vpop.f32.mrb[12].mxu1 }
 0x64b   :  { %v11277_v21 = vpop.f32.mrb[13].mxu1 }
 0x64e   :  { %v11279_v0 = vpop.f32.mrb[14].mxu1 }
 0x64f   :  { %v2384_v17 = vadd.f32 %v11279_v0, %v11275_v20  ;;  %v11283_v18 = vpop.f32.mrb[15].mxu1 }
 0x650   :  { %v2391_v24 = vadd.f32 %v11283_v18, %v11277_v21 }
 0x651   :  { %v2385_v31 = vrot.slane %v2384_v17, 4 }
 0x652   :  { %v2392_v36 = vrot.slane %v2391_v24, 4 }
 0x653   :  { %v2386_v37 = vadd.f32 %v2385_v31, %v2384_v17 }
 0x654   :  { %v2393_v57 = vadd.f32 %v2392_v36, %v2391_v24 }
 0x655   :  { %v2387_v49 = vrot.slane %v2386_v37, 2 }
 0x656   :  { %v2394_v50 = vrot.slane %v2393_v57, 2 }
 0x657   :  { %v2388_v53 = vadd.f32 %v2387_v49, %v2386_v37 }
 0x658   :  { %v2395_v54 = vadd.f32 %v2394_v50, %v2393_v57 }
 0x659   :  { %v2389_v59 = vrot.slane %v2388_v53, 1 }
 0x65a   :  { %v2396_v60 = vrot.slane %v2395_v54, 1 }
 0x65b   :  { %v2390_v62 = vadd.f32 %v2389_v59, %v2388_v53 }
 0x65c   :  { %v2397_v61 = vadd.f32 %v2396_v60, %v2395_v54 }
 0x65e   :  { %2462 = vmatprep.mubr.f32.mxu0 %v2397_v61 }
 0x65f   :  { %2463 = vmatmul.mubr.f32.vlgmr.msra.gmra.mrb[18].mxu0 %v2390_v62 }
 0x660   :  { %3398 = vmatpush1.bf16.msra.mxu0 %v8660_v8 }
 0x661   :  { %3399 = vmatprep.subr.bf16.mxu0 %v8669_v35  ;;  %v8670_v35 = vcombine.low %v2638_v3, %v2642_v4  ;;  %v2718_v3 = vld [vmem:[#allocation7 + $0x2c8] sm:$0xff] }
 0x664   :  { %3400 = vmatpush1.bf16.msra.mxu0 %v8668_v38  ;;  %v8679_v38 = vcombine.high %v2646_v22, %v2650_v34 }
 0x665   :  { %3401 = vmatprep.subr.bf16.mxu0 %v8677_v30  ;;  %v8678_v30 = vcombine.low %v2646_v22, %v2650_v34  ;;  %v2725_v34 = vld [vmem:[#allocation7 + $0x300] sm:$0xff] }
 0x668   :  { %3402 = vmatpush1.bf16.msra.mxu0 %v8676_v42  ;;  %v8687_v42 = vcombine.high %v2654_v11, %v2658_v25 }
 0x669   :  { %3403 = vmatprep.subr.bf16.mxu0 %v8685_v56  ;;  %v8686_v56 = vcombine.low %v2654_v11, %v2658_v25  ;;  %v2730_v25 = vld [vmem:[#allocation7 + $0x328] sm:$0xff] }
 0x66c   :  { %3404 = vmatpush1.bf16.msra.mxu0 %v8684_v1  ;;  %v8695_v1 = vcombine.high %v2662_v43, %v2666_v55  ;;  %v2733_v55 = vld [vmem:[#allocation7 + $0x340] sm:$0xff] }
 0x66d   :  { %3405 = vmatprep.subr.bf16.mxu0 %v8693_v14  ;;  %v2682_v14 = vld [vmem:[#allocation7 + $0x1a8] sm:$0xff] }
 0x670   :  { %3406 = vmatpush1.bf16.msra.mxu0 %v8692_v26  ;;  %v8702_v26 = vcombine.low %v2670_v2, %v2674_v9 }
 0x671   :  { %3407 = vmatprep.subr.bf16.mxu0 %v8701_v40  ;;  %v2690_v40 = vld [vmem:[#allocation7 + $0x1e8] sm:$0xff] }
 0x672   :  { %v8719_v33 = vcombine.high %v2686_v39, %v2690_v40  ;;  %v8718_v44 = vcombine.low %v2686_v39, %v2690_v40  ;;  %v2742_v39 = vld [vmem:[#allocation7 + $0x388] sm:$0xff] }
 0x673   :  { %v2746_v40 = vld [vmem:[#allocation7 + $0x3a8] sm:$0xff] }
 0x674   :  { %3408 = vmatpush1.bf16.msra.mxu0 %v8700_v29 }
 0x675   :  { %3409 = vmatprep.subr.bf16.mxu0 %v8709_v46  ;;  %v2693_v46 = vld [vmem:[#allocation7 + $0x200] sm:$0xff] }
 0x678   :  { %3410 = vmatpush1.bf16.msra.mxu0 %v8708_v47  ;;  %v2697_v47 = vld [vmem:[#allocation7 + $0x220] sm:$0xff] }
 0x679   :  { %3411 = vmatprep.subr.bf16.mxu0 %v8717_v51  ;;  %v8725_v45 = vcombine.high %v2693_v46, %v2697_v47  ;;  %v2698_v51 = vld [vmem:[#allocation7 + $0x228] sm:$0xff] }
 0x67c   :  { %3412 = vmatpush1.bf16.msra.mxu0 %v8716_v52  ;;  %v8724_v52 = vcombine.low %v2693_v46, %v2697_v47  ;;  %v2750_v46 = vld [vmem:[#allocation7 + $0x3c8] sm:$0xff] }
 0x67d   :  { %3413 = vmatprep.subr.bf16.mxu0 %v8725_v45  ;;  %v2754_v47 = vld [vmem:[#allocation7 + $0x3e8] sm:$0xff]  ;;  %v8774_v45 = vcombine.low %v2742_v39, %v2746_v40 }
 0x680   :  { %3414 = vmatpush1.bf16.msra.mxu0 %v8724_v52  ;;  %v8783_v52 = vcombine.high %v2750_v46, %v2754_v47 }
 0x732   :  { %v2464_v10 = vpop.f32.mrb[18].mxu0 }
 0x733   :  { %v2472_v58 = vrot.slane %v2464_v10, %v10774_v13  ;;  %v2466_v63 = vpop.f32.mrb[19].mxu0  ;;  %v8726_v10 = vcombine.low %v2694_v48, %v2698_v51 }
 0x734   :  { %v2476_v5 = vrot.slane %v2466_v63, %v10774_v13  ;;  %v2701_v63 = vld [vmem:[#allocation7 + $0x240] sm:$0xff] }
 0x735   :  { %v11298_v6 = vsub.f32 %v11275_v20, %v2472_v58  ;;  %v11301_v12 = vsub.f32 %v11279_v0, %v2472_v58  ;;  %v8727_v58 = vcombine.high %v2694_v48, %v2698_v51 }
 0x736   :  { %v11304_v17 = vsub.f32 %v11277_v21, %v2476_v5  ;;  %v11307_v24 = vsub.f32 %v11283_v18, %v2476_v5  ;;  %v2705_v5 = vld [vmem:[#allocation7 + $0x260] sm:$0xff] }
 0x737   :  { %v2481_v31 = vmul.f32 %v11298_v6, %v11298_v6  ;;  %v2483_v36 = vmul.f32 %v11301_v12, %v11301_v12 }
 0x738   :  { %v2482_v37 = vmul.f32 %v11304_v17, %v11304_v17  ;;  %v2484_v20 = vmul.f32 %v11307_v24, %v11307_v24 }
 0x739   :  { %v2485_v0 = vadd.f32 %v2483_v36, %v2481_v31  ;;  %v2702_v31 = vld [vmem:[#allocation7 + $0x248] sm:$0xff]  ;;  %v8733_v36 = vcombine.high %v2701_v63, %v2705_v5 }
 0x73a   :  { %v2492_v57 = vadd.f32 %v2484_v20, %v2482_v37  ;;  %v2706_v37 = vld [vmem:[#allocation7 + $0x268] sm:$0xff]  ;;  %v8732_v20 = vcombine.low %v2701_v63, %v2705_v5  ;;  %v2631_v63 = vld [vmem:[#allocation7 + $0x10] sm:$0xff] }
 0x73b   :  { %v2486_v49 = vrot.slane %v2485_v0, 4  ;;  %3415 = vmatprep.subr.bf16.mxu0 %v8733_v36  ;;  %v2635_v5 = vld [vmem:[#allocation7 + $0x30] sm:$0xff] }
 0x73c   :  { %v2493_v21 = vrot.slane %v2492_v57, 4  ;;  %3416 = vmatpush1.bf16.msra.mxu0 %v8732_v20  ;;  %v8665_v36 = vcombine.high %v2631_v63, %v2635_v5  ;;  %v8664_v20 = vcombine.low %v2631_v63, %v2635_v5  ;;  %v2663_v63 = vld [vmem:[#allocation7 + $0x110] sm:$0xff] }
 0x73d   :  { %v2487_v50 = vadd.f32 %v2486_v49, %v2485_v0  ;;  %v8734_v0 = vcombine.low %v2702_v31, %v2706_v37  ;;  %v2709_v49 = vld [vmem:[#allocation7 + $0x280] sm:$0xff]  ;;  %v2667_v5 = vld [vmem:[#allocation7 + $0x130] sm:$0xff] }
 0x73e   :  { %v2494_v53 = vadd.f32 %v2493_v21, %v2492_v57  ;;  %v8735_v57 = vcombine.high %v2702_v31, %v2706_v37  ;;  %v2713_v21 = vld [vmem:[#allocation7 + $0x2a0] sm:$0xff]  ;;  %v2632_v31 = vld [vmem:[#allocation7 + $0x18] sm:$0xff] }
 0x73f   :  { %v2488_v18 = vrot.slane %v2487_v50, 2  ;;  %v2636_v37 = vld [vmem:[#allocation7 + $0x38] sm:$0xff] }
 0x740   :  { %v2495_v54 = vrot.slane %v2494_v53, 2 }
 0x741   :  { %v2489_v59 = vadd.f32 %v2488_v18, %v2487_v50  ;;  %v2710_v50 = vld [vmem:[#allocation7 + $0x288] sm:$0xff] }
 0x742   :  { %v2496_v60 = vadd.f32 %v2495_v54, %v2494_v53  ;;  %v8741_v53 = vcombine.high %v2709_v49, %v2713_v21  ;;  %v2714_v18 = vld [vmem:[#allocation7 + $0x2a8] sm:$0xff]  ;;  %v8740_v54 = vcombine.low %v2709_v49, %v2713_v21 }
 0x743   :  { %v2490_v61 = vrot.slane %v2489_v59, 1 }
 0x744   :  { %v2497_v62 = vrot.slane %v2496_v60, 1  ;;  %3417 = vmatprep.subr.bf16.mxu0 %v8741_v53 }
 0x745   :  { %v2491_v15 = vadd.f32 %v2490_v61, %v2489_v59  ;;  %v8742_v59 = vcombine.low %v2710_v50, %v2714_v18  ;;  %3418 = vmatpush1.bf16.msra.mxu0 %v8740_v54  ;;  %v2717_v61 = vld [vmem:[#allocation7 + $0x2c0] sm:$0xff] }
 0x746   :  { %v2498_v8 = vadd.f32 %v2497_v62, %v2496_v60  ;;  %v8743_v60 = vcombine.high %v2710_v50, %v2714_v18  ;;  %v2721_v62 = vld [vmem:[#allocation7 + $0x2e0] sm:$0xff] }
 0x747   :  { %v8749_v4 = vcombine.high %v2717_v61, %v2721_v62 }
 0x748   :  { %2564 = vmatprep.mubr.f32.mxu1 %v2498_v8  ;;  %v2722_v8 = vld [vmem:[#allocation7 + $0x2e8] sm:$0xff] }
 0x749   :  { %2565 = vmatmul.mubr.f32.vlgmr.msra.gmra.mrb[16].mxu1 %v2491_v15  ;;  %v8748_v15 = vcombine.low %v2717_v61, %v2721_v62  ;;  %v8751_v22 = vcombine.high %v2718_v3, %v2722_v8  ;;  %3419 = vmatprep.subr.bf16.mxu0 %v8749_v4  ;;  %v2499_v61 = vld [vmem:[%s12931_s9] sm:$0x3] }
 0x74a   :  { %3441 = vmatpush1.bf16.msra.mxu1 %v8662_v28  ;;  %v2678_v28 = vld [vmem:[#allocation7 + $0x188] sm:$0xff] }
 0x74b   :  { %3442 = vmatprep.subr.bf16.mxu1 %v8671_v19  ;;  %v8711_v27 = vcombine.high %v2678_v28, %v2682_v14  ;;  %v8710_v29 = vcombine.low %v2678_v28, %v2682_v14  ;;  %v8750_v19 = vcombine.low %v2718_v3, %v2722_v8  ;;  %3420 = vmatpush1.bf16.msra.mxu0 %v8748_v15  ;;  %v2745_v28 = vld [vmem:[#allocation7 + $0x3a0] sm:$0xff] }
 0x74c   :  { %v2607_v3 = vld [vmem:[%s12932_s10] sm:$0x3] }
 0x74d   :  { %v2616_v15 = vrot.slane %v2607_v3, %v10950_v41 }
 0x74e   :  { %3443 = vmatpush1.bf16.msra.mxu1 %v8670_v35  ;;  %v2729_v35 = vld [vmem:[#allocation7 + $0x320] sm:$0xff] }
 0x74f   :  { %3444 = vmatprep.subr.bf16.mxu1 %v8679_v38  ;;  %v2726_v38 = vld [vmem:[#allocation7 + $0x308] sm:$0xff]  ;;  %v8757_v11 = vcombine.high %v2725_v34, %v2729_v35 }
 0x750   :  { %v8759_v43 = vcombine.high %v2726_v38, %v2730_v25 }
 0x751   :  { %3421 = vmatprep.subr.bf16.mxu0 %v8757_v11 }
 0x752   :  { %3445 = vmatpush1.bf16.msra.mxu1 %v8678_v30  ;;  %v8756_v30 = vcombine.low %v2725_v34, %v2729_v35 }
 0x753   :  { %3446 = vmatprep.subr.bf16.mxu1 %v8687_v42  ;;  %v8758_v42 = vcombine.low %v2726_v38, %v2730_v25 }
 0x754   :  { %3422 = vmatpush1.bf16.msra.mxu0 %v8756_v30 }
 0x756   :  { %3447 = vmatpush1.bf16.msra.mxu1 %v8686_v56  ;;  %v2737_v56 = vld [vmem:[#allocation7 + $0x360] sm:$0xff] }
 0x757   :  { %3448 = vmatprep.subr.bf16.mxu1 %v8695_v1  ;;  %v2734_v1 = vld [vmem:[#allocation7 + $0x348] sm:$0xff]  ;;  %v8764_v2 = vcombine.low %v2733_v55, %v2737_v56  ;;  %v8765_v9 = vcombine.high %v2733_v55, %v2737_v56 }
 0x759   :  { %3423 = vmatprep.subr.bf16.mxu0 %v8765_v9  ;;  %v2639_v9 = vld [vmem:[#allocation7 + $0x50] sm:$0xff] }
 0x75a   :  { %3449 = vmatpush1.bf16.msra.mxu1 %v8694_v7  ;;  %v2738_v7 = vld [vmem:[#allocation7 + $0x368] sm:$0xff]  ;;  %3424 = vmatpush1.bf16.msra.mxu0 %v8764_v2 }
 0x75b   :  { %3450 = vmatprep.subr.bf16.mxu1 %v8703_v16  ;;  %v2741_v16 = vld [vmem:[#allocation7 + $0x380] sm:$0xff]  ;;  %v8766_v14 = vcombine.low %v2734_v1, %v2738_v7 }
 0x75c   :  { %v8772_v48 = vcombine.low %v2741_v16, %v2745_v28 }
 0x75e   :  { %3451 = vmatpush1.bf16.msra.mxu1 %v8702_v26  ;;  %v8767_v26 = vcombine.high %v2734_v1, %v2738_v7  ;;  %v2643_v7 = vld [vmem:[#allocation7 + $0x70] sm:$0xff] }
 0x75f   :  { %3452 = vmatprep.subr.bf16.mxu1 %v8711_v27  ;;  %v8773_v27 = vcombine.high %v2741_v16, %v2745_v28  ;;  %v2640_v16 = vld [vmem:[#allocation7 + $0x58] sm:$0xff] }
 0x760   :  { %v2644_v28 = vld [vmem:[#allocation7 + $0x78] sm:$0xff] }
 0x761   :  { %3425 = vmatprep.subr.bf16.mxu0 %v8773_v27  ;;  %v2648_v27 = vld [vmem:[#allocation7 + $0x98] sm:$0xff] }
 0x762   :  { %3453 = vmatpush1.bf16.msra.mxu1 %v8710_v29  ;;  %v2749_v29 = vld [vmem:[#allocation7 + $0x3c0] sm:$0xff]  ;;  %3426 = vmatpush1.bf16.msra.mxu0 %v8772_v48  ;;  %v2656_v48 = vld [vmem:[#allocation7 + $0xd8] sm:$0xff] }
 0x763   :  { %3454 = vmatprep.subr.bf16.mxu1 %v8719_v33  ;;  %v8775_v33 = vcombine.high %v2742_v39, %v2746_v40  ;;  %v2652_v39 = vld [vmem:[#allocation7 + $0xb8] sm:$0xff]  ;;  %v8672_v40 = vcombine.low %v2639_v9, %v2643_v7 }
 0x766   :  { %3455 = vmatpush1.bf16.msra.mxu1 %v8718_v44  ;;  %v2753_v44 = vld [vmem:[#allocation7 + $0x3e0] sm:$0xff] }
 0x767   :  { %3456 = vmatprep.subr.bf16.mxu1 %v8727_v58  ;;  %v8781_v51 = vcombine.high %v2749_v29, %v2753_v44  ;;  %v8782_v58 = vcombine.low %v2750_v46, %v2754_v47  ;;  %v2655_v46 = vld [vmem:[#allocation7 + $0xd0] sm:$0xff] }
 0x768   :  { %v2659_v47 = vld [vmem:[#allocation7 + $0xf0] sm:$0xff] }
 0x769   :  { %3427 = vmatprep.subr.bf16.mxu0 %v8781_v51 }
 0x76a   :  { %3457 = vmatpush1.bf16.msra.mxu1 %v8726_v10  ;;  %v8780_v10 = vcombine.low %v2749_v29, %v2753_v44  ;;  %v8674_v29 = vcombine.low %v2640_v16, %v2644_v28  ;;  %v8683_v44 = vcombine.high %v2648_v27, %v2652_v39 }
 0x76b   :  { %3458 = vmatprep.subr.bf16.mxu1 %v8735_v57  ;;  %v8667_v57 = vcombine.high %v2632_v31, %v2636_v37 }
 0x76c   :  { %3428 = vmatpush1.bf16.msra.mxu0 %v8780_v10  ;;  %v8689_v10 = vcombine.high %v2655_v46, %v2659_v47 }
 0x76d   :  { %3483 = vmatprep.subr.bf16.mxu0 %v8665_v36  ;;  %v2668_v36 = vld [vmem:[#allocation7 + $0x138] sm:$0xff] }
 0x76e   :  { %3459 = vmatpush1.bf16.msra.mxu1 %v8734_v0  ;;  %v8666_v0 = vcombine.low %v2632_v31, %v2636_v37  ;;  %v2664_v31 = vld [vmem:[#allocation7 + $0x118] sm:$0xff]  ;;  %v8688_v37 = vcombine.low %v2655_v46, %v2659_v47 }
 0x76f   :  { %3460 = vmatprep.subr.bf16.mxu1 %v8743_v60  ;;  %v2716_v46 = vld [vmem:[#allocation7 + $0x2b8] sm:$0xff] }
 0x772   :  { %3461 = vmatpush1.bf16.msra.mxu1 %v8742_v59 }
 0x773   :  { %3462 = vmatprep.subr.bf16.mxu1 %v8751_v22  ;;  %v2612_v22 = vrot.slane %v2607_v3, %v10774_v13  ;;  %v2680_v3 = vld [vmem:[#allocation7 + $0x198] sm:$0xff] }
 0x776   :  { %3463 = vmatpush1.bf16.msra.mxu1 %v8750_v19 }
 0x777   :  { %3464 = vmatprep.subr.bf16.mxu1 %v8759_v43 }
 0x77a   :  { %3465 = vmatpush1.bf16.msra.mxu1 %v8758_v42 }
 0x77b   :  { %3466 = vmatprep.subr.bf16.mxu1 %v8767_v26  ;;  %v2651_v26 = vld [vmem:[#allocation7 + $0xb0] sm:$0xff] }
 0x77e   :  { %3467 = vmatpush1.bf16.msra.mxu1 %v8766_v14 }
 0x77f   :  { %3468 = vmatprep.subr.bf16.mxu1 %v8775_v33 }
 0x782   :  { %3469 = vmatpush1.bf16.msra.mxu1 %v8774_v45  ;;  %v2660_v45 = vld [vmem:[#allocation7 + $0xf8] sm:$0xff] }
 0x783   :  { %3470 = vmatprep.subr.bf16.mxu1 %v8783_v52  ;;  %v8682_v52 = vcombine.low %v2648_v27, %v2652_v39 }
 0x786   :  { %3471 = vmatpush1.bf16.msra.mxu1 %v8782_v58  ;;  %v8691_v58 = vcombine.high %v2656_v48, %v2660_v45 }
 0x787   :  { %3526 = vmatprep.subr.bf16.mxu1 %v8667_v57  ;;  %v8699_v57 = vcombine.high %v2664_v31, %v2668_v36 }
 0x81c   :  { %v2566_v49 = vpop.f32.mrb[16].mxu1 }
 0x81d   :  { %v2567_v21 = vadd.f32 1e-05, %v2566_v49  ;;  %v2568_v50 = vpop.f32.mrb[17].mxu1  ;;  %v2671_v49 = vld [vmem:[#allocation7 + $0x150] sm:$0xff] }
 0x81e   :  { %v2569_v53 = vadd.f32 1e-05, %v2568_v50  ;;  %v2672_v50 = vld [vmem:[#allocation7 + $0x158] sm:$0xff] }
 0x81f   :  { %10068 = vrsqrt.f32 %v2567_v21  ;;  %v2675_v21 = vld [vmem:[#allocation7 + $0x170] sm:$0xff] }
 0x820   :  { %10070 = vrsqrt.f32 %v2569_v53  ;;  %v2676_v53 = vld [vmem:[#allocation7 + $0x178] sm:$0xff] }
 0x829   :  { %v10069_v18 = vpop.eup %10068 }
 0x82a   :  { %v10071_v54 = vpop.eup %10070 }
 0x82b   :  { %v2575_v59 = vcombine.low %v10069_v18, %v10071_v54  ;;  %v8696_v18 = vcombine.low %v2663_v63, %v2667_v5  ;;  %v8698_v54 = vcombine.low %v2664_v31, %v2668_v36 }
 0x82d   :  { %v2582_v60 = vrot.slane %v2575_v59, %v10942_v32  ;;  %v8705_v59 = vcombine.high %v2671_v49, %v2675_v21 }
 0x82f   :  { %v2589_v62 = vrot.slane %v2582_v60, %v10942_v32  ;;  %v8707_v60 = vcombine.high %v2672_v50, %v2676_v53 }
 0x831   :  { %v2591_v4 = vmul.f32 %v2589_v62, %v2499_v61  ;;  %v2679_v61 = vld [vmem:[#allocation7 + $0x190] sm:$0xff] }
 0x832   :  { %v2683_v62 = vld [vmem:[#allocation7 + $0x1b0] sm:$0xff] }
 0x833   :  { %v2600_v8 = vrot.slane %v2591_v4, %v10950_v41  ;;  %v2596_v19 = vrot.slane %v2591_v4, %v10774_v13  ;;  %v2684_v4 = vld [vmem:[#allocation7 + $0x1b8] sm:$0xff] }
 0x835   :  { %v2604_v34 = vmul.f32 %v2600_v8, %v11304_v17  ;;  %v2606_v35 = vmul.f32 %v2600_v8, %v11307_v24  ;;  %v2603_v38 = vmul.f32 %v2596_v19, %v11298_v6  ;;  %v2605_v11 = vmul.f32 %v2596_v19, %v11301_v12  ;;  %v2647_v24 = vld [vmem:[#allocation7 + $0x90] sm:$0xff] }
 0x836   :  { %v8673_v6 = vcombine.high %v2639_v9, %v2643_v7  ;;  %v8675_v12 = vcombine.high %v2640_v16, %v2644_v28  ;;  %v8681_v33 = vcombine.high %v2647_v24, %v2651_v26  ;;  %v8680_v51 = vcombine.low %v2647_v24, %v2651_v26  ;;  %v2707_v24 = vld [vmem:[#allocation7 + $0x270] sm:$0xff] }
 0x837   :  { %v2620_v25 = vadd.f32 %v2616_v15, %v2604_v34  ;;  %v2622_v30 = vadd.f32 %v2616_v15, %v2606_v35  ;;  %v2619_v42 = vadd.f32 %v2612_v22, %v2603_v38  ;;  %v2621_v43 = vadd.f32 %v2612_v22, %v2605_v11  ;;  %v2687_v34 = vld [vmem:[#allocation7 + $0x1d0] sm:$0xff]  ;;  %v2688_v38 = vld [vmem:[#allocation7 + $0x1d8] sm:$0xff] }
 0x838   :  { %v8704_v8 = vcombine.low %v2671_v49, %v2675_v21  ;;  %v8706_v15 = vcombine.low %v2672_v50, %v2676_v53  ;;  %v8713_v19 = vcombine.high %v2679_v61, %v2683_v62  ;;  %v8715_v22 = vcombine.high %v2680_v3, %v2684_v4  ;;  %v2691_v35 = vld [vmem:[#allocation7 + $0x1f0] sm:$0xff]  ;;  %v2692_v11 = vld [vmem:[#allocation7 + $0x1f8] sm:$0xff] }
 0x839   :  { %v2624_v55 = vmax.f32 %v2620_v25, 0.0  ;;  %v2626_v56 = vmax.f32 %v2622_v30, 0.0  ;;  %v2623_v1 = vmax.f32 %v2619_v42, 0.0  ;;  %v2625_v2 = vmax.f32 %v2621_v43, 0.0  ;;  %v2732_v49 = vld [vmem:[#allocation7 + $0x338] sm:$0xff] }
 0x83a   :  { %v8712_v25 = vcombine.low %v2679_v61, %v2683_v62  ;;  %v8714_v30 = vcombine.low %v2680_v3, %v2684_v4  ;;  %v8721_v42 = vcombine.high %v2687_v34, %v2691_v35  ;;  %v8723_v43 = vcombine.high %v2688_v38, %v2692_v11  ;;  %v2740_v61 = vld [vmem:[#allocation7 + $0x378] sm:$0xff] }
 0x83b   :  { %v2628_v14 = vpack.c.bf16 %v2626_v56, %v2624_v55  ;;  %v11336_v17 = vpack.c.bf16 %v2625_v2, %v2623_v1  ;;  %v2695_v55 = vld [vmem:[#allocation7 + $0x210] sm:$0xff]  ;;  %v2696_v1 = vld [vmem:[#allocation7 + $0x218] sm:$0xff]  ;;  %v8720_v9 = vcombine.low %v2687_v34, %v2691_v35  ;;  %v8722_v7 = vcombine.low %v2688_v38, %v2692_v11 }
 0x83c   :  { %v2699_v56 = vld [vmem:[#allocation7 + $0x230] sm:$0xff]  ;;  %v2700_v2 = vld [vmem:[#allocation7 + $0x238] sm:$0xff] }
 0x83d   :  { %3429 = vmatprep.mubr.bf16.mxu0 %v2628_v14  ;;  %3472 = vmatprep.mubr.bf16.mxu1 %v2628_v14  ;;  %v8729_v16 = vcombine.high %v2695_v55, %v2699_v56  ;;  %v8731_v28 = vcombine.high %v2696_v1, %v2700_v2  ;;  %v8728_v26 = vcombine.low %v2695_v55, %v2699_v56  ;;  %v2748_v34 = vld [vmem:[#allocation7 + $0x3b8] sm:$0xff] }
 0x83e   :  { %3430 = vmatmul.mubr.bf16.vlgmr.msra.gmra.mrb[28].mxu0 %v11336_v17  ;;  %3473 = vmatmul.mubr.bf16.vlgmr.msra.gmra.mrb[20].mxu1 %v11336_v17  ;;  %v8730_v27 = vcombine.low %v2696_v1, %v2700_v2  ;;  %v2756_v55 = vld [vmem:[#allocation7 + $0x3f8] sm:$0xff] }
 0x83f   :  { %3484 = vmatpush1.bf16.msra.mxu0 %v8664_v20  ;;  %3527 = vmatpush1.bf16.msra.mxu1 %v8666_v0  ;;  %v8690_v20 = vcombine.low %v2656_v48, %v2660_v45  ;;  %v8697_v0 = vcombine.high %v2663_v63, %v2667_v5  ;;  %v2724_v63 = vld [vmem:[#allocation7 + $0x2f8] sm:$0xff] }
 0x840   :  { %3515 = vmatprep.mubr.bf16.mxu0 %v2628_v14  ;;  %3558 = vmatprep.mubr.bf16.mxu1 %v2628_v14  ;;  %v2703_v14 = vld [vmem:[#allocation7 + $0x250] sm:$0xff] }
 0x841   :  { %3485 = vmatprep.subr.bf16.mxu0 %v8673_v6  ;;  %3528 = vmatprep.subr.bf16.mxu1 %v8675_v12  ;;  %v2704_v6 = vld [vmem:[#allocation7 + $0x258] sm:$0xff]  ;;  %v8737_v39 = vcombine.high %v2703_v14, %v2707_v24  ;;  %v8736_v47 = vcombine.low %v2703_v14, %v2707_v24  ;;  %v4009_v24 = vld [vmem:[#allocation9] sm:$0xff] }
 0x842   :  { %v2708_v12 = vld [vmem:[#allocation7 + $0x278] sm:$0xff] }
 0x843   :  { %3486 = vmatpush1.bf16.msra.mxu0 %v8672_v40  ;;  %3529 = vmatpush1.bf16.msra.mxu1 %v8674_v29  ;;  %v8739_v40 = vcombine.high %v2704_v6, %v2708_v12  ;;  %v2711_v29 = vld [vmem:[#allocation7 + $0x290] sm:$0xff]  ;;  %v8738_v48 = vcombine.low %v2704_v6, %v2708_v12  ;;  %v4012_v14 = vld [vmem:[#allocation9 + $0x18] sm:$0xff] }
 0x844   :  { %3487 = vmatprep.subr.bf16.mxu0 %v8681_v33  ;;  %3530 = vmatprep.subr.bf16.mxu1 %v8683_v44  ;;  %v2715_v33 = vld [vmem:[#allocation7 + $0x2b0] sm:$0xff]  ;;  %v2712_v44 = vld [vmem:[#allocation7 + $0x298] sm:$0xff] }
 0x845   :  { %v8745_v45 = vcombine.high %v2711_v29, %v2715_v33  ;;  %v8744_v5 = vcombine.low %v2711_v29, %v2715_v33  ;;  %v8746_v31 = vcombine.low %v2712_v44, %v2716_v46  ;;  %v4011_v12 = vld [vmem:[#allocation9 + $0x10] sm:$0xff]  ;;  %v4013_v29 = vld [vmem:[#allocation9 + $0x20] sm:$0xff] }
 0x846   :  { %v4015_v33 = vld [vmem:[#allocation9 + $0x30] sm:$0xff] }
 0x847   :  { %3488 = vmatpush1.bf16.msra.mxu0 %v8680_v51  ;;  %3531 = vmatpush1.bf16.msra.mxu1 %v8682_v52  ;;  %v8747_v51 = vcombine.high %v2712_v44, %v2716_v46  ;;  %v2719_v52 = vld [vmem:[#allocation7 + $0x2d0] sm:$0xff]  ;;  %v4018_v44 = vld [vmem:[#allocation9 + $0x48] sm:$0xff]  ;;  %v11351_v46 = vpack.c.bf16 %v4015_v33, %v4013_v29  ;;  %v8788_v29 = vld [vmem:[%s12934_s12 + $0x20] sm:$0xff] }
 0x848   :  { %3489 = vmatprep.subr.bf16.mxu0 %v8689_v10  ;;  %3532 = vmatprep.subr.bf16.mxu1 %v8691_v58  ;;  %v2723_v10 = vld [vmem:[#allocation7 + $0x2f0] sm:$0xff]  ;;  %v2720_v58 = vld [vmem:[#allocation7 + $0x2d8] sm:$0xff]  ;;  %v8789_v33 = vld [vmem:[%s12934_s12 + $0x28] sm:$0xff] }
 0x849   :  { %v8753_v36 = vcombine.high %v2719_v52, %v2723_v10  ;;  %v8752_v21 = vcombine.low %v2719_v52, %v2723_v10  ;;  %v8754_v50 = vcombine.low %v2720_v58, %v2724_v63  ;;  %v4024_v52 = vld [vmem:[#allocation9 + $0x78] sm:$0xff] }
 0x84b   :  { %3490 = vmatpush1.bf16.msra.mxu0 %v8688_v37  ;;  %3533 = vmatpush1.bf16.msra.mxu1 %v8690_v20  ;;  %v8755_v37 = vcombine.high %v2720_v58, %v2724_v63  ;;  %v2727_v20 = vld [vmem:[#allocation7 + $0x310] sm:$0xff]  ;;  %v4021_v63 = vld [vmem:[#allocation9 + $0x60] sm:$0xff] }
 0x84c   :  { %3491 = vmatprep.subr.bf16.mxu0 %v8697_v0  ;;  %3534 = vmatprep.subr.bf16.mxu1 %v8699_v57  ;;  %v2731_v0 = vld [vmem:[#allocation7 + $0x330] sm:$0xff]  ;;  %v2728_v57 = vld [vmem:[#allocation7 + $0x318] sm:$0xff] }
 0x84d   :  { %v8761_v53 = vcombine.high %v2727_v20, %v2731_v0  ;;  %v8760_v62 = vcombine.low %v2727_v20, %v2731_v0  ;;  %v8762_v3 = vcombine.low %v2728_v57, %v2732_v49  ;;  %v4025_v0 = vld [vmem:[#allocation9 + $0x80] sm:$0xff] }
 0x84f   :  { %3492 = vmatpush1.bf16.msra.mxu0 %v8696_v18  ;;  %3535 = vmatpush1.bf16.msra.mxu1 %v8698_v54  ;;  %v8763_v18 = vcombine.high %v2728_v57, %v2732_v49  ;;  %v2735_v54 = vld [vmem:[#allocation7 + $0x350] sm:$0xff]  ;;  %v4030_v49 = vld [vmem:[#allocation9 + $0xa8] sm:$0xff] }
 0x850   :  { %3493 = vmatprep.subr.bf16.mxu0 %v8705_v59  ;;  %3536 = vmatprep.subr.bf16.mxu1 %v8707_v60  ;;  %v2739_v59 = vld [vmem:[#allocation7 + $0x370] sm:$0xff]  ;;  %v2736_v60 = vld [vmem:[#allocation7 + $0x358] sm:$0xff] }
 0x851   :  { %v8769_v4 = vcombine.high %v2735_v54, %v2739_v59  ;;  %v8768_v35 = vcombine.low %v2735_v54, %v2739_v59  ;;  %v8770_v38 = vcombine.low %v2736_v60, %v2740_v61  ;;  %v4027_v57 = vld [vmem:[#allocation9 + $0x90] sm:$0xff]  ;;  %v4034_v59 = vld [vmem:[#allocation9 + $0xc8] sm:$0xff] }
 0x852   :  { %v4031_v54 = vld [vmem:[#allocation9 + $0xb0] sm:$0xff] }
 0x853   :  { %3494 = vmatpush1.bf16.msra.mxu0 %v8704_v8  ;;  %3537 = vmatpush1.bf16.msra.mxu1 %v8706_v15  ;;  %v8771_v8 = vcombine.high %v2736_v60, %v2740_v61  ;;  %v2743_v15 = vld [vmem:[#allocation7 + $0x390] sm:$0xff]  ;;  %v4036_v60 = vld [vmem:[#allocation9 + $0xd8] sm:$0xff] }
 0x854   :  { %3495 = vmatprep.subr.bf16.mxu0 %v8713_v19  ;;  %3538 = vmatprep.subr.bf16.mxu1 %v8715_v22  ;;  %v2747_v19 = vld [vmem:[#allocation7 + $0x3b0] sm:$0xff]  ;;  %v2744_v22 = vld [vmem:[#allocation7 + $0x398] sm:$0xff] }
 0x855   :  { %v8777_v11 = vcombine.high %v2743_v15, %v2747_v19  ;;  %v8776_v56 = vcombine.low %v2743_v15, %v2747_v19  ;;  %v8778_v1 = vcombine.low %v2744_v22, %v2748_v34  ;;  %v4040_v15 = vld [vmem:[#allocation9 + $0xf8] sm:$0xff] }
 0x857   :  { %3496 = vmatpush1.bf16.msra.mxu0 %v8712_v25  ;;  %3539 = vmatpush1.bf16.msra.mxu1 %v8714_v30  ;;  %v8779_v25 = vcombine.high %v2744_v22, %v2748_v34  ;;  %v2751_v30 = vld [vmem:[#allocation7 + $0x3d0] sm:$0xff]  ;;  %v4037_v34 = vld [vmem:[#allocation9 + $0xe0] sm:$0xff] }
 0x858   :  { %3497 = vmatprep.subr.bf16.mxu0 %v8721_v42  ;;  %3540 = vmatprep.subr.bf16.mxu1 %v8723_v43  ;;  %v2755_v42 = vld [vmem:[#allocation7 + $0x3f0] sm:$0xff]  ;;  %v2752_v43 = vld [vmem:[#allocation7 + $0x3d8] sm:$0xff] }
 0x859   :  { %v8785_v2 = vcombine.high %v2751_v30, %v2755_v42 }
 0x85b   :  { %3498 = vmatpush1.bf16.msra.mxu0 %v8720_v9  ;;  %3541 = vmatpush1.bf16.msra.mxu1 %v8722_v7  ;;  %v8787_v9 = vcombine.high %v2752_v43, %v2756_v55  ;;  %v8784_v7 = vcombine.low %v2751_v30, %v2755_v42  ;;  %v4044_v30 = vld [vmem:[#allocation9 + $0x118] sm:$0xff] }
 0x85c   :  { %3499 = vmatprep.subr.bf16.mxu0 %v8729_v16  ;;  %3542 = vmatprep.subr.bf16.mxu1 %v8731_v28  ;;  %v8786_v16 = vcombine.low %v2752_v43, %v2756_v55  ;;  %v4010_v28 = vld [vmem:[#allocation9 + $0x8] sm:$0xff] }
 0x85d   :  { %v11343_v6 = vpack.c.bf16 %v4012_v14, %v4010_v28  ;;  %v4041_v14 = vld [vmem:[#allocation9 + $0x100] sm:$0xff] }
 0x85f   :  { %3500 = vmatpush1.bf16.msra.mxu0 %v8728_v26  ;;  %3543 = vmatpush1.bf16.msra.mxu1 %v8730_v27  ;;  %v4014_v26 = vld [vmem:[#allocation9 + $0x28] sm:$0xff]  ;;  %v4016_v27 = vld [vmem:[#allocation9 + $0x38] sm:$0xff] }
 0x860   :  { %3501 = vmatprep.subr.bf16.mxu0 %v8737_v39  ;;  %3544 = vmatprep.subr.bf16.mxu1 %v8739_v40  ;;  %v11345_v39 = vpack.c.bf16 %v4011_v12, %v4009_v24  ;;  %v11347_v40 = vpack.c.bf16 %v4016_v27, %v4014_v26  ;;  %v4043_v24 = vld [vmem:[#allocation9 + $0x110] sm:$0xff] }
 0x861   :  { %v11393_v27 = vpack.c.bf16 %v4043_v24, %v4041_v14  ;;  %v4061_v14 = vld [vmem:[#allocation9 + $0x1a0] sm:$0xff]  ;;  %v4063_v24 = vld [vmem:[#allocation9 + $0x1b0] sm:$0xff] }
 0x863   :  { %3502 = vmatpush1.bf16.msra.mxu0 %v8736_v47  ;;  %3545 = vmatpush1.bf16.msra.mxu1 %v8738_v48  ;;  %v4017_v48 = vld [vmem:[#allocation9 + $0x40] sm:$0xff] }
 0x864   :  { %3503 = vmatprep.subr.bf16.mxu0 %v8745_v45  ;;  %3546 = vmatprep.subr.bf16.mxu1 %v8747_v51  ;;  %v4019_v45 = vld [vmem:[#allocation9 + $0x50] sm:$0xff]  ;;  %v4022_v51 = vld [vmem:[#allocation9 + $0x68] sm:$0xff] }
 0x865   :  { %v11357_v10 = vpack.c.bf16 %v4019_v45, %v4017_v48  ;;  %v11360_v58 = vpack.c.bf16 %v4024_v52, %v4022_v51  ;;  %v3569_v48 = vld [vmem:[%s12934_s12] sm:$0xff]  ;;  %v3570_v45 = vld [vmem:[%s12934_s12 + $0x8] sm:$0xff]  ;;  %v3571_v51 = vld [vmem:[%s12934_s12 + $0x10] sm:$0xff] }
 0x866   :  { %v3572_v52 = vld [vmem:[%s12934_s12 + $0x18] sm:$0xff] }
 0x867   :  { %3504 = vmatpush1.bf16.msra.mxu0 %v8744_v5  ;;  %3547 = vmatpush1.bf16.msra.mxu1 %v8746_v31  ;;  %v4023_v5 = vld [vmem:[#allocation9 + $0x70] sm:$0xff]  ;;  %v4026_v31 = vld [vmem:[#allocation9 + $0x88] sm:$0xff] }
 0x868   :  { %3505 = vmatprep.subr.bf16.mxu0 %v8753_v36  ;;  %3548 = vmatprep.subr.bf16.mxu1 %v8755_v37  ;;  %v4028_v36 = vld [vmem:[#allocation9 + $0x98] sm:$0xff]  ;;  %v11363_v37 = vpack.c.bf16 %v4023_v5, %v4021_v63 }
 0x869   :  { %v11366_v20 = vpack.c.bf16 %v4028_v36, %v4026_v31 }
 0x86b   :  { %3506 = vmatpush1.bf16.msra.mxu0 %v8752_v21  ;;  %3549 = vmatpush1.bf16.msra.mxu1 %v8754_v50  ;;  %v4032_v21 = vld [vmem:[#allocation9 + $0xb8] sm:$0xff]  ;;  %v11369_v50 = vpack.c.bf16 %v4027_v57, %v4025_v0 }
 0x86c   :  { %3507 = vmatprep.subr.bf16.mxu0 %v8761_v53  ;;  %3550 = vmatprep.subr.bf16.mxu1 %v8763_v18  ;;  %v11372_v53 = vpack.c.bf16 %v4032_v21, %v4030_v49  ;;  %v4029_v18 = vld [vmem:[#allocation9 + $0xa0] sm:$0xff] }
 0x86d   :  { %v11375_v61 = vpack.c.bf16 %v4031_v54, %v4029_v18 }
 0x86f   :  { %3508 = vmatpush1.bf16.msra.mxu0 %v8760_v62  ;;  %3551 = vmatpush1.bf16.msra.mxu1 %v8762_v3  ;;  %v11378_v62 = vpack.c.bf16 %v4036_v60, %v4034_v59  ;;  %v4033_v3 = vld [vmem:[#allocation9 + $0xc0] sm:$0xff] }
 0x870   :  { %3509 = vmatprep.subr.bf16.mxu0 %v8769_v4  ;;  %3552 = vmatprep.subr.bf16.mxu1 %v8771_v8  ;;  %v4035_v4 = vld [vmem:[#allocation9 + $0xd0] sm:$0xff]  ;;  %v4038_v8 = vld [vmem:[#allocation9 + $0xe8] sm:$0xff] }
 0x871   :  { %v11381_v19 = vpack.c.bf16 %v4035_v4, %v4033_v3  ;;  %v11384_v22 = vpack.c.bf16 %v4040_v15, %v4038_v8  ;;  %v8800_v3 = vld [vmem:[%s12934_s12 + $0x40] sm:$0xff]  ;;  %v8801_v4 = vld [vmem:[%s12934_s12 + $0x48] sm:$0xff]  ;;  %v8802_v8 = vld [vmem:[%s12934_s12 + $0x50] sm:$0xff] }
 0x872   :  { %v8803_v15 = vld [vmem:[%s12934_s12 + $0x58] sm:$0xff] }
 0x873   :  { %3510 = vmatpush1.bf16.msra.mxu0 %v8768_v35  ;;  %3553 = vmatpush1.bf16.msra.mxu1 %v8770_v38  ;;  %v4039_v35 = vld [vmem:[#allocation9 + $0xf0] sm:$0xff] }
 0x874   :  { %3511 = vmatprep.subr.bf16.mxu0 %v8777_v11  ;;  %3554 = vmatprep.subr.bf16.mxu1 %v8779_v25  ;;  %v4042_v25 = vld [vmem:[#allocation9 + $0x108] sm:$0xff] }
 0x875   :  { %v11390_v28 = vpack.c.bf16 %v4044_v30, %v4042_v25  ;;  %v4053_v25 = vld [vmem:[#allocation9 + $0x160] sm:$0xff]  ;;  %v4055_v30 = vld [vmem:[#allocation9 + $0x170] sm:$0xff] }
 0x877   :  { %3512 = vmatpush1.bf16.msra.mxu0 %v8776_v56  ;;  %3555 = vmatpush1.bf16.msra.mxu1 %v8778_v1  ;;  %v11387_v1 = vpack.c.bf16 %v4039_v35, %v4037_v34  ;;  %v8809_v34 = vld [vmem:[%s12934_s12 + $0x68] sm:$0xff]  ;;  %v8810_v35 = vld [vmem:[%s12934_s12 + $0x70] sm:$0xff] }
 0x878   :  { %3513 = vmatprep.subr.bf16.mxu0 %v8785_v2  ;;  %3556 = vmatprep.subr.bf16.mxu1 %v8787_v9 }
 0x87b   :  { %3514 = vmatpush1.bf16.msra.mxu0 %v8784_v7  ;;  %3557 = vmatpush1.bf16.msra.mxu1 %v8786_v16 }
 0x87c   :  { %9513 = vmatprep.subr.bf16.mxu1 %v11343_v6 }
 0x87e   :  { %3516 = vmatmul.mubr.bf16.vlgmr.msra.gmra.mrb[32].mxu0 %v11336_v17  ;;  %3559 = vmatmul.mubr.bf16.vlgmr.msra.gmra.mrb[24].mxu1 %v11336_v17  ;;  %v4020_v17 = vld [vmem:[#allocation9 + $0x58] sm:$0xff] }
 0x87f   :  { %3655 = vmatprep.mubr.f32.mxu0 %v12956_v23  ;;  %9515 = vmatpush1.bf16.msra.mxu1 %v11345_v39  ;;  %v11354_v47 = vpack.c.bf16 %v4020_v17, %v4018_v44  ;;  %v8790_v44 = vld [vmem:[%s12934_s12 + $0x30] sm:$0xff]  ;;  %v8791_v17 = vld [vmem:[%s12934_s12 + $0x38] sm:$0xff] }
 0x880   :  { %9517 = vmatprep.subr.bf16.mxu1 %v11347_v40 }
 0x883   :  { %9519 = vmatpush1.bf16.msra.mxu1 %v11351_v46 }
 0x884   :  { %9521 = vmatprep.subr.bf16.mxu1 %v11354_v47 }
 0x887   :  { %9523 = vmatpush1.bf16.msra.mxu1 %v11357_v10 }
 0x888   :  { %9525 = vmatprep.subr.bf16.mxu1 %v11360_v58 }
 0x88b   :  { %9527 = vmatpush1.bf16.msra.mxu1 %v11363_v37 }
 0x88c   :  { %9529 = vmatprep.subr.bf16.mxu1 %v11366_v20 }
 0x88f   :  { %9531 = vmatpush1.bf16.msra.mxu1 %v11369_v50 }
 0x890   :  { %9533 = vmatprep.subr.bf16.mxu1 %v11372_v53 }
 0x893   :  { %9535 = vmatpush1.bf16.msra.mxu1 %v11375_v61 }
 0x894   :  { %9537 = vmatprep.subr.bf16.mxu1 %v11378_v62 }
 0x897   :  { %9539 = vmatpush1.bf16.msra.mxu1 %v11381_v19 }
 0x898   :  { %9541 = vmatprep.subr.bf16.mxu1 %v11384_v22 }
 0x89b   :  { %9543 = vmatpush1.bf16.msra.mxu1 %v11387_v1 }
 0x89c   :  { %9545 = vmatprep.subr.bf16.mxu1 %v11390_v28 }
 0x89f   :  { %9547 = vmatpush1.bf16.msra.mxu1 %v11393_v27 }
 0x911   :  { %v3431_v38 = vpop.f32.mrb[28].mxu0  ;;  %v3474_v11 = vpop.f32.mrb[20].mxu1 }
 0x912   :  { %v3433_v42 = vpop.f32.mrb[29].mxu0  ;;  %v3476_v43 = vpop.f32.mrb[21].mxu1 }
 0x913   :  { %v3435_v55 = vpop.f32.mrb[30].mxu0  ;;  %v3478_v56 = vpop.f32.mrb[22].mxu1 }
 0x914   :  { %v9502_v2 = vpack.c.bf16 %v3435_v55, %v3431_v38  ;;  %v9498_v9 = vpack.c.bf16 %v3478_v56, %v3474_v11  ;;  %v3437_v7 = vpop.f32.mrb[31].mxu0  ;;  %v3480_v16 = vpop.f32.mrb[23].mxu1  ;;  %v4056_v38 = vld [vmem:[#allocation9 + $0x178] sm:$0xff] }
 0x915   :  { %v9500_v12 = vpack.c.bf16 %v3437_v7, %v3433_v42  ;;  %v9496_v26 = vpack.c.bf16 %v3480_v16, %v3476_v43  ;;  %v9558_v42 = vpack.c.bf16 %v4055_v30, %v4053_v25  ;;  %v4058_v43 = vld [vmem:[#allocation9 + $0x188] sm:$0xff]  ;;  %v4060_v55 = vld [vmem:[#allocation9 + $0x198] sm:$0xff]  ;;  %v4360_v25 = vld [vmem:[#allocation10 + $0x60] sm:$0xff] }
 0x916   :  { %v9560_v56 = vpack.c.bf16 %v4060_v55, %v4058_v43  ;;  %v4062_v7 = vld [vmem:[#allocation9 + $0x1a8] sm:$0xff]  ;;  %v4064_v16 = vld [vmem:[#allocation9 + $0x1b8] sm:$0xff] }
 0x917   :  { %9497 = vmatprep.subr.bf16.mxu0 %v9496_v26  ;;  %v4066_v26 = vld [vmem:[#allocation9 + $0x1c8] sm:$0xff] }
 0x918   :  { %9499 = vmatpush1.bf16.msra.mxu0 %v9498_v9 }
 0x919   :  { %9501 = vmatprep.subr.bf16.mxu0 %v9500_v12  ;;  %v9566_v12 = vpack.c.bf16 %v4063_v24, %v4061_v14  ;;  %v4380_v24 = vld [vmem:[#allocation10 + $0x100] sm:$0xff] }
 0x91b   :  { %8792 = vmatmul.mubr.msk.f32.vlgmr.msra.gmra.mrb[36].mxu0 %vm3578_vm5, %v8788_v29 }
 0x91c   :  { %9503 = vmatpush1.bf16.msra.mxu0 %v9502_v2  ;;  %3661 = vmatprep.mubr.f32.mxu0 %v12956_v23  ;;  %v4059_v2 = vld [vmem:[#allocation9 + $0x190] sm:$0xff] }
 0x91f   :  { %8793 = vmatmul.mubr.msk.f32.gmra.mrb[38].mxu0 %vm3578_vm5, %v8789_v33  ;;  %v4065_v33 = vld [vmem:[#allocation9 + $0x1c0] sm:$0xff] }
 0x920   :  { %3667 = vmatprep.mubr.f32.mxu0 %v12956_v23 }
 0x923   :  { %8794 = vmatmul.mubr.msk.f32.gmra.mrb[40].mxu0 %vm3578_vm5, %v8790_v44  ;;  %v4067_v44 = vld [vmem:[#allocation9 + $0x1d0] sm:$0xff] }
 0x924   :  { %3673 = vmatprep.mubr.f32.mxu0 %v12956_v23 }
 0x927   :  { %8795 = vmatmul.mubr.msk.f32.gmra.mrb[42].mxu0 %vm3578_vm5, %v8791_v17  ;;  %v9570_v17 = vpack.c.bf16 %v4067_v44, %v4065_v33  ;;  %v4392_v33 = vld [vmem:[#allocation10 + $0x160] sm:$0xff] }
 0x928   :  { %3756 = vmatprep.mubr.f32.mxu0 %v12956_v23 }
 0x92b   :  { %8796 = vmatmul.mubr.msk.f32.vlgmr.msra.gmra.mrb[36].mxu0 %vm3578_vm5, %v3569_v48  ;;  %v4070_v48 = vld [vmem:[#allocation9 + $0x1e8] sm:$0xff] }
 0x92c   :  { %3762 = vmatprep.mubr.f32.mxu0 %v12956_v23 }
 0x92f   :  { %8797 = vmatmul.mubr.msk.f32.gmra.mrb[38].mxu0 %vm3578_vm5, %v3570_v45  ;;  %v4072_v45 = vld [vmem:[#allocation9 + $0x1f8] sm:$0xff] }
 0x930   :  { %3768 = vmatprep.mubr.f32.mxu0 %v12956_v23 }
 0x933   :  { %8798 = vmatmul.mubr.msk.f32.gmra.mrb[40].mxu0 %vm3578_vm5, %v3571_v51  ;;  %v9572_v51 = vpack.c.bf16 %v4072_v45, %v4070_v48  ;;  %v4396_v48 = vld [vmem:[#allocation10 + $0x180] sm:$0xff] }
 0x934   :  { %3774 = vmatprep.mubr.f32.mxu0 %v12956_v23  ;;  %v4400_v45 = vld [vmem:[#allocation10 + $0x1a0] sm:$0xff] }
 0x937   :  { %8799 = vmatmul.mubr.msk.f32.gmra.mrb[42].mxu0 %vm3578_vm5, %v3572_v52  ;;  %v4069_v52 = vld [vmem:[#allocation9 + $0x1e0] sm:$0xff] }
 0x938   :  { %3862 = vmatprep.mubr.f32.mxu0 %v12956_v23 }
 0x951   :  { %v3517_v63 = vpop.f32.mrb[32].mxu0  ;;  %v3560_v5 = vpop.f32.mrb[24].mxu1 }
 0x952   :  { %v3519_v31 = vpop.f32.mrb[33].mxu0  ;;  %v3562_v36 = vpop.f32.mrb[25].mxu1 }
 0x953   :  { %v3521_v0 = vpop.f32.mrb[34].mxu0  ;;  %v3564_v57 = vpop.f32.mrb[26].mxu1 }
 0x954   :  { %v9506_v49 = vpack.c.bf16 %v3521_v0, %v3517_v63  ;;  %v9510_v21 = vpack.c.bf16 %v3564_v57, %v3560_v5  ;;  %v3523_v18 = vpop.f32.mrb[35].mxu0  ;;  %v3566_v54 = vpop.f32.mrb[27].mxu1  ;;  %v4071_v63 = vld [vmem:[#allocation9 + $0x1f0] sm:$0xff] }
 0x955   :  { %v9504_v59 = vpack.c.bf16 %v3523_v18, %v3519_v31  ;;  %v9508_v60 = vpack.c.bf16 %v3566_v54, %v3562_v36  ;;  %v9574_v5 = vpack.c.bf16 %v4071_v63, %v4069_v52  ;;  %v8864_v52 = vcombine.low %v4396_v48, %v4400_v45  ;;  %v4404_v63 = vld [vmem:[#allocation10 + $0x1c0] sm:$0xff] }
 0x957   :  { %9505 = vmatprep.subr.bf16.mxu0 %v9504_v59 }
 0x958   :  { %9507 = vmatpush1.bf16.msra.mxu0 %v9506_v49 }
 0x959   :  { %9509 = vmatprep.subr.bf16.mxu0 %v9508_v60 }
 0x95b   :  { %8804 = vmatmul.mubr.msk.f32.vlgmr.msra.gmra.mrb[36].mxu0 %vm3578_vm5, %v8800_v3 }
 0x95c   :  { %9511 = vmatpush1.bf16.msra.mxu0 %v9510_v21  ;;  %3868 = vmatprep.mubr.f32.mxu0 %v12956_v23 }
 0x95d   :  { %9577 = vmatprep.subr.bf16.mxu0 %v11343_v6  ;;  %v8808_v6 = vld [vmem:[%s12934_s12 + $0x60] sm:$0xff] }
 0x95f   :  { %8805 = vmatmul.mubr.msk.f32.gmra.mrb[38].mxu0 %vm3578_vm5, %v8801_v4 }
 0x960   :  { %3874 = vmatprep.mubr.f32.mxu0 %v12956_v23 }
 0x963   :  { %8806 = vmatmul.mubr.msk.f32.gmra.mrb[40].mxu0 %vm3578_vm5, %v8802_v8 }
 0x964   :  { %3880 = vmatprep.mubr.f32.mxu0 %v12956_v23 }
 0x967   :  { %8807 = vmatmul.mubr.msk.f32.gmra.mrb[42].mxu0 %vm3578_vm5, %v8803_v15 }
 0x968   :  { %3976 = vmatprep.mubr.f32.mxu0 %v12956_v23 }
 0x96b   :  { %8812 = vmatmul.mubr.msk.f32.vlgmr.msra.gmra.mrb[36].mxu0 %vm3578_vm5, %v8808_v6 }
 0x96c   :  { %3982 = vmatprep.mubr.f32.mxu0 %v12956_v23  ;;  %9579 = vmatpush1.bf16.msra.mxu0 %v11345_v39  ;;  %v8811_v39 = vld [vmem:[%s12934_s12 + $0x78] sm:$0xff] }
 0x96d   :  { %9581 = vmatprep.subr.bf16.mxu0 %v11347_v40  ;;  %v4046_v40 = vld [vmem:[#allocation9 + $0x128] sm:$0xff] }
 0x96f   :  { %8813 = vmatmul.mubr.msk.f32.gmra.mrb[38].mxu0 %vm3578_vm5, %v8809_v34 }
 0x970   :  { %3988 = vmatprep.mubr.f32.mxu0 %v12956_v23  ;;  %9583 = vmatpush1.bf16.msra.mxu0 %v11351_v46  ;;  %v4048_v46 = vld [vmem:[#allocation9 + $0x138] sm:$0xff] }
 0x971   :  { %9585 = vmatprep.subr.bf16.mxu0 %v11354_v47  ;;  %v9548_v47 = vpack.c.bf16 %v4048_v46, %v4046_v40 }
 0x973   :  { %8814 = vmatmul.mubr.msk.f32.gmra.mrb[40].mxu0 %vm3578_vm5, %v8810_v35  ;;  %9549 = vmatprep.subr.bf16.mxu1 %v9548_v47 }
 0x974   :  { %3994 = vmatprep.mubr.f32.mxu0 %v12956_v23  ;;  %9587 = vmatpush1.bf16.msra.mxu0 %v11357_v10  ;;  %v4045_v10 = vld [vmem:[#allocation9 + $0x120] sm:$0xff] }
 0x975   :  { %9589 = vmatprep.subr.bf16.mxu0 %v11360_v58  ;;  %v4047_v58 = vld [vmem:[#allocation9 + $0x130] sm:$0xff] }
 0x977   :  { %8815 = vmatmul.mubr.msk.f32.gmra.mrb[42].mxu0 %vm3578_vm5, %v8811_v39 }
 0x978   :  { %9591 = vmatpush1.bf16.msra.mxu0 %v11363_v37  ;;  %v9550_v37 = vpack.c.bf16 %v4047_v58, %v4045_v10 }
 0x979   :  { %9593 = vmatprep.subr.bf16.mxu0 %v11366_v20  ;;  %v4050_v20 = vld [vmem:[#allocation9 + $0x148] sm:$0xff] }
 0x97a   :  { %9551 = vmatpush1.bf16.msra.mxu1 %v9550_v37 }
 0x97c   :  { %9595 = vmatpush1.bf16.msra.mxu0 %v11369_v50  ;;  %v4052_v50 = vld [vmem:[#allocation9 + $0x158] sm:$0xff] }
 0x97d   :  { %9597 = vmatprep.subr.bf16.mxu0 %v11372_v53  ;;  %v9552_v53 = vpack.c.bf16 %v4052_v50, %v4050_v20 }
 0x97f   :  { %9553 = vmatprep.subr.bf16.mxu1 %v9552_v53 }
 0x980   :  { %9599 = vmatpush1.bf16.msra.mxu0 %v11375_v61  ;;  %v4049_v61 = vld [vmem:[#allocation9 + $0x140] sm:$0xff] }
 0x981   :  { %9601 = vmatprep.subr.bf16.mxu0 %v11378_v62  ;;  %v4051_v62 = vld [vmem:[#allocation9 + $0x150] sm:$0xff] }
 0x984   :  { %9603 = vmatpush1.bf16.msra.mxu0 %v11381_v19  ;;  %v9554_v19 = vpack.c.bf16 %v4051_v62, %v4049_v61  ;;  %v4352_v61 = vld [vmem:[#allocation10 + $0x20] sm:$0xff]  ;;  %v11518_v62 = vld [vmem:[#allocation10 + $0x8] sm:$0xff] }
 0x985   :  { %9605 = vmatprep.subr.bf16.mxu0 %v11384_v22  ;;  %v4054_v22 = vld [vmem:[#allocation9 + $0x168] sm:$0xff] }
 0x986   :  { %9555 = vmatpush1.bf16.msra.mxu1 %v9554_v19  ;;  %v9556_v11 = vpack.c.bf16 %v4056_v38, %v4054_v22  ;;  %v11520_v38 = vld [vmem:[#allocation10 + $0x28] sm:$0xff] }
 0x987   :  { %v8818_v30 = vcombine.low %v11518_v62, %v11520_v38 }
 0x988   :  { %9607 = vmatpush1.bf16.msra.mxu0 %v11387_v1  ;;  %9557 = vmatprep.subr.bf16.mxu1 %v9556_v11  ;;  %v4057_v1 = vld [vmem:[#allocation9 + $0x180] sm:$0xff] }
 0x989   :  { %9609 = vmatprep.subr.bf16.mxu0 %v11390_v28  ;;  %v9562_v9 = vpack.c.bf16 %v4059_v2, %v4057_v1  ;;  %v9564_v28 = vpack.c.bf16 %v4064_v16, %v4062_v7  ;;  %v4368_v1 = vld [vmem:[#allocation10 + $0xa0] sm:$0xff] }
 0x98a   :  { %9559 = vmatpush1.bf16.msra.mxu1 %v9558_v42  ;;  %v4372_v7 = vld [vmem:[#allocation10 + $0xc0] sm:$0xff] }
 0x98b   :  { %9561 = vmatprep.subr.bf16.mxu1 %v9560_v56  ;;  %v4376_v16 = vld [vmem:[#allocation10 + $0xe0] sm:$0xff] }
 0x98c   :  { %9611 = vmatpush1.bf16.msra.mxu0 %v11393_v27  ;;  %v4068_v27 = vld [vmem:[#allocation9 + $0x1d8] sm:$0xff]  ;;  %v8840_v14 = vcombine.low %v4372_v7, %v4376_v16 }
 0x98d   :  { %9613 = vmatprep.subr.bf16.mxu0 %v9548_v47  ;;  %v9568_v29 = vpack.c.bf16 %v4068_v27, %v4066_v26 }
 0x98e   :  { %9563 = vmatpush1.bf16.msra.mxu1 %v9562_v9 }
 0x98f   :  { %9565 = vmatprep.subr.bf16.mxu1 %v9564_v28 }
 0x990   :  { %9615 = vmatpush1.bf16.msra.mxu0 %v9550_v37 }
 0x991   :  { %9617 = vmatprep.subr.bf16.mxu0 %v9552_v53  ;;  %v4348_v53 = vld [vmem:[#allocation10] sm:$0xff] }
 0x992   :  { %9567 = vmatpush1.bf16.msra.mxu1 %v9566_v12  ;;  %v8817_v22 = vcombine.high %v4348_v53, %v4352_v61 }
 0x993   :  { %9569 = vmatprep.subr.bf16.mxu1 %v9568_v29 }
 0x994   :  { %9619 = vmatpush1.bf16.msra.mxu0 %v9554_v19  ;;  %v8816_v19 = vcombine.low %v4348_v53, %v4352_v61 }
 0x995   :  { %9621 = vmatprep.subr.bf16.mxu0 %v9556_v11  ;;  %v4356_v11 = vld [vmem:[#allocation10 + $0x40] sm:$0xff] }
 0x996   :  { %9571 = vmatpush1.bf16.msra.mxu1 %v9570_v17  ;;  %v8825_v43 = vcombine.high %v4356_v11, %v4360_v25  ;;  %v8824_v55 = vcombine.low %v4356_v11, %v4360_v25 }
 0x997   :  { %9573 = vmatprep.subr.bf16.mxu1 %v9572_v51 }
 0x998   :  { %9623 = vmatpush1.bf16.msra.mxu0 %v9558_v42  ;;  %v8819_v42 = vcombine.high %v11518_v62, %v11520_v38 }
 0x999   :  { %9625 = vmatprep.subr.bf16.mxu0 %v9560_v56  ;;  %v4364_v56 = vld [vmem:[#allocation10 + $0x80] sm:$0xff] }
 0x99a   :  { %9575 = vmatpush1.bf16.msra.mxu1 %v9574_v5  ;;  %v8833_v2 = vcombine.high %v4364_v56, %v4368_v1 }
 0x99b   :  { %5116 = vmatprep.subr.bf16.mxu1 %v8817_v22 }
 0x99c   :  { %9627 = vmatpush1.bf16.msra.mxu0 %v9562_v9  ;;  %v8832_v9 = vcombine.low %v4364_v56, %v4368_v1 }
 0x99d   :  { %9629 = vmatprep.subr.bf16.mxu0 %v9564_v28  ;;  %v8841_v28 = vcombine.high %v4372_v7, %v4376_v16  ;;  %v4361_v7 = vld [vmem:[#allocation10 + $0x68] sm:$0xff] }
 0x9a0   :  { %9631 = vmatpush1.bf16.msra.mxu0 %v9566_v12  ;;  %v4384_v12 = vld [vmem:[#allocation10 + $0x120] sm:$0xff] }
 0x9a1   :  { %9633 = vmatprep.subr.bf16.mxu0 %v9568_v29  ;;  %v8849_v26 = vcombine.high %v4380_v24, %v4384_v12  ;;  %v8848_v27 = vcombine.low %v4380_v24, %v4384_v12  ;;  %v4388_v29 = vld [vmem:[#allocation10 + $0x140] sm:$0xff]  ;;  %v4365_v24 = vld [vmem:[#allocation10 + $0x88] sm:$0xff] }
 0x9a2   :  { %v8857_v44 = vcombine.high %v4388_v29, %v4392_v33  ;;  %v4369_v12 = vld [vmem:[#allocation10 + $0xa8] sm:$0xff] }
 0x9a4   :  { %9635 = vmatpush1.bf16.msra.mxu0 %v9570_v17  ;;  %v8856_v17 = vcombine.low %v4388_v29, %v4392_v33  ;;  %v4373_v29 = vld [vmem:[#allocation10 + $0xc8] sm:$0xff] }
 0x9a5   :  { %9637 = vmatprep.subr.bf16.mxu0 %v9572_v51  ;;  %v8865_v51 = vcombine.high %v4396_v48, %v4400_v45  ;;  %v4377_v33 = vld [vmem:[#allocation10 + $0xe8] sm:$0xff] }
 0x9a6   :  { %v4381_v48 = vld [vmem:[#allocation10 + $0x108] sm:$0xff] }
 0x9a7   :  { %v4385_v45 = vld [vmem:[#allocation10 + $0x128] sm:$0xff] }
 0x9a8   :  { %9639 = vmatpush1.bf16.msra.mxu0 %v9574_v5  ;;  %v4408_v5 = vld [vmem:[#allocation10 + $0x1e0] sm:$0xff]  ;;  %v8850_v62 = vcombine.low %v4381_v48, %v4385_v45 }
 0x9a9   :  { %5169 = vmatprep.subr.bf16.mxu0 %v8819_v42 }
 0xa3e   :  { %v11494_v31 = vpop.f32.mrb[36].mxu0 }
 0xa3f   :  { %v11496_v36 = vpop.f32.mrb[37].mxu0 }
 0xa42   :  { %v11498_v0 = vpop.f32.mrb[38].mxu0 }
 0xa43   :  { %v4073_v57 = vadd.f32 %v11498_v0, %v11494_v31  ;;  %v11502_v49 = vpop.f32.mrb[39].mxu0 }
 0xa44   :  { %v4082_v21 = vadd.f32 %v11502_v49, %v11496_v36 }
 0xa46   :  { %v11506_v18 = vpop.f32.mrb[40].mxu0 }
 0xa47   :  { %v4074_v54 = vadd.f32 %v4073_v57, %v11506_v18  ;;  %v11509_v59 = vpop.f32.mrb[41].mxu0  ;;  %v8873_v57 = vcombine.high %v4404_v63, %v4408_v5 }
 0xa48   :  { %v4083_v60 = vadd.f32 %v4082_v21, %v11509_v59  ;;  %v8872_v21 = vcombine.low %v4404_v63, %v4408_v5  ;;  %v4389_v63 = vld [vmem:[#allocation10 + $0x148] sm:$0xff] }
 0xa49   :  { %v4393_v5 = vld [vmem:[#allocation10 + $0x168] sm:$0xff] }
 0xa4a   :  { %v11512_v3 = vpop.f32.mrb[42].mxu0  ;;  %v8859_v38 = vcombine.high %v4389_v63, %v4393_v5 }
 0xa4b   :  { %v4075_v4 = vadd.f32 %v4074_v54, %v11512_v3  ;;  %v11515_v8 = vpop.f32.mrb[43].mxu0 }
 0xa4c   :  { %v4084_v15 = vadd.f32 %v4083_v60, %v11515_v8 }
 0xa4d   :  { %v4076_v6 = vrot.slane %v4075_v4, 4 }
 0xa4e   :  { %v4085_v34 = vrot.slane %v4084_v15, 4 }
 0xa4f   :  { %v4077_v35 = vadd.f32 %v4076_v6, %v4075_v4 }
 0xa50   :  { %v4086_v39 = vadd.f32 %v4085_v34, %v4084_v15 }
 0xa51   :  { %v4078_v40 = vrot.slane %v4077_v35, 2 }
 0xa52   :  { %v4087_v46 = vrot.slane %v4086_v39, 2 }
 0xa53   :  { %v4079_v47 = vadd.f32 %v4078_v40, %v4077_v35 }
 0xa54   :  { %v4088_v10 = vadd.f32 %v4087_v46, %v4086_v39 }
 0xa55   :  { %v4080_v58 = vrot.slane %v4079_v47, 1 }
 0xa56   :  { %v4089_v37 = vrot.slane %v4088_v10, 1 }
 0xa57   :  { %v4081_v50 = vadd.f32 %v4080_v58, %v4079_v47 }
 0xa58   :  { %v4090_v20 = vadd.f32 %v4089_v37, %v4088_v10 }
 0xa5a   :  { %4155 = vmatprep.mubr.f32.mxu1 %v4090_v20 }
 0xa5b   :  { %4156 = vmatmul.mubr.f32.vlgmr.msra.gmra.mrb[18].mxu1 %v4081_v50 }
 0xa5c   :  { %5117 = vmatpush1.bf16.msra.mxu1 %v8816_v19 }
 0xa5d   :  { %5118 = vmatprep.subr.bf16.mxu1 %v8825_v43 }
 0xa60   :  { %5119 = vmatpush1.bf16.msra.mxu1 %v8824_v55 }
 0xa61   :  { %5120 = vmatprep.subr.bf16.mxu1 %v8833_v2 }
 0xa64   :  { %5121 = vmatpush1.bf16.msra.mxu1 %v8832_v9  ;;  %v4357_v9 = vld [vmem:[#allocation10 + $0x48] sm:$0xff] }
 0xa65   :  { %5122 = vmatprep.subr.bf16.mxu1 %v8841_v28 }
 0xa68   :  { %5123 = vmatpush1.bf16.msra.mxu1 %v8840_v14  ;;  %v8827_v14 = vcombine.high %v4357_v9, %v4361_v7 }
 0xa69   :  { %5124 = vmatprep.subr.bf16.mxu1 %v8849_v26  ;;  %v8826_v26 = vcombine.low %v4357_v9, %v4361_v7 }
 0xa6c   :  { %5125 = vmatpush1.bf16.msra.mxu1 %v8848_v27  ;;  %v8835_v27 = vcombine.high %v4365_v24, %v4369_v12 }
 0xa6d   :  { %5126 = vmatprep.subr.bf16.mxu1 %v8857_v44  ;;  %v8834_v44 = vcombine.low %v4365_v24, %v4369_v12  ;;  %v4441_v12 = vld [vmem:[#allocation10 + $0x2e8] sm:$0xff] }
 0xa70   :  { %5127 = vmatpush1.bf16.msra.mxu1 %v8856_v17  ;;  %v8843_v17 = vcombine.high %v4373_v29, %v4377_v33 }
 0xa71   :  { %5128 = vmatprep.subr.bf16.mxu1 %v8865_v51  ;;  %v8842_v51 = vcombine.low %v4373_v29, %v4377_v33  ;;  %v4444_v33 = vld [vmem:[#allocation10 + $0x300] sm:$0xff] }
 0xa74   :  { %5129 = vmatpush1.bf16.msra.mxu1 %v8864_v52  ;;  %v8851_v52 = vcombine.high %v4381_v48, %v4385_v45  ;;  %v4449_v45 = vld [vmem:[#allocation10 + $0x328] sm:$0xff] }
 0xa75   :  { %5130 = vmatprep.subr.bf16.mxu1 %v8873_v57  ;;  %v4401_v57 = vld [vmem:[#allocation10 + $0x1a8] sm:$0xff] }
 0xa78   :  { %5131 = vmatpush1.bf16.msra.mxu1 %v8872_v21  ;;  %v8858_v21 = vcombine.low %v4389_v63, %v4393_v5  ;;  %v4452_v5 = vld [vmem:[#allocation10 + $0x340] sm:$0xff] }
 0xb2e   :  { %v4157_v54 = vpop.f32.mrb[18].mxu1 }
 0xb2f   :  { %v4165_v60 = vrot.slane %v4157_v54, %v10774_v13  ;;  %v4159_v4 = vpop.f32.mrb[19].mxu1 }
 0xb30   :  { %v4169_v15 = vrot.slane %v4159_v4, %v10774_v13  ;;  %v4409_v4 = vld [vmem:[#allocation10 + $0x1e8] sm:$0xff] }
 0xb31   :  { %v11529_v6 = vsub.f32 %v11494_v31, %v4165_v60  ;;  %v11532_v34 = vsub.f32 %v11498_v0, %v4165_v60  ;;  %v11535_v35 = vsub.f32 %v11506_v18, %v4165_v60  ;;  %v11538_v39 = vsub.f32 %v11512_v3, %v4165_v60  ;;  %v4405_v60 = vld [vmem:[#allocation10 + $0x1c8] sm:$0xff] }
 0xb32   :  { %v11541_v40 = vsub.f32 %v11496_v36, %v4169_v15  ;;  %v11544_v46 = vsub.f32 %v11502_v49, %v4169_v15  ;;  %v11547_v47 = vsub.f32 %v11509_v59, %v4169_v15  ;;  %v11550_v31 = vsub.f32 %v11515_v8, %v4169_v15 }
 0xb33   :  { %v4178_v0 = vmul.f32 %v11529_v6, %v11529_v6  ;;  %v4180_v18 = vmul.f32 %v11532_v34, %v11532_v34  ;;  %v4182_v49 = vmul.f32 %v11535_v35, %v11535_v35  ;;  %v4184_v58 = vmul.f32 %v11538_v39, %v11538_v39 }
 0xb34   :  { %v4179_v3 = vmul.f32 %v11541_v40, %v11541_v40  ;;  %v4181_v36 = vmul.f32 %v11544_v46, %v11544_v46  ;;  %v4183_v8 = vmul.f32 %v11547_v47, %v11547_v47  ;;  %v4185_v20 = vmul.f32 %v11550_v31, %v11550_v31 }
 0xb35   :  { %v4186_v59 = vadd.f32 %v4180_v18, %v4178_v0  ;;  %v8875_v0 = vcombine.high %v4405_v60, %v4409_v4  ;;  %v8874_v18 = vcombine.low %v4405_v60, %v4409_v4  ;;  %v4460_v4 = vld [vmem:[#allocation10 + $0x380] sm:$0xff] }
 0xb36   :  { %v4195_v10 = vadd.f32 %v4181_v36, %v4179_v3  ;;  %v4412_v3 = vld [vmem:[#allocation10 + $0x200] sm:$0xff] }
 0xb37   :  { %v4187_v37 = vadd.f32 %v4186_v59, %v4182_v49  ;;  %v4416_v36 = vld [vmem:[#allocation10 + $0x220] sm:$0xff]  ;;  %v4413_v49 = vld [vmem:[#allocation10 + $0x208] sm:$0xff] }
 0xb38   :  { %v4196_v50 = vadd.f32 %v4195_v10, %v4183_v8  ;;  %v8881_v59 = vcombine.high %v4412_v3, %v4416_v36  ;;  %v4417_v8 = vld [vmem:[#allocation10 + $0x228] sm:$0xff]  ;;  %v8880_v10 = vcombine.low %v4412_v3, %v4416_v36 }
 0xb39   :  { %v4188_v53 = vadd.f32 %v4187_v37, %v4184_v58  ;;  %v8882_v58 = vcombine.low %v4413_v49, %v4417_v8  ;;  %v8883_v37 = vcombine.high %v4413_v49, %v4417_v8  ;;  %v4465_v36 = vld [vmem:[#allocation10 + $0x3a8] sm:$0xff]  ;;  %v4468_v49 = vld [vmem:[#allocation10 + $0x3c0] sm:$0xff] }
 0xb3a   :  { %v4197_v61 = vadd.f32 %v4196_v50, %v4185_v20  ;;  %5132 = vmatprep.subr.bf16.mxu1 %v8881_v59  ;;  %v4420_v20 = vld [vmem:[#allocation10 + $0x240] sm:$0xff] }
 0xb3b   :  { %v4189_v19 = vrot.slane %v4188_v53, 4  ;;  %5133 = vmatpush1.bf16.msra.mxu1 %v8880_v10  ;;  %v4424_v50 = vld [vmem:[#allocation10 + $0x260] sm:$0xff] }
 0xb3c   :  { %v4198_v22 = vrot.slane %v4197_v61, 4  ;;  %v4472_v59 = vld [vmem:[#allocation10 + $0x3e0] sm:$0xff] }
 0xb3d   :  { %v4190_v11 = vadd.f32 %v4189_v19, %v4188_v53  ;;  %v4421_v53 = vld [vmem:[#allocation10 + $0x248] sm:$0xff] }
 0xb3e   :  { %v4199_v25 = vadd.f32 %v4198_v22, %v4197_v61  ;;  %v8889_v61 = vcombine.high %v4420_v20, %v4424_v50  ;;  %v4425_v19 = vld [vmem:[#allocation10 + $0x268] sm:$0xff]  ;;  %v8888_v22 = vcombine.low %v4420_v20, %v4424_v50 }
 0xb3f   :  { %v4191_v42 = vrot.slane %v4190_v11, 2  ;;  %v4473_v20 = vld [vmem:[#allocation10 + $0x3e8] sm:$0xff] }
 0xb40   :  { %v4200_v43 = vrot.slane %v4199_v25, 2  ;;  %5134 = vmatprep.subr.bf16.mxu1 %v8889_v61 }
 0xb41   :  { %v4192_v55 = vadd.f32 %v4191_v42, %v4190_v11  ;;  %v8890_v11 = vcombine.low %v4421_v53, %v4425_v19  ;;  %5135 = vmatpush1.bf16.msra.mxu1 %v8888_v22  ;;  %v4428_v42 = vld [vmem:[#allocation10 + $0x280] sm:$0xff]  ;;  %v11573_v22 = vld [vmem:[#allocation10 + $0x30] sm:$0xff] }
 0xb42   :  { %v4201_v56 = vadd.f32 %v4200_v43, %v4199_v25  ;;  %v8891_v25 = vcombine.high %v4421_v53, %v4425_v19  ;;  %v4432_v43 = vld [vmem:[#allocation10 + $0x2a0] sm:$0xff]  ;;  %v8936_v53 = vcombine.low %v4468_v49, %v4472_v59  ;;  %v11571_v19 = vld [vmem:[#allocation10 + $0x10] sm:$0xff] }
 0xb43   :  { %v4193_v1 = vrot.slane %v4192_v55, 1 }
 0xb44   :  { %v4202_v2 = vrot.slane %v4201_v56, 1 }
 0xb45   :  { %v4194_v28 = vadd.f32 %v4193_v1, %v4192_v55  ;;  %v4429_v55 = vld [vmem:[#allocation10 + $0x288] sm:$0xff] }
 0xb46   :  { %v4203_v16 = vadd.f32 %v4202_v2, %v4201_v56  ;;  %v8897_v56 = vcombine.high %v4428_v42, %v4432_v43  ;;  %v4433_v1 = vld [vmem:[#allocation10 + $0x2a8] sm:$0xff]  ;;  %v8896_v2 = vcombine.low %v4428_v42, %v4432_v43  ;;  %v11579_v42 = vld [vmem:[#allocation10 + $0x38] sm:$0xff]  ;;  %v8820_v43 = vcombine.low %v11571_v19, %v11573_v22 }
 0xb47   :  { %v8898_v9 = vcombine.low %v4429_v55, %v4433_v1  ;;  %v8899_v7 = vcombine.high %v4429_v55, %v4433_v1 }
 0xb48   :  { %4269 = vmatprep.mubr.f32.mxu0 %v4203_v16  ;;  %5136 = vmatprep.subr.bf16.mxu1 %v8897_v56  ;;  %v4436_v16 = vld [vmem:[#allocation10 + $0x2c0] sm:$0xff] }
 0xb49   :  { %4270 = vmatmul.mubr.f32.vlgmr.msra.gmra.mrb[44].mxu0 %v4194_v28  ;;  %5137 = vmatpush1.bf16.msra.mxu1 %v8896_v2  ;;  %v4440_v28 = vld [vmem:[#allocation10 + $0x2e0] sm:$0xff] }
 0xb4a   :  { %5170 = vmatpush1.bf16.msra.mxu0 %v8818_v30  ;;  %v4397_v30 = vld [vmem:[#allocation10 + $0x188] sm:$0xff]  ;;  %v8905_v24 = vcombine.high %v4436_v16, %v4440_v28 }
 0xb4b   :  { %5171 = vmatprep.subr.bf16.mxu0 %v8827_v14  ;;  %v8867_v54 = vcombine.high %v4397_v30, %v4401_v57  ;;  %v8866_v15 = vcombine.low %v4397_v30, %v4401_v57  ;;  %v4437_v14 = vld [vmem:[#allocation10 + $0x2c8] sm:$0xff] }
 0xb4c   :  { %v8907_v29 = vcombine.high %v4437_v14, %v4441_v12  ;;  %5138 = vmatprep.subr.bf16.mxu1 %v8905_v24  ;;  %v4457_v57 = vld [vmem:[#allocation10 + $0x368] sm:$0xff] }
 0xb4e   :  { %5172 = vmatpush1.bf16.msra.mxu0 %v8826_v26  ;;  %v8904_v26 = vcombine.low %v4436_v16, %v4440_v28 }
 0xb4f   :  { %5173 = vmatprep.subr.bf16.mxu0 %v8835_v27  ;;  %v8906_v27 = vcombine.low %v4437_v14, %v4441_v12  ;;  %v4204_v12 = vld [vmem:[%s12936_s14] sm:$0x3] }
 0xb50   :  { %5139 = vmatpush1.bf16.msra.mxu1 %v8904_v26 }
 0xb52   :  { %5174 = vmatpush1.bf16.msra.mxu0 %v8834_v44  ;;  %v4448_v44 = vld [vmem:[#allocation10 + $0x320] sm:$0xff] }
 0xb53   :  { %5175 = vmatprep.subr.bf16.mxu0 %v8843_v17  ;;  %v4445_v17 = vld [vmem:[#allocation10 + $0x308] sm:$0xff]  ;;  %v8913_v48 = vcombine.high %v4444_v33, %v4448_v44 }
 0xb54   :  { %v8915_v63 = vcombine.high %v4445_v17, %v4449_v45 }
 0xb55   :  { %5140 = vmatprep.subr.bf16.mxu1 %v8913_v48 }
 0xb56   :  { %5176 = vmatpush1.bf16.msra.mxu0 %v8842_v51  ;;  %v8912_v51 = vcombine.low %v4444_v33, %v4448_v44 }
 0xb57   :  { %5177 = vmatprep.subr.bf16.mxu0 %v8851_v52  ;;  %v8914_v52 = vcombine.low %v4445_v17, %v4449_v45 }
 0xb58   :  { %5141 = vmatpush1.bf16.msra.mxu1 %v8912_v51 }
 0xb5a   :  { %5178 = vmatpush1.bf16.msra.mxu0 %v8850_v62  ;;  %v4456_v62 = vld [vmem:[#allocation10 + $0x360] sm:$0xff] }
 0xb5b   :  { %5179 = vmatprep.subr.bf16.mxu0 %v8859_v38  ;;  %v4453_v38 = vld [vmem:[#allocation10 + $0x348] sm:$0xff]  ;;  %v8921_v30 = vcombine.high %v4452_v5, %v4456_v62 }
 0xb5c   :  { %v8923_v60 = vcombine.high %v4453_v38, %v4457_v57 }
 0xb5d   :  { %5142 = vmatprep.subr.bf16.mxu1 %v8921_v30 }
 0xb5e   :  { %5180 = vmatpush1.bf16.msra.mxu0 %v8858_v21  ;;  %v8920_v21 = vcombine.low %v4452_v5, %v4456_v62 }
 0xb5f   :  { %5181 = vmatprep.subr.bf16.mxu0 %v8867_v54  ;;  %v8922_v54 = vcombine.low %v4453_v38, %v4457_v57 }
 0xb60   :  { %5143 = vmatpush1.bf16.msra.mxu1 %v8920_v21 }
 0xb62   :  { %5182 = vmatpush1.bf16.msra.mxu0 %v8866_v15  ;;  %v4464_v15 = vld [vmem:[#allocation10 + $0x3a0] sm:$0xff] }
 0xb63   :  { %5183 = vmatprep.subr.bf16.mxu0 %v8875_v0  ;;  %v4461_v0 = vld [vmem:[#allocation10 + $0x388] sm:$0xff]  ;;  %v8929_v3 = vcombine.high %v4460_v4, %v4464_v15 }
 0xb64   :  { %v8930_v8 = vcombine.low %v4461_v0, %v4465_v36  ;;  %v8931_v10 = vcombine.high %v4461_v0, %v4465_v36  ;;  %v4359_v36 = vld [vmem:[#allocation10 + $0x58] sm:$0xff] }
 0xb65   :  { %5144 = vmatprep.subr.bf16.mxu1 %v8929_v3 }
 0xb66   :  { %5184 = vmatpush1.bf16.msra.mxu0 %v8874_v18  ;;  %v8928_v18 = vcombine.low %v4460_v4, %v4464_v15 }
 0xb67   :  { %5185 = vmatprep.subr.bf16.mxu0 %v8883_v37  ;;  %v4469_v37 = vld [vmem:[#allocation10 + $0x3c8] sm:$0xff] }
 0xb68   :  { %v8939_v50 = vcombine.high %v4469_v37, %v4473_v20  ;;  %5145 = vmatpush1.bf16.msra.mxu1 %v8928_v18  ;;  %v8938_v61 = vcombine.low %v4469_v37, %v4473_v20  ;;  %v4358_v18 = vld [vmem:[#allocation10 + $0x50] sm:$0xff]  ;;  %v4367_v20 = vld [vmem:[#allocation10 + $0x98] sm:$0xff] }
 0xb69   :  { %v4370_v37 = vld [vmem:[#allocation10 + $0xb0] sm:$0xff] }
 0xb6a   :  { %5186 = vmatpush1.bf16.msra.mxu0 %v8882_v58  ;;  %v8937_v58 = vcombine.high %v4468_v49, %v4472_v59 }
 0xb6b   :  { %5187 = vmatprep.subr.bf16.mxu0 %v8891_v25  ;;  %v8821_v25 = vcombine.high %v11571_v19, %v11573_v22 }
 0xb6c   :  { %5146 = vmatprep.subr.bf16.mxu1 %v8937_v58 }
 0xb6d   :  { %5147 = vmatpush1.bf16.msra.mxu1 %v8936_v53 }
 0xb6e   :  { %5188 = vmatpush1.bf16.msra.mxu0 %v8890_v11  ;;  %v11575_v11 = vld [vmem:[#allocation10 + $0x18] sm:$0xff]  ;;  %5222 = vmatprep.subr.bf16.mxu1 %v8821_v25 }
 0xb6f   :  { %5189 = vmatprep.subr.bf16.mxu0 %v8899_v7  ;;  %v8822_v55 = vcombine.low %v11575_v11, %v11579_v42  ;;  %v8823_v56 = vcombine.high %v11575_v11, %v11579_v42 }
 0xb72   :  { %5190 = vmatpush1.bf16.msra.mxu0 %v8898_v9 }
 0xb73   :  { %5191 = vmatprep.subr.bf16.mxu0 %v8907_v29 }
 0xb76   :  { %5192 = vmatpush1.bf16.msra.mxu0 %v8906_v27  ;;  %v4316_v27 = vld [vmem:[%s12937_s15] sm:$0x3] }
 0xb77   :  { %5193 = vmatprep.subr.bf16.mxu0 %v8915_v63  ;;  %v4325_v44 = vrot.slane %v4316_v27, %v10950_v41  ;;  %v4321_v48 = vrot.slane %v4316_v27, %v10774_v13 }
 0xb7a   :  { %5194 = vmatpush1.bf16.msra.mxu0 %v8914_v52 }
 0xb7b   :  { %5195 = vmatprep.subr.bf16.mxu0 %v8923_v60 }
 0xb7e   :  { %5196 = vmatpush1.bf16.msra.mxu0 %v8922_v54 }
 0xb7f   :  { %5197 = vmatprep.subr.bf16.mxu0 %v8931_v10 }
 0xb82   :  { %5198 = vmatpush1.bf16.msra.mxu0 %v8930_v8  ;;  %v4366_v8 = vld [vmem:[#allocation10 + $0x90] sm:$0xff] }
 0xb83   :  { %5199 = vmatprep.subr.bf16.mxu0 %v8939_v50  ;;  %v4371_v50 = vld [vmem:[#allocation10 + $0xb8] sm:$0xff]  ;;  %v8837_v22 = vcombine.high %v4366_v8, %v4370_v37 }
 0xb84   :  { %v8839_v11 = vcombine.high %v4367_v20, %v4371_v50 }
 0xb86   :  { %5200 = vmatpush1.bf16.msra.mxu0 %v8938_v61 }
 0xb87   :  { %5275 = vmatprep.subr.bf16.mxu0 %v8823_v56  ;;  %v4374_v56 = vld [vmem:[#allocation10 + $0xd0] sm:$0xff] }
 0xc1c   :  { %v4271_v1 = vpop.f32.mrb[44].mxu0 }
 0xc1d   :  { %v4272_v2 = vadd.f32 1e-05, %v4271_v1  ;;  %v4273_v9 = vpop.f32.mrb[45].mxu0  ;;  %v4378_v1 = vld [vmem:[#allocation10 + $0xf0] sm:$0xff] }
 0xc1e   :  { %v4274_v7 = vadd.f32 1e-05, %v4273_v9  ;;  %v4379_v9 = vld [vmem:[#allocation10 + $0xf8] sm:$0xff]  ;;  %v8844_v27 = vcombine.low %v4374_v56, %v4378_v1 }
 0xc1f   :  { %10072 = vrsqrt.f32 %v4272_v2  ;;  %v4375_v2 = vld [vmem:[#allocation10 + $0xd8] sm:$0xff] }
 0xc20   :  { %10074 = vrsqrt.f32 %v4274_v7 }
 0xc29   :  { %v10073_v16 = vpop.eup %10072 }
 0xc2a   :  { %v10075_v28 = vpop.eup %10074 }
 0xc2b   :  { %v4280_v14 = vcombine.low %v10073_v16, %v10075_v28  ;;  %v4382_v16 = vld [vmem:[#allocation10 + $0x110] sm:$0xff]  ;;  %v8845_v28 = vcombine.high %v4374_v56, %v4378_v1  ;;  %v4431_v1 = vld [vmem:[#allocation10 + $0x298] sm:$0xff] }
 0xc2c   :  { %v4434_v56 = vld [vmem:[#allocation10 + $0x2b0] sm:$0xff] }
 0xc2d   :  { %v4287_v24 = vrot.slane %v4280_v14, %v10942_v32  ;;  %v8847_v14 = vcombine.high %v4375_v2, %v4379_v9 }
 0xc2f   :  { %v4294_v26 = vrot.slane %v4287_v24, %v10942_v32  ;;  %v4386_v24 = vld [vmem:[#allocation10 + $0x130] sm:$0xff] }
 0xc31   :  { %v4296_v29 = vmul.f32 %v4294_v26, %v4204_v12  ;;  %v4383_v12 = vld [vmem:[#allocation10 + $0x118] sm:$0xff] }
 0xc32   :  { %v4387_v26 = vld [vmem:[#allocation10 + $0x138] sm:$0xff] }
 0xc33   :  { %v4305_v33 = vrot.slane %v4296_v29, %v10950_v41  ;;  %v4301_v17 = vrot.slane %v4296_v29, %v10774_v13  ;;  %v8846_v29 = vcombine.low %v4375_v2, %v4379_v9  ;;  %v4435_v2 = vld [vmem:[#allocation10 + $0x2b8] sm:$0xff] }
 0xc35   :  { %v4309_v45 = vmul.f32 %v4305_v33, %v11541_v40  ;;  %v4311_v51 = vmul.f32 %v4305_v33, %v11544_v46  ;;  %v4308_v52 = vmul.f32 %v4301_v17, %v11529_v6  ;;  %v4310_v63 = vmul.f32 %v4301_v17, %v11532_v34 }
 0xc36   :  { %v4313_v5 = vmul.f32 %v4305_v33, %v11547_v47  ;;  %v4315_v62 = vmul.f32 %v4305_v33, %v11550_v31  ;;  %v4312_v4 = vmul.f32 %v4301_v17, %v11535_v35  ;;  %v4314_v40 = vmul.f32 %v4301_v17, %v11538_v39  ;;  %v4362_v47 = vld [vmem:[#allocation10 + $0x70] sm:$0xff]  ;;  %v4363_v31 = vld [vmem:[#allocation10 + $0x78] sm:$0xff] }
 0xc37   :  { %v4329_v38 = vadd.f32 %v4325_v44, %v4309_v45  ;;  %v4331_v30 = vadd.f32 %v4325_v44, %v4311_v51  ;;  %v4328_v57 = vadd.f32 %v4321_v48, %v4308_v52  ;;  %v4330_v21 = vadd.f32 %v4321_v48, %v4310_v63  ;;  %v4390_v17 = vld [vmem:[#allocation10 + $0x150] sm:$0xff]  ;;  %v4391_v45 = vld [vmem:[#allocation10 + $0x158] sm:$0xff] }
 0xc38   :  { %v4333_v54 = vadd.f32 %v4325_v44, %v4313_v5  ;;  %v4335_v60 = vadd.f32 %v4325_v44, %v4315_v62  ;;  %v4332_v10 = vadd.f32 %v4321_v48, %v4312_v4  ;;  %v4334_v58 = vadd.f32 %v4321_v48, %v4314_v40  ;;  %v4394_v48 = vld [vmem:[#allocation10 + $0x170] sm:$0xff]  ;;  %v4395_v51 = vld [vmem:[#allocation10 + $0x178] sm:$0xff] }
 0xc39   :  { %v4337_v15 = vmax.f32 %v4329_v38, 0.0  ;;  %v4339_v46 = vmax.f32 %v4331_v30, 0.0  ;;  %v4336_v0 = vmax.f32 %v4328_v57, 0.0  ;;  %v4338_v6 = vmax.f32 %v4330_v21, 0.0  ;;  %v4398_v38 = vld [vmem:[#allocation10 + $0x190] sm:$0xff]  ;;  %v4399_v57 = vld [vmem:[#allocation10 + $0x198] sm:$0xff] }
 0xc3a   :  { %v4341_v34 = vmax.f32 %v4333_v54, 0.0  ;;  %v4343_v3 = vmax.f32 %v4335_v60, 0.0  ;;  %v8829_v35 = vcombine.high %v4358_v18, %v4362_v47  ;;  %v8831_v39 = vcombine.high %v4359_v36, %v4363_v31  ;;  %v4402_v30 = vld [vmem:[#allocation10 + $0x1b0] sm:$0xff]  ;;  %v4403_v21 = vld [vmem:[#allocation10 + $0x1b8] sm:$0xff] }
 0xc3b   :  { %v4345_v49 = vpack.c.bf16 %v4339_v46, %v4337_v15  ;;  %v11607_v59 = vpack.c.bf16 %v4338_v6, %v4336_v0  ;;  %v8828_v61 = vcombine.low %v4358_v18, %v4362_v47  ;;  %v8830_v19 = vcombine.low %v4359_v36, %v4363_v31  ;;  %v4406_v15 = vld [vmem:[#allocation10 + $0x1d0] sm:$0xff]  ;;  %v4407_v0 = vld [vmem:[#allocation10 + $0x1d8] sm:$0xff] }
 0xc3c   :  { %v11611_v53 = vpack.c.bf16 %v4343_v3, %v4341_v34  ;;  %v4340_v25 = vmax.f32 %v4332_v10, 0.0  ;;  %v4342_v42 = vmax.f32 %v4334_v58, 0.0  ;;  %v8853_v33 = vcombine.high %v4382_v16, %v4386_v24  ;;  %v4410_v46 = vld [vmem:[#allocation10 + $0x1f0] sm:$0xff]  ;;  %v4411_v6 = vld [vmem:[#allocation10 + $0x1f8] sm:$0xff] }
 0xc3d   :  { %5148 = vmatprep.mubr.bf16.mxu1 %v4345_v49  ;;  %5201 = vmatprep.mubr.bf16.mxu0 %v4345_v49  ;;  %v8855_v44 = vcombine.high %v4383_v12, %v4387_v26  ;;  %v8852_v52 = vcombine.low %v4382_v16, %v4386_v24  ;;  %v8854_v63 = vcombine.low %v4383_v12, %v4387_v26  ;;  %v4414_v36 = vld [vmem:[#allocation10 + $0x210] sm:$0xff]  ;;  %v4439_v24 = vld [vmem:[#allocation10 + $0x2d8] sm:$0xff] }
 0xc3e   :  { %5149 = vmatmul.mubr.bf16.vlgmr.msra.gmra.mrb[28].mxu1 %v11607_v59  ;;  %5202 = vmatmul.mubr.bf16.vlgmr.msra.gmra.mrb[48].mxu0 %v11607_v59  ;;  %v11615_v7 = vpack.c.bf16 %v4342_v42, %v4340_v25  ;;  %v8861_v5 = vcombine.high %v4390_v17, %v4394_v48  ;;  %v8863_v62 = vcombine.high %v4391_v45, %v4395_v51  ;;  %v4418_v31 = vld [vmem:[#allocation10 + $0x230] sm:$0xff]  ;;  %v4443_v12 = vld [vmem:[#allocation10 + $0x2f8] sm:$0xff] }
 0xc3f   :  { %5223 = vmatpush1.bf16.msra.mxu1 %v8820_v43  ;;  %5276 = vmatpush1.bf16.msra.mxu0 %v8822_v55  ;;  %v8836_v43 = vcombine.low %v4366_v8, %v4370_v37  ;;  %v8838_v55 = vcombine.low %v4367_v20, %v4371_v50  ;;  %v8860_v54 = vcombine.low %v4390_v17, %v4394_v48  ;;  %v4419_v8 = vld [vmem:[#allocation10 + $0x238] sm:$0xff]  ;;  %v4422_v37 = vld [vmem:[#allocation10 + $0x250] sm:$0xff] }
 0xc40   :  { %5158 = vmatprep.mubr.bf16.mxu1 %v11611_v53  ;;  %5211 = vmatprep.mubr.bf16.mxu0 %v11611_v53  ;;  %v8862_v60 = vcombine.low %v4391_v45, %v4395_v51  ;;  %v8869_v4 = vcombine.high %v4398_v38, %v4402_v30  ;;  %v8871_v40 = vcombine.high %v4399_v57, %v4403_v21  ;;  %v4426_v20 = vld [vmem:[#allocation10 + $0x270] sm:$0xff]  ;;  %v4423_v50 = vld [vmem:[#allocation10 + $0x258] sm:$0xff] }
 0xc41   :  { %5224 = vmatprep.subr.bf16.mxu1 %v8829_v35  ;;  %5277 = vmatprep.subr.bf16.mxu0 %v8831_v39  ;;  %v8868_v18 = vcombine.low %v4398_v38, %v4402_v30  ;;  %v8870_v34 = vcombine.low %v4399_v57, %v4403_v21  ;;  %v8877_v3 = vcombine.high %v4406_v15, %v4410_v46  ;;  %v4430_v42 = vld [vmem:[#allocation10 + $0x290] sm:$0xff]  ;;  %v4447_v48 = vld [vmem:[#allocation10 + $0x318] sm:$0xff] }
 0xc42   :  { %v8879_v47 = vcombine.high %v4407_v0, %v4411_v6  ;;  %v8876_v10 = vcombine.low %v4406_v15, %v4410_v46  ;;  %v8878_v58 = vcombine.low %v4407_v0, %v4411_v6  ;;  %v8885_v35 = vcombine.high %v4414_v36, %v4418_v31  ;;  %v4450_v17 = vld [vmem:[#allocation10 + $0x330] sm:$0xff]  ;;  %v4451_v45 = vld [vmem:[#allocation10 + $0x338] sm:$0xff] }
 0xc43   :  { %5225 = vmatpush1.bf16.msra.mxu1 %v8828_v61  ;;  %5278 = vmatpush1.bf16.msra.mxu0 %v8830_v19  ;;  %v4427_v61 = vld [vmem:[#allocation10 + $0x278] sm:$0xff]  ;;  %v8884_v19 = vcombine.low %v4414_v36, %v4418_v31  ;;  %v8892_v9 = vcombine.low %v4422_v37, %v4426_v20  ;;  %v8903_v16 = vcombine.high %v4431_v1, %v4435_v2  ;;  %v4458_v38 = vld [vmem:[#allocation10 + $0x370] sm:$0xff] }
 0xc44   :  { %5226 = vmatprep.subr.bf16.mxu1 %v8837_v22  ;;  %5279 = vmatprep.subr.bf16.mxu0 %v8839_v11  ;;  %v8893_v11 = vcombine.high %v4422_v37, %v4426_v20  ;;  %v8895_v25 = vcombine.high %v4423_v50, %v4427_v61  ;;  %v8900_v26 = vcombine.low %v4430_v42, %v4434_v56  ;;  %v4455_v30 = vld [vmem:[#allocation10 + $0x358] sm:$0xff]  ;;  %v4466_v15 = vld [vmem:[#allocation10 + $0x3b0] sm:$0xff] }
 0xc45   :  { %v4459_v57 = vld [vmem:[#allocation10 + $0x378] sm:$0xff]  ;;  %v4474_v36 = vld [vmem:[#allocation10 + $0x3f0] sm:$0xff] }
 0xc46   :  { %5159 = vmatmul.mubr.bf16.gmra.mrb[32].mxu1 %v11615_v7  ;;  %5212 = vmatmul.mubr.bf16.gmra.mrb[52].mxu0 %v11615_v7  ;;  %v4463_v46 = vld [vmem:[#allocation10 + $0x398] sm:$0xff] }
 0xc47   :  { %5227 = vmatpush1.bf16.msra.mxu1 %v8836_v43  ;;  %5280 = vmatpush1.bf16.msra.mxu0 %v8838_v55  ;;  %v8894_v43 = vcombine.low %v4423_v50, %v4427_v61  ;;  %v8901_v55 = vcombine.high %v4430_v42, %v4434_v56  ;;  %v4467_v0 = vld [vmem:[#allocation10 + $0x3b8] sm:$0xff] }
 0xc48   :  { %5254 = vmatprep.mubr.bf16.mxu1 %v4345_v49  ;;  %5307 = vmatprep.mubr.bf16.mxu0 %v4345_v49  ;;  %v4415_v49 = vld [vmem:[#allocation10 + $0x218] sm:$0xff] }
 0xc49   :  { %5228 = vmatprep.subr.bf16.mxu1 %v8845_v28  ;;  %5281 = vmatprep.subr.bf16.mxu0 %v8847_v14  ;;  %v8887_v39 = vcombine.high %v4415_v49, %v4419_v8  ;;  %v8886_v22 = vcombine.low %v4415_v49, %v4419_v8  ;;  %v4438_v28 = vld [vmem:[#allocation10 + $0x2d0] sm:$0xff]  ;;  %v4471_v31 = vld [vmem:[#allocation10 + $0x3d8] sm:$0xff] }
 0xc4a   :  { %v4442_v14 = vld [vmem:[#allocation10 + $0x2f0] sm:$0xff]  ;;  %v4475_v49 = vld [vmem:[#allocation10 + $0x3f8] sm:$0xff] }
 0xc4b   :  { %5229 = vmatpush1.bf16.msra.mxu1 %v8844_v27  ;;  %5282 = vmatpush1.bf16.msra.mxu0 %v8846_v29  ;;  %v8902_v27 = vcombine.low %v4431_v1, %v4435_v2  ;;  %v8909_v29 = vcombine.high %v4438_v28, %v4442_v14  ;;  %v8908_v51 = vcombine.low %v4438_v28, %v4442_v14 }
 0xc4c   :  { %5230 = vmatprep.subr.bf16.mxu1 %v8853_v33  ;;  %5283 = vmatprep.subr.bf16.mxu0 %v8855_v44  ;;  %v8911_v33 = vcombine.high %v4439_v24, %v4443_v12  ;;  %v4446_v44 = vld [vmem:[#allocation10 + $0x310] sm:$0xff]  ;;  %v8942_v37 = vcombine.low %v4471_v31, %v4475_v49 }
 0xc4d   :  { %v8916_v21 = vcombine.low %v4446_v44, %v4450_v17 }
 0xc4f   :  { %5231 = vmatpush1.bf16.msra.mxu1 %v8852_v52  ;;  %5284 = vmatpush1.bf16.msra.mxu0 %v8854_v63  ;;  %v8910_v52 = vcombine.low %v4439_v24, %v4443_v12  ;;  %v8917_v63 = vcombine.high %v4446_v44, %v4450_v17  ;;  %v5945_v44 = vld [vmem:[%s12940_s18 + $0x8] sm:$0xff]  ;;  %v5947_v17 = vld [vmem:[%s12940_s18 + $0x18] sm:$0xff] }
 0xc50   :  { %5232 = vmatprep.subr.bf16.mxu1 %v8861_v5  ;;  %5285 = vmatprep.subr.bf16.mxu0 %v8863_v62  ;;  %v8919_v5 = vcombine.high %v4447_v48, %v4451_v45  ;;  %v4454_v62 = vld [vmem:[#allocation10 + $0x350] sm:$0xff] }
 0xc51   :  { %v8924_v6 = vcombine.low %v4454_v62, %v4458_v38 }
 0xc53   :  { %5233 = vmatpush1.bf16.msra.mxu1 %v8860_v54  ;;  %5286 = vmatpush1.bf16.msra.mxu0 %v8862_v60  ;;  %v8918_v54 = vcombine.low %v4447_v48, %v4451_v45  ;;  %v8925_v60 = vcombine.high %v4454_v62, %v4458_v38  ;;  %v5944_v48 = vld [vmem:[%s12940_s18] sm:$0xff]  ;;  %v11642_v45 = vpack.c.bf16 %v5947_v17, %v5945_v44 }
 0xc54   :  { %5234 = vmatprep.subr.bf16.mxu1 %v8869_v4  ;;  %5287 = vmatprep.subr.bf16.mxu0 %v8871_v40  ;;  %v8927_v4 = vcombine.high %v4455_v30, %v4459_v57  ;;  %v4462_v40 = vld [vmem:[#allocation10 + $0x390] sm:$0xff]  ;;  %v5948_v38 = vld [vmem:[%s12940_s18 + $0x20] sm:$0xff] }
 0xc55   :  { %v8932_v8 = vcombine.low %v4462_v40, %v4466_v15 }
 0xc57   :  { %5235 = vmatpush1.bf16.msra.mxu1 %v8868_v18  ;;  %5288 = vmatpush1.bf16.msra.mxu0 %v8870_v34  ;;  %v8926_v18 = vcombine.low %v4455_v30, %v4459_v57  ;;  %v8933_v34 = vcombine.high %v4462_v40, %v4466_v15  ;;  %v5950_v30 = vld [vmem:[%s12940_s18 + $0x30] sm:$0xff]  ;;  %v5953_v57 = vld [vmem:[%s12940_s18 + $0x48] sm:$0xff]  ;;  %v5952_v15 = vld [vmem:[%s12940_s18 + $0x40] sm:$0xff] }
 0xc58   :  { %5236 = vmatprep.subr.bf16.mxu1 %v8877_v3  ;;  %5289 = vmatprep.subr.bf16.mxu0 %v8879_v47  ;;  %v8935_v3 = vcombine.high %v4463_v46, %v4467_v0  ;;  %v4470_v47 = vld [vmem:[#allocation10 + $0x3d0] sm:$0xff] }
 0xc5b   :  { %5237 = vmatpush1.bf16.msra.mxu1 %v8876_v10  ;;  %5290 = vmatpush1.bf16.msra.mxu0 %v8878_v58  ;;  %v8934_v10 = vcombine.low %v4463_v46, %v4467_v0  ;;  %v8941_v58 = vcombine.high %v4470_v47, %v4474_v36  ;;  %v5954_v46 = vld [vmem:[%s12940_s18 + $0x50] sm:$0xff]  ;;  %v5957_v0 = vld [vmem:[%s12940_s18 + $0x68] sm:$0xff] }
 0xc5c   :  { %5238 = vmatprep.subr.bf16.mxu1 %v8885_v35  ;;  %5291 = vmatprep.subr.bf16.mxu0 %v8887_v39  ;;  %v8943_v35 = vcombine.high %v4471_v31, %v4475_v49  ;;  %v8940_v39 = vcombine.low %v4470_v47, %v4474_v36  ;;  %v5956_v36 = vld [vmem:[%s12940_s18 + $0x60] sm:$0xff]  ;;  %v5958_v31 = vld [vmem:[%s12940_s18 + $0x70] sm:$0xff]  ;;  %v5961_v49 = vld [vmem:[%s12940_s18 + $0x88] sm:$0xff] }
 0xc5f   :  { %5239 = vmatpush1.bf16.msra.mxu1 %v8884_v19  ;;  %5292 = vmatpush1.bf16.msra.mxu0 %v8886_v22 }
 0xc60   :  { %5240 = vmatprep.subr.bf16.mxu1 %v8893_v11  ;;  %5293 = vmatprep.subr.bf16.mxu0 %v8895_v25 }
 0xc63   :  { %5241 = vmatpush1.bf16.msra.mxu1 %v8892_v9  ;;  %5294 = vmatpush1.bf16.msra.mxu0 %v8894_v43 }
 0xc64   :  { %5242 = vmatprep.subr.bf16.mxu1 %v8901_v55  ;;  %5295 = vmatprep.subr.bf16.mxu0 %v8903_v16 }
 0xc67   :  { %5243 = vmatpush1.bf16.msra.mxu1 %v8900_v26  ;;  %5296 = vmatpush1.bf16.msra.mxu0 %v8902_v27 }
 0xc68   :  { %5244 = vmatprep.subr.bf16.mxu1 %v8909_v29  ;;  %5297 = vmatprep.subr.bf16.mxu0 %v8911_v33  ;;  %v5328_v29 = vld [vmem:[%s12939_s17] sm:$0xff] }
 0xc69   :  { %v8944_v33 = vld [vmem:[%s12939_s17 + $0x40] sm:$0xff] }
 0xc6b   :  { %5245 = vmatpush1.bf16.msra.mxu1 %v8908_v51  ;;  %5298 = vmatpush1.bf16.msra.mxu0 %v8910_v52  ;;  %v5946_v51 = vld [vmem:[%s12940_s18 + $0x10] sm:$0xff]  ;;  %v5949_v52 = vld [vmem:[%s12940_s18 + $0x28] sm:$0xff] }
 0xc6c   :  { %5246 = vmatprep.subr.bf16.mxu1 %v8917_v63  ;;  %5299 = vmatprep.subr.bf16.mxu0 %v8919_v5  ;;  %v5951_v63 = vld [vmem:[%s12940_s18 + $0x38] sm:$0xff]  ;;  %v11653_v5 = vpack.c.bf16 %v5946_v51, %v5944_v48 }
 0xc6d   :  { %v11656_v62 = vpack.c.bf16 %v5951_v63, %v5949_v52  ;;  %v8968_v63 = vld [vmem:[%s12939_s17 + $0x80] sm:$0xff] }
 0xc6f   :  { %5247 = vmatpush1.bf16.msra.mxu1 %v8916_v21  ;;  %5300 = vmatpush1.bf16.msra.mxu0 %v8918_v54  ;;  %v5955_v21 = vld [vmem:[%s12940_s18 + $0x58] sm:$0xff]  ;;  %v5329_v54 = vld [vmem:[%s12939_s17 + $0x8] sm:$0xff] }
 0xc70   :  { %5248 = vmatprep.subr.bf16.mxu1 %v8925_v60  ;;  %5301 = vmatprep.subr.bf16.mxu0 %v8927_v4  ;;  %v8945_v60 = vld [vmem:[%s12939_s17 + $0x48] sm:$0xff]  ;;  %v11681_v4 = vpack.c.bf16 %v5950_v30, %v5948_v38  ;;  %v11684_v40 = vpack.c.bf16 %v5955_v21, %v5953_v57  ;;  %v8970_v30 = vld [vmem:[%s12939_s17 + $0x90] sm:$0xff]  ;;  %v8971_v57 = vld [vmem:[%s12939_s17 + $0x98] sm:$0xff] }
 0xc71   :  { %v8969_v38 = vld [vmem:[%s12939_s17 + $0x88] sm:$0xff]  ;;  %v8972_v21 = vld [vmem:[%s12939_s17 + $0xa0] sm:$0xff] }
 0xc73   :  { %5249 = vmatpush1.bf16.msra.mxu1 %v8924_v6  ;;  %5302 = vmatpush1.bf16.msra.mxu0 %v8926_v18  ;;  %v5959_v6 = vld [vmem:[%s12940_s18 + $0x78] sm:$0xff]  ;;  %v5330_v18 = vld [vmem:[%s12939_s17 + $0x10] sm:$0xff] }
 0xc74   :  { %5250 = vmatprep.subr.bf16.mxu1 %v8933_v34  ;;  %5303 = vmatprep.subr.bf16.mxu0 %v8935_v3  ;;  %v8946_v34 = vld [vmem:[%s12939_s17 + $0x50] sm:$0xff]  ;;  %v11709_v3 = vpack.c.bf16 %v5954_v46, %v5952_v15  ;;  %v11712_v47 = vpack.c.bf16 %v5959_v6, %v5957_v0  ;;  %v8975_v15 = vld [vmem:[%s12939_s17 + $0xb8] sm:$0xff]  ;;  %v8984_v46 = vld [vmem:[%s12939_s17 + $0xc0] sm:$0xff] }
 0xc75   :  { %v8985_v0 = vld [vmem:[%s12939_s17 + $0xc8] sm:$0xff]  ;;  %v8986_v6 = vld [vmem:[%s12939_s17 + $0xd0] sm:$0xff] }
 0xc77   :  { %5251 = vmatpush1.bf16.msra.mxu1 %v8932_v8  ;;  %5304 = vmatpush1.bf16.msra.mxu0 %v8934_v10  ;;  %v5963_v8 = vld [vmem:[%s12940_s18 + $0x98] sm:$0xff] }
 0xc78   :  { %5252 = vmatprep.subr.bf16.mxu1 %v8941_v58  ;;  %5305 = vmatprep.subr.bf16.mxu0 %v8943_v35  ;;  %v5331_v10 = vld [vmem:[%s12939_s17 + $0x18] sm:$0xff]  ;;  %v11737_v35 = vpack.c.bf16 %v5958_v31, %v5956_v36  ;;  %v8989_v36 = vld [vmem:[%s12939_s17 + $0xe8] sm:$0xff]  ;;  %v8990_v31 = vld [vmem:[%s12939_s17 + $0xf0] sm:$0xff] }
 0xc79   :  { %v8947_v58 = vld [vmem:[%s12939_s17 + $0x58] sm:$0xff] }
 0xc7b   :  { %5253 = vmatpush1.bf16.msra.mxu1 %v8940_v39  ;;  %5306 = vmatpush1.bf16.msra.mxu0 %v8942_v37  ;;  %v11740_v39 = vpack.c.bf16 %v5963_v8, %v5961_v49  ;;  %v5332_v37 = vld [vmem:[%s12939_s17 + $0x20] sm:$0xff]  ;;  %v8991_v49 = vld [vmem:[%s12939_s17 + $0xf8] sm:$0xff] }
 0xc7c   :  { %v5960_v8 = vld [vmem:[%s12940_s18 + $0x80] sm:$0xff] }
 0xc7e   :  { %5255 = vmatmul.mubr.bf16.vlgmr.msra.gmra.mrb[36].mxu1 %v11607_v59  ;;  %5308 = vmatmul.mubr.bf16.vlgmr.msra.gmra.mrb[56].mxu0 %v11607_v59 }
 0xc7f   :  { %5264 = vmatprep.mubr.bf16.mxu1 %v11611_v53  ;;  %5317 = vmatprep.mubr.bf16.mxu0 %v11611_v53 }
 0xc86   :  { %5265 = vmatmul.mubr.bf16.gmra.mrb[40].mxu1 %v11615_v7  ;;  %5318 = vmatmul.mubr.bf16.gmra.mrb[60].mxu0 %v11615_v7 }
 0xc87   :  { %5571 = vmatprep.mubr.f32.mxu1 %v12956_v23  ;;  %5434 = vmatprep.mubr.f32.mxu0 %v12956_v23 }
 0xd11   :  { %v5150_v20 = vpop.f32.mrb[28].mxu1  ;;  %v5203_v50 = vpop.f32.mrb[48].mxu0 }
 0xd12   :  { %v5152_v61 = vpop.f32.mrb[29].mxu1  ;;  %v5205_v19 = vpop.f32.mrb[49].mxu0 }
 0xd13   :  { %v5154_v22 = vpop.f32.mrb[30].mxu1  ;;  %v5207_v11 = vpop.f32.mrb[50].mxu0 }
 0xd14   :  { %v9650_v25 = vpack.c.bf16 %v5154_v22, %v5150_v20  ;;  %v9642_v59 = vpack.c.bf16 %v5207_v11, %v5203_v50  ;;  %v5156_v42 = vpop.f32.mrb[31].mxu1  ;;  %v5209_v56 = vpop.f32.mrb[51].mxu0  ;;  %v8948_v20 = vld [vmem:[%s12939_s17 + $0x60] sm:$0xff]  ;;  %v5333_v50 = vld [vmem:[%s12939_s17 + $0x28] sm:$0xff]  ;;  %v8950_v22 = vld [vmem:[%s12939_s17 + $0x70] sm:$0xff] }
 0xd15   :  { %v9648_v1 = vpack.c.bf16 %v5156_v42, %v5152_v61  ;;  %v9640_v53 = vpack.c.bf16 %v5209_v56, %v5205_v19  ;;  %v8949_v61 = vld [vmem:[%s12939_s17 + $0x68] sm:$0xff]  ;;  %v5334_v19 = vld [vmem:[%s12939_s17 + $0x30] sm:$0xff]  ;;  %v5335_v11 = vld [vmem:[%s12939_s17 + $0x38] sm:$0xff] }
 0xd17   :  { %9641 = vmatprep.subr.bf16.mxu0 %v9640_v53  ;;  %9649 = vmatprep.subr.bf16.mxu1 %v9648_v1 }
 0xd18   :  { %9643 = vmatpush1.bf16.msra.mxu0 %v9642_v59  ;;  %9651 = vmatpush1.bf16.msra.mxu1 %v9650_v25  ;;  %v8951_v25 = vld [vmem:[%s12939_s17 + $0x78] sm:$0xff] }
 0xd19   :  { %v5160_v7 = vpop.f32.mrb[32].mxu1  ;;  %v5213_v2 = vpop.f32.mrb[52].mxu0 }
 0xd1a   :  { %v5162_v9 = vpop.f32.mrb[33].mxu1  ;;  %v5215_v43 = vpop.f32.mrb[53].mxu0 }
 0xd1b   :  { %v5164_v55 = vpop.f32.mrb[34].mxu1  ;;  %v5217_v16 = vpop.f32.mrb[54].mxu0 }
 0xd1c   :  { %v9654_v28 = vpack.c.bf16 %v5164_v55, %v5160_v7  ;;  %v9646_v14 = vpack.c.bf16 %v5217_v16, %v5213_v2  ;;  %v5166_v24 = vpop.f32.mrb[35].mxu1  ;;  %v5219_v12 = vpop.f32.mrb[55].mxu0 }
 0xd1d   :  { %v9652_v26 = vpack.c.bf16 %v5166_v24, %v5162_v9  ;;  %v9644_v27 = vpack.c.bf16 %v5219_v12, %v5215_v43 }
 0xd1f   :  { %9645 = vmatprep.subr.bf16.mxu0 %v9644_v27  ;;  %9653 = vmatprep.subr.bf16.mxu1 %v9652_v26 }
 0xd20   :  { %9647 = vmatpush1.bf16.msra.mxu0 %v9646_v14  ;;  %9655 = vmatpush1.bf16.msra.mxu1 %v9654_v28 }
 0xd21   :  { %9673 = vmatprep.subr.bf16.mxu0 %v11642_v45 }
 0xd23   :  { %8960 = vmatmul.mubr.msk.f32.vlgmr.msra.gmra.mrb[44].mxu1 %vm5345_vm6, %v5328_v29  ;;  %8952 = vmatmul.mubr.msk.f32.vlgmr.msra.gmra.mrb[46].mxu0 %vm5345_vm6, %v8944_v33 }
 0xd24   :  { %5577 = vmatprep.mubr.f32.mxu1 %v12956_v23  ;;  %5440 = vmatprep.mubr.f32.mxu0 %v12956_v23 }
 0xd25   :  { %9675 = vmatpush1.bf16.msra.mxu0 %v11653_v5 }
 0xd26   :  { %9677 = vmatprep.subr.bf16.mxu0 %v11656_v62 }
 0xd27   :  { %8961 = vmatmul.mubr.msk.f32.gmra.mrb[46].mxu1 %vm5345_vm6, %v5329_v54  ;;  %8953 = vmatmul.mubr.msk.f32.gmra.mrb[64].mxu0 %vm5345_vm6, %v8945_v60  ;;  %v8973_v54 = vld [vmem:[%s12939_s17 + $0xa8] sm:$0xff]  ;;  %v8974_v60 = vld [vmem:[%s12939_s17 + $0xb0] sm:$0xff] }
 0xd28   :  { %5583 = vmatprep.mubr.f32.mxu1 %v12956_v23  ;;  %5446 = vmatprep.mubr.f32.mxu0 %v12956_v23 }
 0xd29   :  { %9679 = vmatpush1.bf16.msra.mxu0 %v11681_v4 }
 0xd2a   :  { %9681 = vmatprep.subr.bf16.mxu0 %v11684_v40 }
 0xd2b   :  { %8962 = vmatmul.mubr.msk.f32.gmra.mrb[48].mxu1 %vm5345_vm6, %v5330_v18  ;;  %8954 = vmatmul.mubr.msk.f32.gmra.mrb[66].mxu0 %vm5345_vm6, %v8946_v34  ;;  %v8987_v18 = vld [vmem:[%s12939_s17 + $0xd8] sm:$0xff]  ;;  %v8988_v34 = vld [vmem:[%s12939_s17 + $0xe0] sm:$0xff] }
 0xd2c   :  { %5589 = vmatprep.mubr.f32.mxu1 %v12956_v23  ;;  %5452 = vmatprep.mubr.f32.mxu0 %v12956_v23 }
 0xd2d   :  { %9683 = vmatpush1.bf16.msra.mxu0 %v11709_v3 }
 0xd2e   :  { %9685 = vmatprep.subr.bf16.mxu0 %v11712_v47 }
 0xd2f   :  { %8963 = vmatmul.mubr.msk.f32.gmra.mrb[50].mxu1 %vm5345_vm6, %v5331_v10  ;;  %8955 = vmatmul.mubr.msk.f32.gmra.mrb[68].mxu0 %vm5345_vm6, %v8947_v58  ;;  %v5962_v10 = vld [vmem:[%s12940_s18 + $0x90] sm:$0xff] }
 0xd30   :  { %5595 = vmatprep.mubr.f32.mxu1 %v12956_v23  ;;  %5458 = vmatprep.mubr.f32.mxu0 %v12956_v23  ;;  %v11872_v58 = vpack.c.bf16 %v5962_v10, %v5960_v8  ;;  %v5997_v10 = vld [vmem:[%s12940_s18 + $0x1a8] sm:$0xff] }
 0xd31   :  { %9687 = vmatpush1.bf16.msra.mxu0 %v11737_v35 }
 0xd32   :  { %9689 = vmatprep.subr.bf16.mxu0 %v11740_v39 }
 0xd33   :  { %8964 = vmatmul.mubr.msk.f32.gmra.mrb[52].mxu1 %vm5345_vm6, %v5332_v37  ;;  %8956 = vmatmul.mubr.msk.f32.gmra.mrb[70].mxu0 %vm5345_vm6, %v8948_v20  ;;  %v5965_v37 = vld [vmem:[%s12940_s18 + $0xa8] sm:$0xff]  ;;  %v5967_v20 = vld [vmem:[%s12940_s18 + $0xb8] sm:$0xff] }
 0xd34   :  { %5601 = vmatprep.mubr.f32.mxu1 %v12956_v23  ;;  %5464 = vmatprep.mubr.f32.mxu0 %v12956_v23 }
 0xd35   :  { %9691 = vmatpush1.bf16.msra.mxu0 %v11872_v58 }
 0xd37   :  { %8965 = vmatmul.mubr.msk.f32.gmra.mrb[54].mxu1 %vm5345_vm6, %v5333_v50  ;;  %8957 = vmatmul.mubr.msk.f32.gmra.mrb[72].mxu0 %vm5345_vm6, %v8949_v61  ;;  %v11881_v50 = vpack.c.bf16 %v5967_v20, %v5965_v37  ;;  %v5964_v61 = vld [vmem:[%s12940_s18 + $0xa0] sm:$0xff]  ;;  %v5999_v37 = vld [vmem:[%s12940_s18 + $0x1b8] sm:$0xff] }
 0xd38   :  { %5607 = vmatprep.mubr.f32.mxu1 %v12956_v23  ;;  %5470 = vmatprep.mubr.f32.mxu0 %v12956_v23 }
 0xd39   :  { %9693 = vmatprep.subr.bf16.mxu0 %v11881_v50 }
 0xd3b   :  { %8966 = vmatmul.mubr.msk.f32.gmra.mrb[56].mxu1 %vm5345_vm6, %v5334_v19  ;;  %8958 = vmatmul.mubr.msk.f32.gmra.mrb[74].mxu0 %vm5345_vm6, %v8950_v22  ;;  %v5966_v19 = vld [vmem:[%s12940_s18 + $0xb0] sm:$0xff] }
 0xd3c   :  { %5613 = vmatprep.mubr.f32.mxu1 %v12956_v23  ;;  %5476 = vmatprep.mubr.f32.mxu0 %v12956_v23  ;;  %v11889_v22 = vpack.c.bf16 %v5966_v19, %v5964_v61  ;;  %v12025_v61 = vpack.c.bf16 %v5999_v37, %v5997_v10  ;;  %v5996_v19 = vld [vmem:[%s12940_s18 + $0x1a0] sm:$0xff] }
 0xd3e   :  { %9695 = vmatpush1.bf16.msra.mxu0 %v11889_v22 }
 0xd3f   :  { %8967 = vmatmul.mubr.msk.f32.gmra.mrb[58].mxu1 %vm5345_vm6, %v5335_v11  ;;  %8959 = vmatmul.mubr.msk.f32.gmra.mrb[76].mxu0 %vm5345_vm6, %v8951_v25  ;;  %v5969_v11 = vld [vmem:[%s12940_s18 + $0xc8] sm:$0xff]  ;;  %v5971_v25 = vld [vmem:[%s12940_s18 + $0xd8] sm:$0xff] }
 0xd40   :  { %5717 = vmatprep.mubr.f32.mxu1 %v12956_v23 }
 0xd51   :  { %v5256_v59 = vpop.f32.mrb[36].mxu1  ;;  %v5309_v42 = vpop.f32.mrb[56].mxu0 }
 0xd52   :  { %v5258_v56 = vpop.f32.mrb[37].mxu1  ;;  %v5311_v1 = vpop.f32.mrb[57].mxu0 }
 0xd53   :  { %v5260_v53 = vpop.f32.mrb[38].mxu1  ;;  %v5313_v7 = vpop.f32.mrb[58].mxu0 }
 0xd54   :  { %v9658_v2 = vpack.c.bf16 %v5260_v53, %v5256_v59  ;;  %v9666_v9 = vpack.c.bf16 %v5313_v7, %v5309_v42  ;;  %v5262_v43 = vpop.f32.mrb[39].mxu1  ;;  %v5315_v55 = vpop.f32.mrb[59].mxu0  ;;  %v11899_v59 = vpack.c.bf16 %v5971_v25, %v5969_v11  ;;  %v5968_v42 = vld [vmem:[%s12940_s18 + $0xc0] sm:$0xff]  ;;  %v5973_v53 = vld [vmem:[%s12940_s18 + $0xe8] sm:$0xff]  ;;  %v5975_v7 = vld [vmem:[%s12940_s18 + $0xf8] sm:$0xff] }
 0xd55   :  { %v9656_v16 = vpack.c.bf16 %v5262_v43, %v5258_v56  ;;  %v9664_v28 = vpack.c.bf16 %v5315_v55, %v5311_v1  ;;  %v5970_v56 = vld [vmem:[%s12940_s18 + $0xd0] sm:$0xff] }
 0xd56   :  { %v11907_v1 = vpack.c.bf16 %v5970_v56, %v5968_v42  ;;  %9697 = vmatprep.subr.bf16.mxu0 %v11899_v59  ;;  %v5974_v43 = vld [vmem:[%s12940_s18 + $0xf0] sm:$0xff]  ;;  %v6001_v56 = vld [vmem:[%s12940_s18 + $0x1c8] sm:$0xff] }
 0xd57   :  { %9657 = vmatprep.subr.bf16.mxu1 %v9656_v16  ;;  %v5977_v16 = vld [vmem:[%s12940_s18 + $0x108] sm:$0xff]  ;;  %v5998_v11 = vld [vmem:[%s12940_s18 + $0x1b0] sm:$0xff] }
 0xd58   :  { %9659 = vmatpush1.bf16.msra.mxu1 %v9658_v2  ;;  %9699 = vmatpush1.bf16.msra.mxu0 %v11907_v1  ;;  %v11917_v2 = vpack.c.bf16 %v5975_v7, %v5973_v53  ;;  %v12033_v25 = vpack.c.bf16 %v5998_v11, %v5996_v19  ;;  %v6003_v53 = vld [vmem:[%s12940_s18 + $0x1d8] sm:$0xff] }
 0xd59   :  { %v5266_v14 = vpop.f32.mrb[40].mxu1  ;;  %v5319_v24 = vpop.f32.mrb[60].mxu0 }
 0xd5a   :  { %v5268_v12 = vpop.f32.mrb[41].mxu1  ;;  %v5321_v26 = vpop.f32.mrb[61].mxu0  ;;  %9701 = vmatprep.subr.bf16.mxu0 %v11917_v2 }
 0xd5b   :  { %v5270_v27 = vpop.f32.mrb[42].mxu1  ;;  %v5323_v29 = vpop.f32.mrb[62].mxu0 }
 0xd5c   :  { %v9662_v33 = vpack.c.bf16 %v5270_v27, %v5266_v14  ;;  %v9670_v44 = vpack.c.bf16 %v5323_v29, %v5319_v24  ;;  %v5272_v17 = vpop.f32.mrb[43].mxu1  ;;  %v5325_v48 = vpop.f32.mrb[63].mxu0  ;;  %v5976_v24 = vld [vmem:[%s12940_s18 + $0x100] sm:$0xff]  ;;  %v5981_v27 = vld [vmem:[%s12940_s18 + $0x128] sm:$0xff]  ;;  %v5983_v29 = vld [vmem:[%s12940_s18 + $0x138] sm:$0xff] }
 0xd5d   :  { %v9660_v51 = vpack.c.bf16 %v5272_v17, %v5268_v12  ;;  %v9668_v52 = vpack.c.bf16 %v5325_v48, %v5321_v26  ;;  %v5978_v12 = vld [vmem:[%s12940_s18 + $0x110] sm:$0xff] }
 0xd5e   :  { %v11943_v26 = vpack.c.bf16 %v5978_v12, %v5976_v24  ;;  %v5982_v17 = vld [vmem:[%s12940_s18 + $0x130] sm:$0xff]  ;;  %v6005_v12 = vld [vmem:[%s12940_s18 + $0x1e8] sm:$0xff] }
 0xd5f   :  { %9661 = vmatprep.subr.bf16.mxu1 %v9660_v51  ;;  %v5985_v51 = vld [vmem:[%s12940_s18 + $0x148] sm:$0xff] }
 0xd60   :  { %9663 = vmatpush1.bf16.msra.mxu1 %v9662_v33  ;;  %v11953_v33 = vpack.c.bf16 %v5983_v29, %v5981_v27  ;;  %v6007_v27 = vld [vmem:[%s12940_s18 + $0x1f8] sm:$0xff] }
 0xd61   :  { %9665 = vmatprep.subr.bf16.mxu1 %v9664_v28  ;;  %v5979_v28 = vld [vmem:[%s12940_s18 + $0x118] sm:$0xff] }
 0xd62   :  { %v11935_v14 = vpack.c.bf16 %v5979_v28, %v5977_v16  ;;  %v6002_v16 = vld [vmem:[%s12940_s18 + $0x1d0] sm:$0xff] }
 0xd63   :  { %8976 = vmatmul.mubr.msk.f32.vlgmr.msra.gmra.mrb[44].mxu1 %vm5345_vm6, %v8968_v63 }
 0xd64   :  { %9667 = vmatpush1.bf16.msra.mxu1 %v9666_v9  ;;  %5723 = vmatprep.mubr.f32.mxu1 %v12956_v23  ;;  %v5972_v9 = vld [vmem:[%s12940_s18 + $0xe0] sm:$0xff] }
 0xd65   :  { %9669 = vmatprep.subr.bf16.mxu1 %v9668_v52  ;;  %v11925_v55 = vpack.c.bf16 %v5974_v43, %v5972_v9  ;;  %v5987_v52 = vld [vmem:[%s12940_s18 + $0x158] sm:$0xff]  ;;  %v12043_v9 = vpack.c.bf16 %v6003_v53, %v6001_v56  ;;  %v6000_v43 = vld [vmem:[%s12940_s18 + $0x1c0] sm:$0xff] }
 0xd66   :  { %v11971_v63 = vpack.c.bf16 %v5987_v52, %v5985_v51  ;;  %v12051_v28 = vpack.c.bf16 %v6002_v16, %v6000_v43  ;;  %v6006_v51 = vld [vmem:[%s12940_s18 + $0x1f0] sm:$0xff] }
 0xd67   :  { %8977 = vmatmul.mubr.msk.f32.gmra.mrb[46].mxu1 %vm5345_vm6, %v8969_v38  ;;  %9703 = vmatpush1.bf16.msra.mxu0 %v11925_v55  ;;  %v5984_v38 = vld [vmem:[%s12940_s18 + $0x140] sm:$0xff] }
 0xd68   :  { %9671 = vmatpush1.bf16.msra.mxu1 %v9670_v44  ;;  %5729 = vmatprep.mubr.f32.mxu1 %v12956_v23  ;;  %v5980_v44 = vld [vmem:[%s12940_s18 + $0x120] sm:$0xff] }
 0xd69   :  { %9705 = vmatprep.subr.bf16.mxu0 %v11935_v14  ;;  %v11961_v48 = vpack.c.bf16 %v5982_v17, %v5980_v44  ;;  %v12061_v44 = vpack.c.bf16 %v6007_v27, %v6005_v12  ;;  %v6004_v17 = vld [vmem:[%s12940_s18 + $0x1e0] sm:$0xff] }
 0xd6a   :  { %v12069_v52 = vpack.c.bf16 %v6006_v51, %v6004_v17 }
 0xd6b   :  { %8978 = vmatmul.mubr.msk.f32.gmra.mrb[48].mxu1 %vm5345_vm6, %v8970_v30  ;;  %9707 = vmatpush1.bf16.msra.mxu0 %v11943_v26  ;;  %v5986_v30 = vld [vmem:[%s12940_s18 + $0x150] sm:$0xff] }
 0xd6c   :  { %5735 = vmatprep.mubr.f32.mxu1 %v12956_v23  ;;  %9709 = vmatprep.subr.bf16.mxu0 %v11953_v33 }
 0xd6f   :  { %8979 = vmatmul.mubr.msk.f32.gmra.mrb[50].mxu1 %vm5345_vm6, %v8971_v57  ;;  %9711 = vmatpush1.bf16.msra.mxu0 %v11961_v48  ;;  %v11979_v57 = vpack.c.bf16 %v5986_v30, %v5984_v38 }
 0xd70   :  { %5741 = vmatprep.mubr.f32.mxu1 %v12956_v23  ;;  %9713 = vmatprep.subr.bf16.mxu0 %v11971_v63 }
 0xd73   :  { %8980 = vmatmul.mubr.msk.f32.gmra.mrb[52].mxu1 %vm5345_vm6, %v8972_v21  ;;  %9715 = vmatpush1.bf16.msra.mxu0 %v11979_v57  ;;  %v5989_v21 = vld [vmem:[%s12940_s18 + $0x168] sm:$0xff] }
 0xd74   :  { %5747 = vmatprep.mubr.f32.mxu1 %v12956_v23 }
 0xd77   :  { %8981 = vmatmul.mubr.msk.f32.gmra.mrb[54].mxu1 %vm5345_vm6, %v8973_v54  ;;  %v5991_v54 = vld [vmem:[%s12940_s18 + $0x178] sm:$0xff] }
 0xd78   :  { %5753 = vmatprep.mubr.f32.mxu1 %v12956_v23 }
 0xd7b   :  { %8982 = vmatmul.mubr.msk.f32.gmra.mrb[56].mxu1 %vm5345_vm6, %v8974_v60  ;;  %v11989_v60 = vpack.c.bf16 %v5991_v54, %v5989_v21 }
 0xd7c   :  { %5759 = vmatprep.mubr.f32.mxu1 %v12956_v23 }
 0xd7d   :  { %9717 = vmatprep.subr.bf16.mxu0 %v11989_v60 }
 0xd7f   :  { %8983 = vmatmul.mubr.msk.f32.gmra.mrb[58].mxu1 %vm5345_vm6, %v8975_v15  ;;  %v5988_v15 = vld [vmem:[%s12940_s18 + $0x160] sm:$0xff] }
 0xd80   :  { %5879 = vmatprep.mubr.f32.mxu1 %v12956_v23 }
 0xd83   :  { %8992 = vmatmul.mubr.msk.f32.vlgmr.msra.gmra.mrb[44].mxu1 %vm5345_vm6, %v8984_v46  ;;  %v5990_v46 = vld [vmem:[%s12940_s18 + $0x170] sm:$0xff] }
 0xd84   :  { %5885 = vmatprep.mubr.f32.mxu1 %v12956_v23 }
 0xd87   :  { %8993 = vmatmul.mubr.msk.f32.gmra.mrb[46].mxu1 %vm5345_vm6, %v8985_v0  ;;  %v11997_v0 = vpack.c.bf16 %v5990_v46, %v5988_v15 }
 0xd88   :  { %5891 = vmatprep.mubr.f32.mxu1 %v12956_v23 }
 0xd89   :  { %9719 = vmatpush1.bf16.msra.mxu0 %v11997_v0 }
 0xd8b   :  { %8994 = vmatmul.mubr.msk.f32.gmra.mrb[48].mxu1 %vm5345_vm6, %v8986_v6  ;;  %v5993_v6 = vld [vmem:[%s12940_s18 + $0x188] sm:$0xff] }
 0xd8c   :  { %5897 = vmatprep.mubr.f32.mxu1 %v12956_v23 }
 0xd8f   :  { %8995 = vmatmul.mubr.msk.f32.gmra.mrb[50].mxu1 %vm5345_vm6, %v8987_v18  ;;  %v5995_v18 = vld [vmem:[%s12940_s18 + $0x198] sm:$0xff] }
 0xd90   :  { %5903 = vmatprep.mubr.f32.mxu1 %v12956_v23 }
 0xd93   :  { %8996 = vmatmul.mubr.msk.f32.gmra.mrb[52].mxu1 %vm5345_vm6, %v8988_v34  ;;  %v12007_v34 = vpack.c.bf16 %v5995_v18, %v5993_v6 }
 0xd94   :  { %5909 = vmatprep.mubr.f32.mxu1 %v12956_v23 }
 0xd95   :  { %9721 = vmatprep.subr.bf16.mxu0 %v12007_v34 }
 0xd97   :  { %8997 = vmatmul.mubr.msk.f32.gmra.mrb[54].mxu1 %vm5345_vm6, %v8989_v36  ;;  %v5992_v36 = vld [vmem:[%s12940_s18 + $0x180] sm:$0xff] }
 0xd98   :  { %5915 = vmatprep.mubr.f32.mxu1 %v12956_v23 }
 0xd9b   :  { %8998 = vmatmul.mubr.msk.f32.gmra.mrb[56].mxu1 %vm5345_vm6, %v8990_v31  ;;  %v5994_v31 = vld [vmem:[%s12940_s18 + $0x190] sm:$0xff] }
 0xd9c   :  { %5921 = vmatprep.mubr.f32.mxu1 %v12956_v23 }
 0xd9f   :  { %8999 = vmatmul.mubr.msk.f32.gmra.mrb[58].mxu1 %vm5345_vm6, %v8991_v49  ;;  %v12015_v49 = vpack.c.bf16 %v5994_v31, %v5992_v36 }
 0xda1   :  { %9723 = vmatpush1.bf16.msra.mxu0 %v12015_v49 }
 0xda2   :  { %9725 = vmatprep.subr.bf16.mxu0 %v12025_v61 }
 0xda5   :  { %9727 = vmatpush1.bf16.msra.mxu0 %v12033_v25 }
 0xda6   :  { %9729 = vmatprep.subr.bf16.mxu0 %v12043_v9 }
 0xda9   :  { %9731 = vmatpush1.bf16.msra.mxu0 %v12051_v28 }
 0xdaa   :  { %9733 = vmatprep.subr.bf16.mxu0 %v12061_v44 }
 0xdad   :  { %9735 = vmatpush1.bf16.msra.mxu0 %v12069_v52 }
 0xdae   :  { %9737 = vmatprep.subr.bf16.mxu0 %v11642_v45 }
 0xdf6   :  { %v5436_v8 = vpop.f32.mrb[46].mxu0 }
 0xdf7   :  { %v5438_v20 = vpop.f32.mrb[47].mxu0 }
 0xdfa   :  { %v5442_v42 = vpop.f32.mrb[64].mxu0 }
 0xdfb   :  { %v5444_v7 = vpop.f32.mrb[65].mxu0 }
 0xdfe   :  { %v5448_v24 = vpop.f32.mrb[66].mxu0 }
 0xdff   :  { %v5450_v29 = vpop.f32.mrb[67].mxu0 }
 0xe02   :  { %v5454_v38 = vpop.f32.mrb[68].mxu0 }
 0xe03   :  { %v5456_v30 = vpop.f32.mrb[69].mxu0 }
 0xe06   :  { %v5460_v21 = vpop.f32.mrb[70].mxu0 }
 0xe07   :  { %v5462_v54 = vpop.f32.mrb[71].mxu0 }
 0xe0a   :  { %v5466_v15 = vpop.f32.mrb[72].mxu0 }
 0xe0b   :  { %v5468_v46 = vpop.f32.mrb[73].mxu0 }
 0xe0e   :  { %v5472_v6 = vpop.f32.mrb[74].mxu0 }
 0xe0f   :  { %v5474_v18 = vpop.f32.mrb[75].mxu0 }
 0xe12   :  { %v5478_v36 = vpop.f32.mrb[76].mxu0 }
 0xe13   :  { %v5480_v31 = vpop.f32.mrb[77].mxu0 }
 0xe56   :  { %v5881_v10 = vpop.f32.mrb[44].mxu1 }
 0xe57   :  { %v12074_v37 = vadd.f32 %v5881_v10, %v5436_v8  ;;  %v5883_v19 = vpop.f32.mrb[45].mxu1 }
 0xe58   :  { %v12076_v11 = vadd.f32 %v5883_v19, %v5438_v20 }
 0xe5a   :  { %v5887_v56 = vpop.f32.mrb[46].mxu1 }
 0xe5b   :  { %v12078_v53 = vadd.f32 %v5887_v56, %v5442_v42  ;;  %v5889_v43 = vpop.f32.mrb[47].mxu1 }
 0xe5c   :  { %v12080_v16 = vadd.f32 %v5889_v43, %v5444_v7 }
 0xe5d   :  { %v6008_v7 = vadd.f32 %v12078_v53, %v12074_v37 }
 0xe5e   :  { %v5893_v45 = vpop.f32.mrb[48].mxu1 }
 0xe5f   :  { %v12082_v12 = vadd.f32 %v5893_v45, %v5448_v24  ;;  %v5895_v27 = vpop.f32.mrb[49].mxu1  ;;  %v6021_v24 = vadd.f32 %v12080_v16, %v12076_v11 }
 0xe60   :  { %v12084_v17 = vadd.f32 %v5895_v27, %v5450_v29 }
 0xe61   :  { %v6009_v43 = vadd.f32 %v12082_v12, %v6008_v7 }
 0xe62   :  { %v5899_v51 = vpop.f32.mrb[50].mxu1 }
 0xe63   :  { %v12086_v23 = vadd.f32 %v5899_v51, %v5454_v38  ;;  %v5901_v8 = vpop.f32.mrb[51].mxu1 }
 0xe64   :  { %v12088_v10 = vadd.f32 %v5901_v8, %v5456_v30  ;;  %v6022_v30 = vadd.f32 %v12084_v17, %v6021_v24 }
 0xe66   :  { %v5905_v20 = vpop.f32.mrb[52].mxu1 }
 0xe67   :  { %v12090_v19 = vadd.f32 %v5905_v20, %v5460_v21  ;;  %v5907_v42 = vpop.f32.mrb[53].mxu1  ;;  %v6010_v21 = vadd.f32 %v12086_v23, %v6009_v43 }
 0xe68   :  { %v12092_v56 = vadd.f32 %v5907_v42, %v5462_v54  ;;  %v6023_v54 = vadd.f32 %v12088_v10, %v6022_v30 }
 0xe69   :  { %12988 = vst [vmem:[#allocation19_spill] sm:$0xff] %v12090_v19  ;;  %v6011_v8 = vadd.f32 %v12090_v19, %v6010_v21 }
 0xe6a   :  { %v5911_v29 = vpop.f32.mrb[54].mxu1  ;;  %v6024_v41 = vadd.f32 %v12092_v56, %v6023_v54 }
 0xe6b   :  { %v12099_v38 = vadd.f32 %v5911_v29, %v5466_v15  ;;  %v5913_v45 = vpop.f32.mrb[55].mxu1 }
 0xe6c   :  { %v12102_v27 = vadd.f32 %v5913_v45, %v5468_v46 }
 0xe6d   :  { %12989 = vst [vmem:[#allocation20_spill] sm:$0xff] %v12099_v38  ;;  %v6012_v15 = vadd.f32 %v12099_v38, %v6011_v8 }
 0xe6e   :  { %v5917_v51 = vpop.f32.mrb[56].mxu1  ;;  %v6025_v24 = vadd.f32 %v12102_v27, %v6024_v41 }
 0xe6f   :  { %v12107_v20 = vadd.f32 %v5917_v51, %v5472_v6  ;;  %v5919_v42 = vpop.f32.mrb[57].mxu1 }
 0xe70   :  { %v12110_v7 = vadd.f32 %v5919_v42, %v5474_v18 }
 0xe71   :  { %12990 = vst [vmem:[#allocation21_spill] sm:$0xff] %v12107_v20  ;;  %v6013_v29 = vadd.f32 %v12107_v20, %v6012_v15 }
 0xe72   :  { %v5923_v46 = vpop.f32.mrb[58].mxu1  ;;  %v6026_v30 = vadd.f32 %v12110_v7, %v6025_v24 }
 0xe73   :  { %v12115_v43 = vadd.f32 %v5923_v46, %v5478_v36  ;;  %v5925_v45 = vpop.f32.mrb[59].mxu1 }
 0xe74   :  { %v12118_v21 = vadd.f32 %v5925_v45, %v5480_v31  ;;  %v6399_v31 = vld [vmem:[#allocation12 + $0x1c0] sm:$0xff] }
 0xe75   :  { %v6014_v6 = vadd.f32 %v12115_v43, %v6013_v29 }
 0xe76   :  { %v6027_v54 = vadd.f32 %v12118_v21, %v6026_v30 }
 0xe77   :  { %v6015_v18 = vrot.slane %v6014_v6, 4 }
 0xe78   :  { %v6028_v51 = vrot.slane %v6027_v54, 4 }
 0xe79   :  { %v6016_v42 = vadd.f32 %v6015_v18, %v6014_v6 }
 0xe7a   :  { %v6029_v8 = vadd.f32 %v6028_v51, %v6027_v54 }
 0xe7b   :  { %v6017_v32 = vrot.slane %v6016_v42, 2 }
 0xe7c   :  { %v6030_v41 = vrot.slane %v6029_v8, 2 }
 0xe7d   :  { %v6018_v38 = vadd.f32 %v6017_v32, %v6016_v42  ;;  %v6343_v32 = vld [vmem:[#allocation12] sm:$0xff] }
 0xe7e   :  { %v6031_v19 = vadd.f32 %v6030_v41, %v6029_v8 }
 0xe7f   :  { %v6019_v15 = vrot.slane %v6018_v38, 1 }
 0xe80   :  { %v6032_v36 = vrot.slane %v6031_v19, 1 }
 0xe81   :  { %v6020_v20 = vadd.f32 %v6019_v15, %v6018_v38 }
 0xe82   :  { %v6033_v46 = vadd.f32 %v6032_v36, %v6031_v19  ;;  %v6403_v19 = vld [vmem:[#allocation12 + $0x1e0] sm:$0xff] }
 0xe83   :  { %v9057_v38 = vcombine.high %v6399_v31, %v6403_v19 }
 0xe84   :  { %6098 = vmatprep.mubr.f32.mxu0 %v6033_v46 }
 0xe85   :  { %6099 = vmatmul.mubr.f32.vlgmr.msra.gmra.mrb[78].mxu0 %v6020_v20  ;;  %v9056_v20 = vcombine.low %v6399_v31, %v6403_v19 }
 0xe86   :  { %9739 = vmatpush1.bf16.msra.mxu0 %v11653_v5  ;;  %v6347_v5 = vld [vmem:[#allocation12 + $0x20] sm:$0xff] }
 0xe87   :  { %9741 = vmatprep.subr.bf16.mxu0 %v11656_v62  ;;  %v12153_v62 = vld [vmem:[#allocation12 + $0x8] sm:$0xff] }
 0xe8a   :  { %9743 = vmatpush1.bf16.msra.mxu0 %v11681_v4  ;;  %v9000_v4 = vcombine.low %v6343_v32, %v6347_v5 }
 0xe8b   :  { %9745 = vmatprep.subr.bf16.mxu0 %v11684_v40  ;;  %v9001_v40 = vcombine.high %v6343_v32, %v6347_v5  ;;  %v12991_v32 = vld [vmem:[#allocation19_spill] sm:$0xff] }
 0xe8d   :  { %7111 = vmatprep.subr.bf16.mxu1 %v9001_v40 }
 0xe8e   :  { %9747 = vmatpush1.bf16.msra.mxu0 %v11709_v3  ;;  %v12155_v3 = vld [vmem:[#allocation12 + $0x28] sm:$0xff]  ;;  %7112 = vmatpush1.bf16.msra.mxu1 %v9000_v4 }
 0xe8f   :  { %9749 = vmatprep.subr.bf16.mxu0 %v11712_v47  ;;  %v6351_v47 = vld [vmem:[#allocation12 + $0x40] sm:$0xff] }
 0xe92   :  { %9751 = vmatpush1.bf16.msra.mxu0 %v11737_v35  ;;  %v6355_v35 = vld [vmem:[#allocation12 + $0x60] sm:$0xff] }
 0xe93   :  { %9753 = vmatprep.subr.bf16.mxu0 %v11740_v39  ;;  %v9002_v39 = vcombine.low %v12153_v62, %v12155_v3 }
 0xe96   :  { %9755 = vmatpush1.bf16.msra.mxu0 %v11872_v58  ;;  %v9003_v58 = vcombine.high %v12153_v62, %v12155_v3 }
 0xe97   :  { %9757 = vmatprep.subr.bf16.mxu0 %v11881_v50  ;;  %v9009_v50 = vcombine.high %v6351_v47, %v6355_v35 }
 0xe99   :  { %7113 = vmatprep.subr.bf16.mxu1 %v9009_v50 }
 0xe9a   :  { %9759 = vmatpush1.bf16.msra.mxu0 %v11889_v22  ;;  %v9008_v22 = vcombine.low %v6351_v47, %v6355_v35 }
 0xe9b   :  { %9761 = vmatprep.subr.bf16.mxu0 %v11899_v59  ;;  %v6359_v59 = vld [vmem:[#allocation12 + $0x80] sm:$0xff] }
 0xe9c   :  { %7114 = vmatpush1.bf16.msra.mxu1 %v9008_v22 }
 0xe9e   :  { %9763 = vmatpush1.bf16.msra.mxu0 %v11907_v1  ;;  %v6363_v1 = vld [vmem:[#allocation12 + $0xa0] sm:$0xff] }
 0xe9f   :  { %9765 = vmatprep.subr.bf16.mxu0 %v11917_v2  ;;  %v9017_v2 = vcombine.high %v6359_v59, %v6363_v1 }
 0xea1   :  { %7115 = vmatprep.subr.bf16.mxu1 %v9017_v2 }
 0xea2   :  { %9767 = vmatpush1.bf16.msra.mxu0 %v11925_v55  ;;  %v9016_v55 = vcombine.low %v6359_v59, %v6363_v1 }
 0xea3   :  { %9769 = vmatprep.subr.bf16.mxu0 %v11935_v14  ;;  %v6367_v14 = vld [vmem:[#allocation12 + $0xc0] sm:$0xff] }
 0xea4   :  { %7116 = vmatpush1.bf16.msra.mxu1 %v9016_v55 }
 0xea6   :  { %9771 = vmatpush1.bf16.msra.mxu0 %v11943_v26  ;;  %v6371_v26 = vld [vmem:[#allocation12 + $0xe0] sm:$0xff] }
 0xea7   :  { %9773 = vmatprep.subr.bf16.mxu0 %v11953_v33  ;;  %v9025_v33 = vcombine.high %v6367_v14, %v6371_v26 }
 0xea9   :  { %7117 = vmatprep.subr.bf16.mxu1 %v9025_v33 }
 0xeaa   :  { %9775 = vmatpush1.bf16.msra.mxu0 %v11961_v48  ;;  %v9024_v48 = vcombine.low %v6367_v14, %v6371_v26 }
 0xeab   :  { %9777 = vmatprep.subr.bf16.mxu0 %v11971_v63  ;;  %v6375_v63 = vld [vmem:[#allocation12 + $0x100] sm:$0xff] }
 0xeac   :  { %7118 = vmatpush1.bf16.msra.mxu1 %v9024_v48 }
 0xeae   :  { %9779 = vmatpush1.bf16.msra.mxu0 %v11979_v57  ;;  %v6379_v57 = vld [vmem:[#allocation12 + $0x120] sm:$0xff] }
 0xeaf   :  { %9781 = vmatprep.subr.bf16.mxu0 %v11989_v60  ;;  %v9033_v60 = vcombine.high %v6375_v63, %v6379_v57 }
 0xeb1   :  { %7119 = vmatprep.subr.bf16.mxu1 %v9033_v60 }
 0xeb2   :  { %9783 = vmatpush1.bf16.msra.mxu0 %v11997_v0  ;;  %v9032_v0 = vcombine.low %v6375_v63, %v6379_v57 }
 0xeb3   :  { %9785 = vmatprep.subr.bf16.mxu0 %v12007_v34  ;;  %v6383_v34 = vld [vmem:[#allocation12 + $0x140] sm:$0xff] }
 0xeb4   :  { %7120 = vmatpush1.bf16.msra.mxu1 %v9032_v0 }
 0xeb6   :  { %9787 = vmatpush1.bf16.msra.mxu0 %v12015_v49  ;;  %v6387_v49 = vld [vmem:[#allocation12 + $0x160] sm:$0xff] }
 0xeb7   :  { %9789 = vmatprep.subr.bf16.mxu0 %v12025_v61  ;;  %v9041_v61 = vcombine.high %v6383_v34, %v6387_v49 }
 0xeb9   :  { %7121 = vmatprep.subr.bf16.mxu1 %v9041_v61 }
 0xeba   :  { %9791 = vmatpush1.bf16.msra.mxu0 %v12033_v25  ;;  %v9040_v25 = vcombine.low %v6383_v34, %v6387_v49 }
 0xebb   :  { %9793 = vmatprep.subr.bf16.mxu0 %v12043_v9  ;;  %v6391_v9 = vld [vmem:[#allocation12 + $0x180] sm:$0xff] }
 0xebc   :  { %7122 = vmatpush1.bf16.msra.mxu1 %v9040_v25 }
 0xebe   :  { %9795 = vmatpush1.bf16.msra.mxu0 %v12051_v28  ;;  %v6395_v28 = vld [vmem:[#allocation12 + $0x1a0] sm:$0xff] }
 0xebf   :  { %9797 = vmatprep.subr.bf16.mxu0 %v12061_v44  ;;  %v9049_v44 = vcombine.high %v6391_v9, %v6395_v28 }
 0xec1   :  { %7123 = vmatprep.subr.bf16.mxu1 %v9049_v44 }
 0xec2   :  { %9799 = vmatpush1.bf16.msra.mxu0 %v12069_v52  ;;  %v9048_v52 = vcombine.low %v6391_v9, %v6395_v28 }
 0xec3   :  { %7184 = vmatprep.subr.bf16.mxu0 %v9003_v58 }
 0xec4   :  { %7124 = vmatpush1.bf16.msra.mxu1 %v9048_v52 }
 0xec5   :  { %7125 = vmatprep.subr.bf16.mxu1 %v9057_v38 }
 0xec8   :  { %7126 = vmatpush1.bf16.msra.mxu1 %v9056_v20 }
 0xf58   :  { %v6100_v24 = vpop.f32.mrb[78].mxu0 }
 0xf59   :  { %v6108_v29 = vrot.slane %v6100_v24, %v10774_v13  ;;  %v6102_v45 = vpop.f32.mrb[79].mxu0 }
 0xf5a   :  { %v6112_v30 = vrot.slane %v6102_v45, %v10774_v13 }
 0xf5b   :  { %v12173_v51 = vsub.f32 %v12074_v37, %v6108_v29  ;;  %v12176_v42 = vsub.f32 %v12078_v53, %v6108_v29  ;;  %v12194_v15 = vsub.f32 %v12086_v23, %v6108_v29  ;;  %v12206_v5 = vsub.f32 %v12991_v32, %v6108_v29  ;;  %v6368_v32 = vld [vmem:[#allocation12 + $0xc8] sm:$0xff] }
 0xf5c   :  { %v12164_v6 = vsub.f32 %v12076_v11, %v6112_v30  ;;  %v12167_v54 = vsub.f32 %v12080_v16, %v6112_v30  ;;  %v12170_v18 = vsub.f32 %v12084_v17, %v6112_v30  ;;  %v12179_v8 = vsub.f32 %v12088_v10, %v6112_v30 }
 0xf5d   :  { %v12186_v16 = vsub.f32 %v12082_v12, %v6108_v29  ;;  %v12189_v17 = vsub.f32 %v12092_v56, %v6112_v30  ;;  %v6129_v10 = vmul.f32 %v12173_v51, %v12173_v51  ;;  %v6131_v36 = vmul.f32 %v12176_v42, %v12176_v42 }
 0xf5e   :  { %v6130_v41 = vmul.f32 %v12164_v6, %v12164_v6  ;;  %v6132_v11 = vmul.f32 %v12167_v54, %v12167_v54  ;;  %v6134_v37 = vmul.f32 %v12170_v18, %v12170_v18  ;;  %v12201_v46 = vsub.f32 %v12102_v27, %v6112_v30  ;;  %v12992_v27 = vld [vmem:[#allocation20_spill] sm:$0xff] }
 0xf5f   :  { %v6136_v12 = vmul.f32 %v12179_v8, %v12179_v8  ;;  %v6133_v23 = vmul.f32 %v12186_v16, %v12186_v16  ;;  %v6145_v4 = vadd.f32 %v6131_v36, %v6129_v10  ;;  %v12211_v40 = vsub.f32 %v12110_v7, %v6112_v30  ;;  %v12993_v7 = vld [vmem:[#allocation21_spill] sm:$0xff]  ;;  %v6360_v10 = vld [vmem:[#allocation12 + $0x88] sm:$0xff] }
 0xf60   :  { %v6158_v53 = vadd.f32 %v6132_v11, %v6130_v41  ;;  %v6138_v47 = vmul.f32 %v12189_v17, %v12189_v17  ;;  %v12216_v58 = vsub.f32 %v12992_v27, %v6108_v29  ;;  %v6135_v50 = vmul.f32 %v12194_v15, %v12194_v15  ;;  %v6356_v41 = vld [vmem:[#allocation12 + $0x68] sm:$0xff] }
 0xf61   :  { %v6146_v22 = vadd.f32 %v6145_v4, %v6133_v23  ;;  %v12221_v59 = vsub.f32 %v12118_v21, %v6112_v30  ;;  %v6140_v1 = vmul.f32 %v12201_v46, %v12201_v46  ;;  %v12226_v55 = vsub.f32 %v12993_v7, %v6108_v29  ;;  %v6352_v30 = vld [vmem:[#allocation12 + $0x48] sm:$0xff] }
 0xf62   :  { %v6159_v56 = vadd.f32 %v6158_v53, %v6134_v37  ;;  %v6137_v14 = vmul.f32 %v12206_v5, %v12206_v5  ;;  %v6142_v33 = vmul.f32 %v12211_v40, %v12211_v40  ;;  %v12233_v63 = vsub.f32 %v12115_v43, %v6108_v29  ;;  %v6364_v36 = vld [vmem:[#allocation12 + $0xa8] sm:$0xff] }
 0xf63   :  { %v6147_v26 = vadd.f32 %v6146_v22, %v6135_v50  ;;  %v6139_v21 = vmul.f32 %v12216_v58, %v12216_v58  ;;  %v6144_v60 = vmul.f32 %v12221_v59, %v12221_v59  ;;  %v6141_v34 = vmul.f32 %v12226_v55, %v12226_v55  ;;  %v6372_v23 = vld [vmem:[#allocation12 + $0xe8] sm:$0xff] }
 0xf64   :  { %v6160_v35 = vadd.f32 %v6159_v56, %v6136_v12  ;;  %v6143_v25 = vmul.f32 %v12233_v63, %v12233_v63  ;;  %v9011_v53 = vcombine.high %v6352_v30, %v6356_v41  ;;  %v9010_v12 = vcombine.low %v6352_v30, %v6356_v41  ;;  %v6380_v27 = vld [vmem:[#allocation12 + $0x128] sm:$0xff]  ;;  %v6427_v30 = vld [vmem:[#allocation12 + $0x2a0] sm:$0xff] }
 0xf65   :  { %v6148_v57 = vadd.f32 %v6147_v26, %v6137_v14  ;;  %v9019_v56 = vcombine.high %v6360_v10, %v6364_v36  ;;  %v9018_v4 = vcombine.low %v6360_v10, %v6364_v36  ;;  %v9026_v50 = vcombine.low %v6368_v32, %v6372_v23  ;;  %v6396_v7 = vld [vmem:[#allocation12 + $0x1a8] sm:$0xff] }
 0xf66   :  { %v6161_v2 = vadd.f32 %v6160_v35, %v6138_v47  ;;  %v9027_v47 = vcombine.high %v6368_v32, %v6372_v23  ;;  %v6376_v35 = vld [vmem:[#allocation12 + $0x108] sm:$0xff] }
 0xf67   :  { %v6149_v49 = vadd.f32 %v6148_v57, %v6139_v21  ;;  %v9035_v22 = vcombine.high %v6376_v35, %v6380_v27  ;;  %v9034_v62 = vcombine.low %v6376_v35, %v6380_v27  ;;  %v6424_v41 = vld [vmem:[#allocation12 + $0x288] sm:$0xff] }
 0xf68   :  { %v6162_v48 = vadd.f32 %v6161_v2, %v6140_v1  ;;  %v6384_v1 = vld [vmem:[#allocation12 + $0x148] sm:$0xff] }
 0xf69   :  { %v6150_v9 = vadd.f32 %v6149_v49, %v6141_v34  ;;  %v6388_v2 = vld [vmem:[#allocation12 + $0x168] sm:$0xff]  ;;  %v6411_v34 = vld [vmem:[#allocation12 + $0x220] sm:$0xff] }
 0xf6a   :  { %v6163_v0 = vadd.f32 %v6162_v48, %v6142_v33  ;;  %v9043_v3 = vcombine.high %v6384_v1, %v6388_v2  ;;  %v9042_v14 = vcombine.low %v6384_v1, %v6388_v2  ;;  %v6400_v33 = vld [vmem:[#allocation12 + $0x1c8] sm:$0xff] }
 0xf6b   :  { %v6151_v43 = vadd.f32 %v6150_v9, %v6143_v25  ;;  %v6404_v48 = vld [vmem:[#allocation12 + $0x1e8] sm:$0xff] }
 0xf6c   :  { %v6164_v61 = vadd.f32 %v6163_v0, %v6144_v60  ;;  %v9059_v57 = vcombine.high %v6400_v33, %v6404_v48  ;;  %v9058_v60 = vcombine.low %v6400_v33, %v6404_v48  ;;  %v6407_v0 = vld [vmem:[#allocation12 + $0x200] sm:$0xff]  ;;  %v6408_v49 = vld [vmem:[#allocation12 + $0x208] sm:$0xff] }
 0xf6d   :  { %v6152_v52 = vrot.slane %v6151_v43, 4  ;;  %v6412_v25 = vld [vmem:[#allocation12 + $0x228] sm:$0xff]  ;;  %v9064_v9 = vcombine.low %v6407_v0, %v6411_v34 }
 0xf6e   :  { %v6165_v28 = vrot.slane %v6164_v61, 4  ;;  %v6432_v32 = vld [vmem:[#allocation12 + $0x2c8] sm:$0xff] }
 0xf6f   :  { %v6153_v19 = vadd.f32 %v6152_v52, %v6151_v43  ;;  %v9067_v43 = vcombine.high %v6408_v49, %v6412_v25  ;;  %v6419_v52 = vld [vmem:[#allocation12 + $0x260] sm:$0xff]  ;;  %v6440_v1 = vld [vmem:[#allocation12 + $0x308] sm:$0xff] }
 0xf70   :  { %v6166_v44 = vadd.f32 %v6165_v28, %v6164_v61  ;;  %v9065_v61 = vcombine.high %v6407_v0, %v6411_v34  ;;  %v9066_v28 = vcombine.low %v6408_v49, %v6412_v25  ;;  %v6448_v33 = vld [vmem:[#allocation12 + $0x348] sm:$0xff]  ;;  %v6459_v0 = vld [vmem:[#allocation12 + $0x3a0] sm:$0xff] }
 0xf71   :  { %v6154_v20 = vrot.slane %v6153_v19, 2  ;;  %v6456_v25 = vld [vmem:[#allocation12 + $0x388] sm:$0xff] }
 0xf72   :  { %v6167_v31 = vrot.slane %v6166_v44, 2  ;;  %7127 = vmatprep.subr.bf16.mxu1 %v9065_v61 }
 0xf73   :  { %v6155_v29 = vadd.f32 %v6154_v20, %v6153_v19  ;;  %7128 = vmatpush1.bf16.msra.mxu1 %v9064_v9  ;;  %v6460_v9 = vld [vmem:[#allocation12 + $0x3a8] sm:$0xff] }
 0xf74   :  { %v6168_v38 = vadd.f32 %v6167_v31, %v6166_v44  ;;  %v6415_v44 = vld [vmem:[#allocation12 + $0x240] sm:$0xff]  ;;  %v6416_v31 = vld [vmem:[#allocation12 + $0x248] sm:$0xff] }
 0xf75   :  { %v6156_v11 = vrot.slane %v6155_v29, 1  ;;  %v9073_v19 = vcombine.high %v6415_v44, %v6419_v52  ;;  %v9072_v20 = vcombine.low %v6415_v44, %v6419_v52  ;;  %v6467_v44 = vld [vmem:[#allocation12 + $0x3e0] sm:$0xff]  ;;  %v6464_v52 = vld [vmem:[#allocation12 + $0x3c8] sm:$0xff] }
 0xf76   :  { %v6169_v24 = vrot.slane %v6168_v38, 1 }
 0xf77   :  { %v6157_v37 = vadd.f32 %v6156_v11, %v6155_v29  ;;  %7129 = vmatprep.subr.bf16.mxu1 %v9073_v19 }
 0xf78   :  { %v6170_v45 = vadd.f32 %v6169_v24, %v6168_v38  ;;  %v6420_v38 = vld [vmem:[#allocation12 + $0x268] sm:$0xff]  ;;  %7130 = vmatpush1.bf16.msra.mxu1 %v9072_v20 }
 0xf79   :  { %v9074_v24 = vcombine.low %v6416_v31, %v6420_v38  ;;  %v9075_v29 = vcombine.high %v6416_v31, %v6420_v38  ;;  %v6468_v31 = vld [vmem:[#allocation12 + $0x3e8] sm:$0xff]  ;;  %v9114_v38 = vcombine.low %v6456_v25, %v6460_v9 }
 0xf7a   :  { %6236 = vmatprep.mubr.f32.mxu0 %v6170_v45  ;;  %v6423_v45 = vld [vmem:[#allocation12 + $0x280] sm:$0xff] }
 0xf7b   :  { %6237 = vmatmul.mubr.f32.vlgmr.msra.gmra.mrb[80].mxu0 %v6157_v37  ;;  %v9081_v11 = vcombine.high %v6423_v45, %v6427_v30  ;;  %v6428_v37 = vld [vmem:[#allocation12 + $0x2a8] sm:$0xff] }
 0xf7c   :  { %7185 = vmatpush1.bf16.msra.mxu0 %v9002_v39  ;;  %v6392_v39 = vld [vmem:[#allocation12 + $0x188] sm:$0xff]  ;;  %v9082_v10 = vcombine.low %v6424_v41, %v6428_v37  ;;  %v9083_v36 = vcombine.high %v6424_v41, %v6428_v37  ;;  %v12248_v41 = vld [vmem:[#allocation12 + $0x30] sm:$0xff] }
 0xf7d   :  { %7186 = vmatprep.subr.bf16.mxu0 %v9011_v53  ;;  %v9051_v26 = vcombine.high %v6392_v39, %v6396_v7  ;;  %v9050_v21 = vcombine.low %v6392_v39, %v6396_v7  ;;  %v9080_v53 = vcombine.low %v6423_v45, %v6427_v30  ;;  %7131 = vmatprep.subr.bf16.mxu1 %v9081_v11  ;;  %v12246_v30 = vld [vmem:[#allocation12 + $0x10] sm:$0xff]  ;;  %v12250_v11 = vld [vmem:[#allocation12 + $0x18] sm:$0xff] }
 0xf7e   :  { %v9122_v45 = vcombine.low %v6464_v52, %v6468_v31  ;;  %v9004_v37 = vcombine.low %v12246_v30, %v12248_v41 }
 0xf7f   :  { %7132 = vmatpush1.bf16.msra.mxu1 %v9080_v53  ;;  %v9005_v53 = vcombine.high %v12246_v30, %v12248_v41  ;;  %v6369_v41 = vld [vmem:[#allocation12 + $0xd0] sm:$0xff] }
 0xf80   :  { %7187 = vmatpush1.bf16.msra.mxu0 %v9010_v12  ;;  %v6431_v12 = vld [vmem:[#allocation12 + $0x2c0] sm:$0xff] }
 0xf81   :  { %7188 = vmatprep.subr.bf16.mxu0 %v9019_v56  ;;  %v6435_v56 = vld [vmem:[#allocation12 + $0x2e0] sm:$0xff] }
 0xf82   :  { %v9089_v23 = vcombine.high %v6431_v12, %v6435_v56 }
 0xf84   :  { %7189 = vmatpush1.bf16.msra.mxu0 %v9018_v4  ;;  %v6436_v4 = vld [vmem:[#allocation12 + $0x2e8] sm:$0xff]  ;;  %7133 = vmatprep.subr.bf16.mxu1 %v9089_v23 }
 0xf85   :  { %7190 = vmatprep.subr.bf16.mxu0 %v9027_v47  ;;  %v9088_v47 = vcombine.low %v6431_v12, %v6435_v56  ;;  %v9090_v35 = vcombine.low %v6432_v32, %v6436_v4  ;;  %v9091_v27 = vcombine.high %v6432_v32, %v6436_v4 }
 0xf87   :  { %7134 = vmatpush1.bf16.msra.mxu1 %v9088_v47 }
 0xf88   :  { %7191 = vmatpush1.bf16.msra.mxu0 %v9026_v50  ;;  %v6439_v50 = vld [vmem:[#allocation12 + $0x300] sm:$0xff] }
 0xf89   :  { %7192 = vmatprep.subr.bf16.mxu0 %v9035_v22  ;;  %v6443_v22 = vld [vmem:[#allocation12 + $0x320] sm:$0xff] }
 0xf8a   :  { %v9097_v2 = vcombine.high %v6439_v50, %v6443_v22 }
 0xf8c   :  { %7193 = vmatpush1.bf16.msra.mxu0 %v9034_v62  ;;  %v6444_v62 = vld [vmem:[#allocation12 + $0x328] sm:$0xff]  ;;  %7135 = vmatprep.subr.bf16.mxu1 %v9097_v2 }
 0xf8d   :  { %7194 = vmatprep.subr.bf16.mxu0 %v9043_v3  ;;  %v9096_v3 = vcombine.low %v6439_v50, %v6443_v22  ;;  %v9098_v39 = vcombine.low %v6440_v1, %v6444_v62  ;;  %v9099_v7 = vcombine.high %v6440_v1, %v6444_v62  ;;  %v12994_v50 = vld [vmem:[#allocation17_spill] sm:$0xff] }
 0xf8e   :  { %v6171_v1 = vld [vmem:[%s12941_s19] sm:$0x3] }
 0xf8f   :  { %7136 = vmatpush1.bf16.msra.mxu1 %v9096_v3  ;;  %v6291_v62 = vld [vmem:[%s12942_s20] sm:$0x3] }
 0xf90   :  { %7195 = vmatpush1.bf16.msra.mxu0 %v9042_v14  ;;  %v6447_v14 = vld [vmem:[#allocation12 + $0x340] sm:$0xff] }
 0xf91   :  { %7196 = vmatprep.subr.bf16.mxu0 %v9051_v26  ;;  %v6451_v26 = vld [vmem:[#allocation12 + $0x360] sm:$0xff] }
 0xf92   :  { %v9104_v48 = vcombine.low %v6447_v14, %v6451_v26 }
 0xf94   :  { %7197 = vmatpush1.bf16.msra.mxu0 %v9050_v21  ;;  %v9105_v21 = vcombine.high %v6447_v14, %v6451_v26  ;;  %v12277_v26 = vrot.slane %v6291_v62, %v10774_v13 }
 0xf95   :  { %7198 = vmatprep.subr.bf16.mxu0 %v9059_v57  ;;  %v6452_v57 = vld [vmem:[#allocation12 + $0x368] sm:$0xff] }
 0xf96   :  { %v9106_v34 = vcombine.low %v6448_v33, %v6452_v57  ;;  %v9107_v49 = vcombine.high %v6448_v33, %v6452_v57  ;;  %7137 = vmatprep.subr.bf16.mxu1 %v9105_v21 }
 0xf97   :  { %7138 = vmatpush1.bf16.msra.mxu1 %v9104_v48 }
 0xf98   :  { %7199 = vmatpush1.bf16.msra.mxu0 %v9058_v60  ;;  %v6455_v60 = vld [vmem:[#allocation12 + $0x380] sm:$0xff] }
 0xf99   :  { %7200 = vmatprep.subr.bf16.mxu0 %v9067_v43  ;;  %v9113_v61 = vcombine.high %v6455_v60, %v6459_v0  ;;  %v9115_v43 = vcombine.high %v6456_v25, %v6460_v9  ;;  %v9112_v19 = vcombine.low %v6455_v60, %v6459_v0 }
 0xf9b   :  { %7139 = vmatprep.subr.bf16.mxu1 %v9113_v61 }
 0xf9c   :  { %7201 = vmatpush1.bf16.msra.mxu0 %v9066_v28  ;;  %v6463_v28 = vld [vmem:[#allocation12 + $0x3c0] sm:$0xff]  ;;  %7140 = vmatpush1.bf16.msra.mxu1 %v9112_v19  ;;  %v6357_v19 = vld [vmem:[#allocation12 + $0x70] sm:$0xff] }
 0xf9d   :  { %7202 = vmatprep.subr.bf16.mxu0 %v9075_v29  ;;  %v9121_v20 = vcombine.high %v6463_v28, %v6467_v44  ;;  %v9120_v29 = vcombine.low %v6463_v28, %v6467_v44  ;;  %v6353_v44 = vld [vmem:[#allocation12 + $0x50] sm:$0xff] }
 0xf9f   :  { %7141 = vmatprep.subr.bf16.mxu1 %v9121_v20  ;;  %v6358_v20 = vld [vmem:[#allocation12 + $0x78] sm:$0xff] }
 0xfa0   :  { %7203 = vmatpush1.bf16.msra.mxu0 %v9074_v24  ;;  %v9123_v24 = vcombine.high %v6464_v52, %v6468_v31  ;;  %7142 = vmatpush1.bf16.msra.mxu1 %v9120_v29 }
 0xfa1   :  { %7204 = vmatprep.subr.bf16.mxu0 %v9083_v36  ;;  %7257 = vmatprep.subr.bf16.mxu1 %v9005_v53  ;;  %v6365_v53 = vld [vmem:[#allocation12 + $0xb0] sm:$0xff] }
 0xfa4   :  { %7205 = vmatpush1.bf16.msra.mxu0 %v9082_v10  ;;  %v12256_v10 = vld [vmem:[#allocation12 + $0x38] sm:$0xff] }
 0xfa5   :  { %7206 = vmatprep.subr.bf16.mxu0 %v9091_v27  ;;  %v9006_v36 = vcombine.low %v12250_v11, %v12256_v10  ;;  %v9007_v12 = vcombine.high %v12250_v11, %v12256_v10  ;;  %v6373_v10 = vld [vmem:[#allocation12 + $0xf0] sm:$0xff] }
 0xfa8   :  { %7207 = vmatpush1.bf16.msra.mxu0 %v9090_v35 }
 0xfa9   :  { %7208 = vmatprep.subr.bf16.mxu0 %v9099_v7  ;;  %v12995_v7 = vld [vmem:[#allocation18_spill] sm:$0xff] }
 0xfaa   :  { %v12280_v33 = vrot.slane %v6291_v62, %v12995_v7 }
 0xfac   :  { %7209 = vmatpush1.bf16.msra.mxu0 %v9098_v39 }
 0xfad   :  { %7210 = vmatprep.subr.bf16.mxu0 %v9107_v49 }
 0xfb0   :  { %7211 = vmatpush1.bf16.msra.mxu0 %v9106_v34 }
 0xfb1   :  { %7212 = vmatprep.subr.bf16.mxu0 %v9115_v43 }
 0xfb4   :  { %7213 = vmatpush1.bf16.msra.mxu0 %v9114_v38  ;;  %v6354_v38 = vld [vmem:[#allocation12 + $0x58] sm:$0xff] }
 0xfb5   :  { %7214 = vmatprep.subr.bf16.mxu0 %v9123_v24 }
 0xfb8   :  { %7215 = vmatpush1.bf16.msra.mxu0 %v9122_v45  ;;  %v6361_v45 = vld [vmem:[#allocation12 + $0x90] sm:$0xff] }
 0xfb9   :  { %7330 = vmatprep.subr.bf16.mxu0 %v9007_v12  ;;  %v6362_v12 = vld [vmem:[#allocation12 + $0x98] sm:$0xff] }
0x104e   :  { %v6238_v56 = vpop.f32.mrb[80].mxu0 }
0x104f   :  { %v6239_v32 = vadd.f32 1e-05, %v6238_v56  ;;  %v6240_v23 = vpop.f32.mrb[81].mxu0  ;;  %v6366_v56 = vld [vmem:[#allocation12 + $0xb8] sm:$0xff] }
0x1050   :  { %v6241_v4 = vadd.f32 1e-05, %v6240_v23 }
0x1051   :  { %10076 = vrsqrt.f32 %v6239_v32 }
0x1052   :  { %10078 = vrsqrt.f32 %v6241_v4  ;;  %v9012_v4 = vcombine.low %v6353_v44, %v6357_v19 }
0x105b   :  { %v10077_v47 = vpop.eup %10076 }
0x105c   :  { %v10079_v35 = vpop.eup %10078 }
0x105d   :  { %v6247_v27 = vcombine.low %v10077_v47, %v10079_v35  ;;  %v9013_v47 = vcombine.high %v6353_v44, %v6357_v19  ;;  %v9015_v35 = vcombine.high %v6354_v38, %v6358_v20 }
0x105f   :  { %v6254_v22 = vrot.slane %v6247_v27, %v12994_v50 }
0x1061   :  { %v6261_v2 = vrot.slane %v6254_v22, %v12994_v50  ;;  %v9014_v50 = vcombine.low %v6354_v38, %v6358_v20  ;;  %v9021_v22 = vcombine.high %v6361_v45, %v6365_v53  ;;  %v6389_v38 = vld [vmem:[#allocation12 + $0x170] sm:$0xff]  ;;  %v6386_v20 = vld [vmem:[#allocation12 + $0x158] sm:$0xff] }
0x1063   :  { %v6263_v3 = vmul.f32 %v6261_v2, %v6171_v1  ;;  %v9023_v1 = vcombine.high %v6362_v12, %v6366_v56 }
0x1065   :  { %v12271_v39 = vrot.slane %v6263_v3, %v10774_v13  ;;  %v12274_v14 = vrot.slane %v6263_v3, %v12995_v7 }
0x1067   :  { %v6276_v48 = vmul.f32 %v12274_v14, %v12164_v6  ;;  %v6278_v21 = vmul.f32 %v12274_v14, %v12167_v54  ;;  %v6275_v57 = vmul.f32 %v12271_v39, %v12173_v51  ;;  %v6277_v60 = vmul.f32 %v12271_v39, %v12176_v42 }
0x1068   :  { %v6280_v0 = vmul.f32 %v12274_v14, %v12170_v18  ;;  %v6282_v34 = vmul.f32 %v12274_v14, %v12179_v8  ;;  %v6279_v42 = vmul.f32 %v12271_v39, %v12186_v16  ;;  %v6281_v18 = vmul.f32 %v12271_v39, %v12194_v15 }
0x1069   :  { %v6304_v49 = vadd.f32 %v12280_v33, %v6276_v48  ;;  %v6306_v61 = vadd.f32 %v12280_v33, %v6278_v21  ;;  %v6303_v6 = vadd.f32 %v12277_v26, %v6275_v57  ;;  %v6305_v54 = vadd.f32 %v12277_v26, %v6277_v60  ;;  %v6374_v48 = vld [vmem:[#allocation12 + $0xf8] sm:$0xff] }
0x106a   :  { %v6308_v25 = vadd.f32 %v12280_v33, %v6280_v0  ;;  %v6310_v51 = vadd.f32 %v12280_v33, %v6282_v34  ;;  %v6284_v16 = vmul.f32 %v12274_v14, %v12189_v17  ;;  %v6286_v15 = vmul.f32 %v12274_v14, %v12201_v46  ;;  %v6377_v0 = vld [vmem:[#allocation12 + $0x110] sm:$0xff] }
0x106b   :  { %v6320_v9 = vmax.f32 %v6304_v49, 0.0  ;;  %v6322_v8 = vmax.f32 %v6306_v61, 0.0  ;;  %v6319_v28 = vmax.f32 %v6303_v6, 0.0  ;;  %v6321_v43 = vmax.f32 %v6305_v54, 0.0  ;;  %v6381_v34 = vld [vmem:[#allocation12 + $0x130] sm:$0xff]  ;;  %v6378_v49 = vld [vmem:[#allocation12 + $0x118] sm:$0xff] }
0x106c   :  { %v6324_v52 = vmax.f32 %v6308_v25, 0.0  ;;  %v6326_v31 = vmax.f32 %v6310_v51, 0.0  ;;  %v6307_v32 = vadd.f32 %v12277_v26, %v6279_v42  ;;  %v6309_v23 = vadd.f32 %v12277_v26, %v6281_v18  ;;  %v6382_v61 = vld [vmem:[#allocation12 + $0x138] sm:$0xff] }
0x106d   :  { %v12304_v24 = vpack.c.bf16 %v6322_v8, %v6320_v9  ;;  %v12306_v29 = vpack.c.bf16 %v6321_v43, %v6319_v28  ;;  %v6312_v46 = vadd.f32 %v12280_v33, %v6284_v16  ;;  %v6314_v27 = vadd.f32 %v12280_v33, %v6286_v15 }
0x106e   :  { %v12318_v17 = vpack.c.bf16 %v6326_v31, %v6324_v52  ;;  %v6323_v2 = vmax.f32 %v6307_v32, 0.0  ;;  %v6325_v62 = vmax.f32 %v6309_v23, 0.0  ;;  %v6283_v3 = vmul.f32 %v12271_v39, %v12206_v5  ;;  %v6397_v32 = vld [vmem:[#allocation12 + $0x1b0] sm:$0xff]  ;;  %v6394_v23 = vld [vmem:[#allocation12 + $0x198] sm:$0xff] }
0x106f   :  { %7143 = vmatprep.mubr.bf16.mxu1 %v12304_v24  ;;  %7216 = vmatprep.mubr.bf16.mxu0 %v12304_v24  ;;  %v6285_v30 = vmul.f32 %v12271_v39, %v12216_v58  ;;  %v6328_v11 = vmax.f32 %v6312_v46, 0.0  ;;  %v6288_v21 = vmul.f32 %v12274_v14, %v12211_v40  ;;  %v6290_v57 = vmul.f32 %v12274_v14, %v12221_v59 }
0x1070   :  { %7144 = vmatmul.mubr.bf16.vlgmr.msra.gmra.mrb[60].mxu1 %v12306_v29  ;;  %7217 = vmatmul.mubr.bf16.vlgmr.msra.gmra.mrb[84].mxu0 %v12306_v29  ;;  %v9020_v5 = vcombine.low %v6361_v45, %v6365_v53  ;;  %v9022_v60 = vcombine.low %v6362_v12, %v6366_v56  ;;  %v12338_v58 = vpack.c.bf16 %v6325_v62, %v6323_v2  ;;  %v6390_v45 = vld [vmem:[#allocation12 + $0x178] sm:$0xff]  ;;  %v6405_v2 = vld [vmem:[#allocation12 + $0x1f0] sm:$0xff] }
0x1071   :  { %7258 = vmatpush1.bf16.msra.mxu1 %v9004_v37  ;;  %7331 = vmatpush1.bf16.msra.mxu0 %v9006_v36  ;;  %v6330_v37 = vmax.f32 %v6314_v27, 0.0  ;;  %v6370_v36 = vld [vmem:[#allocation12 + $0xd8] sm:$0xff]  ;;  %v6311_v6 = vadd.f32 %v12277_v26, %v6283_v3  ;;  %v6313_v54 = vadd.f32 %v12277_v26, %v6285_v30  ;;  %v9028_v40 = vcombine.low %v6369_v41, %v6373_v10 }
0x1072   :  { %7153 = vmatprep.mubr.bf16.mxu1 %v12318_v17  ;;  %7226 = vmatprep.mubr.bf16.mxu0 %v12318_v17  ;;  %v9029_v25 = vcombine.high %v6369_v41, %v6373_v10  ;;  %v9031_v51 = vcombine.high %v6370_v36, %v6374_v48  ;;  %v6316_v14 = vadd.f32 %v12280_v33, %v6288_v21  ;;  %v6402_v62 = vld [vmem:[#allocation12 + $0x1d8] sm:$0xff] }
0x1073   :  { %7259 = vmatprep.subr.bf16.mxu1 %v9013_v47  ;;  %7332 = vmatprep.subr.bf16.mxu0 %v9015_v35  ;;  %v12344_v59 = vpack.c.bf16 %v6330_v37, %v6328_v11  ;;  %v6318_v42 = vadd.f32 %v12280_v33, %v6290_v57  ;;  %v9030_v18 = vcombine.low %v6370_v36, %v6374_v48  ;;  %v6327_v28 = vmax.f32 %v6311_v6, 0.0  ;;  %v6385_v33 = vld [vmem:[#allocation12 + $0x150] sm:$0xff]  ;;  %v6406_v3 = vld [vmem:[#allocation12 + $0x1f8] sm:$0xff] }
0x1074   :  { %v9037_v9 = vcombine.high %v6377_v0, %v6381_v34  ;;  %v9039_v8 = vcombine.high %v6378_v49, %v6382_v61  ;;  %v6329_v43 = vmax.f32 %v6313_v54, 0.0  ;;  %v6287_v44 = vmul.f32 %v12271_v39, %v12226_v55  ;;  %v6393_v55 = vld [vmem:[#allocation12 + $0x190] sm:$0xff]  ;;  %v6410_v21 = vld [vmem:[#allocation12 + $0x218] sm:$0xff] }
0x1075   :  { %7260 = vmatpush1.bf16.msra.mxu1 %v9012_v4  ;;  %7333 = vmatpush1.bf16.msra.mxu0 %v9014_v50  ;;  %v6289_v52 = vmul.f32 %v12271_v39, %v12233_v63  ;;  %v6332_v31 = vmax.f32 %v6316_v14, 0.0  ;;  %v6334_v19 = vmax.f32 %v6318_v42, 0.0  ;;  %v9036_v16 = vcombine.low %v6377_v0, %v6381_v34  ;;  %v6398_v4 = vld [vmem:[#allocation12 + $0x1b8] sm:$0xff]  ;;  %v6409_v37 = vld [vmem:[#allocation12 + $0x210] sm:$0xff] }
0x1076   :  { %7261 = vmatprep.subr.bf16.mxu1 %v9021_v22  ;;  %7334 = vmatprep.subr.bf16.mxu0 %v9023_v1  ;;  %v9038_v15 = vcombine.low %v6378_v49, %v6382_v61  ;;  %v12354_v53 = vpack.c.bf16 %v6329_v43, %v6327_v28  ;;  %v6315_v12 = vadd.f32 %v12277_v26, %v6287_v44  ;;  %v6401_v1 = vld [vmem:[#allocation12 + $0x1d0] sm:$0xff]  ;;  %v6414_v57 = vld [vmem:[#allocation12 + $0x238] sm:$0xff] }
0x1077   :  { %v6317_v63 = vadd.f32 %v12277_v26, %v6289_v52  ;;  %v9045_v39 = vcombine.high %v6385_v33, %v6389_v38  ;;  %v9047_v56 = vcombine.high %v6386_v20, %v6390_v45  ;;  %v12360_v47 = vpack.c.bf16 %v6334_v19, %v6332_v31  ;;  %v6413_v48 = vld [vmem:[#allocation12 + $0x230] sm:$0xff]  ;;  %v6418_v6 = vld [vmem:[#allocation12 + $0x258] sm:$0xff] }
0x1078   :  { %7154 = vmatmul.mubr.bf16.gmra.mrb[64].mxu1 %v12338_v58  ;;  %7227 = vmatmul.mubr.bf16.gmra.mrb[88].mxu0 %v12338_v58  ;;  %v9044_v35 = vcombine.low %v6385_v33, %v6389_v38  ;;  %v9046_v46 = vcombine.low %v6386_v20, %v6390_v45  ;;  %v9053_v26 = vcombine.high %v6393_v55, %v6397_v32  ;;  %v6331_v50 = vmax.f32 %v6315_v12, 0.0  ;;  %v6417_v49 = vld [vmem:[#allocation12 + $0x250] sm:$0xff]  ;;  %v6422_v54 = vld [vmem:[#allocation12 + $0x278] sm:$0xff] }
0x1079   :  { %7262 = vmatpush1.bf16.msra.mxu1 %v9020_v5  ;;  %7335 = vmatpush1.bf16.msra.mxu0 %v9022_v60  ;;  %v9055_v27 = vcombine.high %v6394_v23, %v6398_v4  ;;  %v6333_v22 = vmax.f32 %v6317_v63, 0.0  ;;  %v9052_v30 = vcombine.low %v6393_v55, %v6397_v32  ;;  %v9054_v41 = vcombine.low %v6394_v23, %v6398_v4  ;;  %v6421_v61 = vld [vmem:[#allocation12 + $0x270] sm:$0xff]  ;;  %v6434_v31 = vld [vmem:[#allocation12 + $0x2d8] sm:$0xff] }
0x107a   :  { %7163 = vmatprep.mubr.bf16.mxu1 %v12344_v59  ;;  %7236 = vmatprep.mubr.bf16.mxu0 %v12344_v59  ;;  %v9061_v10 = vcombine.high %v6401_v1, %v6405_v2  ;;  %v9063_v36 = vcombine.high %v6402_v62, %v6406_v3  ;;  %v9060_v5 = vcombine.low %v6401_v1, %v6405_v2  ;;  %v6425_v42 = vld [vmem:[#allocation12 + $0x290] sm:$0xff]  ;;  %v6438_v19 = vld [vmem:[#allocation12 + $0x2f8] sm:$0xff] }
0x107b   :  { %7263 = vmatprep.subr.bf16.mxu1 %v9029_v25  ;;  %7336 = vmatprep.subr.bf16.mxu0 %v9031_v51  ;;  %v12364_v11 = vpack.c.bf16 %v6333_v22, %v6331_v50  ;;  %v9062_v60 = vcombine.low %v6402_v62, %v6406_v3  ;;  %v9069_v0 = vcombine.high %v6409_v37, %v6413_v48  ;;  %v6433_v52 = vld [vmem:[#allocation12 + $0x2d0] sm:$0xff]  ;;  %v6442_v12 = vld [vmem:[#allocation12 + $0x318] sm:$0xff] }
0x107c   :  { %v9071_v34 = vcombine.high %v6410_v21, %v6414_v57  ;;  %v9070_v25 = vcombine.low %v6410_v21, %v6414_v57  ;;  %v9077_v51 = vcombine.high %v6417_v49, %v6421_v61  ;;  %v9079_v14 = vcombine.high %v6418_v6, %v6422_v54  ;;  %v6437_v33 = vld [vmem:[#allocation12 + $0x2f0] sm:$0xff]  ;;  %v6446_v63 = vld [vmem:[#allocation12 + $0x338] sm:$0xff] }
0x107d   :  { %7264 = vmatpush1.bf16.msra.mxu1 %v9028_v40  ;;  %7337 = vmatpush1.bf16.msra.mxu0 %v9030_v18  ;;  %v9068_v40 = vcombine.low %v6409_v37, %v6413_v48  ;;  %v6429_v18 = vld [vmem:[#allocation12 + $0x2b0] sm:$0xff]  ;;  %v9078_v28 = vcombine.low %v6418_v6, %v6422_v54  ;;  %v9093_v45 = vcombine.high %v6433_v52, %v6437_v33  ;;  %v6458_v3 = vld [vmem:[#allocation12 + $0x398] sm:$0xff] }
0x107e   :  { %7265 = vmatprep.subr.bf16.mxu1 %v9037_v9  ;;  %7338 = vmatprep.subr.bf16.mxu0 %v9039_v8  ;;  %v6426_v9 = vld [vmem:[#allocation12 + $0x298] sm:$0xff]  ;;  %v9076_v8 = vcombine.low %v6417_v49, %v6421_v61  ;;  %v9085_v43 = vcombine.high %v6425_v42, %v6429_v18  ;;  %v9084_v38 = vcombine.low %v6425_v42, %v6429_v18  ;;  %v6445_v55 = vld [vmem:[#allocation12 + $0x330] sm:$0xff] }
0x107f   :  { %v9103_v23 = vcombine.high %v6442_v12, %v6446_v63  ;;  %v6449_v4 = vld [vmem:[#allocation12 + $0x350] sm:$0xff]  ;;  %v9102_v50 = vcombine.low %v6442_v12, %v6446_v63  ;;  %v6466_v57 = vld [vmem:[#allocation12 + $0x3d8] sm:$0xff] }
0x1080   :  { %7164 = vmatmul.mubr.bf16.gmra.mrb[68].mxu1 %v12354_v53  ;;  %7237 = vmatmul.mubr.bf16.gmra.mrb[92].mxu0 %v12354_v53  ;;  %v6457_v2 = vld [vmem:[#allocation12 + $0x390] sm:$0xff] }
0x1081   :  { %7266 = vmatpush1.bf16.msra.mxu1 %v9036_v16  ;;  %7339 = vmatpush1.bf16.msra.mxu0 %v9038_v15  ;;  %v9095_v16 = vcombine.high %v6434_v31, %v6438_v19  ;;  %v6441_v15 = vld [vmem:[#allocation12 + $0x310] sm:$0xff] }
0x1082   :  { %7173 = vmatprep.mubr.bf16.mxu1 %v12360_v47  ;;  %7246 = vmatprep.mubr.bf16.mxu0 %v12360_v47  ;;  %v9101_v32 = vcombine.high %v6441_v15, %v6445_v55  ;;  %v6461_v62 = vld [vmem:[#allocation12 + $0x3b0] sm:$0xff] }
0x1083   :  { %7267 = vmatprep.subr.bf16.mxu1 %v9045_v39  ;;  %7340 = vmatprep.subr.bf16.mxu0 %v9047_v56  ;;  %v9092_v39 = vcombine.low %v6433_v52, %v6437_v33  ;;  %v9094_v56 = vcombine.low %v6434_v31, %v6438_v19  ;;  %v6465_v48 = vld [vmem:[#allocation12 + $0x3d0] sm:$0xff] }
0x1084   :  { %v6469_v21 = vld [vmem:[#allocation12 + $0x3f0] sm:$0xff] }
0x1085   :  { %7268 = vmatpush1.bf16.msra.mxu1 %v9044_v35  ;;  %7341 = vmatpush1.bf16.msra.mxu0 %v9046_v46  ;;  %v6453_v35 = vld [vmem:[#allocation12 + $0x370] sm:$0xff]  ;;  %v6450_v46 = vld [vmem:[#allocation12 + $0x358] sm:$0xff]  ;;  %v9124_v61 = vcombine.low %v6465_v48, %v6469_v21 }
0x1086   :  { %7269 = vmatprep.subr.bf16.mxu1 %v9053_v26  ;;  %7342 = vmatprep.subr.bf16.mxu0 %v9055_v27  ;;  %v6454_v26 = vld [vmem:[#allocation12 + $0x378] sm:$0xff]  ;;  %v9100_v27 = vcombine.low %v6441_v15, %v6445_v55  ;;  %v9109_v22 = vcombine.high %v6449_v4, %v6453_v35 }
0x1087   :  { %v9111_v1 = vcombine.high %v6450_v46, %v6454_v26  ;;  %v9110_v37 = vcombine.low %v6450_v46, %v6454_v26 }
0x1088   :  { %7174 = vmatmul.mubr.bf16.gmra.mrb[72].mxu1 %v12364_v11  ;;  %7247 = vmatmul.mubr.bf16.gmra.mrb[96].mxu0 %v12364_v11 }
0x1089   :  { %7270 = vmatpush1.bf16.msra.mxu1 %v9052_v30  ;;  %7343 = vmatpush1.bf16.msra.mxu0 %v9054_v41  ;;  %v6462_v30 = vld [vmem:[#allocation12 + $0x3b8] sm:$0xff]  ;;  %v9108_v41 = vcombine.low %v6449_v4, %v6453_v35 }
0x108a   :  { %7289 = vmatprep.mubr.bf16.mxu1 %v12304_v24  ;;  %7362 = vmatprep.mubr.bf16.mxu0 %v12304_v24  ;;  %v6430_v24 = vld [vmem:[#allocation12 + $0x2b8] sm:$0xff] }
0x108b   :  { %7271 = vmatprep.subr.bf16.mxu1 %v9061_v10  ;;  %7344 = vmatprep.subr.bf16.mxu0 %v9063_v36  ;;  %v9087_v44 = vcombine.high %v6426_v9, %v6430_v24  ;;  %v9086_v20 = vcombine.low %v6426_v9, %v6430_v24  ;;  %v9117_v10 = vcombine.high %v6457_v2, %v6461_v62 }
0x108c   :  { %v9119_v36 = vcombine.high %v6458_v3, %v6462_v30 }
0x108d   :  { %7272 = vmatpush1.bf16.msra.mxu1 %v9060_v5  ;;  %7345 = vmatpush1.bf16.msra.mxu0 %v9062_v60  ;;  %v6470_v5 = vld [vmem:[#allocation12 + $0x3f8] sm:$0xff]  ;;  %v9116_v60 = vcombine.low %v6457_v2, %v6461_v62 }
0x108e   :  { %7273 = vmatprep.subr.bf16.mxu1 %v9069_v0  ;;  %7346 = vmatprep.subr.bf16.mxu0 %v9071_v34  ;;  %v9118_v0 = vcombine.low %v6458_v3, %v6462_v30  ;;  %v9125_v34 = vcombine.high %v6465_v48, %v6469_v21  ;;  %v9127_v49 = vcombine.high %v6466_v57, %v6470_v5  ;;  %v9131_v48 = vld [vmem:[%s12944_s22 + $0x98] sm:$0xff]  ;;  %v9132_v21 = vld [vmem:[%s12944_s22 + $0xa0] sm:$0xff] }
0x108f   :  { %v9126_v6 = vcombine.low %v6466_v57, %v6470_v5  ;;  %v9133_v57 = vld [vmem:[%s12944_s22 + $0xa8] sm:$0xff]  ;;  %v9134_v5 = vld [vmem:[%s12944_s22 + $0xb0] sm:$0xff] }
0x1091   :  { %7274 = vmatpush1.bf16.msra.mxu1 %v9068_v40  ;;  %7347 = vmatpush1.bf16.msra.mxu0 %v9070_v25 }
0x1092   :  { %7275 = vmatprep.subr.bf16.mxu1 %v9077_v51  ;;  %7348 = vmatprep.subr.bf16.mxu0 %v9079_v14 }
0x1095   :  { %7276 = vmatpush1.bf16.msra.mxu1 %v9076_v8  ;;  %7349 = vmatpush1.bf16.msra.mxu0 %v9078_v28 }
0x1096   :  { %7277 = vmatprep.subr.bf16.mxu1 %v9085_v43  ;;  %7350 = vmatprep.subr.bf16.mxu0 %v9087_v44 }
0x1099   :  { %7278 = vmatpush1.bf16.msra.mxu1 %v9084_v38  ;;  %7351 = vmatpush1.bf16.msra.mxu0 %v9086_v20 }
0x109a   :  { %7279 = vmatprep.subr.bf16.mxu1 %v9093_v45  ;;  %7352 = vmatprep.subr.bf16.mxu0 %v9095_v16 }
0x109d   :  { %7280 = vmatpush1.bf16.msra.mxu1 %v9092_v39  ;;  %7353 = vmatpush1.bf16.msra.mxu0 %v9094_v56 }
0x109e   :  { %7281 = vmatprep.subr.bf16.mxu1 %v9101_v32  ;;  %7354 = vmatprep.subr.bf16.mxu0 %v9103_v23 }
0x10a1   :  { %7282 = vmatpush1.bf16.msra.mxu1 %v9100_v27  ;;  %7355 = vmatpush1.bf16.msra.mxu0 %v9102_v50 }
0x10a2   :  { %7283 = vmatprep.subr.bf16.mxu1 %v9109_v22  ;;  %7356 = vmatprep.subr.bf16.mxu0 %v9111_v1 }
0x10a5   :  { %7284 = vmatpush1.bf16.msra.mxu1 %v9108_v41  ;;  %7357 = vmatpush1.bf16.msra.mxu0 %v9110_v37  ;;  %v9128_v37 = vld [vmem:[%s12944_s22 + $0x80] sm:$0xff] }
0x10a6   :  { %7285 = vmatprep.subr.bf16.mxu1 %v9117_v10  ;;  %7358 = vmatprep.subr.bf16.mxu0 %v9119_v36  ;;  %v9129_v10 = vld [vmem:[%s12944_s22 + $0x88] sm:$0xff]  ;;  %v9130_v36 = vld [vmem:[%s12944_s22 + $0x90] sm:$0xff] }
0x10a9   :  { %7286 = vmatpush1.bf16.msra.mxu1 %v9116_v60  ;;  %7359 = vmatpush1.bf16.msra.mxu0 %v9118_v0  ;;  %v9135_v60 = vld [vmem:[%s12944_s22 + $0xb8] sm:$0xff]  ;;  %v9136_v0 = vld [vmem:[%s12944_s22 + $0xc0] sm:$0xff] }
0x10aa   :  { %7287 = vmatprep.subr.bf16.mxu1 %v9125_v34  ;;  %7360 = vmatprep.subr.bf16.mxu0 %v9127_v49 }
0x10ad   :  { %7288 = vmatpush1.bf16.msra.mxu1 %v9124_v61  ;;  %7361 = vmatpush1.bf16.msra.mxu0 %v9126_v6 }
0x10b0   :  { %7290 = vmatmul.mubr.bf16.vlgmr.msra.gmra.mrb[76].mxu1 %v12306_v29  ;;  %7363 = vmatmul.mubr.bf16.vlgmr.msra.gmra.mrb[100].mxu0 %v12306_v29  ;;  %v12996_v29 = vmov 0.0  }
0x10b1   :  { %7299 = vmatprep.mubr.bf16.mxu1 %v12318_v17  ;;  %7372 = vmatprep.mubr.bf16.mxu0 %v12318_v17 }
0x10b8   :  { %7300 = vmatmul.mubr.bf16.gmra.mrb[80].mxu1 %v12338_v58  ;;  %7373 = vmatmul.mubr.bf16.gmra.mrb[104].mxu0 %v12338_v58 }
0x10b9   :  { %7309 = vmatprep.mubr.bf16.mxu1 %v12344_v59  ;;  %7382 = vmatprep.mubr.bf16.mxu0 %v12344_v59 }
0x10c0   :  { %7310 = vmatmul.mubr.bf16.gmra.mrb[84].mxu1 %v12354_v53  ;;  %7383 = vmatmul.mubr.bf16.gmra.mrb[108].mxu0 %v12354_v53 }
0x10c1   :  { %7319 = vmatprep.mubr.bf16.mxu1 %v12360_v47  ;;  %7392 = vmatprep.mubr.bf16.mxu0 %v12360_v47 }
0x10c8   :  { %7320 = vmatmul.mubr.bf16.gmra.mrb[88].mxu1 %v12364_v11  ;;  %7393 = vmatmul.mubr.bf16.gmra.mrb[112].mxu0 %v12364_v11 }
0x10c9   :  { %7549 = vmatprep.mubr.f32.mxu1 %v12996_v29 }
0x1143   :  { %v7145_v17 = vpop.f32.mrb[60].mxu1  ;;  %v7218_v58 = vpop.f32.mrb[84].mxu0 }
0x1144   :  { %v7147_v54 = vpop.f32.mrb[61].mxu1  ;;  %v7220_v40 = vpop.f32.mrb[85].mxu0 }
0x1145   :  { %v7149_v25 = vpop.f32.mrb[62].mxu1  ;;  %v7222_v59 = vpop.f32.mrb[86].mxu0 }
0x1146   :  { %v9818_v51 = vpack.c.bf16 %v7149_v25, %v7145_v17  ;;  %v9802_v14 = vpack.c.bf16 %v7222_v59, %v7218_v58  ;;  %v7151_v42 = vpop.f32.mrb[63].mxu1  ;;  %v7224_v53 = vpop.f32.mrb[87].mxu0 }
0x1147   :  { %v9816_v18 = vpack.c.bf16 %v7151_v42, %v7147_v54  ;;  %v9800_v9 = vpack.c.bf16 %v7224_v53, %v7220_v40  ;;  %v9138_v53 = vld [vmem:[%s12944_s22 + $0xd0] sm:$0xff] }
0x1149   :  { %9801 = vmatprep.subr.bf16.mxu1 %v9800_v9 }
0x114a   :  { %9803 = vmatpush1.bf16.msra.mxu1 %v9802_v14 }
0x114b   :  { %v7155_v47 = vpop.f32.mrb[64].mxu1  ;;  %v7228_v24 = vpop.f32.mrb[88].mxu0 }
0x114c   :  { %v7157_v8 = vpop.f32.mrb[65].mxu1  ;;  %v7230_v11 = vpop.f32.mrb[89].mxu0 }
0x114d   :  { %v7159_v28 = vpop.f32.mrb[66].mxu1  ;;  %v7232_v43 = vpop.f32.mrb[90].mxu0 }
0x114e   :  { %v9822_v44 = vpack.c.bf16 %v7159_v28, %v7155_v47  ;;  %v9806_v52 = vpack.c.bf16 %v7232_v43, %v7228_v24  ;;  %v7161_v33 = vpop.f32.mrb[67].mxu1  ;;  %v7234_v31 = vpop.f32.mrb[91].mxu0 }
0x114f   :  { %v9820_v19 = vpack.c.bf16 %v7161_v33, %v7157_v8  ;;  %v9804_v38 = vpack.c.bf16 %v7234_v31, %v7230_v11  ;;  %v9139_v33 = vld [vmem:[%s12944_s22 + $0xd8] sm:$0xff] }
0x1151   :  { %9805 = vmatprep.subr.bf16.mxu1 %v9804_v38  ;;  %v9140_v38 = vld [vmem:[%s12944_s22 + $0xe0] sm:$0xff] }
0x1152   :  { %9807 = vmatpush1.bf16.msra.mxu1 %v9806_v52 }
0x1153   :  { %v7165_v20 = vpop.f32.mrb[68].mxu1  ;;  %v7238_v45 = vpop.f32.mrb[92].mxu0 }
0x1154   :  { %v7167_v16 = vpop.f32.mrb[69].mxu1  ;;  %v7240_v15 = vpop.f32.mrb[93].mxu0 }
0x1155   :  { %v7169_v55 = vpop.f32.mrb[70].mxu1  ;;  %v7242_v12 = vpop.f32.mrb[94].mxu0 }
0x1156   :  { %v9826_v63 = vpack.c.bf16 %v7169_v55, %v7165_v20  ;;  %v9810_v39 = vpack.c.bf16 %v7242_v12, %v7238_v45  ;;  %v7171_v56 = vpop.f32.mrb[71].mxu1  ;;  %v7244_v32 = vpop.f32.mrb[95].mxu0 }
0x1157   :  { %v9824_v23 = vpack.c.bf16 %v7171_v56, %v7167_v16  ;;  %v9808_v4 = vpack.c.bf16 %v7244_v32, %v7240_v15 }
0x1159   :  { %9809 = vmatprep.subr.bf16.mxu1 %v9808_v4 }
0x115a   :  { %9811 = vmatpush1.bf16.msra.mxu1 %v9810_v39 }
0x115b   :  { %v7175_v35 = vpop.f32.mrb[72].mxu1  ;;  %v7248_v46 = vpop.f32.mrb[96].mxu0 }
0x115c   :  { %v7177_v26 = vpop.f32.mrb[73].mxu1  ;;  %v7250_v27 = vpop.f32.mrb[97].mxu0 }
0x115d   :  { %v7179_v50 = vpop.f32.mrb[74].mxu1  ;;  %v7252_v22 = vpop.f32.mrb[98].mxu0 }
0x115e   :  { %v9830_v1 = vpack.c.bf16 %v7179_v50, %v7175_v35  ;;  %v9814_v2 = vpack.c.bf16 %v7252_v22, %v7248_v46  ;;  %v7181_v62 = vpop.f32.mrb[75].mxu1  ;;  %v7254_v3 = vpop.f32.mrb[99].mxu0  ;;  %v9142_v46 = vld [vmem:[%s12944_s22 + $0xf0] sm:$0xff] }
0x115f   :  { %v9828_v30 = vpack.c.bf16 %v7181_v62, %v7177_v26  ;;  %v9812_v41 = vpack.c.bf16 %v7254_v3, %v7250_v27 }
0x1161   :  { %9813 = vmatprep.subr.bf16.mxu1 %v9812_v41 }
0x1162   :  { %9815 = vmatpush1.bf16.msra.mxu1 %v9814_v2 }
0x1163   :  { %9817 = vmatprep.subr.bf16.mxu1 %v9816_v18 }
0x1165   :  { %9144 = vmatmul.mubr.msk.f32.vlgmr.msra.gmra.mrb[92].mxu1 %vm7436_vm7, %v9128_v37  ;;  %v9143_v37 = vld [vmem:[%s12944_s22 + $0xf8] sm:$0xff] }
0x1166   :  { %9819 = vmatpush1.bf16.msra.mxu1 %v9818_v51  ;;  %7555 = vmatprep.mubr.f32.mxu1 %v12996_v29  ;;  %v9137_v51 = vld [vmem:[%s12944_s22 + $0xc8] sm:$0xff] }
0x1167   :  { %9821 = vmatprep.subr.bf16.mxu1 %v9820_v19 }
0x1169   :  { %9145 = vmatmul.mubr.msk.f32.gmra.mrb[94].mxu1 %vm7436_vm7, %v9129_v10 }
0x116a   :  { %9823 = vmatpush1.bf16.msra.mxu1 %v9822_v44  ;;  %7561 = vmatprep.mubr.f32.mxu1 %v12996_v29 }
0x116b   :  { %9825 = vmatprep.subr.bf16.mxu1 %v9824_v23  ;;  %v9141_v23 = vld [vmem:[%s12944_s22 + $0xe8] sm:$0xff] }
0x116d   :  { %9146 = vmatmul.mubr.msk.f32.gmra.mrb[96].mxu1 %vm7436_vm7, %v9130_v36 }
0x116e   :  { %9827 = vmatpush1.bf16.msra.mxu1 %v9826_v63  ;;  %7567 = vmatprep.mubr.f32.mxu1 %v12996_v29 }
0x116f   :  { %9829 = vmatprep.subr.bf16.mxu1 %v9828_v30 }
0x1171   :  { %9147 = vmatmul.mubr.msk.f32.gmra.mrb[98].mxu1 %vm7436_vm7, %v9131_v48  ;;  %v7403_v48 = vld [vmem:[%s12944_s22] sm:$0xff] }
0x1172   :  { %9831 = vmatpush1.bf16.msra.mxu1 %v9830_v1  ;;  %7573 = vmatprep.mubr.f32.mxu1 %v12996_v29 }
0x1175   :  { %9148 = vmatmul.mubr.msk.f32.gmra.mrb[100].mxu1 %vm7436_vm7, %v9132_v21  ;;  %v7404_v21 = vld [vmem:[%s12944_s22 + $0x8] sm:$0xff] }
0x1176   :  { %7579 = vmatprep.mubr.f32.mxu1 %v12996_v29 }
0x1179   :  { %9149 = vmatmul.mubr.msk.f32.gmra.mrb[102].mxu1 %vm7436_vm7, %v9133_v57  ;;  %v7405_v57 = vld [vmem:[%s12944_s22 + $0x10] sm:$0xff] }
0x117a   :  { %7585 = vmatprep.mubr.f32.mxu1 %v12996_v29 }
0x117d   :  { %9150 = vmatmul.mubr.msk.f32.gmra.mrb[104].mxu1 %vm7436_vm7, %v9134_v5  ;;  %v7406_v5 = vld [vmem:[%s12944_s22 + $0x18] sm:$0xff] }
0x117e   :  { %7591 = vmatprep.mubr.f32.mxu1 %v12996_v29 }
0x1181   :  { %9151 = vmatmul.mubr.msk.f32.gmra.mrb[106].mxu1 %vm7436_vm7, %v9135_v60  ;;  %v7407_v60 = vld [vmem:[%s12944_s22 + $0x20] sm:$0xff] }
0x1182   :  { %7597 = vmatprep.mubr.f32.mxu1 %v12996_v29 }
0x1183   :  { %v12428_v34 = vpop.f32.mrb[76].mxu1  ;;  %v12430_v49 = vpop.f32.mrb[100].mxu0 }
0x1184   :  { %v7293_v61 = vpop.f32.mrb[77].mxu1  ;;  %v12432_v6 = vpop.f32.mrb[101].mxu0 }
0x1185   :  { %v12434_v17 = vpop.f32.mrb[78].mxu1  ;;  %v12436_v58 = vpop.f32.mrb[102].mxu0  ;;  %9152 = vmatmul.mubr.msk.f32.gmra.mrb[108].mxu1 %vm7436_vm7, %v9136_v0  ;;  %v7408_v0 = vld [vmem:[%s12944_s22 + $0x28] sm:$0xff] }
0x1186   :  { %v9834_v54 = vpack.c.bf16 %v12434_v17, %v12428_v34  ;;  %v9850_v40 = vpack.c.bf16 %v12436_v58, %v12430_v49  ;;  %v7297_v25 = vpop.f32.mrb[79].mxu1  ;;  %v12443_v59 = vpop.f32.mrb[103].mxu0  ;;  %7603 = vmatprep.mubr.f32.mxu1 %v12996_v29  ;;  %v7409_v34 = vld [vmem:[%s12944_s22 + $0x30] sm:$0xff]  ;;  %v7412_v17 = vld [vmem:[%s12944_s22 + $0x48] sm:$0xff]  ;;  %v9179_v58 = vld [vmem:[%s12944_s22 + $0x118] sm:$0xff] }
0x1187   :  { %v9832_v14 = vpack.c.bf16 %v7297_v25, %v7293_v61  ;;  %v9848_v42 = vpack.c.bf16 %v12443_v59, %v12432_v6  ;;  %v7410_v61 = vld [vmem:[%s12944_s22 + $0x38] sm:$0xff]  ;;  %v7411_v6 = vld [vmem:[%s12944_s22 + $0x40] sm:$0xff]  ;;  %v9178_v49 = vld [vmem:[%s12944_s22 + $0x110] sm:$0xff] }
0x1188   :  { %v7414_v25 = vld [vmem:[%s12944_s22 + $0x58] sm:$0xff]  ;;  %v7415_v59 = vld [vmem:[%s12944_s22 + $0x60] sm:$0xff] }
0x1189   :  { %9833 = vmatprep.subr.bf16.mxu1 %v9832_v14  ;;  %9153 = vmatmul.mubr.msk.f32.gmra.mrb[110].mxu1 %vm7436_vm7, %v9137_v51  ;;  %v7416_v51 = vld [vmem:[%s12944_s22 + $0x68] sm:$0xff]  ;;  %v7417_v14 = vld [vmem:[%s12944_s22 + $0x70] sm:$0xff] }
0x118a   :  { %7609 = vmatprep.mubr.f32.mxu1 %v12996_v29 }
0x118b   :  { %v7301_v18 = vpop.f32.mrb[80].mxu1  ;;  %v12456_v9 = vpop.f32.mrb[104].mxu0 }
0x118c   :  { %v7303_v47 = vpop.f32.mrb[81].mxu1  ;;  %v12458_v24 = vpop.f32.mrb[105].mxu0 }
0x118d   :  { %v7305_v8 = vpop.f32.mrb[82].mxu1  ;;  %v12460_v11 = vpop.f32.mrb[106].mxu0  ;;  %9154 = vmatmul.mubr.msk.f32.gmra.mrb[112].mxu1 %vm7436_vm7, %v9138_v53  ;;  %v9176_v53 = vld [vmem:[%s12944_s22 + $0x100] sm:$0xff] }
0x118e   :  { %v9838_v28 = vpack.c.bf16 %v7305_v8, %v7301_v18  ;;  %v9854_v43 = vpack.c.bf16 %v12460_v11, %v12456_v9  ;;  %v7307_v44 = vpop.f32.mrb[83].mxu1  ;;  %v12465_v52 = vpop.f32.mrb[107].mxu0  ;;  %7615 = vmatprep.mubr.f32.mxu1 %v12996_v29  ;;  %v9177_v18 = vld [vmem:[%s12944_s22 + $0x108] sm:$0xff]  ;;  %v9184_v8 = vld [vmem:[%s12944_s22 + $0x140] sm:$0xff] }
0x118f   :  { %v9836_v31 = vpack.c.bf16 %v7307_v44, %v7303_v47  ;;  %v9852_v19 = vpack.c.bf16 %v12465_v52, %v12458_v24  ;;  %v9181_v9 = vld [vmem:[%s12944_s22 + $0x128] sm:$0xff]  ;;  %v9182_v47 = vld [vmem:[%s12944_s22 + $0x130] sm:$0xff]  ;;  %v9183_v24 = vld [vmem:[%s12944_s22 + $0x138] sm:$0xff] }
0x1190   :  { %v9185_v11 = vld [vmem:[%s12944_s22 + $0x148] sm:$0xff]  ;;  %v9188_v44 = vld [vmem:[%s12944_s22 + $0x160] sm:$0xff] }
0x1191   :  { %9155 = vmatmul.mubr.msk.f32.gmra.mrb[114].mxu1 %vm7436_vm7, %v9139_v33  ;;  %v9189_v52 = vld [vmem:[%s12944_s22 + $0x168] sm:$0xff]  ;;  %v9190_v33 = vld [vmem:[%s12944_s22 + $0x170] sm:$0xff] }
0x1192   :  { %7621 = vmatprep.mubr.f32.mxu1 %v12996_v29 }
0x1193   :  { %v7311_v20 = vpop.f32.mrb[84].mxu1  ;;  %v12478_v45 = vpop.f32.mrb[108].mxu0 }
0x1194   :  { %v7313_v16 = vpop.f32.mrb[85].mxu1  ;;  %v12480_v15 = vpop.f32.mrb[109].mxu0 }
0x1195   :  { %v7315_v55 = vpop.f32.mrb[86].mxu1  ;;  %v12482_v12 = vpop.f32.mrb[110].mxu0  ;;  %9156 = vmatmul.mubr.msk.f32.gmra.mrb[116].mxu1 %vm7436_vm7, %v9140_v38  ;;  %v9209_v38 = vld [vmem:[%s12944_s22 + $0x188] sm:$0xff] }
0x1196   :  { %v9842_v63 = vpack.c.bf16 %v7315_v55, %v7311_v20  ;;  %v9858_v39 = vpack.c.bf16 %v12482_v12, %v12478_v45  ;;  %v7317_v56 = vpop.f32.mrb[87].mxu1  ;;  %v12487_v32 = vpop.f32.mrb[111].mxu0  ;;  %7627 = vmatprep.mubr.f32.mxu1 %v12996_v29  ;;  %v9210_v20 = vld [vmem:[%s12944_s22 + $0x190] sm:$0xff]  ;;  %v9211_v45 = vld [vmem:[%s12944_s22 + $0x198] sm:$0xff] }
0x1197   :  { %v9840_v4 = vpack.c.bf16 %v7317_v56, %v7313_v16  ;;  %v9856_v35 = vpack.c.bf16 %v12487_v32, %v12480_v15  ;;  %v9212_v16 = vld [vmem:[%s12944_s22 + $0x1a0] sm:$0xff]  ;;  %v9213_v15 = vld [vmem:[%s12944_s22 + $0x1a8] sm:$0xff]  ;;  %v9214_v55 = vld [vmem:[%s12944_s22 + $0x1b0] sm:$0xff] }
0x1198   :  { %v9215_v12 = vld [vmem:[%s12944_s22 + $0x1b8] sm:$0xff]  ;;  %v9218_v56 = vld [vmem:[%s12944_s22 + $0x1d0] sm:$0xff] }
0x1199   :  { %9157 = vmatmul.mubr.msk.f32.gmra.mrb[118].mxu1 %vm7436_vm7, %v9141_v23  ;;  %v9219_v32 = vld [vmem:[%s12944_s22 + $0x1d8] sm:$0xff]  ;;  %v9220_v23 = vld [vmem:[%s12944_s22 + $0x1e0] sm:$0xff] }
0x119a   :  { %7633 = vmatprep.mubr.f32.mxu1 %v12996_v29 }
0x119b   :  { %v7321_v26 = vpop.f32.mrb[88].mxu1  ;;  %v12500_v27 = vpop.f32.mrb[112].mxu0 }
0x119c   :  { %v7323_v50 = vpop.f32.mrb[89].mxu1  ;;  %v12502_v22 = vpop.f32.mrb[113].mxu0 }
0x119d   :  { %v7325_v1 = vpop.f32.mrb[90].mxu1  ;;  %v12504_v2 = vpop.f32.mrb[114].mxu0  ;;  %9158 = vmatmul.mubr.msk.f32.gmra.mrb[120].mxu1 %vm7436_vm7, %v9142_v46  ;;  %v9223_v46 = vld [vmem:[%s12944_s22 + $0x1f8] sm:$0xff] }
0x119e   :  { %v9846_v62 = vpack.c.bf16 %v7325_v1, %v7321_v26  ;;  %v9862_v3 = vpack.c.bf16 %v12504_v2, %v12500_v27  ;;  %v7327_v30 = vpop.f32.mrb[91].mxu1  ;;  %v12509_v41 = vpop.f32.mrb[115].mxu0  ;;  %7639 = vmatprep.mubr.f32.mxu1 %v12996_v29  ;;  %v8371_v26 = vld [vmem:[%s12997_s24] sm:$0x3] }
0x119f   :  { %v9844_v10 = vpack.c.bf16 %v7327_v30, %v7323_v50  ;;  %v9860_v36 = vpack.c.bf16 %v12509_v41, %v12502_v22  ;;  %v12789_v27 = vrot.slane %v8371_v26, %v10774_v13  ;;  %v12792_v50 = vrot.slane %v8371_v26, %v12995_v7 }
0x11a1   :  { %9159 = vmatmul.mubr.msk.f32.gmra.mrb[122].mxu1 %vm7436_vm7, %v9143_v37 }
0x11a2   :  { %7758 = vmatprep.mubr.f32.mxu1 %v12996_v29 }
0x11a5   :  { %9160 = vmatmul.mubr.msk.f32.vlgmr.msra.gmra.mrb[92].mxu1 %vm7436_vm7, %v7403_v48 }
0x11a6   :  { %9835 = vmatpush1.bf16.msra.mxu1 %v9834_v54  ;;  %7764 = vmatprep.mubr.f32.mxu1 %v12996_v29  ;;  %v7413_v54 = vld [vmem:[%s12944_s22 + $0x50] sm:$0xff] }
0x11a7   :  { %9837 = vmatprep.subr.bf16.mxu1 %v9836_v31  ;;  %v9191_v31 = vld [vmem:[%s12944_s22 + $0x178] sm:$0xff] }
0x11a9   :  { %9161 = vmatmul.mubr.msk.f32.gmra.mrb[94].mxu1 %vm7436_vm7, %v7404_v21 }
0x11aa   :  { %9839 = vmatpush1.bf16.msra.mxu1 %v9838_v28  ;;  %7770 = vmatprep.mubr.f32.mxu1 %v12996_v29  ;;  %v9186_v28 = vld [vmem:[%s12944_s22 + $0x150] sm:$0xff] }
0x11ab   :  { %9841 = vmatprep.subr.bf16.mxu1 %v9840_v4  ;;  %v9221_v4 = vld [vmem:[%s12944_s22 + $0x1e8] sm:$0xff] }
0x11ad   :  { %9162 = vmatmul.mubr.msk.f32.gmra.mrb[96].mxu1 %vm7436_vm7, %v7405_v57 }
0x11ae   :  { %9843 = vmatpush1.bf16.msra.mxu1 %v9842_v63  ;;  %7776 = vmatprep.mubr.f32.mxu1 %v12996_v29  ;;  %v9216_v63 = vld [vmem:[%s12944_s22 + $0x1c0] sm:$0xff] }
0x11af   :  { %9845 = vmatprep.subr.bf16.mxu1 %v9844_v10 }
0x11b1   :  { %9163 = vmatmul.mubr.msk.f32.gmra.mrb[98].mxu1 %vm7436_vm7, %v7406_v5 }
0x11b2   :  { %9847 = vmatpush1.bf16.msra.mxu1 %v9846_v62  ;;  %7782 = vmatprep.mubr.f32.mxu1 %v12996_v29 }
0x11b3   :  { %9849 = vmatprep.subr.bf16.mxu1 %v9848_v42  ;;  %v7418_v42 = vld [vmem:[%s12944_s22 + $0x78] sm:$0xff] }
0x11b5   :  { %9164 = vmatmul.mubr.msk.f32.gmra.mrb[100].mxu1 %vm7436_vm7, %v7407_v60 }
0x11b6   :  { %7788 = vmatprep.mubr.f32.mxu1 %v12996_v29 }
0x11b9   :  { %9165 = vmatmul.mubr.msk.f32.gmra.mrb[102].mxu1 %vm7436_vm7, %v7408_v0 }
0x11ba   :  { %7794 = vmatprep.mubr.f32.mxu1 %v12996_v29 }
0x11bd   :  { %9166 = vmatmul.mubr.msk.f32.gmra.mrb[104].mxu1 %vm7436_vm7, %v7409_v34 }
0x11be   :  { %7800 = vmatprep.mubr.f32.mxu1 %v12996_v29 }
0x11c1   :  { %9167 = vmatmul.mubr.msk.f32.gmra.mrb[106].mxu1 %vm7436_vm7, %v7410_v61 }
0x11c2   :  { %7806 = vmatprep.mubr.f32.mxu1 %v12996_v29 }
0x11c5   :  { %9168 = vmatmul.mubr.msk.f32.gmra.mrb[108].mxu1 %vm7436_vm7, %v7411_v6 }
0x11c6   :  { %7812 = vmatprep.mubr.f32.mxu1 %v12996_v29 }
0x11c9   :  { %9169 = vmatmul.mubr.msk.f32.gmra.mrb[110].mxu1 %vm7436_vm7, %v7412_v17 }
0x11ca   :  { %7818 = vmatprep.mubr.f32.mxu1 %v12996_v29 }
0x11cd   :  { %9170 = vmatmul.mubr.msk.f32.gmra.mrb[112].mxu1 %vm7436_vm7, %v7413_v54 }
0x11ce   :  { %7824 = vmatprep.mubr.f32.mxu1 %v12996_v29 }
0x11d1   :  { %9171 = vmatmul.mubr.msk.f32.gmra.mrb[114].mxu1 %vm7436_vm7, %v7414_v25 }
0x11d2   :  { %7830 = vmatprep.mubr.f32.mxu1 %v12996_v29 }
0x11d5   :  { %9172 = vmatmul.mubr.msk.f32.gmra.mrb[116].mxu1 %vm7436_vm7, %v7415_v59 }
0x11d6   :  { %7836 = vmatprep.mubr.f32.mxu1 %v12996_v29 }
0x11d9   :  { %9173 = vmatmul.mubr.msk.f32.gmra.mrb[118].mxu1 %vm7436_vm7, %v7416_v51 }
0x11da   :  { %7842 = vmatprep.mubr.f32.mxu1 %v12996_v29 }
0x11dd   :  { %9174 = vmatmul.mubr.msk.f32.gmra.mrb[120].mxu1 %vm7436_vm7, %v7417_v14 }
0x11de   :  { %7848 = vmatprep.mubr.f32.mxu1 %v12996_v29 }
0x11e1   :  { %9175 = vmatmul.mubr.msk.f32.gmra.mrb[122].mxu1 %vm7436_vm7, %v7418_v42 }
0x11e2   :  { %7984 = vmatprep.mubr.f32.mxu1 %v12996_v29 }
0x11e5   :  { %9192 = vmatmul.mubr.msk.f32.vlgmr.msra.gmra.mrb[92].mxu1 %vm7436_vm7, %v9176_v53 }
0x11e6   :  { %9851 = vmatpush1.bf16.msra.mxu1 %v9850_v40  ;;  %7990 = vmatprep.mubr.f32.mxu1 %v12996_v29  ;;  %v9180_v40 = vld [vmem:[%s12944_s22 + $0x120] sm:$0xff] }
0x11e7   :  { %9853 = vmatprep.subr.bf16.mxu1 %v9852_v19  ;;  %v9208_v19 = vld [vmem:[%s12944_s22 + $0x180] sm:$0xff] }
0x11e9   :  { %9193 = vmatmul.mubr.msk.f32.gmra.mrb[94].mxu1 %vm7436_vm7, %v9177_v18 }
0x11ea   :  { %9855 = vmatpush1.bf16.msra.mxu1 %v9854_v43  ;;  %7996 = vmatprep.mubr.f32.mxu1 %v12996_v29  ;;  %v9187_v43 = vld [vmem:[%s12944_s22 + $0x158] sm:$0xff] }
0x11eb   :  { %9857 = vmatprep.subr.bf16.mxu1 %v9856_v35  ;;  %v9222_v35 = vld [vmem:[%s12944_s22 + $0x1f0] sm:$0xff] }
0x11ed   :  { %9194 = vmatmul.mubr.msk.f32.gmra.mrb[96].mxu1 %vm7436_vm7, %v9178_v49 }
0x11ee   :  { %9859 = vmatpush1.bf16.msra.mxu1 %v9858_v39  ;;  %8002 = vmatprep.mubr.f32.mxu1 %v12996_v29  ;;  %v9217_v39 = vld [vmem:[%s12944_s22 + $0x1c8] sm:$0xff] }
0x11ef   :  { %9861 = vmatprep.subr.bf16.mxu1 %v9860_v36 }
0x11f1   :  { %9195 = vmatmul.mubr.msk.f32.gmra.mrb[98].mxu1 %vm7436_vm7, %v9179_v58 }
0x11f2   :  { %9863 = vmatpush1.bf16.msra.mxu1 %v9862_v3  ;;  %8008 = vmatprep.mubr.f32.mxu1 %v12996_v29 }
0x11f5   :  { %9196 = vmatmul.mubr.msk.f32.gmra.mrb[100].mxu1 %vm7436_vm7, %v9180_v40 }
0x11f6   :  { %8014 = vmatprep.mubr.f32.mxu1 %v12996_v29 }
0x11f9   :  { %9197 = vmatmul.mubr.msk.f32.gmra.mrb[102].mxu1 %vm7436_vm7, %v9181_v9 }
0x11fa   :  { %8020 = vmatprep.mubr.f32.mxu1 %v12996_v29 }
0x11fd   :  { %9198 = vmatmul.mubr.msk.f32.gmra.mrb[104].mxu1 %vm7436_vm7, %v9182_v47 }
0x11fe   :  { %8026 = vmatprep.mubr.f32.mxu1 %v12996_v29 }
0x1201   :  { %9199 = vmatmul.mubr.msk.f32.gmra.mrb[106].mxu1 %vm7436_vm7, %v9183_v24 }
0x1202   :  { %8032 = vmatprep.mubr.f32.mxu1 %v12996_v29 }
0x1205   :  { %9200 = vmatmul.mubr.msk.f32.gmra.mrb[108].mxu1 %vm7436_vm7, %v9184_v8 }
0x1206   :  { %8038 = vmatprep.mubr.f32.mxu1 %v12996_v29 }
0x1209   :  { %9201 = vmatmul.mubr.msk.f32.gmra.mrb[110].mxu1 %vm7436_vm7, %v9185_v11 }
0x120a   :  { %8044 = vmatprep.mubr.f32.mxu1 %v12996_v29 }
0x120d   :  { %9202 = vmatmul.mubr.msk.f32.gmra.mrb[112].mxu1 %vm7436_vm7, %v9186_v28 }
0x120e   :  { %8050 = vmatprep.mubr.f32.mxu1 %v12996_v29 }
0x1211   :  { %9203 = vmatmul.mubr.msk.f32.gmra.mrb[114].mxu1 %vm7436_vm7, %v9187_v43 }
0x1212   :  { %8056 = vmatprep.mubr.f32.mxu1 %v12996_v29 }
0x1215   :  { %9204 = vmatmul.mubr.msk.f32.gmra.mrb[116].mxu1 %vm7436_vm7, %v9188_v44 }
0x1216   :  { %8062 = vmatprep.mubr.f32.mxu1 %v12996_v29 }
0x1219   :  { %9205 = vmatmul.mubr.msk.f32.gmra.mrb[118].mxu1 %vm7436_vm7, %v9189_v52 }
0x121a   :  { %8068 = vmatprep.mubr.f32.mxu1 %v12996_v29 }
0x121d   :  { %9206 = vmatmul.mubr.msk.f32.gmra.mrb[120].mxu1 %vm7436_vm7, %v9190_v33 }
0x121e   :  { %8074 = vmatprep.mubr.f32.mxu1 %v12996_v29 }
0x1221   :  { %9207 = vmatmul.mubr.msk.f32.gmra.mrb[122].mxu1 %vm7436_vm7, %v9191_v31 }
0x1222   :  { %8242 = vmatprep.mubr.f32.mxu1 %v12996_v29 }
0x1225   :  { %9224 = vmatmul.mubr.msk.f32.vlgmr.msra.gmra.mrb[92].mxu1 %vm7436_vm7, %v9208_v19 }
0x1226   :  { %8248 = vmatprep.mubr.f32.mxu1 %v12996_v29 }
0x1229   :  { %9225 = vmatmul.mubr.msk.f32.gmra.mrb[94].mxu1 %vm7436_vm7, %v9209_v38 }
0x122a   :  { %8254 = vmatprep.mubr.f32.mxu1 %v12996_v29 }
0x122d   :  { %9226 = vmatmul.mubr.msk.f32.gmra.mrb[96].mxu1 %vm7436_vm7, %v9210_v20 }
0x122e   :  { %8260 = vmatprep.mubr.f32.mxu1 %v12996_v29 }
0x1231   :  { %9227 = vmatmul.mubr.msk.f32.gmra.mrb[98].mxu1 %vm7436_vm7, %v9211_v45 }
0x1232   :  { %8266 = vmatprep.mubr.f32.mxu1 %v12996_v29 }
0x1235   :  { %9228 = vmatmul.mubr.msk.f32.gmra.mrb[100].mxu1 %vm7436_vm7, %v9212_v16 }
0x1236   :  { %8272 = vmatprep.mubr.f32.mxu1 %v12996_v29 }
0x1239   :  { %9229 = vmatmul.mubr.msk.f32.gmra.mrb[102].mxu1 %vm7436_vm7, %v9213_v15 }
0x123a   :  { %8278 = vmatprep.mubr.f32.mxu1 %v12996_v29 }
0x123d   :  { %9230 = vmatmul.mubr.msk.f32.gmra.mrb[104].mxu1 %vm7436_vm7, %v9214_v55 }
0x123e   :  { %8284 = vmatprep.mubr.f32.mxu1 %v12996_v29 }
0x1241   :  { %9231 = vmatmul.mubr.msk.f32.gmra.mrb[106].mxu1 %vm7436_vm7, %v9215_v12 }
0x1242   :  { %8290 = vmatprep.mubr.f32.mxu1 %v12996_v29 }
0x1245   :  { %9232 = vmatmul.mubr.msk.f32.gmra.mrb[108].mxu1 %vm7436_vm7, %v9216_v63 }
0x1246   :  { %8296 = vmatprep.mubr.f32.mxu1 %v12996_v29 }
0x1249   :  { %9233 = vmatmul.mubr.msk.f32.gmra.mrb[110].mxu1 %vm7436_vm7, %v9217_v39 }
0x124a   :  { %8302 = vmatprep.mubr.f32.mxu1 %v12996_v29 }
0x124d   :  { %9234 = vmatmul.mubr.msk.f32.gmra.mrb[112].mxu1 %vm7436_vm7, %v9218_v56 }
0x124e   :  { %8308 = vmatprep.mubr.f32.mxu1 %v12996_v29 }
0x1251   :  { %9235 = vmatmul.mubr.msk.f32.gmra.mrb[114].mxu1 %vm7436_vm7, %v9219_v32 }
0x1252   :  { %8314 = vmatprep.mubr.f32.mxu1 %v12996_v29 }
0x1255   :  { %9236 = vmatmul.mubr.msk.f32.gmra.mrb[116].mxu1 %vm7436_vm7, %v9220_v23 }
0x1256   :  { %8320 = vmatprep.mubr.f32.mxu1 %v12996_v29 }
0x1259   :  { %9237 = vmatmul.mubr.msk.f32.gmra.mrb[118].mxu1 %vm7436_vm7, %v9221_v4 }
0x125a   :  { %8326 = vmatprep.mubr.f32.mxu1 %v12996_v29 }
0x125d   :  { %9238 = vmatmul.mubr.msk.f32.gmra.mrb[120].mxu1 %vm7436_vm7, %v9222_v35 }
0x125e   :  { %8332 = vmatprep.mubr.f32.mxu1 %v12996_v29 }
0x1261   :  { %9239 = vmatmul.mubr.msk.f32.gmra.mrb[122].mxu1 %vm7436_vm7, %v9223_v46 }
0x12f8   :  { %v8244_v22 = vpop.f32.mrb[92].mxu1 }
0x12f9   :  { %v8383_v1 = vadd.f32 %v12789_v27, %v8244_v22  ;;  %v8246_v29 = vpop.f32.mrb[93].mxu1 }
0x12fa   :  { %v8384_v2 = vadd.f32 %v12792_v50, %v8246_v29 }
0x12fb   :  { %10080 = vtanh.f32 %v8383_v1 }
0x12fc   :  { %10082 = vtanh.f32 %v8384_v2  ;;  %v8250_v62 = vpop.f32.mrb[94].mxu1 }
0x12fd   :  { %v8385_v3 = vadd.f32 %v12789_v27, %v8250_v62  ;;  %v8252_v30 = vpop.f32.mrb[95].mxu1 }
0x12fe   :  { %v8386_v41 = vadd.f32 %v12792_v50, %v8252_v30 }
0x12ff   :  { %10084 = vtanh.f32 %v8385_v3 }
0x1300   :  { %10086 = vtanh.f32 %v8386_v41  ;;  %v8256_v13 = vpop.f32.mrb[96].mxu1 }
0x1301   :  { %v8387_v7 = vadd.f32 %v12789_v27, %v8256_v13  ;;  %v8258_v37 = vpop.f32.mrb[97].mxu1 }
0x1302   :  { %v8388_v10 = vadd.f32 %v12792_v50, %v8258_v37 }
0x1303   :  { %10088 = vtanh.f32 %v8387_v7 }
0x1304   :  { %10090 = vtanh.f32 %v8388_v10  ;;  %v8262_v36 = vpop.f32.mrb[98].mxu1 }
0x1305   :  { %v10081_v48 = vpop.eup %10080  ;;  %v8389_v21 = vadd.f32 %v12789_v27, %v8262_v36  ;;  %v8264_v57 = vpop.f32.mrb[99].mxu1 }
0x1306   :  { %v10083_v5 = vpop.eup %10082  ;;  %8447 = vst [vmem:[%s12998_s0] sm:$0xff] %v10081_v48  ;;  %v8390_v60 = vadd.f32 %v12792_v50, %v8264_v57 }
0x1307   :  { %8448 = vst [vmem:[%s12998_s0 + $0x8] sm:$0xff] %v10083_v5  ;;  %10092 = vtanh.f32 %v8389_v21 }
0x1308   :  { %10094 = vtanh.f32 %v8390_v60  ;;  %v8268_v0 = vpop.f32.mrb[100].mxu1 }
0x1309   :  { %v10085_v34 = vpop.eup %10084  ;;  %v8391_v61 = vadd.f32 %v12789_v27, %v8268_v0  ;;  %v8270_v6 = vpop.f32.mrb[101].mxu1 }
0x130a   :  { %v10087_v17 = vpop.eup %10086  ;;  %8449 = vst [vmem:[%s12998_s0 + $0x10] sm:$0xff] %v10085_v34  ;;  %v8392_v54 = vadd.f32 %v12792_v50, %v8270_v6 }
0x130b   :  { %8450 = vst [vmem:[%s12998_s0 + $0x18] sm:$0xff] %v10087_v17  ;;  %10096 = vtanh.f32 %v8391_v61 }
0x130c   :  { %10098 = vtanh.f32 %v8392_v54  ;;  %v8274_v25 = vpop.f32.mrb[102].mxu1 }
0x130d   :  { %v10089_v59 = vpop.eup %10088  ;;  %v8393_v51 = vadd.f32 %v12789_v27, %v8274_v25  ;;  %v8276_v14 = vpop.f32.mrb[103].mxu1 }
0x130e   :  { %v10091_v42 = vpop.eup %10090  ;;  %8451 = vst [vmem:[%s12998_s0 + $0x20] sm:$0xff] %v10089_v59  ;;  %v8394_v53 = vadd.f32 %v12792_v50, %v8276_v14 }
0x130f   :  { %8452 = vst [vmem:[%s12998_s0 + $0x28] sm:$0xff] %v10091_v42  ;;  %10100 = vtanh.f32 %v8393_v51 }
0x1310   :  { %10102 = vtanh.f32 %v8394_v53  ;;  %v8280_v18 = vpop.f32.mrb[104].mxu1 }
0x1311   :  { %v10093_v49 = vpop.eup %10092  ;;  %v8395_v58 = vadd.f32 %v12789_v27, %v8280_v18  ;;  %v8282_v40 = vpop.f32.mrb[105].mxu1 }
0x1312   :  { %v10095_v9 = vpop.eup %10094  ;;  %8453 = vst [vmem:[%s12998_s0 + $0x30] sm:$0xff] %v10093_v49  ;;  %v8396_v47 = vadd.f32 %v12792_v50, %v8282_v40 }
0x1313   :  { %8454 = vst [vmem:[%s12998_s0 + $0x38] sm:$0xff] %v10095_v9  ;;  %10104 = vtanh.f32 %v8395_v58 }
0x1314   :  { %10106 = vtanh.f32 %v8396_v47  ;;  %v8286_v24 = vpop.f32.mrb[106].mxu1 }
0x1315   :  { %v10097_v8 = vpop.eup %10096  ;;  %v8397_v11 = vadd.f32 %v12789_v27, %v8286_v24  ;;  %v8288_v28 = vpop.f32.mrb[107].mxu1 }
0x1316   :  { %v10099_v43 = vpop.eup %10098  ;;  %8455 = vst [vmem:[%s12998_s0 + $0x40] sm:$0xff] %v10097_v8  ;;  %v8398_v44 = vadd.f32 %v12792_v50, %v8288_v28 }
0x1317   :  { %8456 = vst [vmem:[%s12998_s0 + $0x48] sm:$0xff] %v10099_v43  ;;  %10108 = vtanh.f32 %v8397_v11 }
0x1318   :  { %10110 = vtanh.f32 %v8398_v44  ;;  %v8292_v52 = vpop.f32.mrb[108].mxu1 }
0x1319   :  { %v10101_v33 = vpop.eup %10100  ;;  %v8399_v31 = vadd.f32 %v12789_v27, %v8292_v52  ;;  %v8294_v19 = vpop.f32.mrb[109].mxu1 }
0x131a   :  { %v10103_v38 = vpop.eup %10102  ;;  %8457 = vst [vmem:[%s12998_s0 + $0x50] sm:$0xff] %v10101_v33  ;;  %v8400_v20 = vadd.f32 %v12792_v50, %v8294_v19 }
0x131b   :  { %8458 = vst [vmem:[%s12998_s0 + $0x58] sm:$0xff] %v10103_v38  ;;  %10112 = vtanh.f32 %v8399_v31 }
0x131c   :  { %10114 = vtanh.f32 %v8400_v20  ;;  %v8298_v45 = vpop.f32.mrb[110].mxu1 }
0x131d   :  { %v10105_v16 = vpop.eup %10104  ;;  %v8401_v15 = vadd.f32 %v12789_v27, %v8298_v45  ;;  %v8300_v55 = vpop.f32.mrb[111].mxu1 }
0x131e   :  { %v10107_v12 = vpop.eup %10106  ;;  %8459 = vst [vmem:[%s12998_s0 + $0x60] sm:$0xff] %v10105_v16  ;;  %v8402_v63 = vadd.f32 %v12792_v50, %v8300_v55 }
0x131f   :  { %8460 = vst [vmem:[%s12998_s0 + $0x68] sm:$0xff] %v10107_v12  ;;  %10116 = vtanh.f32 %v8401_v15 }
0x1320   :  { %10118 = vtanh.f32 %v8402_v63  ;;  %v8304_v39 = vpop.f32.mrb[112].mxu1 }
0x1321   :  { %v10109_v56 = vpop.eup %10108  ;;  %v8403_v32 = vadd.f32 %v12789_v27, %v8304_v39  ;;  %v8306_v23 = vpop.f32.mrb[113].mxu1 }
0x1322   :  { %v10111_v4 = vpop.eup %10110  ;;  %8461 = vst [vmem:[%s12998_s0 + $0x70] sm:$0xff] %v10109_v56  ;;  %v8404_v35 = vadd.f32 %v12792_v50, %v8306_v23 }
0x1323   :  { %8462 = vst [vmem:[%s12998_s0 + $0x78] sm:$0xff] %v10111_v4  ;;  %10120 = vtanh.f32 %v8403_v32 }
0x1324   :  { %10122 = vtanh.f32 %v8404_v35  ;;  %v8310_v46 = vpop.f32.mrb[114].mxu1 }
0x1325   :  { %v10113_v26 = vpop.eup %10112  ;;  %v8405_v22 = vadd.f32 %v12789_v27, %v8310_v46  ;;  %v8312_v1 = vpop.f32.mrb[115].mxu1 }
0x1326   :  { %v10115_v29 = vpop.eup %10114  ;;  %8463 = vst [vmem:[%s12998_s0 + $0x80] sm:$0xff] %v10113_v26  ;;  %v8406_v2 = vadd.f32 %v12792_v50, %v8312_v1 }
0x1327   :  { %8464 = vst [vmem:[%s12998_s0 + $0x88] sm:$0xff] %v10115_v29  ;;  %10124 = vtanh.f32 %v8405_v22 }
0x1328   :  { %10126 = vtanh.f32 %v8406_v2  ;;  %v8316_v62 = vpop.f32.mrb[116].mxu1 }
0x1329   :  { %v10117_v3 = vpop.eup %10116  ;;  %v8407_v30 = vadd.f32 %v12789_v27, %v8316_v62  ;;  %v8318_v41 = vpop.f32.mrb[117].mxu1 }
0x132a   :  { %v10119_v13 = vpop.eup %10118  ;;  %8465 = vst [vmem:[%s12998_s0 + $0x90] sm:$0xff] %v10117_v3  ;;  %v8408_v7 = vadd.f32 %v12792_v50, %v8318_v41 }
0x132b   :  { %8466 = vst [vmem:[%s12998_s0 + $0x98] sm:$0xff] %v10119_v13  ;;  %10128 = vtanh.f32 %v8407_v30 }
0x132c   :  { %10130 = vtanh.f32 %v8408_v7  ;;  %v8322_v37 = vpop.f32.mrb[118].mxu1 }
0x132d   :  { %v10121_v10 = vpop.eup %10120  ;;  %v8409_v36 = vadd.f32 %v12789_v27, %v8322_v37  ;;  %v8324_v48 = vpop.f32.mrb[119].mxu1 }
0x132e   :  { %v10123_v21 = vpop.eup %10122  ;;  %8467 = vst [vmem:[%s12998_s0 + $0xa0] sm:$0xff] %v10121_v10  ;;  %v8410_v57 = vadd.f32 %v12792_v50, %v8324_v48 }
0x132f   :  { %8468 = vst [vmem:[%s12998_s0 + $0xa8] sm:$0xff] %v10123_v21  ;;  %10132 = vtanh.f32 %v8409_v36 }
0x1330   :  { %10134 = vtanh.f32 %v8410_v57  ;;  %v8328_v5 = vpop.f32.mrb[120].mxu1 }
0x1331   :  { %v10125_v60 = vpop.eup %10124  ;;  %v8411_v0 = vadd.f32 %v12789_v27, %v8328_v5  ;;  %v8330_v34 = vpop.f32.mrb[121].mxu1 }
0x1332   :  { %v10127_v61 = vpop.eup %10126  ;;  %8469 = vst [vmem:[%s12998_s0 + $0xb0] sm:$0xff] %v10125_v60  ;;  %v8412_v6 = vadd.f32 %v12792_v50, %v8330_v34 }
0x1333   :  { %8470 = vst [vmem:[%s12998_s0 + $0xb8] sm:$0xff] %v10127_v61  ;;  %10136 = vtanh.f32 %v8411_v0 }
0x1334   :  { %10138 = vtanh.f32 %v8412_v6  ;;  %v8334_v17 = vpop.f32.mrb[122].mxu1 }
0x1335   :  { %v10129_v54 = vpop.eup %10128  ;;  %v8413_v25 = vadd.f32 %v12789_v27, %v8334_v17  ;;  %v8336_v59 = vpop.f32.mrb[123].mxu1 }
0x1336   :  { %v10131_v51 = vpop.eup %10130  ;;  %8471 = vst [vmem:[%s12998_s0 + $0xc0] sm:$0xff] %v10129_v54  ;;  %v8414_v14 = vadd.f32 %v12792_v50, %v8336_v59 }
0x1337   :  { %8472 = vst [vmem:[%s12998_s0 + $0xc8] sm:$0xff] %v10131_v51  ;;  %10140 = vtanh.f32 %v8413_v25 }
0x1338   :  { %10142 = vtanh.f32 %v8414_v14 }
0x1339   :  { %v10133_v42 = vpop.eup %10132 }
0x133a   :  { %v10135_v53 = vpop.eup %10134  ;;  %8473 = vst [vmem:[%s12998_s0 + $0xd0] sm:$0xff] %v10133_v42 }
0x133b   :  { %8474 = vst [vmem:[%s12998_s0 + $0xd8] sm:$0xff] %v10135_v53 }
0x133d   :  { %v10137_v27 = vpop.eup %10136 }
0x133e   :  { %v10139_v18 = vpop.eup %10138  ;;  %8475 = vst [vmem:[%s12998_s0 + $0xe0] sm:$0xff] %v10137_v27 }
0x133f   :  { %8476 = vst [vmem:[%s12998_s0 + $0xe8] sm:$0xff] %v10139_v18 }
0x1341   :  { %v10141_v50 = vpop.eup %10140 }
0x1342   :  { %v10143_v49 = vpop.eup %10142  ;;  %8477 = vst [vmem:[%s12998_s0 + $0xf0] sm:$0xff] %v10141_v50 }
0x1343   :  { %8478 = vst [vmem:[%s12998_s0 + $0xf8] sm:$0xff] %v10143_v49 }
0x1344   :  { %8483 = vsyncpa [#allocation3], 1 }
0x1345   :  { %8484 = vsyncpa [#allocation5], 1 }
0x1346   :  { %8485 = vsyncpa [#allocation8], 1 }
0x1347   :  { %8486 = vsyncpa [#allocation11], 1 }

</bundles_post_ra>
